<compile_context>
chip_gen: v5e
topology: v5e:2x2
jax: 0.10.0
libtpu: 0.0.40
codegen_flags: <defaults>
</compile_context>

<pallas_src>
import functools

import jax
import jax.numpy as jnp
from jax.experimental import pallas as pl
from jax.experimental.pallas import tpu as pltpu


# ----------------------------------------------------------------------------
# Pallas kernel: fused 3x3 conv (9 shifted-band matmuls) + BN affine + LeakyReLU
# ----------------------------------------------------------------------------
def _conv_bn_act_kernel(x_ref, w_ref, scale_ref, bias_ref, o_ref, *, taps, slope):
    # x_ref:     (1, P, L, Cin)   bf16  stride-phase-decomposed padded input
    # w_ref:     (9, Cin, Cout)   bf16  one (Cin, Cout) matrix per tap
    # scale_ref: (1, Cout)        f32   BN scale  (gamma / sqrt(var + eps))
    # bias_ref:  (1, Cout)        f32   BN bias   (beta - mean * scale)
    # o_ref:     (1, B, Cout)     f32   band output (junk columns dropped by wrapper)
    nrows = o_ref.shape[1]
    acc = None
    for t, (ph, off) in enumerate(taps):          # static 9-way unroll
        xs = x_ref[0, ph, pl.ds(off, nrows), :]   # (B, Cin) bf16, static offsets
        part = jnp.dot(xs, w_ref[t], preferred_element_type=jnp.float32)
        acc = part if acc is None else acc + part
    y = acc * scale_ref[...] + bias_ref[...]      # f32 epilogue
    if slope == 0.0:                              # ReLU
        y = jnp.maximum(y, 0.0)
    elif slope != 1.0:                            # LeakyReLU(slope); slope==1 -> identity
        y = jnp.where(y >= 0.0, y, slope * y)
    o_ref[0] = y


def conv3x3_bn_act(x, w9, scale, bias, *, stride, pad, slope):
    """y = act((conv3x3(x, w) * scale) + bias) for NHWC x; conv has no bias.

    x:  (N, H, W, Cin) float.  w9: (9, Cin, Cout) bf16 (packed at init).
    scale/bias: (1, Cout) f32.  slope: 0.0 -> ReLU, 0.2 -> LeakyReLU, 1.0 -> identity.
    """
    N, H, W, Cin = x.shape
    kh = kw = 3
    T, _, Cout = w9.shape
    s = stride
    Hp, Wp = H + 2 * pad, W + 2 * pad
    Hout = (Hp - kh) // s + 1
    Wout = (Wp - kw) // s + 1
    # equal-size stride phases (pad a little extra on bottom/right)
    Lh = max(Hout + (kh - 1) // s, -(-Hp // s))
    Lw = max(Wout + (kw - 1) // s, -(-Wp // s))
    xp = jnp.pad(x, ((0, 0), (pad, s * Lh - H - pad), (pad, s * Lw - W - pad), (0, 0)))
    # phases[n, p*s+q, a*Lw+b, c] = xp[n, a*s+p, b*s+q, c]  (no data duplication)
    ph = xp.reshape(N, Lh, s, Lw, s, Cin).transpose(0, 2, 4, 1, 3, 5)
    ph = ph.reshape(N, s * s, Lh * Lw, Cin).astype(jnp.bfloat16)

    # All 9 taps share the band-relative valid positions ho*Lw + wo.
    B = (Hout - 1) * Lw + Wout
    taps = tuple(((i % s) * s + (j % s), (i // s) * Lw + (j // s))
                 for i in range(kh) for j in range(kw))

    flops = 2 * N * B * Cin * Cout * T
    bytes_accessed = int(ph.size) * 2 + int(w9.size) * 2 + (N * B * Cout + 2 * Cout) * 4

    out = pl.pallas_call(
        functools.partial(_conv_bn_act_kernel, taps=taps, slope=slope),
        out_shape=jax.ShapeDtypeStruct((N, B, Cout), jnp.float32),
        grid=(N,),
        in_specs=[
            pl.BlockSpec((1, s * s, Lh * Lw, Cin), lambda n: (n, 0, 0, 0)),
            pl.BlockSpec((T, Cin, Cout), lambda n: (0, 0, 0)),
            pl.BlockSpec((1, Cout), lambda n: (0, 0)),
            pl.BlockSpec((1, Cout), lambda n: (0, 0)),
        ],
        out_specs=pl.BlockSpec((1, B, Cout), lambda n: (n, 0, 0)),
        compiler_params=pltpu.CompilerParams(dimension_semantics=("parallel",)),
        cost_estimate=pl.CostEstimate(flops=flops, transcendentals=0,
                                      bytes_accessed=bytes_accessed),
    )(ph, w9, scale, bias)

    # Drop the (Lw - Wout) junk columns interleaved in each band row -> NHWC output.
    out = jnp.pad(out, ((0, 0), (0, Hout * Lw - B), (0, 0)))
    out = out.reshape(N, Hout, Lw, Cout)[:, :, :Wout, :]
    return out


# ----------------------------------------------------------------------------
# Deterministic parameter init (shapes from Propose.__init__ with ndf=32,
# in_channels=32, plus a small synthetic backbone). Weights are packed/cast once.
# ----------------------------------------------------------------------------
def init_params(key, img_channels=3, bb_mid=16, bb_out=32, ndf=32, num_classes=10):
    ks = jax.random.split(key, 18)

    def conv_w9(k, cin, cout):
        w = 0.1 * jax.random.normal(k, (3, 3, cin, cout), jnp.float32)
        return w.reshape(9, cin, cout).astype(jnp.bfloat16)   # packed per-tap, bf16

    def bn(kg, kb, c, eps=1e-5):
        gamma = 1.0 + 0.1 * jax.random.normal(kg, (c,), jnp.float32)
        beta = 0.1 * jax.random.normal(kb, (c,), jnp.float32)
        rmean = jnp.zeros((c,), jnp.float32)    # fresh-module running stats
        rvar = jnp.ones((c,), jnp.float32)
        scale = gamma / jnp.sqrt(rvar + eps)
        bias = beta - rmean * scale
        return scale.reshape(1, c), bias.reshape(1, c)

    p = {}
    # backbone children: conv1, bn1, relu, conv2, bn2, relu, GAP, linear
    p["bb_w1"] = conv_w9(ks[0], img_channels, bb_mid)
    p["bb_bn1_scale"], p["bb_bn1_bias"] = bn(ks[1], ks[2], bb_mid)
    p["bb_w2"] = conv_w9(ks[3], bb_mid, bb_out)
    p["bb_w2_scale"] = jnp.ones((1, bb_out), jnp.float32)   # conv-only in disc path
    p["bb_w2_bias"] = jnp.zeros((1, bb_out), jnp.float32)
    p["bb_bn2_scale"], p["bb_bn2_bias"] = bn(ks[4], ks[5], bb_out)
    p["fc_w"] = 0.1 * jax.random.normal(ks[6], (bb_out, num_classes), jnp.float32)
    p["fc_b"] = 0.1 * jax.random.normal(ks[7], (num_classes,), jnp.float32)
    # discriminator (exactly the shapes of Propose.discriminator, bias=False)
    p["d_w1"] = conv_w9(ks[8], bb_out, ndf)
    p["d_bn1_scale"], p["d_bn1_bias"] = bn(ks[9], ks[10], ndf)
    p["d_w2"] = conv_w9(ks[11], ndf, ndf * 2)
    p["d_bn2_scale"], p["d_bn2_bias"] = bn(ks[12], ks[13], ndf * 2)
    p["d_w3"] = conv_w9(ks[14], ndf * 2, ndf * 4)
    p["d_bn3_scale"], p["d_bn3_bias"] = bn(ks[15], ks[16], ndf * 4)
    p["d_w4"] = 0.1 * jax.random.normal(ks[17], (3, 3, ndf * 4, 1), jnp.float32)  # HWIO
    return p


# ----------------------------------------------------------------------------
# Propose.forward
# ----------------------------------------------------------------------------
def propose_forward(params, inputs_nchw):
    p = params
    x = jnp.transpose(inputs_nchw, (0, 2, 3, 1))  # NCHW -> NHWC

    # backbone children[0:4]: conv1+bn1+relu (fused Pallas), then conv2 (Pallas, identity)
    h = conv3x3_bn_act(x, p["bb_w1"], p["bb_bn1_scale"], p["bb_bn1_bias"],
                       stride=2, pad=1, slope=0.0)
    disc_in = conv3x3_bn_act(h, p["bb_w2"], p["bb_w2_scale"], p["bb_w2_bias"],
                             stride=1, pad=1, slope=1.0)

    # rest of backbone: bn2 + relu fused into GAP (plain XLA elementwise), then linear
    feat = jnp.maximum(disc_in * p["bb_bn2_scale"][0] + p["bb_bn2_bias"][0], 0.0)
    pooled = jnp.mean(feat, axis=(1, 2))                    # global average pool
    classifier = pooled @ p["fc_w"] + p["fc_b"]             # tiny head: plain XLA

    # discriminator: 3 x (conv + BN + LeakyReLU(0.2)) fused Pallas kernels
    d = conv3x3_bn_act(disc_in, p["d_w1"], p["d_bn1_scale"], p["d_bn1_bias"],
                       stride=2, pad=1, slope=0.2)
    d = conv3x3_bn_act(d, p["d_w2"], p["d_bn2_scale"], p["d_bn2_bias"],
                       stride=2, pad=1, slope=0.2)
    d = conv3x3_bn_act(d, p["d_w3"], p["d_bn3_scale"], p["d_bn3_bias"],
                       stride=2, pad=0, slope=0.2)
    # final 1-output-channel conv: tiny tail, done in plain XLA per perf review
    d = jax.lax.conv_general_dilated(
        d, p["d_w4"], window_strides=(1, 1), padding=((1, 1), (1, 1)),
        dimension_numbers=("NHWC", "HWIO", "NHWC"))
    d = jnp.transpose(d, (0, 3, 1, 2))            # back to NCHW: (N, 1, 1, 1)
    discriminator = jnp.squeeze(d)                # matches torch `.squeeze()`
    return classifier, discriminator


if __name__ == "__main__":
    key = jax.random.PRNGKey(0)
    pkey, xkey = jax.random.split(key)
    params = init_params(pkey)

    # NCHW input like the PyTorch module: batch=2, 3 channels, 32x32 spatial
    # (32 so the padding=0 stride=2 conv in the discriminator stays valid).
    inputs = jax.random.normal(xkey, (2, 3, 32, 32), jnp.float32)

    classifier, discriminator = jax.jit(propose_forward)(params, inputs)
    jax.block_until_ready((classifier, discriminator))

    assert classifier.shape == (2, 10), classifier.shape
    assert discriminator.shape == (2,), discriminator.shape
    assert bool(jnp.all(jnp.isfinite(classifier)))
    assert bool(jnp.all(jnp.isfinite(discriminator)))
    print("KERNEL_OK")
</pallas_src>

<mosaic_0001>
module attributes {stable_mosaic.version = 11 : i64} {
  func.func @_conv_bn_act_kernel(%arg0: i32, %arg1: memref<1x4x289x3xbf16, #tpu.memory_space<vmem>>, %arg2: memref<9x3x16xbf16, #tpu.memory_space<vmem>>, %arg3: memref<1x16xf32, #tpu.memory_space<vmem>>, %arg4: memref<1x16xf32, #tpu.memory_space<vmem>>, %arg5: memref<1x271x16xf32, #tpu.memory_space<vmem>>) attributes {dimension_semantics = [#tpu.dimension_semantics<parallel>], iteration_bounds = array<i64: 2>, scalar_prefetch = 0 : i64, scratch_operands = 0 : i64, tpu.core_type = #tpu.core_type<tc>, window_params = [{transform_indices = @transform_0, window_bounds = array<i64: 1, 4, 289, 3>}, {pipeline_mode = #tpu.pipeline_mode<synchronous>, transform_indices = @transform_1, window_bounds = array<i64: 9, 3, 16>}, {pipeline_mode = #tpu.pipeline_mode<synchronous>, transform_indices = @transform_2, window_bounds = array<i64: 1, 16>}, {pipeline_mode = #tpu.pipeline_mode<synchronous>, transform_indices = @transform_3, window_bounds = array<i64: 1, 16>}, {transform_indices = @transform_4, window_bounds = array<i64: 1, 271, 16>}]} {
    %c0 = arith.constant 0 : index
    %c0_0 = arith.constant 0 : index
    %c0_1 = arith.constant 0 : index
    %c0_2 = arith.constant 0 : index
    %0 = vector.load %arg1[%c0, %c0_0, %c0_1, %c0_2] : memref<1x4x289x3xbf16, #tpu.memory_space<vmem>>, vector<1x1x271x3xbf16>
    %1 = vector.shape_cast %0 : vector<1x1x271x3xbf16> to vector<271x3xbf16>
    %c0_3 = arith.constant 0 : index
    %c0_4 = arith.constant 0 : index
    %c0_5 = arith.constant 0 : index
    %2 = vector.load %arg2[%c0_3, %c0_4, %c0_5] : memref<9x3x16xbf16, #tpu.memory_space<vmem>>, vector<1x3x16xbf16>
    %3 = vector.shape_cast %2 : vector<1x3x16xbf16> to vector<3x16xbf16>
    %cst = arith.constant dense<0.000000e+00> : vector<271x16xf32>
    %4 = tpu.matmul %1, %3, %cst {dimension_numbers = #tpu.dot_dimension_numbers<[1], [0], [0], [1], [0, 0, 1, 1], [], []>} : vector<271x3xbf16>, vector<3x16xbf16>, vector<271x16xf32> -> vector<271x16xf32>
    %c0_6 = arith.constant 0 : index
    %c1 = arith.constant 1 : index
    %c0_7 = arith.constant 0 : index
    %c0_8 = arith.constant 0 : index
    %5 = vector.load %arg1[%c0_6, %c1, %c0_7, %c0_8] : memref<1x4x289x3xbf16, #tpu.memory_space<vmem>>, vector<1x1x271x3xbf16>
    %6 = vector.shape_cast %5 : vector<1x1x271x3xbf16> to vector<271x3xbf16>
    %c1_9 = arith.constant 1 : index
    %c0_10 = arith.constant 0 : index
    %c0_11 = arith.constant 0 : index
    %7 = vector.load %arg2[%c1_9, %c0_10, %c0_11] : memref<9x3x16xbf16, #tpu.memory_space<vmem>>, vector<1x3x16xbf16>
    %8 = vector.shape_cast %7 : vector<1x3x16xbf16> to vector<3x16xbf16>
    %cst_12 = arith.constant dense<0.000000e+00> : vector<271x16xf32>
    %9 = tpu.matmul %6, %8, %cst_12 {dimension_numbers = #tpu.dot_dimension_numbers<[1], [0], [0], [1], [0, 0, 1, 1], [], []>} : vector<271x3xbf16>, vector<3x16xbf16>, vector<271x16xf32> -> vector<271x16xf32>
    %10 = arith.addf %4, %9 : vector<271x16xf32>
    %c0_13 = arith.constant 0 : index
    %c0_14 = arith.constant 0 : index
    %c1_15 = arith.constant 1 : index
    %c0_16 = arith.constant 0 : index
    %11 = vector.load %arg1[%c0_13, %c0_14, %c1_15, %c0_16] : memref<1x4x289x3xbf16, #tpu.memory_space<vmem>>, vector<1x1x271x3xbf16>
    %12 = vector.shape_cast %11 : vector<1x1x271x3xbf16> to vector<271x3xbf16>
    %c2 = arith.constant 2 : index
    %c0_17 = arith.constant 0 : index
    %c0_18 = arith.constant 0 : index
    %13 = vector.load %arg2[%c2, %c0_17, %c0_18] : memref<9x3x16xbf16, #tpu.memory_space<vmem>>, vector<1x3x16xbf16>
    %14 = vector.shape_cast %13 : vector<1x3x16xbf16> to vector<3x16xbf16>
    %cst_19 = arith.constant dense<0.000000e+00> : vector<271x16xf32>
    %15 = tpu.matmul %12, %14, %cst_19 {dimension_numbers = #tpu.dot_dimension_numbers<[1], [0], [0], [1], [0, 0, 1, 1], [], []>} : vector<271x3xbf16>, vector<3x16xbf16>, vector<271x16xf32> -> vector<271x16xf32>
    %16 = arith.addf %10, %15 : vector<271x16xf32>
    %c0_20 = arith.constant 0 : index
    %c2_21 = arith.constant 2 : index
    %c0_22 = arith.constant 0 : index
    %c0_23 = arith.constant 0 : index
    %17 = vector.load %arg1[%c0_20, %c2_21, %c0_22, %c0_23] : memref<1x4x289x3xbf16, #tpu.memory_space<vmem>>, vector<1x1x271x3xbf16>
    %18 = vector.shape_cast %17 : vector<1x1x271x3xbf16> to vector<271x3xbf16>
    %c3 = arith.constant 3 : index
    %c0_24 = arith.constant 0 : index
    %c0_25 = arith.constant 0 : index
    %19 = vector.load %arg2[%c3, %c0_24, %c0_25] : memref<9x3x16xbf16, #tpu.memory_space<vmem>>, vector<1x3x16xbf16>
    %20 = vector.shape_cast %19 : vector<1x3x16xbf16> to vector<3x16xbf16>
    %cst_26 = arith.constant dense<0.000000e+00> : vector<271x16xf32>
    %21 = tpu.matmul %18, %20, %cst_26 {dimension_numbers = #tpu.dot_dimension_numbers<[1], [0], [0], [1], [0, 0, 1, 1], [], []>} : vector<271x3xbf16>, vector<3x16xbf16>, vector<271x16xf32> -> vector<271x16xf32>
    %22 = arith.addf %16, %21 : vector<271x16xf32>
    %c0_27 = arith.constant 0 : index
    %c3_28 = arith.constant 3 : index
    %c0_29 = arith.constant 0 : index
    %c0_30 = arith.constant 0 : index
    %23 = vector.load %arg1[%c0_27, %c3_28, %c0_29, %c0_30] : memref<1x4x289x3xbf16, #tpu.memory_space<vmem>>, vector<1x1x271x3xbf16>
    %24 = vector.shape_cast %23 : vector<1x1x271x3xbf16> to vector<271x3xbf16>
    %c4 = arith.constant 4 : index
    %c0_31 = arith.constant 0 : index
    %c0_32 = arith.constant 0 : index
    %25 = vector.load %arg2[%c4, %c0_31, %c0_32] : memref<9x3x16xbf16, #tpu.memory_space<vmem>>, vector<1x3x16xbf16>
    %26 = vector.shape_cast %25 : vector<1x3x16xbf16> to vector<3x16xbf16>
    %cst_33 = arith.constant dense<0.000000e+00> : vector<271x16xf32>
    %27 = tpu.matmul %24, %26, %cst_33 {dimension_numbers = #tpu.dot_dimension_numbers<[1], [0], [0], [1], [0, 0, 1, 1], [], []>} : vector<271x3xbf16>, vector<3x16xbf16>, vector<271x16xf32> -> vector<271x16xf32>
    %28 = arith.addf %22, %27 : vector<271x16xf32>
    %c0_34 = arith.constant 0 : index
    %c2_35 = arith.constant 2 : index
    %c1_36 = arith.constant 1 : index
    %c0_37 = arith.constant 0 : index
    %29 = vector.load %arg1[%c0_34, %c2_35, %c1_36, %c0_37] : memref<1x4x289x3xbf16, #tpu.memory_space<vmem>>, vector<1x1x271x3xbf16>
    %30 = vector.shape_cast %29 : vector<1x1x271x3xbf16> to vector<271x3xbf16>
    %c5 = arith.constant 5 : index
    %c0_38 = arith.constant 0 : index
    %c0_39 = arith.constant 0 : index
    %31 = vector.load %arg2[%c5, %c0_38, %c0_39] : memref<9x3x16xbf16, #tpu.memory_space<vmem>>, vector<1x3x16xbf16>
    %32 = vector.shape_cast %31 : vector<1x3x16xbf16> to vector<3x16xbf16>
    %cst_40 = arith.constant dense<0.000000e+00> : vector<271x16xf32>
    %33 = tpu.matmul %30, %32, %cst_40 {dimension_numbers = #tpu.dot_dimension_numbers<[1], [0], [0], [1], [0, 0, 1, 1], [], []>} : vector<271x3xbf16>, vector<3x16xbf16>, vector<271x16xf32> -> vector<271x16xf32>
    %34 = arith.addf %28, %33 : vector<271x16xf32>
    %c0_41 = arith.constant 0 : index
    %c0_42 = arith.constant 0 : index
    %c17 = arith.constant 17 : index
    %c0_43 = arith.constant 0 : index
    %35 = vector.load %arg1[%c0_41, %c0_42, %c17, %c0_43] : memref<1x4x289x3xbf16, #tpu.memory_space<vmem>>, vector<1x1x271x3xbf16>
    %36 = vector.shape_cast %35 : vector<1x1x271x3xbf16> to vector<271x3xbf16>
    %c6 = arith.constant 6 : index
    %c0_44 = arith.constant 0 : index
    %c0_45 = arith.constant 0 : index
    %37 = vector.load %arg2[%c6, %c0_44, %c0_45] : memref<9x3x16xbf16, #tpu.memory_space<vmem>>, vector<1x3x16xbf16>
    %38 = vector.shape_cast %37 : vector<1x3x16xbf16> to vector<3x16xbf16>
    %cst_46 = arith.constant dense<0.000000e+00> : vector<271x16xf32>
    %39 = tpu.matmul %36, %38, %cst_46 {dimension_numbers = #tpu.dot_dimension_numbers<[1], [0], [0], [1], [0, 0, 1, 1], [], []>} : vector<271x3xbf16>, vector<3x16xbf16>, vector<271x16xf32> -> vector<271x16xf32>
    %40 = arith.addf %34, %39 : vector<271x16xf32>
    %c0_47 = arith.constant 0 : index
    %c1_48 = arith.constant 1 : index
    %c17_49 = arith.constant 17 : index
    %c0_50 = arith.constant 0 : index
    %41 = vector.load %arg1[%c0_47, %c1_48, %c17_49, %c0_50] : memref<1x4x289x3xbf16, #tpu.memory_space<vmem>>, vector<1x1x271x3xbf16>
    %42 = vector.shape_cast %41 : vector<1x1x271x3xbf16> to vector<271x3xbf16>
    %c7 = arith.constant 7 : index
    %c0_51 = arith.constant 0 : index
    %c0_52 = arith.constant 0 : index
    %43 = vector.load %arg2[%c7, %c0_51, %c0_52] : memref<9x3x16xbf16, #tpu.memory_space<vmem>>, vector<1x3x16xbf16>
    %44 = vector.shape_cast %43 : vector<1x3x16xbf16> to vector<3x16xbf16>
    %cst_53 = arith.constant dense<0.000000e+00> : vector<271x16xf32>
    %45 = tpu.matmul %42, %44, %cst_53 {dimension_numbers = #tpu.dot_dimension_numbers<[1], [0], [0], [1], [0, 0, 1, 1], [], []>} : vector<271x3xbf16>, vector<3x16xbf16>, vector<271x16xf32> -> vector<271x16xf32>
    %46 = arith.addf %40, %45 : vector<271x16xf32>
    %c0_54 = arith.constant 0 : index
    %c0_55 = arith.constant 0 : index
    %c18 = arith.constant 18 : index
    %c0_56 = arith.constant 0 : index
    %47 = vector.load %arg1[%c0_54, %c0_55, %c18, %c0_56] : memref<1x4x289x3xbf16, #tpu.memory_space<vmem>>, vector<1x1x271x3xbf16>
    %48 = vector.shape_cast %47 : vector<1x1x271x3xbf16> to vector<271x3xbf16>
    %c8 = arith.constant 8 : index
    %c0_57 = arith.constant 0 : index
    %c0_58 = arith.constant 0 : index
    %49 = vector.load %arg2[%c8, %c0_57, %c0_58] : memref<9x3x16xbf16, #tpu.memory_space<vmem>>, vector<1x3x16xbf16>
    %50 = vector.shape_cast %49 : vector<1x3x16xbf16> to vector<3x16xbf16>
    %cst_59 = arith.constant dense<0.000000e+00> : vector<271x16xf32>
    %51 = tpu.matmul %48, %50, %cst_59 {dimension_numbers = #tpu.dot_dimension_numbers<[1], [0], [0], [1], [0, 0, 1, 1], [], []>} : vector<271x3xbf16>, vector<3x16xbf16>, vector<271x16xf32> -> vector<271x16xf32>
    %52 = arith.addf %46, %51 : vector<271x16xf32>
    %c0_60 = arith.constant 0 : index
    %c0_61 = arith.constant 0 : index
    %53 = vector.load %arg3[%c0_60, %c0_61] : memref<1x16xf32, #tpu.memory_space<vmem>>, vector<1x16xf32>
    %54 = vector.broadcast %53 : vector<1x16xf32> to vector<271x16xf32>
    %55 = arith.mulf %52, %54 : vector<271x16xf32>
    %c0_62 = arith.constant 0 : index
    %c0_63 = arith.constant 0 : index
    %56 = vector.load %arg4[%c0_62, %c0_63] : memref<1x16xf32, #tpu.memory_space<vmem>>, vector<1x16xf32>
    %57 = vector.broadcast %56 : vector<1x16xf32> to vector<271x16xf32>
    %58 = arith.addf %55, %57 : vector<271x16xf32>
    %cst_64 = arith.constant 0.000000e+00 : f32
    %59 = vector.broadcast %cst_64 : f32 to vector<271x16xf32>
    %60 = arith.maximumf %58, %59 : vector<271x16xf32>
    %c0_65 = arith.constant 0 : index
    %c0_66 = arith.constant 0 : index
    %c0_67 = arith.constant 0 : index
    %61 = vector.load %arg5[%c0_65, %c0_66, %c0_67] : memref<1x271x16xf32, #tpu.memory_space<vmem>>, vector<1x271x16xf32>
    %62 = vector.shape_cast %61 : vector<1x271x16xf32> to vector<271x16xf32>
    %63 = vector.shape_cast %60 : vector<271x16xf32> to vector<1x271x16xf32>
    tpu.vector_store %arg5[%c0_65, %c0_66, %c0_67], %63 {strides = array<i32>} : memref<1x271x16xf32, #tpu.memory_space<vmem>>, vector<1x271x16xf32>,
    return
  }
  func.func @transform_0(%arg0: i32) -> (i32, i32, i32, i32) {
    %c0_i32 = arith.constant 0 : i32
    %c0_i32_0 = arith.constant 0 : i32
    %c0_i32_1 = arith.constant 0 : i32
    %c0_i32_2 = arith.constant 0 : i32
    return %arg0, %c0_i32, %c0_i32_0, %c0_i32_1 : i32, i32, i32, i32
  }
  func.func @transform_1(%arg0: i32) -> (i32, i32, i32) {
    %c0_i32 = arith.constant 0 : i32
    %c0_i32_0 = arith.constant 0 : i32
    %c0_i32_1 = arith.constant 0 : i32
    %c0_i32_2 = arith.constant 0 : i32
    return %c0_i32, %c0_i32_0, %c0_i32_1 : i32, i32, i32
  }
  func.func @transform_2(%arg0: i32) -> (i32, i32) {
    %c0_i32 = arith.constant 0 : i32
    %c0_i32_0 = arith.constant 0 : i32
    %c0_i32_1 = arith.constant 0 : i32
    return %c0_i32, %c0_i32_0 : i32, i32
  }
  func.func @transform_3(%arg0: i32) -> (i32, i32) {
    %c0_i32 = arith.constant 0 : i32
    %c0_i32_0 = arith.constant 0 : i32
    %c0_i32_1 = arith.constant 0 : i32
    return %c0_i32, %c0_i32_0 : i32, i32
  }
  func.func @transform_4(%arg0: i32) -> (i32, i32, i32) {
    %c0_i32 = arith.constant 0 : i32
    %c0_i32_0 = arith.constant 0 : i32
    %c0_i32_1 = arith.constant 0 : i32
    return %arg0, %c0_i32, %c0_i32_0 : i32, i32, i32
  }
}

module attributes {stable_mosaic.version = 11 : i64} {
  func.func @_conv_bn_act_kernel(%arg0: i32, %arg1: memref<1x1x324x16xbf16, #tpu.memory_space<vmem>>, %arg2: memref<9x16x32xbf16, #tpu.memory_space<vmem>>, %arg3: memref<1x32xf32, #tpu.memory_space<vmem>>, %arg4: memref<1x32xf32, #tpu.memory_space<vmem>>, %arg5: memref<1x286x32xf32, #tpu.memory_space<vmem>>) attributes {dimension_semantics = [#tpu.dimension_semantics<parallel>], iteration_bounds = array<i64: 2>, scalar_prefetch = 0 : i64, scratch_operands = 0 : i64, tpu.core_type = #tpu.core_type<tc>, window_params = [{transform_indices = @transform_0, window_bounds = array<i64: 1, 1, 324, 16>}, {pipeline_mode = #tpu.pipeline_mode<synchronous>, transform_indices = @transform_1, window_bounds = array<i64: 9, 16, 32>}, {pipeline_mode = #tpu.pipeline_mode<synchronous>, transform_indices = @transform_2, window_bounds = array<i64: 1, 32>}, {pipeline_mode = #tpu.pipeline_mode<synchronous>, transform_indices = @transform_3, window_bounds = array<i64: 1, 32>}, {transform_indices = @transform_4, window_bounds = array<i64: 1, 286, 32>}]} {
    %c0 = arith.constant 0 : index
    %c0_0 = arith.constant 0 : index
    %c0_1 = arith.constant 0 : index
    %c0_2 = arith.constant 0 : index
    %0 = vector.load %arg1[%c0, %c0_0, %c0_1, %c0_2] : memref<1x1x324x16xbf16, #tpu.memory_space<vmem>>, vector<1x1x286x16xbf16>
    %1 = vector.shape_cast %0 : vector<1x1x286x16xbf16> to vector<286x16xbf16>
    %c0_3 = arith.constant 0 : index
    %c0_4 = arith.constant 0 : index
    %c0_5 = arith.constant 0 : index
    %2 = vector.load %arg2[%c0_3, %c0_4, %c0_5] : memref<9x16x32xbf16, #tpu.memory_space<vmem>>, vector<1x16x32xbf16>
    %3 = vector.shape_cast %2 : vector<1x16x32xbf16> to vector<16x32xbf16>
    %cst = arith.constant dense<0.000000e+00> : vector<286x32xf32>
    %4 = tpu.matmul %1, %3, %cst {dimension_numbers = #tpu.dot_dimension_numbers<[1], [0], [0], [1], [0, 0, 1, 1], [], []>} : vector<286x16xbf16>, vector<16x32xbf16>, vector<286x32xf32> -> vector<286x32xf32>
    %c0_6 = arith.constant 0 : index
    %c0_7 = arith.constant 0 : index
    %c1 = arith.constant 1 : index
    %c0_8 = arith.constant 0 : index
    %5 = vector.load %arg1[%c0_6, %c0_7, %c1, %c0_8] : memref<1x1x324x16xbf16, #tpu.memory_space<vmem>>, vector<1x1x286x16xbf16>
    %6 = vector.shape_cast %5 : vector<1x1x286x16xbf16> to vector<286x16xbf16>
    %c1_9 = arith.constant 1 : index
    %c0_10 = arith.constant 0 : index
    %c0_11 = arith.constant 0 : index
    %7 = vector.load %arg2[%c1_9, %c0_10, %c0_11] : memref<9x16x32xbf16, #tpu.memory_space<vmem>>, vector<1x16x32xbf16>
    %8 = vector.shape_cast %7 : vector<1x16x32xbf16> to vector<16x32xbf16>
    %cst_12 = arith.constant dense<0.000000e+00> : vector<286x32xf32>
    %9 = tpu.matmul %6, %8, %cst_12 {dimension_numbers = #tpu.dot_dimension_numbers<[1], [0], [0], [1], [0, 0, 1, 1], [], []>} : vector<286x16xbf16>, vector<16x32xbf16>, vector<286x32xf32> -> vector<286x32xf32>
    %10 = arith.addf %4, %9 : vector<286x32xf32>
    %c0_13 = arith.constant 0 : index
    %c0_14 = arith.constant 0 : index
    %c2 = arith.constant 2 : index
    %c0_15 = arith.constant 0 : index
    %11 = vector.load %arg1[%c0_13, %c0_14, %c2, %c0_15] : memref<1x1x324x16xbf16, #tpu.memory_space<vmem>>, vector<1x1x286x16xbf16>
    %12 = vector.shape_cast %11 : vector<1x1x286x16xbf16> to vector<286x16xbf16>
    %c2_16 = arith.constant 2 : index
    %c0_17 = arith.constant 0 : index
    %c0_18 = arith.constant 0 : index
    %13 = vector.load %arg2[%c2_16, %c0_17, %c0_18] : memref<9x16x32xbf16, #tpu.memory_space<vmem>>, vector<1x16x32xbf16>
    %14 = vector.shape_cast %13 : vector<1x16x32xbf16> to vector<16x32xbf16>
    %cst_19 = arith.constant dense<0.000000e+00> : vector<286x32xf32>
    %15 = tpu.matmul %12, %14, %cst_19 {dimension_numbers = #tpu.dot_dimension_numbers<[1], [0], [0], [1], [0, 0, 1, 1], [], []>} : vector<286x16xbf16>, vector<16x32xbf16>, vector<286x32xf32> -> vector<286x32xf32>
    %16 = arith.addf %10, %15 : vector<286x32xf32>
    %c0_20 = arith.constant 0 : index
    %c0_21 = arith.constant 0 : index
    %c18 = arith.constant 18 : index
    %c0_22 = arith.constant 0 : index
    %17 = vector.load %arg1[%c0_20, %c0_21, %c18, %c0_22] : memref<1x1x324x16xbf16, #tpu.memory_space<vmem>>, vector<1x1x286x16xbf16>
    %18 = vector.shape_cast %17 : vector<1x1x286x16xbf16> to vector<286x16xbf16>
    %c3 = arith.constant 3 : index
    %c0_23 = arith.constant 0 : index
    %c0_24 = arith.constant 0 : index
    %19 = vector.load %arg2[%c3, %c0_23, %c0_24] : memref<9x16x32xbf16, #tpu.memory_space<vmem>>, vector<1x16x32xbf16>
    %20 = vector.shape_cast %19 : vector<1x16x32xbf16> to vector<16x32xbf16>
    %cst_25 = arith.constant dense<0.000000e+00> : vector<286x32xf32>
    %21 = tpu.matmul %18, %20, %cst_25 {dimension_numbers = #tpu.dot_dimension_numbers<[1], [0], [0], [1], [0, 0, 1, 1], [], []>} : vector<286x16xbf16>, vector<16x32xbf16>, vector<286x32xf32> -> vector<286x32xf32>
    %22 = arith.addf %16, %21 : vector<286x32xf32>
    %c0_26 = arith.constant 0 : index
    %c0_27 = arith.constant 0 : index
    %c19 = arith.constant 19 : index
    %c0_28 = arith.constant 0 : index
    %23 = vector.load %arg1[%c0_26, %c0_27, %c19, %c0_28] : memref<1x1x324x16xbf16, #tpu.memory_space<vmem>>, vector<1x1x286x16xbf16>
    %24 = vector.shape_cast %23 : vector<1x1x286x16xbf16> to vector<286x16xbf16>
    %c4 = arith.constant 4 : index
    %c0_29 = arith.constant 0 : index
    %c0_30 = arith.constant 0 : index
    %25 = vector.load %arg2[%c4, %c0_29, %c0_30] : memref<9x16x32xbf16, #tpu.memory_space<vmem>>, vector<1x16x32xbf16>
    %26 = vector.shape_cast %25 : vector<1x16x32xbf16> to vector<16x32xbf16>
    %cst_31 = arith.constant dense<0.000000e+00> : vector<286x32xf32>
    %27 = tpu.matmul %24, %26, %cst_31 {dimension_numbers = #tpu.dot_dimension_numbers<[1], [0], [0], [1], [0, 0, 1, 1], [], []>} : vector<286x16xbf16>, vector<16x32xbf16>, vector<286x32xf32> -> vector<286x32xf32>
    %28 = arith.addf %22, %27 : vector<286x32xf32>
    %c0_32 = arith.constant 0 : index
    %c0_33 = arith.constant 0 : index
    %c20 = arith.constant 20 : index
    %c0_34 = arith.constant 0 : index
    %29 = vector.load %arg1[%c0_32, %c0_33, %c20, %c0_34] : memref<1x1x324x16xbf16, #tpu.memory_space<vmem>>, vector<1x1x286x16xbf16>
    %30 = vector.shape_cast %29 : vector<1x1x286x16xbf16> to vector<286x16xbf16>
    %c5 = arith.constant 5 : index
    %c0_35 = arith.constant 0 : index
    %c0_36 = arith.constant 0 : index
    %31 = vector.load %arg2[%c5, %c0_35, %c0_36] : memref<9x16x32xbf16, #tpu.memory_space<vmem>>, vector<1x16x32xbf16>
    %32 = vector.shape_cast %31 : vector<1x16x32xbf16> to vector<16x32xbf16>
    %cst_37 = arith.constant dense<0.000000e+00> : vector<286x32xf32>
    %33 = tpu.matmul %30, %32, %cst_37 {dimension_numbers = #tpu.dot_dimension_numbers<[1], [0], [0], [1], [0, 0, 1, 1], [], []>} : vector<286x16xbf16>, vector<16x32xbf16>, vector<286x32xf32> -> vector<286x32xf32>
    %34 = arith.addf %28, %33 : vector<286x32xf32>
    %c0_38 = arith.constant 0 : index
    %c0_39 = arith.constant 0 : index
    %c36 = arith.constant 36 : index
    %c0_40 = arith.constant 0 : index
    %35 = vector.load %arg1[%c0_38, %c0_39, %c36, %c0_40] : memref<1x1x324x16xbf16, #tpu.memory_space<vmem>>, vector<1x1x286x16xbf16>
    %36 = vector.shape_cast %35 : vector<1x1x286x16xbf16> to vector<286x16xbf16>
    %c6 = arith.constant 6 : index
    %c0_41 = arith.constant 0 : index
    %c0_42 = arith.constant 0 : index
    %37 = vector.load %arg2[%c6, %c0_41, %c0_42] : memref<9x16x32xbf16, #tpu.memory_space<vmem>>, vector<1x16x32xbf16>
    %38 = vector.shape_cast %37 : vector<1x16x32xbf16> to vector<16x32xbf16>
    %cst_43 = arith.constant dense<0.000000e+00> : vector<286x32xf32>
    %39 = tpu.matmul %36, %38, %cst_43 {dimension_numbers = #tpu.dot_dimension_numbers<[1], [0], [0], [1], [0, 0, 1, 1], [], []>} : vector<286x16xbf16>, vector<16x32xbf16>, vector<286x32xf32> -> vector<286x32xf32>
    %40 = arith.addf %34, %39 : vector<286x32xf32>
    %c0_44 = arith.constant 0 : index
    %c0_45 = arith.constant 0 : index
    %c37 = arith.constant 37 : index
    %c0_46 = arith.constant 0 : index
    %41 = vector.load %arg1[%c0_44, %c0_45, %c37, %c0_46] : memref<1x1x324x16xbf16, #tpu.memory_space<vmem>>, vector<1x1x286x16xbf16>
    %42 = vector.shape_cast %41 : vector<1x1x286x16xbf16> to vector<286x16xbf16>
    %c7 = arith.constant 7 : index
    %c0_47 = arith.constant 0 : index
    %c0_48 = arith.constant 0 : index
    %43 = vector.load %arg2[%c7, %c0_47, %c0_48] : memref<9x16x32xbf16, #tpu.memory_space<vmem>>, vector<1x16x32xbf16>
    %44 = vector.shape_cast %43 : vector<1x16x32xbf16> to vector<16x32xbf16>
    %cst_49 = arith.constant dense<0.000000e+00> : vector<286x32xf32>
    %45 = tpu.matmul %42, %44, %cst_49 {dimension_numbers = #tpu.dot_dimension_numbers<[1], [0], [0], [1], [0, 0, 1, 1], [], []>} : vector<286x16xbf16>, vector<16x32xbf16>, vector<286x32xf32> -> vector<286x32xf32>
    %46 = arith.addf %40, %45 : vector<286x32xf32>
    %c0_50 = arith.constant 0 : index
    %c0_51 = arith.constant 0 : index
    %c38 = arith.constant 38 : index
    %c0_52 = arith.constant 0 : index
    %47 = vector.load %arg1[%c0_50, %c0_51, %c38, %c0_52] : memref<1x1x324x16xbf16, #tpu.memory_space<vmem>>, vector<1x1x286x16xbf16>
    %48 = vector.shape_cast %47 : vector<1x1x286x16xbf16> to vector<286x16xbf16>
    %c8 = arith.constant 8 : index
    %c0_53 = arith.constant 0 : index
    %c0_54 = arith.constant 0 : index
    %49 = vector.load %arg2[%c8, %c0_53, %c0_54] : memref<9x16x32xbf16, #tpu.memory_space<vmem>>, vector<1x16x32xbf16>
    %50 = vector.shape_cast %49 : vector<1x16x32xbf16> to vector<16x32xbf16>
    %cst_55 = arith.constant dense<0.000000e+00> : vector<286x32xf32>
    %51 = tpu.matmul %48, %50, %cst_55 {dimension_numbers = #tpu.dot_dimension_numbers<[1], [0], [0], [1], [0, 0, 1, 1], [], []>} : vector<286x16xbf16>, vector<16x32xbf16>, vector<286x32xf32> -> vector<286x32xf32>
    %52 = arith.addf %46, %51 : vector<286x32xf32>
    %c0_56 = arith.constant 0 : index
    %c0_57 = arith.constant 0 : index
    %53 = vector.load %arg3[%c0_56, %c0_57] : memref<1x32xf32, #tpu.memory_space<vmem>>, vector<1x32xf32>
    %54 = vector.broadcast %53 : vector<1x32xf32> to vector<286x32xf32>
    %55 = arith.mulf %52, %54 : vector<286x32xf32>
    %c0_58 = arith.constant 0 : index
    %c0_59 = arith.constant 0 : index
    %56 = vector.load %arg4[%c0_58, %c0_59] : memref<1x32xf32, #tpu.memory_space<vmem>>, vector<1x32xf32>
    %57 = vector.broadcast %56 : vector<1x32xf32> to vector<286x32xf32>
    %58 = arith.addf %55, %57 : vector<286x32xf32>
    %c0_60 = arith.constant 0 : index
    %c0_61 = arith.constant 0 : index
    %c0_62 = arith.constant 0 : index
    %59 = vector.load %arg5[%c0_60, %c0_61, %c0_62] : memref<1x286x32xf32, #tpu.memory_space<vmem>>, vector<1x286x32xf32>
    %60 = vector.shape_cast %59 : vector<1x286x32xf32> to vector<286x32xf32>
    %61 = vector.shape_cast %58 : vector<286x32xf32> to vector<1x286x32xf32>
    tpu.vector_store %arg5[%c0_60, %c0_61, %c0_62], %61 {strides = array<i32>} : memref<1x286x32xf32, #tpu.memory_space<vmem>>, vector<1x286x32xf32>,
    return
  }
  func.func @transform_0(%arg0: i32) -> (i32, i32, i32, i32) {
    %c0_i32 = arith.constant 0 : i32
    %c0_i32_0 = arith.constant 0 : i32
    %c0_i32_1 = arith.constant 0 : i32
    %c0_i32_2 = arith.constant 0 : i32
    return %arg0, %c0_i32, %c0_i32_0, %c0_i32_1 : i32, i32, i32, i32
  }
  func.func @transform_1(%arg0: i32) -> (i32, i32, i32) {
    %c0_i32 = arith.constant 0 : i32
    %c0_i32_0 = arith.constant 0 : i32
    %c0_i32_1 = arith.constant 0 : i32
    %c0_i32_2 = arith.constant 0 : i32
    return %c0_i32, %c0_i32_0, %c0_i32_1 : i32, i32, i32
  }
  func.func @transform_2(%arg0: i32) -> (i32, i32) {
    %c0_i32 = arith.constant 0 : i32
    %c0_i32_0 = arith.constant 0 : i32
    %c0_i32_1 = arith.constant 0 : i32
    return %c0_i32, %c0_i32_0 : i32, i32
  }
  func.func @transform_3(%arg0: i32) -> (i32, i32) {
    %c0_i32 = arith.constant 0 : i32
    %c0_i32_0 = arith.constant 0 : i32
    %c0_i32_1 = arith.constant 0 : i32
    return %c0_i32, %c0_i32_0 : i32, i32
  }
  func.func @transform_4(%arg0: i32) -> (i32, i32, i32) {
    %c0_i32 = arith.constant 0 : i32
    %c0_i32_0 = arith.constant 0 : i32
    %c0_i32_1 = arith.constant 0 : i32
    return %arg0, %c0_i32, %c0_i32_0 : i32, i32, i32
  }
}

module attributes {stable_mosaic.version = 11 : i64} {
  func.func @_conv_bn_act_kernel(%arg0: i32, %arg1: memref<1x4x81x32xbf16, #tpu.memory_space<vmem>>, %arg2: memref<9x32x32xbf16, #tpu.memory_space<vmem>>, %arg3: memref<1x32xf32, #tpu.memory_space<vmem>>, %arg4: memref<1x32xf32, #tpu.memory_space<vmem>>, %arg5: memref<1x71x32xf32, #tpu.memory_space<vmem>>) attributes {dimension_semantics = [#tpu.dimension_semantics<parallel>], iteration_bounds = array<i64: 2>, scalar_prefetch = 0 : i64, scratch_operands = 0 : i64, tpu.core_type = #tpu.core_type<tc>, window_params = [{transform_indices = @transform_0, window_bounds = array<i64: 1, 4, 81, 32>}, {pipeline_mode = #tpu.pipeline_mode<synchronous>, transform_indices = @transform_1, window_bounds = array<i64: 9, 32, 32>}, {pipeline_mode = #tpu.pipeline_mode<synchronous>, transform_indices = @transform_2, window_bounds = array<i64: 1, 32>}, {pipeline_mode = #tpu.pipeline_mode<synchronous>, transform_indices = @transform_3, window_bounds = array<i64: 1, 32>}, {transform_indices = @transform_4, window_bounds = array<i64: 1, 71, 32>}]} {
    %c0 = arith.constant 0 : index
    %c0_0 = arith.constant 0 : index
    %c0_1 = arith.constant 0 : index
    %c0_2 = arith.constant 0 : index
    %0 = vector.load %arg1[%c0, %c0_0, %c0_1, %c0_2] : memref<1x4x81x32xbf16, #tpu.memory_space<vmem>>, vector<1x1x71x32xbf16>
    %1 = vector.shape_cast %0 : vector<1x1x71x32xbf16> to vector<71x32xbf16>
    %c0_3 = arith.constant 0 : index
    %c0_4 = arith.constant 0 : index
    %c0_5 = arith.constant 0 : index
    %2 = vector.load %arg2[%c0_3, %c0_4, %c0_5] : memref<9x32x32xbf16, #tpu.memory_space<vmem>>, vector<1x32x32xbf16>
    %3 = vector.shape_cast %2 : vector<1x32x32xbf16> to vector<32x32xbf16>
    %cst = arith.constant dense<0.000000e+00> : vector<71x32xf32>
    %4 = tpu.matmul %1, %3, %cst {dimension_numbers = #tpu.dot_dimension_numbers<[1], [0], [0], [1], [0, 0, 1, 1], [], []>} : vector<71x32xbf16>, vector<32x32xbf16>, vector<71x32xf32> -> vector<71x32xf32>
    %c0_6 = arith.constant 0 : index
    %c1 = arith.constant 1 : index
    %c0_7 = arith.constant 0 : index
    %c0_8 = arith.constant 0 : index
    %5 = vector.load %arg1[%c0_6, %c1, %c0_7, %c0_8] : memref<1x4x81x32xbf16, #tpu.memory_space<vmem>>, vector<1x1x71x32xbf16>
    %6 = vector.shape_cast %5 : vector<1x1x71x32xbf16> to vector<71x32xbf16>
    %c1_9 = arith.constant 1 : index
    %c0_10 = arith.constant 0 : index
    %c0_11 = arith.constant 0 : index
    %7 = vector.load %arg2[%c1_9, %c0_10, %c0_11] : memref<9x32x32xbf16, #tpu.memory_space<vmem>>, vector<1x32x32xbf16>
    %8 = vector.shape_cast %7 : vector<1x32x32xbf16> to vector<32x32xbf16>
    %cst_12 = arith.constant dense<0.000000e+00> : vector<71x32xf32>
    %9 = tpu.matmul %6, %8, %cst_12 {dimension_numbers = #tpu.dot_dimension_numbers<[1], [0], [0], [1], [0, 0, 1, 1], [], []>} : vector<71x32xbf16>, vector<32x32xbf16>, vector<71x32xf32> -> vector<71x32xf32>
    %10 = arith.addf %4, %9 : vector<71x32xf32>
    %c0_13 = arith.constant 0 : index
    %c0_14 = arith.constant 0 : index
    %c1_15 = arith.constant 1 : index
    %c0_16 = arith.constant 0 : index
    %11 = vector.load %arg1[%c0_13, %c0_14, %c1_15, %c0_16] : memref<1x4x81x32xbf16, #tpu.memory_space<vmem>>, vector<1x1x71x32xbf16>
    %12 = vector.shape_cast %11 : vector<1x1x71x32xbf16> to vector<71x32xbf16>
    %c2 = arith.constant 2 : index
    %c0_17 = arith.constant 0 : index
    %c0_18 = arith.constant 0 : index
    %13 = vector.load %arg2[%c2, %c0_17, %c0_18] : memref<9x32x32xbf16, #tpu.memory_space<vmem>>, vector<1x32x32xbf16>
    %14 = vector.shape_cast %13 : vector<1x32x32xbf16> to vector<32x32xbf16>
    %cst_19 = arith.constant dense<0.000000e+00> : vector<71x32xf32>
    %15 = tpu.matmul %12, %14, %cst_19 {dimension_numbers = #tpu.dot_dimension_numbers<[1], [0], [0], [1], [0, 0, 1, 1], [], []>} : vector<71x32xbf16>, vector<32x32xbf16>, vector<71x32xf32> -> vector<71x32xf32>
    %16 = arith.addf %10, %15 : vector<71x32xf32>
    %c0_20 = arith.constant 0 : index
    %c2_21 = arith.constant 2 : index
    %c0_22 = arith.constant 0 : index
    %c0_23 = arith.constant 0 : index
    %17 = vector.load %arg1[%c0_20, %c2_21, %c0_22, %c0_23] : memref<1x4x81x32xbf16, #tpu.memory_space<vmem>>, vector<1x1x71x32xbf16>
    %18 = vector.shape_cast %17 : vector<1x1x71x32xbf16> to vector<71x32xbf16>
    %c3 = arith.constant 3 : index
    %c0_24 = arith.constant 0 : index
    %c0_25 = arith.constant 0 : index
    %19 = vector.load %arg2[%c3, %c0_24, %c0_25] : memref<9x32x32xbf16, #tpu.memory_space<vmem>>, vector<1x32x32xbf16>
    %20 = vector.shape_cast %19 : vector<1x32x32xbf16> to vector<32x32xbf16>
    %cst_26 = arith.constant dense<0.000000e+00> : vector<71x32xf32>
    %21 = tpu.matmul %18, %20, %cst_26 {dimension_numbers = #tpu.dot_dimension_numbers<[1], [0], [0], [1], [0, 0, 1, 1], [], []>} : vector<71x32xbf16>, vector<32x32xbf16>, vector<71x32xf32> -> vector<71x32xf32>
    %22 = arith.addf %16, %21 : vector<71x32xf32>
    %c0_27 = arith.constant 0 : index
    %c3_28 = arith.constant 3 : index
    %c0_29 = arith.constant 0 : index
    %c0_30 = arith.constant 0 : index
    %23 = vector.load %arg1[%c0_27, %c3_28, %c0_29, %c0_30] : memref<1x4x81x32xbf16, #tpu.memory_space<vmem>>, vector<1x1x71x32xbf16>
    %24 = vector.shape_cast %23 : vector<1x1x71x32xbf16> to vector<71x32xbf16>
    %c4 = arith.constant 4 : index
    %c0_31 = arith.constant 0 : index
    %c0_32 = arith.constant 0 : index
    %25 = vector.load %arg2[%c4, %c0_31, %c0_32] : memref<9x32x32xbf16, #tpu.memory_space<vmem>>, vector<1x32x32xbf16>
    %26 = vector.shape_cast %25 : vector<1x32x32xbf16> to vector<32x32xbf16>
    %cst_33 = arith.constant dense<0.000000e+00> : vector<71x32xf32>
    %27 = tpu.matmul %24, %26, %cst_33 {dimension_numbers = #tpu.dot_dimension_numbers<[1], [0], [0], [1], [0, 0, 1, 1], [], []>} : vector<71x32xbf16>, vector<32x32xbf16>, vector<71x32xf32> -> vector<71x32xf32>
    %28 = arith.addf %22, %27 : vector<71x32xf32>
    %c0_34 = arith.constant 0 : index
    %c2_35 = arith.constant 2 : index
    %c1_36 = arith.constant 1 : index
    %c0_37 = arith.constant 0 : index
    %29 = vector.load %arg1[%c0_34, %c2_35, %c1_36, %c0_37] : memref<1x4x81x32xbf16, #tpu.memory_space<vmem>>, vector<1x1x71x32xbf16>
    %30 = vector.shape_cast %29 : vector<1x1x71x32xbf16> to vector<71x32xbf16>
    %c5 = arith.constant 5 : index
    %c0_38 = arith.constant 0 : index
    %c0_39 = arith.constant 0 : index
    %31 = vector.load %arg2[%c5, %c0_38, %c0_39] : memref<9x32x32xbf16, #tpu.memory_space<vmem>>, vector<1x32x32xbf16>
    %32 = vector.shape_cast %31 : vector<1x32x32xbf16> to vector<32x32xbf16>
    %cst_40 = arith.constant dense<0.000000e+00> : vector<71x32xf32>
    %33 = tpu.matmul %30, %32, %cst_40 {dimension_numbers = #tpu.dot_dimension_numbers<[1], [0], [0], [1], [0, 0, 1, 1], [], []>} : vector<71x32xbf16>, vector<32x32xbf16>, vector<71x32xf32> -> vector<71x32xf32>
    %34 = arith.addf %28, %33 : vector<71x32xf32>
    %c0_41 = arith.constant 0 : index
    %c0_42 = arith.constant 0 : index
    %c9 = arith.constant 9 : index
    %c0_43 = arith.constant 0 : index
    %35 = vector.load %arg1[%c0_41, %c0_42, %c9, %c0_43] : memref<1x4x81x32xbf16, #tpu.memory_space<vmem>>, vector<1x1x71x32xbf16>
    %36 = vector.shape_cast %35 : vector<1x1x71x32xbf16> to vector<71x32xbf16>
    %c6 = arith.constant 6 : index
    %c0_44 = arith.constant 0 : index
    %c0_45 = arith.constant 0 : index
    %37 = vector.load %arg2[%c6, %c0_44, %c0_45] : memref<9x32x32xbf16, #tpu.memory_space<vmem>>, vector<1x32x32xbf16>
    %38 = vector.shape_cast %37 : vector<1x32x32xbf16> to vector<32x32xbf16>
    %cst_46 = arith.constant dense<0.000000e+00> : vector<71x32xf32>
    %39 = tpu.matmul %36, %38, %cst_46 {dimension_numbers = #tpu.dot_dimension_numbers<[1], [0], [0], [1], [0, 0, 1, 1], [], []>} : vector<71x32xbf16>, vector<32x32xbf16>, vector<71x32xf32> -> vector<71x32xf32>
    %40 = arith.addf %34, %39 : vector<71x32xf32>
    %c0_47 = arith.constant 0 : index
    %c1_48 = arith.constant 1 : index
    %c9_49 = arith.constant 9 : index
    %c0_50 = arith.constant 0 : index
    %41 = vector.load %arg1[%c0_47, %c1_48, %c9_49, %c0_50] : memref<1x4x81x32xbf16, #tpu.memory_space<vmem>>, vector<1x1x71x32xbf16>
    %42 = vector.shape_cast %41 : vector<1x1x71x32xbf16> to vector<71x32xbf16>
    %c7 = arith.constant 7 : index
    %c0_51 = arith.constant 0 : index
    %c0_52 = arith.constant 0 : index
    %43 = vector.load %arg2[%c7, %c0_51, %c0_52] : memref<9x32x32xbf16, #tpu.memory_space<vmem>>, vector<1x32x32xbf16>
    %44 = vector.shape_cast %43 : vector<1x32x32xbf16> to vector<32x32xbf16>
    %cst_53 = arith.constant dense<0.000000e+00> : vector<71x32xf32>
    %45 = tpu.matmul %42, %44, %cst_53 {dimension_numbers = #tpu.dot_dimension_numbers<[1], [0], [0], [1], [0, 0, 1, 1], [], []>} : vector<71x32xbf16>, vector<32x32xbf16>, vector<71x32xf32> -> vector<71x32xf32>
    %46 = arith.addf %40, %45 : vector<71x32xf32>
    %c0_54 = arith.constant 0 : index
    %c0_55 = arith.constant 0 : index
    %c10 = arith.constant 10 : index
    %c0_56 = arith.constant 0 : index
    %47 = vector.load %arg1[%c0_54, %c0_55, %c10, %c0_56] : memref<1x4x81x32xbf16, #tpu.memory_space<vmem>>, vector<1x1x71x32xbf16>
    %48 = vector.shape_cast %47 : vector<1x1x71x32xbf16> to vector<71x32xbf16>
    %c8 = arith.constant 8 : index
    %c0_57 = arith.constant 0 : index
    %c0_58 = arith.constant 0 : index
    %49 = vector.load %arg2[%c8, %c0_57, %c0_58] : memref<9x32x32xbf16, #tpu.memory_space<vmem>>, vector<1x32x32xbf16>
    %50 = vector.shape_cast %49 : vector<1x32x32xbf16> to vector<32x32xbf16>
    %cst_59 = arith.constant dense<0.000000e+00> : vector<71x32xf32>
    %51 = tpu.matmul %48, %50, %cst_59 {dimension_numbers = #tpu.dot_dimension_numbers<[1], [0], [0], [1], [0, 0, 1, 1], [], []>} : vector<71x32xbf16>, vector<32x32xbf16>, vector<71x32xf32> -> vector<71x32xf32>
    %52 = arith.addf %46, %51 : vector<71x32xf32>
    %c0_60 = arith.constant 0 : index
    %c0_61 = arith.constant 0 : index
    %53 = vector.load %arg3[%c0_60, %c0_61] : memref<1x32xf32, #tpu.memory_space<vmem>>, vector<1x32xf32>
    %54 = vector.broadcast %53 : vector<1x32xf32> to vector<71x32xf32>
    %55 = arith.mulf %52, %54 : vector<71x32xf32>
    %c0_62 = arith.constant 0 : index
    %c0_63 = arith.constant 0 : index
    %56 = vector.load %arg4[%c0_62, %c0_63] : memref<1x32xf32, #tpu.memory_space<vmem>>, vector<1x32xf32>
    %57 = vector.broadcast %56 : vector<1x32xf32> to vector<71x32xf32>
    %58 = arith.addf %55, %57 : vector<71x32xf32>
    %cst_64 = arith.constant 0.000000e+00 : f32
    %59 = vector.broadcast %cst_64 : f32 to vector<71x32xf32>
    %60 = arith.cmpf oge, %58, %59 : vector<71x32xf32>
    %cst_65 = arith.constant 2.000000e-01 : f32
    %61 = vector.broadcast %cst_65 : f32 to vector<71x32xf32>
    %62 = arith.mulf %61, %58 : vector<71x32xf32>
    %63 = arith.select %60, %58, %62 : vector<71x32xi1>, vector<71x32xf32>
    %c0_66 = arith.constant 0 : index
    %c0_67 = arith.constant 0 : index
    %c0_68 = arith.constant 0 : index
    %64 = vector.load %arg5[%c0_66, %c0_67, %c0_68] : memref<1x71x32xf32, #tpu.memory_space<vmem>>, vector<1x71x32xf32>
    %65 = vector.shape_cast %64 : vector<1x71x32xf32> to vector<71x32xf32>
    %66 = vector.shape_cast %63 : vector<71x32xf32> to vector<1x71x32xf32>
    tpu.vector_store %arg5[%c0_66, %c0_67, %c0_68], %66 {strides = array<i32>} : memref<1x71x32xf32, #tpu.memory_space<vmem>>, vector<1x71x32xf32>,
    return
  }
  func.func @transform_0(%arg0: i32) -> (i32, i32, i32, i32) {
    %c0_i32 = arith.constant 0 : i32
    %c0_i32_0 = arith.constant 0 : i32
    %c0_i32_1 = arith.constant 0 : i32
    %c0_i32_2 = arith.constant 0 : i32
    return %arg0, %c0_i32, %c0_i32_0, %c0_i32_1 : i32, i32, i32, i32
  }
  func.func @transform_1(%arg0: i32) -> (i32, i32, i32) {
    %c0_i32 = arith.constant 0 : i32
    %c0_i32_0 = arith.constant 0 : i32
    %c0_i32_1 = arith.constant 0 : i32
    %c0_i32_2 = arith.constant 0 : i32
    return %c0_i32, %c0_i32_0, %c0_i32_1 : i32, i32, i32
  }
  func.func @transform_2(%arg0: i32) -> (i32, i32) {
    %c0_i32 = arith.constant 0 : i32
    %c0_i32_0 = arith.constant 0 : i32
    %c0_i32_1 = arith.constant 0 : i32
    return %c0_i32, %c0_i32_0 : i32, i32
  }
  func.func @transform_3(%arg0: i32) -> (i32, i32) {
    %c0_i32 = arith.constant 0 : i32
    %c0_i32_0 = arith.constant 0 : i32
    %c0_i32_1 = arith.constant 0 : i32
    return %c0_i32, %c0_i32_0 : i32, i32
  }
  func.func @transform_4(%arg0: i32) -> (i32, i32, i32) {
    %c0_i32 = arith.constant 0 : i32
    %c0_i32_0 = arith.constant 0 : i32
    %c0_i32_1 = arith.constant 0 : i32
    return %arg0, %c0_i32, %c0_i32_0 : i32, i32, i32
  }
}

module attributes {stable_mosaic.version = 11 : i64} {
  func.func @_conv_bn_act_kernel(%arg0: i32, %arg1: memref<1x4x25x32xbf16, #tpu.memory_space<vmem>>, %arg2: memref<9x32x64xbf16, #tpu.memory_space<vmem>>, %arg3: memref<1x64xf32, #tpu.memory_space<vmem>>, %arg4: memref<1x64xf32, #tpu.memory_space<vmem>>, %arg5: memref<1x19x64xf32, #tpu.memory_space<vmem>>) attributes {dimension_semantics = [#tpu.dimension_semantics<parallel>], iteration_bounds = array<i64: 2>, scalar_prefetch = 0 : i64, scratch_operands = 0 : i64, tpu.core_type = #tpu.core_type<tc>, window_params = [{transform_indices = @transform_0, window_bounds = array<i64: 1, 4, 25, 32>}, {pipeline_mode = #tpu.pipeline_mode<synchronous>, transform_indices = @transform_1, window_bounds = array<i64: 9, 32, 64>}, {pipeline_mode = #tpu.pipeline_mode<synchronous>, transform_indices = @transform_2, window_bounds = array<i64: 1, 64>}, {pipeline_mode = #tpu.pipeline_mode<synchronous>, transform_indices = @transform_3, window_bounds = array<i64: 1, 64>}, {transform_indices = @transform_4, window_bounds = array<i64: 1, 19, 64>}]} {
    %c0 = arith.constant 0 : index
    %c0_0 = arith.constant 0 : index
    %c0_1 = arith.constant 0 : index
    %c0_2 = arith.constant 0 : index
    %0 = vector.load %arg1[%c0, %c0_0, %c0_1, %c0_2] : memref<1x4x25x32xbf16, #tpu.memory_space<vmem>>, vector<1x1x19x32xbf16>
    %1 = vector.shape_cast %0 : vector<1x1x19x32xbf16> to vector<19x32xbf16>
    %c0_3 = arith.constant 0 : index
    %c0_4 = arith.constant 0 : index
    %c0_5 = arith.constant 0 : index
    %2 = vector.load %arg2[%c0_3, %c0_4, %c0_5] : memref<9x32x64xbf16, #tpu.memory_space<vmem>>, vector<1x32x64xbf16>
    %3 = vector.shape_cast %2 : vector<1x32x64xbf16> to vector<32x64xbf16>
    %cst = arith.constant dense<0.000000e+00> : vector<19x64xf32>
    %4 = tpu.matmul %1, %3, %cst {dimension_numbers = #tpu.dot_dimension_numbers<[1], [0], [0], [1], [0, 0, 1, 1], [], []>} : vector<19x32xbf16>, vector<32x64xbf16>, vector<19x64xf32> -> vector<19x64xf32>
    %c0_6 = arith.constant 0 : index
    %c1 = arith.constant 1 : index
    %c0_7 = arith.constant 0 : index
    %c0_8 = arith.constant 0 : index
    %5 = vector.load %arg1[%c0_6, %c1, %c0_7, %c0_8] : memref<1x4x25x32xbf16, #tpu.memory_space<vmem>>, vector<1x1x19x32xbf16>
    %6 = vector.shape_cast %5 : vector<1x1x19x32xbf16> to vector<19x32xbf16>
    %c1_9 = arith.constant 1 : index
    %c0_10 = arith.constant 0 : index
    %c0_11 = arith.constant 0 : index
    %7 = vector.load %arg2[%c1_9, %c0_10, %c0_11] : memref<9x32x64xbf16, #tpu.memory_space<vmem>>, vector<1x32x64xbf16>
    %8 = vector.shape_cast %7 : vector<1x32x64xbf16> to vector<32x64xbf16>
    %cst_12 = arith.constant dense<0.000000e+00> : vector<19x64xf32>
    %9 = tpu.matmul %6, %8, %cst_12 {dimension_numbers = #tpu.dot_dimension_numbers<[1], [0], [0], [1], [0, 0, 1, 1], [], []>} : vector<19x32xbf16>, vector<32x64xbf16>, vector<19x64xf32> -> vector<19x64xf32>
    %10 = arith.addf %4, %9 : vector<19x64xf32>
    %c0_13 = arith.constant 0 : index
    %c0_14 = arith.constant 0 : index
    %c1_15 = arith.constant 1 : index
    %c0_16 = arith.constant 0 : index
    %11 = vector.load %arg1[%c0_13, %c0_14, %c1_15, %c0_16] : memref<1x4x25x32xbf16, #tpu.memory_space<vmem>>, vector<1x1x19x32xbf16>
    %12 = vector.shape_cast %11 : vector<1x1x19x32xbf16> to vector<19x32xbf16>
    %c2 = arith.constant 2 : index
    %c0_17 = arith.constant 0 : index
    %c0_18 = arith.constant 0 : index
    %13 = vector.load %arg2[%c2, %c0_17, %c0_18] : memref<9x32x64xbf16, #tpu.memory_space<vmem>>, vector<1x32x64xbf16>
    %14 = vector.shape_cast %13 : vector<1x32x64xbf16> to vector<32x64xbf16>
    %cst_19 = arith.constant dense<0.000000e+00> : vector<19x64xf32>
    %15 = tpu.matmul %12, %14, %cst_19 {dimension_numbers = #tpu.dot_dimension_numbers<[1], [0], [0], [1], [0, 0, 1, 1], [], []>} : vector<19x32xbf16>, vector<32x64xbf16>, vector<19x64xf32> -> vector<19x64xf32>
    %16 = arith.addf %10, %15 : vector<19x64xf32>
    %c0_20 = arith.constant 0 : index
    %c2_21 = arith.constant 2 : index
    %c0_22 = arith.constant 0 : index
    %c0_23 = arith.constant 0 : index
    %17 = vector.load %arg1[%c0_20, %c2_21, %c0_22, %c0_23] : memref<1x4x25x32xbf16, #tpu.memory_space<vmem>>, vector<1x1x19x32xbf16>
    %18 = vector.shape_cast %17 : vector<1x1x19x32xbf16> to vector<19x32xbf16>
    %c3 = arith.constant 3 : index
    %c0_24 = arith.constant 0 : index
    %c0_25 = arith.constant 0 : index
    %19 = vector.load %arg2[%c3, %c0_24, %c0_25] : memref<9x32x64xbf16, #tpu.memory_space<vmem>>, vector<1x32x64xbf16>
    %20 = vector.shape_cast %19 : vector<1x32x64xbf16> to vector<32x64xbf16>
    %cst_26 = arith.constant dense<0.000000e+00> : vector<19x64xf32>
    %21 = tpu.matmul %18, %20, %cst_26 {dimension_numbers = #tpu.dot_dimension_numbers<[1], [0], [0], [1], [0, 0, 1, 1], [], []>} : vector<19x32xbf16>, vector<32x64xbf16>, vector<19x64xf32> -> vector<19x64xf32>
    %22 = arith.addf %16, %21 : vector<19x64xf32>
    %c0_27 = arith.constant 0 : index
    %c3_28 = arith.constant 3 : index
    %c0_29 = arith.constant 0 : index
    %c0_30 = arith.constant 0 : index
    %23 = vector.load %arg1[%c0_27, %c3_28, %c0_29, %c0_30] : memref<1x4x25x32xbf16, #tpu.memory_space<vmem>>, vector<1x1x19x32xbf16>
    %24 = vector.shape_cast %23 : vector<1x1x19x32xbf16> to vector<19x32xbf16>
    %c4 = arith.constant 4 : index
    %c0_31 = arith.constant 0 : index
    %c0_32 = arith.constant 0 : index
    %25 = vector.load %arg2[%c4, %c0_31, %c0_32] : memref<9x32x64xbf16, #tpu.memory_space<vmem>>, vector<1x32x64xbf16>
    %26 = vector.shape_cast %25 : vector<1x32x64xbf16> to vector<32x64xbf16>
    %cst_33 = arith.constant dense<0.000000e+00> : vector<19x64xf32>
    %27 = tpu.matmul %24, %26, %cst_33 {dimension_numbers = #tpu.dot_dimension_numbers<[1], [0], [0], [1], [0, 0, 1, 1], [], []>} : vector<19x32xbf16>, vector<32x64xbf16>, vector<19x64xf32> -> vector<19x64xf32>
    %28 = arith.addf %22, %27 : vector<19x64xf32>
    %c0_34 = arith.constant 0 : index
    %c2_35 = arith.constant 2 : index
    %c1_36 = arith.constant 1 : index
    %c0_37 = arith.constant 0 : index
    %29 = vector.load %arg1[%c0_34, %c2_35, %c1_36, %c0_37] : memref<1x4x25x32xbf16, #tpu.memory_space<vmem>>, vector<1x1x19x32xbf16>
    %30 = vector.shape_cast %29 : vector<1x1x19x32xbf16> to vector<19x32xbf16>
    %c5 = arith.constant 5 : index
    %c0_38 = arith.constant 0 : index
    %c0_39 = arith.constant 0 : index
    %31 = vector.load %arg2[%c5, %c0_38, %c0_39] : memref<9x32x64xbf16, #tpu.memory_space<vmem>>, vector<1x32x64xbf16>
    %32 = vector.shape_cast %31 : vector<1x32x64xbf16> to vector<32x64xbf16>
    %cst_40 = arith.constant dense<0.000000e+00> : vector<19x64xf32>
    %33 = tpu.matmul %30, %32, %cst_40 {dimension_numbers = #tpu.dot_dimension_numbers<[1], [0], [0], [1], [0, 0, 1, 1], [], []>} : vector<19x32xbf16>, vector<32x64xbf16>, vector<19x64xf32> -> vector<19x64xf32>
    %34 = arith.addf %28, %33 : vector<19x64xf32>
    %c0_41 = arith.constant 0 : index
    %c0_42 = arith.constant 0 : index
    %c5_43 = arith.constant 5 : index
    %c0_44 = arith.constant 0 : index
    %35 = vector.load %arg1[%c0_41, %c0_42, %c5_43, %c0_44] : memref<1x4x25x32xbf16, #tpu.memory_space<vmem>>, vector<1x1x19x32xbf16>
    %36 = vector.shape_cast %35 : vector<1x1x19x32xbf16> to vector<19x32xbf16>
    %c6 = arith.constant 6 : index
    %c0_45 = arith.constant 0 : index
    %c0_46 = arith.constant 0 : index
    %37 = vector.load %arg2[%c6, %c0_45, %c0_46] : memref<9x32x64xbf16, #tpu.memory_space<vmem>>, vector<1x32x64xbf16>
    %38 = vector.shape_cast %37 : vector<1x32x64xbf16> to vector<32x64xbf16>
    %cst_47 = arith.constant dense<0.000000e+00> : vector<19x64xf32>
    %39 = tpu.matmul %36, %38, %cst_47 {dimension_numbers = #tpu.dot_dimension_numbers<[1], [0], [0], [1], [0, 0, 1, 1], [], []>} : vector<19x32xbf16>, vector<32x64xbf16>, vector<19x64xf32> -> vector<19x64xf32>
    %40 = arith.addf %34, %39 : vector<19x64xf32>
    %c0_48 = arith.constant 0 : index
    %c1_49 = arith.constant 1 : index
    %c5_50 = arith.constant 5 : index
    %c0_51 = arith.constant 0 : index
    %41 = vector.load %arg1[%c0_48, %c1_49, %c5_50, %c0_51] : memref<1x4x25x32xbf16, #tpu.memory_space<vmem>>, vector<1x1x19x32xbf16>
    %42 = vector.shape_cast %41 : vector<1x1x19x32xbf16> to vector<19x32xbf16>
    %c7 = arith.constant 7 : index
    %c0_52 = arith.constant 0 : index
    %c0_53 = arith.constant 0 : index
    %43 = vector.load %arg2[%c7, %c0_52, %c0_53] : memref<9x32x64xbf16, #tpu.memory_space<vmem>>, vector<1x32x64xbf16>
    %44 = vector.shape_cast %43 : vector<1x32x64xbf16> to vector<32x64xbf16>
    %cst_54 = arith.constant dense<0.000000e+00> : vector<19x64xf32>
    %45 = tpu.matmul %42, %44, %cst_54 {dimension_numbers = #tpu.dot_dimension_numbers<[1], [0], [0], [1], [0, 0, 1, 1], [], []>} : vector<19x32xbf16>, vector<32x64xbf16>, vector<19x64xf32> -> vector<19x64xf32>
    %46 = arith.addf %40, %45 : vector<19x64xf32>
    %c0_55 = arith.constant 0 : index
    %c0_56 = arith.constant 0 : index
    %c6_57 = arith.constant 6 : index
    %c0_58 = arith.constant 0 : index
    %47 = vector.load %arg1[%c0_55, %c0_56, %c6_57, %c0_58] : memref<1x4x25x32xbf16, #tpu.memory_space<vmem>>, vector<1x1x19x32xbf16>
    %48 = vector.shape_cast %47 : vector<1x1x19x32xbf16> to vector<19x32xbf16>
    %c8 = arith.constant 8 : index
    %c0_59 = arith.constant 0 : index
    %c0_60 = arith.constant 0 : index
    %49 = vector.load %arg2[%c8, %c0_59, %c0_60] : memref<9x32x64xbf16, #tpu.memory_space<vmem>>, vector<1x32x64xbf16>
    %50 = vector.shape_cast %49 : vector<1x32x64xbf16> to vector<32x64xbf16>
    %cst_61 = arith.constant dense<0.000000e+00> : vector<19x64xf32>
    %51 = tpu.matmul %48, %50, %cst_61 {dimension_numbers = #tpu.dot_dimension_numbers<[1], [0], [0], [1], [0, 0, 1, 1], [], []>} : vector<19x32xbf16>, vector<32x64xbf16>, vector<19x64xf32> -> vector<19x64xf32>
    %52 = arith.addf %46, %51 : vector<19x64xf32>
    %c0_62 = arith.constant 0 : index
    %c0_63 = arith.constant 0 : index
    %53 = vector.load %arg3[%c0_62, %c0_63] : memref<1x64xf32, #tpu.memory_space<vmem>>, vector<1x64xf32>
    %54 = vector.broadcast %53 : vector<1x64xf32> to vector<19x64xf32>
    %55 = arith.mulf %52, %54 : vector<19x64xf32>
    %c0_64 = arith.constant 0 : index
    %c0_65 = arith.constant 0 : index
    %56 = vector.load %arg4[%c0_64, %c0_65] : memref<1x64xf32, #tpu.memory_space<vmem>>, vector<1x64xf32>
    %57 = vector.broadcast %56 : vector<1x64xf32> to vector<19x64xf32>
    %58 = arith.addf %55, %57 : vector<19x64xf32>
    %cst_66 = arith.constant 0.000000e+00 : f32
    %59 = vector.broadcast %cst_66 : f32 to vector<19x64xf32>
    %60 = arith.cmpf oge, %58, %59 : vector<19x64xf32>
    %cst_67 = arith.constant 2.000000e-01 : f32
    %61 = vector.broadcast %cst_67 : f32 to vector<19x64xf32>
    %62 = arith.mulf %61, %58 : vector<19x64xf32>
    %63 = arith.select %60, %58, %62 : vector<19x64xi1>, vector<19x64xf32>
    %c0_68 = arith.constant 0 : index
    %c0_69 = arith.constant 0 : index
    %c0_70 = arith.constant 0 : index
    %64 = vector.load %arg5[%c0_68, %c0_69, %c0_70] : memref<1x19x64xf32, #tpu.memory_space<vmem>>, vector<1x19x64xf32>
    %65 = vector.shape_cast %64 : vector<1x19x64xf32> to vector<19x64xf32>
    %66 = vector.shape_cast %63 : vector<19x64xf32> to vector<1x19x64xf32>
    tpu.vector_store %arg5[%c0_68, %c0_69, %c0_70], %66 {strides = array<i32>} : memref<1x19x64xf32, #tpu.memory_space<vmem>>, vector<1x19x64xf32>,
    return
  }
  func.func @transform_0(%arg0: i32) -> (i32, i32, i32, i32) {
    %c0_i32 = arith.constant 0 : i32
    %c0_i32_0 = arith.constant 0 : i32
    %c0_i32_1 = arith.constant 0 : i32
    %c0_i32_2 = arith.constant 0 : i32
    return %arg0, %c0_i32, %c0_i32_0, %c0_i32_1 : i32, i32, i32, i32
  }
  func.func @transform_1(%arg0: i32) -> (i32, i32, i32) {
    %c0_i32 = arith.constant 0 : i32
    %c0_i32_0 = arith.constant 0 : i32
    %c0_i32_1 = arith.constant 0 : i32
    %c0_i32_2 = arith.constant 0 : i32
    return %c0_i32, %c0_i32_0, %c0_i32_1 : i32, i32, i32
  }
  func.func @transform_2(%arg0: i32) -> (i32, i32) {
    %c0_i32 = arith.constant 0 : i32
    %c0_i32_0 = arith.constant 0 : i32
    %c0_i32_1 = arith.constant 0 : i32
    return %c0_i32, %c0_i32_0 : i32, i32
  }
  func.func @transform_3(%arg0: i32) -> (i32, i32) {
    %c0_i32 = arith.constant 0 : i32
    %c0_i32_0 = arith.constant 0 : i32
    %c0_i32_1 = arith.constant 0 : i32
    return %c0_i32, %c0_i32_0 : i32, i32
  }
  func.func @transform_4(%arg0: i32) -> (i32, i32, i32) {
    %c0_i32 = arith.constant 0 : i32
    %c0_i32_0 = arith.constant 0 : i32
    %c0_i32_1 = arith.constant 0 : i32
    return %arg0, %c0_i32, %c0_i32_0 : i32, i32, i32
  }
}

module attributes {stable_mosaic.version = 11 : i64} {
  func.func @_conv_bn_act_kernel(%arg0: i32, %arg1: memref<1x4x4x64xbf16, #tpu.memory_space<vmem>>, %arg2: memref<9x64x128xbf16, #tpu.memory_space<vmem>>, %arg3: memref<1x128xf32, #tpu.memory_space<vmem>>, %arg4: memref<1x128xf32, #tpu.memory_space<vmem>>, %arg5: memref<1x1x128xf32, #tpu.memory_space<vmem>>) attributes {dimension_semantics = [#tpu.dimension_semantics<parallel>], iteration_bounds = array<i64: 2>, scalar_prefetch = 0 : i64, scratch_operands = 0 : i64, tpu.core_type = #tpu.core_type<tc>, window_params = [{transform_indices = @transform_0, window_bounds = array<i64: 1, 4, 4, 64>}, {pipeline_mode = #tpu.pipeline_mode<synchronous>, transform_indices = @transform_1, window_bounds = array<i64: 9, 64, 128>}, {pipeline_mode = #tpu.pipeline_mode<synchronous>, transform_indices = @transform_2, window_bounds = array<i64: 1, 128>}, {pipeline_mode = #tpu.pipeline_mode<synchronous>, transform_indices = @transform_3, window_bounds = array<i64: 1, 128>}, {transform_indices = @transform_4, window_bounds = array<i64: 1, 1, 128>}]} {
    %c0 = arith.constant 0 : index
    %c0_0 = arith.constant 0 : index
    %c0_1 = arith.constant 0 : index
    %c0_2 = arith.constant 0 : index
    %0 = vector.load %arg1[%c0, %c0_0, %c0_1, %c0_2] : memref<1x4x4x64xbf16, #tpu.memory_space<vmem>>, vector<1x1x1x64xbf16>
    %1 = vector.shape_cast %0 : vector<1x1x1x64xbf16> to vector<1x64xbf16>
    %c0_3 = arith.constant 0 : index
    %c0_4 = arith.constant 0 : index
    %c0_5 = arith.constant 0 : index
    %2 = vector.load %arg2[%c0_3, %c0_4, %c0_5] : memref<9x64x128xbf16, #tpu.memory_space<vmem>>, vector<1x64x128xbf16>
    %3 = vector.shape_cast %2 : vector<1x64x128xbf16> to vector<64x128xbf16>
    %cst = arith.constant dense<0.000000e+00> : vector<1x128xf32>
    %4 = tpu.matmul %1, %3, %cst {dimension_numbers = #tpu.dot_dimension_numbers<[1], [0], [0], [1], [0, 0, 1, 1], [], []>} : vector<1x64xbf16>, vector<64x128xbf16>, vector<1x128xf32> -> vector<1x128xf32>
    %c0_6 = arith.constant 0 : index
    %c1 = arith.constant 1 : index
    %c0_7 = arith.constant 0 : index
    %c0_8 = arith.constant 0 : index
    %5 = vector.load %arg1[%c0_6, %c1, %c0_7, %c0_8] : memref<1x4x4x64xbf16, #tpu.memory_space<vmem>>, vector<1x1x1x64xbf16>
    %6 = vector.shape_cast %5 : vector<1x1x1x64xbf16> to vector<1x64xbf16>
    %c1_9 = arith.constant 1 : index
    %c0_10 = arith.constant 0 : index
    %c0_11 = arith.constant 0 : index
    %7 = vector.load %arg2[%c1_9, %c0_10, %c0_11] : memref<9x64x128xbf16, #tpu.memory_space<vmem>>, vector<1x64x128xbf16>
    %8 = vector.shape_cast %7 : vector<1x64x128xbf16> to vector<64x128xbf16>
    %cst_12 = arith.constant dense<0.000000e+00> : vector<1x128xf32>
    %9 = tpu.matmul %6, %8, %cst_12 {dimension_numbers = #tpu.dot_dimension_numbers<[1], [0], [0], [1], [0, 0, 1, 1], [], []>} : vector<1x64xbf16>, vector<64x128xbf16>, vector<1x128xf32> -> vector<1x128xf32>
    %10 = arith.addf %4, %9 : vector<1x128xf32>
    %c0_13 = arith.constant 0 : index
    %c0_14 = arith.constant 0 : index
    %c1_15 = arith.constant 1 : index
    %c0_16 = arith.constant 0 : index
    %11 = vector.load %arg1[%c0_13, %c0_14, %c1_15, %c0_16] : memref<1x4x4x64xbf16, #tpu.memory_space<vmem>>, vector<1x1x1x64xbf16>
    %12 = vector.shape_cast %11 : vector<1x1x1x64xbf16> to vector<1x64xbf16>
    %c2 = arith.constant 2 : index
    %c0_17 = arith.constant 0 : index
    %c0_18 = arith.constant 0 : index
    %13 = vector.load %arg2[%c2, %c0_17, %c0_18] : memref<9x64x128xbf16, #tpu.memory_space<vmem>>, vector<1x64x128xbf16>
    %14 = vector.shape_cast %13 : vector<1x64x128xbf16> to vector<64x128xbf16>
    %cst_19 = arith.constant dense<0.000000e+00> : vector<1x128xf32>
    %15 = tpu.matmul %12, %14, %cst_19 {dimension_numbers = #tpu.dot_dimension_numbers<[1], [0], [0], [1], [0, 0, 1, 1], [], []>} : vector<1x64xbf16>, vector<64x128xbf16>, vector<1x128xf32> -> vector<1x128xf32>
    %16 = arith.addf %10, %15 : vector<1x128xf32>
    %c0_20 = arith.constant 0 : index
    %c2_21 = arith.constant 2 : index
    %c0_22 = arith.constant 0 : index
    %c0_23 = arith.constant 0 : index
    %17 = vector.load %arg1[%c0_20, %c2_21, %c0_22, %c0_23] : memref<1x4x4x64xbf16, #tpu.memory_space<vmem>>, vector<1x1x1x64xbf16>
    %18 = vector.shape_cast %17 : vector<1x1x1x64xbf16> to vector<1x64xbf16>
    %c3 = arith.constant 3 : index
    %c0_24 = arith.constant 0 : index
    %c0_25 = arith.constant 0 : index
    %19 = vector.load %arg2[%c3, %c0_24, %c0_25] : memref<9x64x128xbf16, #tpu.memory_space<vmem>>, vector<1x64x128xbf16>
    %20 = vector.shape_cast %19 : vector<1x64x128xbf16> to vector<64x128xbf16>
    %cst_26 = arith.constant dense<0.000000e+00> : vector<1x128xf32>
    %21 = tpu.matmul %18, %20, %cst_26 {dimension_numbers = #tpu.dot_dimension_numbers<[1], [0], [0], [1], [0, 0, 1, 1], [], []>} : vector<1x64xbf16>, vector<64x128xbf16>, vector<1x128xf32> -> vector<1x128xf32>
    %22 = arith.addf %16, %21 : vector<1x128xf32>
    %c0_27 = arith.constant 0 : index
    %c3_28 = arith.constant 3 : index
    %c0_29 = arith.constant 0 : index
    %c0_30 = arith.constant 0 : index
    %23 = vector.load %arg1[%c0_27, %c3_28, %c0_29, %c0_30] : memref<1x4x4x64xbf16, #tpu.memory_space<vmem>>, vector<1x1x1x64xbf16>
    %24 = vector.shape_cast %23 : vector<1x1x1x64xbf16> to vector<1x64xbf16>
    %c4 = arith.constant 4 : index
    %c0_31 = arith.constant 0 : index
    %c0_32 = arith.constant 0 : index
    %25 = vector.load %arg2[%c4, %c0_31, %c0_32] : memref<9x64x128xbf16, #tpu.memory_space<vmem>>, vector<1x64x128xbf16>
    %26 = vector.shape_cast %25 : vector<1x64x128xbf16> to vector<64x128xbf16>
    %cst_33 = arith.constant dense<0.000000e+00> : vector<1x128xf32>
    %27 = tpu.matmul %24, %26, %cst_33 {dimension_numbers = #tpu.dot_dimension_numbers<[1], [0], [0], [1], [0, 0, 1, 1], [], []>} : vector<1x64xbf16>, vector<64x128xbf16>, vector<1x128xf32> -> vector<1x128xf32>
    %28 = arith.addf %22, %27 : vector<1x128xf32>
    %c0_34 = arith.constant 0 : index
    %c2_35 = arith.constant 2 : index
    %c1_36 = arith.constant 1 : index
    %c0_37 = arith.constant 0 : index
    %29 = vector.load %arg1[%c0_34, %c2_35, %c1_36, %c0_37] : memref<1x4x4x64xbf16, #tpu.memory_space<vmem>>, vector<1x1x1x64xbf16>
    %30 = vector.shape_cast %29 : vector<1x1x1x64xbf16> to vector<1x64xbf16>
    %c5 = arith.constant 5 : index
    %c0_38 = arith.constant 0 : index
    %c0_39 = arith.constant 0 : index
    %31 = vector.load %arg2[%c5, %c0_38, %c0_39] : memref<9x64x128xbf16, #tpu.memory_space<vmem>>, vector<1x64x128xbf16>
    %32 = vector.shape_cast %31 : vector<1x64x128xbf16> to vector<64x128xbf16>
    %cst_40 = arith.constant dense<0.000000e+00> : vector<1x128xf32>
    %33 = tpu.matmul %30, %32, %cst_40 {dimension_numbers = #tpu.dot_dimension_numbers<[1], [0], [0], [1], [0, 0, 1, 1], [], []>} : vector<1x64xbf16>, vector<64x128xbf16>, vector<1x128xf32> -> vector<1x128xf32>
    %34 = arith.addf %28, %33 : vector<1x128xf32>
    %c0_41 = arith.constant 0 : index
    %c0_42 = arith.constant 0 : index
    %c2_43 = arith.constant 2 : index
    %c0_44 = arith.constant 0 : index
    %35 = vector.load %arg1[%c0_41, %c0_42, %c2_43, %c0_44] : memref<1x4x4x64xbf16, #tpu.memory_space<vmem>>, vector<1x1x1x64xbf16>
    %36 = vector.shape_cast %35 : vector<1x1x1x64xbf16> to vector<1x64xbf16>
    %c6 = arith.constant 6 : index
    %c0_45 = arith.constant 0 : index
    %c0_46 = arith.constant 0 : index
    %37 = vector.load %arg2[%c6, %c0_45, %c0_46] : memref<9x64x128xbf16, #tpu.memory_space<vmem>>, vector<1x64x128xbf16>
    %38 = vector.shape_cast %37 : vector<1x64x128xbf16> to vector<64x128xbf16>
    %cst_47 = arith.constant dense<0.000000e+00> : vector<1x128xf32>
    %39 = tpu.matmul %36, %38, %cst_47 {dimension_numbers = #tpu.dot_dimension_numbers<[1], [0], [0], [1], [0, 0, 1, 1], [], []>} : vector<1x64xbf16>, vector<64x128xbf16>, vector<1x128xf32> -> vector<1x128xf32>
    %40 = arith.addf %34, %39 : vector<1x128xf32>
    %c0_48 = arith.constant 0 : index
    %c1_49 = arith.constant 1 : index
    %c2_50 = arith.constant 2 : index
    %c0_51 = arith.constant 0 : index
    %41 = vector.load %arg1[%c0_48, %c1_49, %c2_50, %c0_51] : memref<1x4x4x64xbf16, #tpu.memory_space<vmem>>, vector<1x1x1x64xbf16>
    %42 = vector.shape_cast %41 : vector<1x1x1x64xbf16> to vector<1x64xbf16>
    %c7 = arith.constant 7 : index
    %c0_52 = arith.constant 0 : index
    %c0_53 = arith.constant 0 : index
    %43 = vector.load %arg2[%c7, %c0_52, %c0_53] : memref<9x64x128xbf16, #tpu.memory_space<vmem>>, vector<1x64x128xbf16>
    %44 = vector.shape_cast %43 : vector<1x64x128xbf16> to vector<64x128xbf16>
    %cst_54 = arith.constant dense<0.000000e+00> : vector<1x128xf32>
    %45 = tpu.matmul %42, %44, %cst_54 {dimension_numbers = #tpu.dot_dimension_numbers<[1], [0], [0], [1], [0, 0, 1, 1], [], []>} : vector<1x64xbf16>, vector<64x128xbf16>, vector<1x128xf32> -> vector<1x128xf32>
    %46 = arith.addf %40, %45 : vector<1x128xf32>
    %c0_55 = arith.constant 0 : index
    %c0_56 = arith.constant 0 : index
    %c3_57 = arith.constant 3 : index
    %c0_58 = arith.constant 0 : index
    %47 = vector.load %arg1[%c0_55, %c0_56, %c3_57, %c0_58] : memref<1x4x4x64xbf16, #tpu.memory_space<vmem>>, vector<1x1x1x64xbf16>
    %48 = vector.shape_cast %47 : vector<1x1x1x64xbf16> to vector<1x64xbf16>
    %c8 = arith.constant 8 : index
    %c0_59 = arith.constant 0 : index
    %c0_60 = arith.constant 0 : index
    %49 = vector.load %arg2[%c8, %c0_59, %c0_60] : memref<9x64x128xbf16, #tpu.memory_space<vmem>>, vector<1x64x128xbf16>
    %50 = vector.shape_cast %49 : vector<1x64x128xbf16> to vector<64x128xbf16>
    %cst_61 = arith.constant dense<0.000000e+00> : vector<1x128xf32>
    %51 = tpu.matmul %48, %50, %cst_61 {dimension_numbers = #tpu.dot_dimension_numbers<[1], [0], [0], [1], [0, 0, 1, 1], [], []>} : vector<1x64xbf16>, vector<64x128xbf16>, vector<1x128xf32> -> vector<1x128xf32>
    %52 = arith.addf %46, %51 : vector<1x128xf32>
    %c0_62 = arith.constant 0 : index
    %c0_63 = arith.constant 0 : index
    %53 = vector.load %arg3[%c0_62, %c0_63] : memref<1x128xf32, #tpu.memory_space<vmem>>, vector<1x128xf32>
    %54 = arith.mulf %52, %53 : vector<1x128xf32>
    %c0_64 = arith.constant 0 : index
    %c0_65 = arith.constant 0 : index
    %55 = vector.load %arg4[%c0_64, %c0_65] : memref<1x128xf32, #tpu.memory_space<vmem>>, vector<1x128xf32>
    %56 = arith.addf %54, %55 : vector<1x128xf32>
    %cst_66 = arith.constant 0.000000e+00 : f32
    %57 = vector.broadcast %cst_66 : f32 to vector<1x128xf32>
    %58 = arith.cmpf oge, %56, %57 : vector<1x128xf32>
    %cst_67 = arith.constant 2.000000e-01 : f32
    %59 = vector.broadcast %cst_67 : f32 to vector<1x128xf32>
    %60 = arith.mulf %59, %56 : vector<1x128xf32>
    %61 = arith.select %58, %56, %60 : vector<1x128xi1>, vector<1x128xf32>
    %c0_68 = arith.constant 0 : index
    %c0_69 = arith.constant 0 : index
    %c0_70 = arith.constant 0 : index
    %62 = vector.load %arg5[%c0_68, %c0_69, %c0_70] : memref<1x1x128xf32, #tpu.memory_space<vmem>>, vector<1x1x128xf32>
    %63 = vector.shape_cast %62 : vector<1x1x128xf32> to vector<1x128xf32>
    %64 = vector.shape_cast %61 : vector<1x128xf32> to vector<1x1x128xf32>
    tpu.vector_store %arg5[%c0_68, %c0_69, %c0_70], %64 {strides = array<i32>} : memref<1x1x128xf32, #tpu.memory_space<vmem>>, vector<1x1x128xf32>,
    return
  }
  func.func @transform_0(%arg0: i32) -> (i32, i32, i32, i32) {
    %c0_i32 = arith.constant 0 : i32
    %c0_i32_0 = arith.constant 0 : i32
    %c0_i32_1 = arith.constant 0 : i32
    %c0_i32_2 = arith.constant 0 : i32
    return %arg0, %c0_i32, %c0_i32_0, %c0_i32_1 : i32, i32, i32, i32
  }
  func.func @transform_1(%arg0: i32) -> (i32, i32, i32) {
    %c0_i32 = arith.constant 0 : i32
    %c0_i32_0 = arith.constant 0 : i32
    %c0_i32_1 = arith.constant 0 : i32
    %c0_i32_2 = arith.constant 0 : i32
    return %c0_i32, %c0_i32_0, %c0_i32_1 : i32, i32, i32
  }
  func.func @transform_2(%arg0: i32) -> (i32, i32) {
    %c0_i32 = arith.constant 0 : i32
    %c0_i32_0 = arith.constant 0 : i32
    %c0_i32_1 = arith.constant 0 : i32
    return %c0_i32, %c0_i32_0 : i32, i32
  }
  func.func @transform_3(%arg0: i32) -> (i32, i32) {
    %c0_i32 = arith.constant 0 : i32
    %c0_i32_0 = arith.constant 0 : i32
    %c0_i32_1 = arith.constant 0 : i32
    return %c0_i32, %c0_i32_0 : i32, i32
  }
  func.func @transform_4(%arg0: i32) -> (i32, i32, i32) {
    %c0_i32 = arith.constant 0 : i32
    %c0_i32_0 = arith.constant 0 : i32
    %c0_i32_1 = arith.constant 0 : i32
    return %arg0, %c0_i32, %c0_i32_0 : i32, i32, i32
  }
}

</mosaic_0001>

<bundles_post_ra>
// kernel: propose_forward.5
= control target key start
LH: loop header
LB: loop body
LE: loop exit
PB: predicated region body
PF: predicated region fallthrough
CT: control target
= control target key end

     0   :  { %s4341_s15 = smov 0   ;;  %s5438_s0 = inlined_call_operand.vmem [shape: bf16[2,4,289,3], index: 0, kind: input, shape index: {}]   ;;  %s5439_s1 = inlined_call_operand.vmem [shape: bf16[9,3,16], index: 1, kind: input, shape index: {}]   ;;  %s5440_s2 = inlined_call_operand.vmem [shape: f32[1,16], index: 2, kind: input, shape index: {}]   ;;  %s5441_s3 = inlined_call_operand.vmem [shape: f32[1,16], index: 3, kind: input, shape index: {}]   ;;  %s5442_s4 = inlined_call_operand.vmem [shape: f32[2,271,16], index: 4, kind: output, shape index: {}]  }
   0x1 LB: > { %s3375_s16 = sadd.s32 4294967295, %s4313_s15   ;;  %p3379_p0 = scmp.ge.s32.totalorder %s4313_s15, 1  ;;  %s4313_s15 = sphi %s4341_s15, %s14_s15  }
   0x2   : > { %p162_p1 = scmp.lt.s32.totalorder %s4313_s15, 3 }
   0x4   : > { %p163_p2 = pnand %p3379_p0, %p162_p1 }
   0x6   : > { %166 = sbr.rel (%p163_p2) target bundleno = 780 (0x30c), region = 36 }
   0xb   : > { %v3416_v0 = vld [vmem:[%s5439_s1 + $0x2] sm:$0x3]  ;;  %vm408_vm0 = vcmask 1040384   ;;  %vm409_vm1 = vcmask 1041408   ;;  %p188_p3 = scmp.lt.s32.totalorder %s3375_s16, 1  ;;  %v4315_v1 = vmov 65535  }
   0xc   : > { %v410_v2 = vsel %vm408_vm0, 4294967295, %v4315_v1  ;;  %v3587_v3 = vld [vmem:[%s5439_s1 + $0x4] sm:$0x3]  ;;  %v233_v4 = vld [vmem:[%s5439_s1] sm:$0x3]  ;;  %vm356_vm2 = vcmask 23552  }
   0xd   : > { %v4358_v5 = vsel %vm409_vm1, %v410_v2, 0  ;;  %s5460_s16 = smov (!%p188_p3, %s3375_s16), 1  ;;  %v3759_v6 = vld [vmem:[%s5439_s1 + $0x8] sm:$0x3]  ;;  %v3639_v18 = vld [vmem:[%s5439_s1 + $0x6] sm:$0x3] }
   0xe   : > { %v413_v7 = vand.u32 %v3416_v0, %v4358_v5  ;;  %v915_v8 = vand.u32 %v3587_v3, %v4358_v5  ;;  %v646_v9 = vand.u32 %v4358_v5, %v233_v4  ;;  %v1523_v10 = vand.u32 %v3759_v6, %v4358_v5  ;;  %s4279_s25 = smul.u32 592, %s5460_s16  ;;  %v3863_v28 = vld [vmem:[%s5439_s1 + $0xc] sm:$0x3]  ;;  %v3983_v30 = vld [vmem:[%s5439_s1 + $0xe] sm:$0x3] }
   0xf   : > { %v1219_v20 = vand.u32 %v3639_v18, %v4358_v5  ;;  %v2263_v29 = vand.u32 %v3863_v28, %v4358_v5  ;;  %v3845_v31 = vld [vmem:[%s5439_s1 + $0xa] sm:$0x3]  ;;  %v2701_v33 = vand.u32 %v3983_v30, %v4358_v5  ;;  %v4069_v35 = vld [vmem:[%s5439_s1 + $0x10] sm:$0x3]  ;;  %vm744_vm3 = vsmask.f32 7424 }
  0x10   : > { %4276 = vmatpush.bf16.msra.mxu1 %v413_v7  ;;  %4277 = vmatpush.bf16.msra.mxu2 %v413_v7  ;;  %s4373_s28 = scalar_lea.vmem %s5438_s0, %s4279_s25  ;;  %v1825_v34 = vand.u32 %v3845_v31, %v4358_v5  ;;  %v3044_v36 = vand.u32 %v4069_v35, %v4358_v5  ;;  %vm2956_vm4 = vcmask 1046528   ;;  %s4280_s19 = smul.u32 272, %s5460_s16  ;;  %vm3284_vm5 = vcmask 130048  }
  0x11   : > { %422 = vmatpush.bf16.msra.mxu0 %v413_v7  ;;  %v4179_v11 = vld [vmem:[%s4373_s28 + $0xbc] sm:$0xff]  ;;  %v4184_v12 = vld [vmem:[%s4373_s28 + $0xe4] sm:$0xff]  ;;  %v4174_v13 = vld [vmem:[%s4373_s28 + $0x94] sm:$0xff]  ;;  %4278 = vmatpush.bf16.msra.mxu3 %v413_v7  ;;  %vm3318_vm6 = vcmask 129024  }
  0x12   : > { %v4189_v14 = vld [vmem:[%s4373_s28 + $0x10c] sm:$0xff]  ;;  %v4180_v15 = vld [vmem:[%s4373_s28 + $0xc4] sm:$0xff]  ;;  %v4175_v17 = vld [vmem:[%s4373_s28 + $0x9c] sm:$0xff]  ;;  %s5078_s16 = scalar_lea.vmem %s5442_s4, %s4280_s19 }
  0x13   : > { %3490 = vmatmul.msk.bf16.vlgmr.msra.gmra.mxu1 %vm356_vm2, %v4179_v11  ;;  %3495 = vmatmul.msk.bf16.vlgmr.msra.gmra.mxu2 %vm356_vm2, %v4184_v12  ;;  %v4185_v16 = vld [vmem:[%s4373_s28 + $0xec] sm:$0xff]  ;;  %v4190_v19 = vld [vmem:[%s4373_s28 + $0x114] sm:$0xff]  ;;  %v4176_v23 = vld [vmem:[%s4373_s28 + $0xa4] sm:$0xff] }
  0x14   : > { %924 = vmatpush.bf16.msrb.mxu2 %v915_v8  ;;  %655 = vmatpush.bf16.msrb.mxu1 %v646_v9  ;;  %v4181_v21 = vld [vmem:[%s4373_s28 + $0xcc] sm:$0xff]  ;;  %v4186_v22 = vld [vmem:[%s4373_s28 + $0xf4] sm:$0xff]  ;;  %v4187_v26 = vld [vmem:[%s4373_s28 + $0xfc] sm:$0xff] }
  0x15   : > { %1532 = vmatpush.bf16.msrb.mxu0 %v1523_v10  ;;  %3500 = vmatmul.msk.bf16.vlgmr.msra.gmra.mxu3 %vm356_vm2, %v4189_v14  ;;  %v4402_v24 = vld [vmem:[%s4373_s28 + $0x128] sm:$0xff]  ;;  %v4182_v25 = vld [vmem:[%s4373_s28 + $0xd4] sm:$0xff]  ;;  %v4183_v37 = vld [vmem:[%s4373_s28 + $0xdc] sm:$0xff] }
  0x16   : > { %3485 = vmatmul.msk.bf16.vlgmr.msra.gmra.mxu0 %vm356_vm2, %v4174_v13  ;;  %1228 = vmatpush.bf16.msrb.mxu3 %v1219_v20  ;;  %v4177_v27 = vld [vmem:[%s4373_s28 + $0xac] sm:$0xff]  ;;  %v4188_v38 = vld [vmem:[%s4373_s28 + $0x104] sm:$0xff]  ;;  %v4178_v39 = vld [vmem:[%s4373_s28 + $0xb4] sm:$0xff] }
  0x17   : > { %v4423_v32 = vld [vmem:[%s4373_s28 + $0x130] sm:$0xff]  ;;  %v4157_v40 = vld [vmem:[%s4373_s28] sm:$0xff]  ;;  %v4158_v41 = vld [vmem:[%s4373_s28 + $0x8] sm:$0xff] }
  0x18   : > { %2272 = vmatpush.bf16.msra.mxu2 %v2263_v29  ;;  %1834 = vmatpush.bf16.msra.mxu1 %v1825_v34  ;;  %v747_v42 = vshll.u32 %v4157_v40, 16  ;;  %v4442_v43 = vld [vmem:[%s4373_s28 + $0x138] sm:$0xff]  ;;  %v745_v44 = vshrl.u32 %v4157_v40, 16  ;;  %v751_v46 = vshll.u32 %v4158_v41, 16  ;;  %v4159_v51 = vld [vmem:[%s4373_s28 + $0x10] sm:$0xff]  ;;  %v4453_v52 = vld [vmem:[%s4373_s28 + $0x140] sm:$0xff] }
  0x19   : > { %3053 = vmatpush.bf16.msra.mxu0 %v3044_v36  ;;  %v4208_v50 = vld [vmem:[%s4373_s28 + $0x1bc] sm:$0xff]  ;;  %v755_v53 = vshrl.u32 %v4158_v41, 16  ;;  %v758_v54 = vshll.u32 %v4159_v51, 16  ;;  %v4209_v58 = vld [vmem:[%s4373_s28 + $0x1c4] sm:$0xff]  ;;  %v762_v60 = vshrl.u32 %v4159_v51, 16  ;;  %v4210_v2 = vld [vmem:[%s4373_s28 + $0x1cc] sm:$0xff] }
  0x1a   : > { %2710 = vmatpush.bf16.msra.mxu3 %v2701_v33  ;;  %v749_v45 = vrot.slane %v747_v42, 1  ;;  %v753_v48 = vrot.slane %v751_v46, 1  ;;  %v4160_v59 = vld [vmem:[%s4373_s28 + $0x18] sm:$0xff]  ;;  %v4464_v62 = vld [vmem:[%s4373_s28 + $0x148] sm:$0xff]  ;;  %v4161_v3 = vld [vmem:[%s4373_s28 + $0x20] sm:$0xff] }
  0x1b   : > { %v760_v56 = vrot.slane %v758_v54, 1  ;;  %v765_v61 = vshll.u32 %v4160_v59, 16  ;;  %v769_v4 = vshrl.u32 %v4160_v59, 16  ;;  %v772_v5 = vshll.u32 %v4161_v3, 16  ;;  %v4196_v6 = vld [vmem:[%s4373_s28 + $0x150] sm:$0xff]  ;;  %v4162_v13 = vld [vmem:[%s4373_s28 + $0x28] sm:$0xff] }
  0x1c   : > { %v750_v47 = vor.u32 %v749_v45, %v745_v44  ;;  %v757_v55 = vor.u32 %v755_v53, %v753_v48  ;;  %v4211_v11 = vld [vmem:[%s4373_s28 + $0x1d4] sm:$0xff]  ;;  %v783_v33 = vshrl.u32 %v4162_v13, 16  ;;  %v4213_v44 = vld [vmem:[%s4373_s28 + $0x1e4] sm:$0xff] }
  0x1d   : > { %v764_v63 = vor.u32 %v762_v60, %v760_v56  ;;  %v767_v0 = vrot.slane %v765_v61, 1  ;;  %v774_v8 = vrot.slane %v772_v5, 1  ;;  %v4163_v29 = vld [vmem:[%s4373_s28 + $0x30] sm:$0xff] }
  0x1e   : > { %v754_v49 = vsel %vm744_vm3, %v750_v47, %v753_v48  ;;  %v761_v57 = vsel %vm744_vm3, %v757_v55, %v760_v56  ;;  %v786_v34 = vshll.u32 %v4163_v29, 16  ;;  %v4164_v47 = vld [vmem:[%s4373_s28 + $0x38] sm:$0xff]  ;;  %v4199_v55 = vld [vmem:[%s4373_s28 + $0x168] sm:$0xff] }
  0x1f   : > { %v768_v1 = vsel %vm744_vm3, %v764_v63, %v767_v0  ;;  %v771_v7 = vor.u32 %v769_v4, %v767_v0  ;;  %v4214_v61 = vld [vmem:[%s4373_s28 + $0x1ec] sm:$0xff]  ;;  %v797_v4 = vshrl.u32 %v4164_v47, 16 }
  0x21   : > { %v775_v10 = vsel %vm744_vm3, %v771_v7, %v774_v8 }
  0x23   : > { %3491 = vmatmul.msk.bf16.gmra.mxu1 %vm356_vm2, %v4180_v15  ;;  %3496 = vmatmul.msk.bf16.gmra.mxu2 %vm356_vm2, %v4185_v16  ;;  %v776_v16 = vshrl.u32 %v4161_v3, 16 }
  0x25   : > { %3501 = vmatmul.msk.bf16.gmra.mxu3 %vm356_vm2, %v4190_v19  ;;  %v4197_v19 = vld [vmem:[%s4373_s28 + $0x158] sm:$0xff]  ;;  %v778_v20 = vor.u32 %v776_v16, %v774_v8  ;;  %v4200_v8 = vld [vmem:[%s4373_s28 + $0x170] sm:$0xff] }
  0x26   : > { %3486 = vmatmul.msk.bf16.gmra.mxu0 %vm356_vm2, %v4175_v17  ;;  %v779_v17 = vshll.u32 %v4162_v13, 16 }
  0x33   : > { %3492 = vmatmul.msk.bf16.gmra.mxu1 %vm356_vm2, %v4181_v21  ;;  %3497 = vmatmul.msk.bf16.gmra.mxu2 %vm356_vm2, %v4186_v22  ;;  %v781_v21 = vrot.slane %v779_v17, 1 }
  0x35   : > { %3708 = vmatmul.msk.bf16.vlgmr.msrb.gmra.mxu3 %vm356_vm2, %v4402_v24 }
  0x36   : > { %3487 = vmatmul.msk.bf16.gmra.mxu0 %vm356_vm2, %v4176_v23 }
  0x43   : > { %3493 = vmatmul.msk.bf16.gmra.mxu1 %vm356_vm2, %v4182_v25  ;;  %3498 = vmatmul.msk.bf16.gmra.mxu2 %vm356_vm2, %v4187_v26  ;;  %v782_v25 = vsel %vm744_vm3, %v778_v20, %v781_v21  ;;  %v4212_v26 = vld [vmem:[%s4373_s28 + $0x1dc] sm:$0xff] }
  0x45   : > { %3709 = vmatmul.msk.bf16.gmra.mxu3 %vm356_vm2, %v4423_v32 }
  0x46   : > { %3488 = vmatmul.msk.bf16.gmra.mxu0 %vm356_vm2, %v4177_v27 }
  0x53   : > { %3494 = vmatmul.msk.bf16.gmra.mxu1 %vm356_vm2, %v4183_v37  ;;  %3499 = vmatmul.msk.bf16.gmra.mxu2 %vm356_vm2, %v4188_v38  ;;  %v4198_v37 = vld [vmem:[%s4373_s28 + $0x160] sm:$0xff]  ;;  %v785_v38 = vor.u32 %v783_v33, %v781_v21 }
  0x55   : > { %3710 = vmatmul.msk.bf16.gmra.mxu3 %vm356_vm2, %v4442_v43 }
  0x56   : > { %3489 = vmatmul.msk.bf16.gmra.mxu0 %vm356_vm2, %v4178_v39  ;;  %v788_v39 = vrot.slane %v786_v34, 1 }
  0x58   : > { %v789_v42 = vsel %vm744_vm3, %v785_v38, %v788_v39 }
  0x63   : > { %3570 = vmatmul.msk.bf16.vlgmr.msrb.gmra.mxu1 %vm356_vm2, %v4157_v40  ;;  %3588 = vmatmul.msk.bf16.vlgmr.msrb.gmra.mxu2 %vm356_vm2, %v754_v49 }
  0x65   : > { %3711 = vmatmul.msk.bf16.gmra.mxu3 %vm356_vm2, %v4453_v52 }
  0x66   : > { %3828 = vmatmul.msk.bf16.vlgmr.msrb.gmra.mxu0 %vm356_vm2, %v4208_v50  ;;  %v790_v50 = vshrl.u32 %v4163_v29, 16 }
  0x68   : > { %v792_v56 = vor.u32 %v790_v50, %v788_v39  ;;  %v4201_v39 = vld [vmem:[%s4373_s28 + $0x178] sm:$0xff] }
  0x73   : > { %3571 = vmatmul.msk.bf16.gmra.mxu1 %vm356_vm2, %v4158_v41  ;;  %3589 = vmatmul.msk.bf16.gmra.mxu2 %vm356_vm2, %v761_v57 }
  0x75   : > { %3712 = vmatmul.msk.bf16.gmra.mxu3 %vm356_vm2, %v4464_v62 }
  0x76   : > { %3829 = vmatmul.msk.bf16.gmra.mxu0 %vm356_vm2, %v4209_v58 }
  0x83   : > { %3572 = vmatmul.msk.bf16.gmra.mxu1 %vm356_vm2, %v4159_v51  ;;  %3590 = vmatmul.msk.bf16.gmra.mxu2 %vm356_vm2, %v768_v1  ;;  %v793_v51 = vshll.u32 %v4164_v47, 16  ;;  %v4165_v1 = vld [vmem:[%s4373_s28 + $0x40] sm:$0xff] }
  0x84   : > { %v800_v5 = vshll.u32 %v4165_v1, 16  ;;  %v804_v33 = vshrl.u32 %v4165_v1, 16 }
  0x85   : > { %3713 = vmatmul.msk.bf16.gmra.mxu3 %vm356_vm2, %v4196_v6  ;;  %v795_v57 = vrot.slane %v793_v51, 1 }
  0x86   : > { %3830 = vmatmul.msk.bf16.gmra.mxu0 %vm356_vm2, %v4210_v2 }
  0x87   : > { %v796_v60 = vsel %vm744_vm3, %v792_v56, %v795_v57 }
  0x90   : > { %v4476_v9 = vpop.f32.mrf.mxu1 }
  0x93   : > { %v4480_v12 = vpop.f32.mrf.mxu0  ;;  %3573 = vmatmul.msk.bf16.gmra.mxu1 %vm356_vm2, %v4160_v59  ;;  %3591 = vmatmul.msk.bf16.gmra.mxu2 %vm356_vm2, %v775_v10  ;;  %v799_v10 = vor.u32 %v797_v4, %v795_v57 }
  0x95   : > { %3714 = vmatmul.msk.bf16.gmra.mxu3 %vm356_vm2, %v4197_v19  ;;  %v4215_v19 = vld [vmem:[%s4373_s28 + $0x1f4] sm:$0xff] }
  0x96   : > { %3831 = vmatmul.msk.bf16.gmra.mxu0 %vm356_vm2, %v4211_v11  ;;  %v4486_v14 = vpop.f32.mrf.mxu2  ;;  %v802_v11 = vrot.slane %v800_v5, 1 }
  0x98   : > { %v4488_v15 = vpop.f32.mrf.mxu1  ;;  %v4500_v27 = vpop.f32.mrf.mxu3  ;;  %v803_v17 = vsel %vm744_vm3, %v799_v10, %v802_v11 }
  0x9b   : > { %v4490_v18 = vpop.f32.mrf.mxu0 }
  0x9e   : > { %v4494_v22 = vpop.f32.mrf.mxu2 }
  0xa0   : > { %v4496_v23 = vpop.f32.mrf.mxu1  ;;  %v4512_v35 = vpop.f32.mrf.mxu3 }
  0xa3   : > { %v4502_v28 = vpop.f32.mrf.mxu0  ;;  %3574 = vmatmul.msk.bf16.gmra.mxu1 %vm356_vm2, %v4161_v3  ;;  %3592 = vmatmul.msk.bf16.gmra.mxu2 %vm356_vm2, %v782_v25  ;;  %v4166_v25 = vld [vmem:[%s4373_s28 + $0x48] sm:$0xff] }
  0xa4   : > { %v807_v34 = vshll.u32 %v4166_v25, 16  ;;  %v811_v10 = vshrl.u32 %v4166_v25, 16 }
  0xa5   : > { %3715 = vmatmul.msk.bf16.gmra.mxu3 %vm356_vm2, %v4198_v37 }
  0xa6   : > { %3832 = vmatmul.msk.bf16.gmra.mxu0 %vm356_vm2, %v4212_v26  ;;  %v4508_v30 = vpop.f32.mrf.mxu2 }
  0xa8   : > { %v4510_v31 = vpop.f32.mrf.mxu1  ;;  %v4524_v45 = vpop.f32.mrf.mxu3 }
  0xab   : > { %v4514_v36 = vpop.f32.mrf.mxu0 }
  0xae   : > { %v4518_v40 = vpop.f32.mrf.mxu2 }
  0xb0   : > { %v4520_v41 = vpop.f32.mrf.mxu1  ;;  %v4536_v53 = vpop.f32.mrf.mxu3 }
  0xb1   : > { %5443 = vst [vmem:[#allocation2_spill] sm:$0xff] %v4536_v53 }
  0xb3   : > { %v4526_v46 = vpop.f32.mrf.mxu0  ;;  %3575 = vmatmul.msk.bf16.gmra.mxu1 %vm356_vm2, %v4162_v13  ;;  %3593 = vmatmul.msk.bf16.gmra.mxu2 %vm356_vm2, %v789_v42  ;;  %v806_v42 = vor.u32 %v804_v33, %v802_v11 }
  0xb5   : > { %3716 = vmatmul.msk.bf16.gmra.mxu3 %vm356_vm2, %v4199_v55  ;;  %v4216_v55 = vld [vmem:[%s4373_s28 + $0x1fc] sm:$0xff] }
  0xb6   : > { %3833 = vmatmul.msk.bf16.gmra.mxu0 %vm356_vm2, %v4213_v44  ;;  %v4532_v48 = vpop.f32.mrf.mxu2  ;;  %v809_v44 = vrot.slane %v807_v34, 1  ;;  %v4202_v34 = vld [vmem:[%s4373_s28 + $0x180] sm:$0xff] }
  0xb8   : > { %v4534_v49 = vpop.f32.mrf.mxu1  ;;  %v1230_v63 = vpop.f32.mrf.mxu3  ;;  %v810_v51 = vsel %vm744_vm3, %v806_v42, %v809_v44 }
  0xbb   : > { %v4538_v54 = vpop.f32.mrf.mxu0 }
  0xbe   : > { %v4542_v58 = vpop.f32.mrf.mxu2 }
  0xc0   : > { %v4544_v59 = vpop.f32.mrf.mxu1  ;;  %v1232_v6 = vpop.f32.mrf.mxu3 }
  0xc3   : > { %v4548_v0 = vpop.f32.mrf.mxu0  ;;  %3576 = vmatmul.msk.bf16.gmra.mxu1 %vm356_vm2, %v4163_v29  ;;  %3594 = vmatmul.msk.bf16.gmra.mxu2 %vm356_vm2, %v796_v60  ;;  %v4167_v60 = vld [vmem:[%s4373_s28 + $0x50] sm:$0xff] }
  0xc4   : > { %v814_v11 = vshll.u32 %v4167_v60, 16 }
  0xc5   : > { %3717 = vmatmul.msk.bf16.gmra.mxu3 %vm356_vm2, %v4200_v8 }
  0xc6   : > { %3834 = vmatmul.msk.bf16.gmra.mxu0 %vm356_vm2, %v4214_v61  ;;  %v4554_v2 = vpop.f32.mrf.mxu2  ;;  %v816_v42 = vrot.slane %v814_v11, 1 }
  0xc8   : > { %v4556_v3 = vpop.f32.mrf.mxu1  ;;  %v1235_v20 = vpop.f32.mrf.mxu3 }
  0xcb   : > { %v4558_v7 = vpop.f32.mrf.mxu0 }
  0xce   : > { %v4562_v13 = vpop.f32.mrf.mxu2 }
  0xd0   : > { %v4564_v16 = vpop.f32.mrf.mxu1  ;;  %v4578_v37 = vpop.f32.mrf.mxu3 }
  0xd3   : > { %v4568_v21 = vpop.f32.mrf.mxu0  ;;  %3577 = vmatmul.msk.bf16.gmra.mxu1 %vm356_vm2, %v4164_v47  ;;  %3595 = vmatmul.msk.bf16.gmra.mxu2 %vm356_vm2, %v803_v17 }
  0xd5   : > { %3718 = vmatmul.msk.bf16.gmra.mxu3 %vm356_vm2, %v4201_v39  ;;  %v813_v39 = vor.u32 %v811_v10, %v809_v44 }
  0xd6   : > { %3835 = vmatmul.msk.bf16.gmra.mxu0 %vm356_vm2, %v4215_v19  ;;  %v4574_v26 = vpop.f32.mrf.mxu2 }
  0xd8   : > { %v4576_v29 = vpop.f32.mrf.mxu1  ;;  %v4588_v56 = vpop.f32.mrf.mxu3 }
  0xdb   : > { %v4580_v38 = vpop.f32.mrf.mxu0 }
  0xde   : > { %v4584_v47 = vpop.f32.mrf.mxu2 }
  0xe0   : > { %v657_v50 = vpop.f32.mrf.mxu1  ;;  %v4595_v17 = vpop.f32.mrf.mxu3 }
  0xe1   : > { %v658_v61 = vadd.f32 %v657_v50, %v4480_v12 }
  0xe3   : > { %v1534_v57 = vpop.f32.mrf.mxu0  ;;  %3578 = vmatmul.msk.bf16.gmra.mxu1 %vm356_vm2, %v4165_v1  ;;  %3596 = vmatmul.msk.bf16.gmra.mxu2 %vm356_vm2, %v810_v51 }
  0xe5   : > { %3719 = vmatmul.msk.bf16.gmra.mxu3 %vm356_vm2, %v4202_v34 }
  0xe6   : > { %3836 = vmatmul.msk.bf16.gmra.mxu0 %vm356_vm2, %v4216_v55  ;;  %v926_v4 = vpop.f32.mrf.mxu2 }
  0xe7   : > { %v1011_v5 = vadd.f32 %v926_v4, %v658_v61  ;;  %v817_v61 = vsel %vm744_vm3, %v813_v39, %v816_v42  ;;  %v4217_v4 = vld [vmem:[%s4373_s28 + $0x204] sm:$0xff] }
  0xe8   : > { %v659_v8 = vpop.f32.mrf.mxu1  ;;  %v4604_v53 = vpop.f32.mrf.mxu3 }
  0xe9   : > { %v1315_v19 = vadd.f32 %v1230_v63, %v1011_v5  ;;  %v660_v12 = vadd.f32 %v659_v8, %v4490_v18  ;;  %v4168_v18 = vld [vmem:[%s4373_s28 + $0x58] sm:$0xff] }
  0xea   : > { %v821_v34 = vshll.u32 %v4168_v18, 16 }
  0xeb   : > { %v1536_v33 = vpop.f32.mrf.mxu0  ;;  %v4599_v1 = vadd.f32 %v1534_v57, %v1315_v19  ;;  %v818_v19 = vshrl.u32 %v4167_v60, 16 }
  0xee   : > { %v928_v50 = vpop.f32.mrf.mxu2 }
  0xef   : > { %v1012_v51 = vadd.f32 %v928_v50, %v660_v12  ;;  %v820_v50 = vor.u32 %v818_v19, %v816_v42 }
  0xf0   : > { %v662_v55 = vpop.f32.mrf.mxu1 }
  0xf1   : > { %v1316_v63 = vadd.f32 %v1232_v6, %v1012_v51  ;;  %v663_v44 = vadd.f32 %v662_v55, %v4502_v28  ;;  %v4613_v6 = vpop.f32.mrf.mxu3  ;;  %v823_v51 = vrot.slane %v821_v34, 1 }
  0xf3   : > { %v1539_v5 = vpop.f32.mrf.mxu0  ;;  %3579 = vmatmul.msk.bf16.gmra.mxu1 %vm356_vm2, %v4166_v25  ;;  %3597 = vmatmul.msk.bf16.gmra.mxu2 %vm356_vm2, %v817_v61  ;;  %v4608_v57 = vadd.f32 %v1536_v33, %v1316_v63  ;;  %v4203_v25 = vld [vmem:[%s4373_s28 + $0x188] sm:$0xff]  ;;  %v824_v63 = vsel %vm744_vm3, %v820_v50, %v823_v51 }
  0xf5   : > { %3720 = vmatmul.msk.bf16.gmra.mxu3 %vm356_vm2, %v4203_v25 }
  0xf6   : > { %3837 = vmatmul.msk.bf16.gmra.mxu0 %vm356_vm2, %v4217_v4  ;;  %v931_v8 = vpop.f32.mrf.mxu2 }
  0xf7   : > { %v1013_v10 = vadd.f32 %v931_v8, %v663_v44  ;;  %v4218_v44 = vld [vmem:[%s4373_s28 + $0x20c] sm:$0xff] }
  0xf8   : > { %v664_v11 = vpop.f32.mrf.mxu1 }
  0xf9   : > { %v1317_v39 = vadd.f32 %v1235_v20, %v1013_v10  ;;  %v665_v28 = vadd.f32 %v664_v11, %v4514_v36  ;;  %v4622_v8 = vpop.f32.mrf.mxu3  ;;  %v4169_v36 = vld [vmem:[%s4373_s28 + $0x60] sm:$0xff] }
  0xfa   : > { %v828_v25 = vshll.u32 %v4169_v36, 16 }
  0xfb   : > { %v1541_v12 = vpop.f32.mrf.mxu0  ;;  %v4617_v33 = vadd.f32 %v1539_v5, %v1317_v39  ;;  %v825_v39 = vshrl.u32 %v4168_v18, 16 }
  0xfe   : > { %v933_v55 = vpop.f32.mrf.mxu2 }
  0xff   : > { %v1014_v61 = vadd.f32 %v933_v55, %v665_v28  ;;  %v4204_v28 = vld [vmem:[%s4373_s28 + $0x190] sm:$0xff]  ;;  %v827_v55 = vor.u32 %v825_v39, %v823_v51 }
 0x100   : > { %v667_v4 = vpop.f32.mrf.mxu1 }
 0x101   : > { %v1318_v20 = vadd.f32 %v4578_v37, %v1014_v61  ;;  %v668_v5 = vadd.f32 %v667_v4, %v4526_v46  ;;  %v4632_v37 = vpop.f32.mrf.mxu3  ;;  %v830_v61 = vrot.slane %v828_v25, 1 }
 0x103   : > { %v1544_v10 = vpop.f32.mrf.mxu0  ;;  %3580 = vmatmul.msk.bf16.gmra.mxu1 %vm356_vm2, %v4167_v60  ;;  %3598 = vmatmul.msk.bf16.gmra.mxu2 %vm356_vm2, %v824_v63  ;;  %v4627_v42 = vadd.f32 %v1541_v12, %v1318_v20  ;;  %v831_v20 = vsel %vm744_vm3, %v827_v55, %v830_v61 }
 0x105   : > { %3721 = vmatmul.msk.bf16.gmra.mxu3 %vm356_vm2, %v4204_v28 }
 0x106   : > { %3838 = vmatmul.msk.bf16.gmra.mxu0 %vm356_vm2, %v4218_v44  ;;  %v936_v11 = vpop.f32.mrf.mxu2 }
 0x107   : > { %v1015_v19 = vadd.f32 %v936_v11, %v668_v5  ;;  %v4219_v5 = vld [vmem:[%s4373_s28 + $0x214] sm:$0xff] }
 0x108   : > { %v669_v34 = vpop.f32.mrf.mxu1 }
 0x109   : > { %v1319_v50 = vadd.f32 %v4588_v56, %v1015_v19  ;;  %v670_v46 = vadd.f32 %v669_v34, %v4538_v54  ;;  %v4642_v11 = vpop.f32.mrf.mxu3  ;;  %v4170_v54 = vld [vmem:[%s4373_s28 + $0x68] sm:$0xff] }
 0x10a   : > { %v835_v28 = vshll.u32 %v4170_v54, 16 }
 0x10b   : > { %v1546_v60 = vpop.f32.mrf.mxu0  ;;  %v4637_v12 = vadd.f32 %v1544_v10, %v1319_v50  ;;  %v832_v50 = vshrl.u32 %v4169_v36, 16 }
 0x10e   : > { %v938_v4 = vpop.f32.mrf.mxu2 }
 0x10f   : > { %v1016_v63 = vadd.f32 %v938_v4, %v670_v46  ;;  %v4205_v46 = vld [vmem:[%s4373_s28 + $0x198] sm:$0xff]  ;;  %v834_v4 = vor.u32 %v832_v50, %v830_v61 }
 0x110   : > { %v672_v44 = vpop.f32.mrf.mxu1 }
 0x111   : > { %v1320_v56 = vadd.f32 %v4595_v17, %v1016_v63  ;;  %v673_v10 = vadd.f32 %v672_v44, %v4548_v0  ;;  %v4652_v17 = vpop.f32.mrf.mxu3  ;;  %v837_v63 = vrot.slane %v835_v28, 1 }
 0x113   : > { %v1549_v19 = vpop.f32.mrf.mxu0  ;;  %3581 = vmatmul.msk.bf16.gmra.mxu1 %vm356_vm2, %v4168_v18  ;;  %3599 = vmatmul.msk.bf16.gmra.mxu2 %vm356_vm2, %v831_v20  ;;  %v4647_v51 = vadd.f32 %v1546_v60, %v1320_v56  ;;  %v838_v56 = vsel %vm744_vm3, %v834_v4, %v837_v63 }
 0x115   : > { %3722 = vmatmul.msk.bf16.gmra.mxu3 %vm356_vm2, %v4205_v46 }
 0x116   : > { %3839 = vmatmul.msk.bf16.gmra.mxu0 %vm356_vm2, %v4219_v5  ;;  %v941_v34 = vpop.f32.mrf.mxu2 }
 0x117   : > { %v1017_v39 = vadd.f32 %v941_v34, %v673_v10  ;;  %v4220_v10 = vld [vmem:[%s4373_s28 + $0x21c] sm:$0xff] }
 0x118   : > { %v674_v25 = vpop.f32.mrf.mxu1 }
 0x119   : > { %v1321_v55 = vadd.f32 %v4604_v53, %v1017_v39  ;;  %v675_v0 = vadd.f32 %v674_v25, %v4558_v7  ;;  %v4662_v34 = vpop.f32.mrf.mxu3  ;;  %v4171_v7 = vld [vmem:[%s4373_s28 + $0x70] sm:$0xff] }
 0x11a   : > { %v842_v46 = vshll.u32 %v4171_v7, 16 }
 0x11b   : > { %v1551_v18 = vpop.f32.mrf.mxu0  ;;  %v4657_v60 = vadd.f32 %v1549_v19, %v1321_v55  ;;  %v839_v55 = vshrl.u32 %v4170_v54, 16 }
 0x11e   : > { %v943_v44 = vpop.f32.mrf.mxu2 }
 0x11f   : > { %v1018_v20 = vadd.f32 %v943_v44, %v675_v0  ;;  %v4206_v0 = vld [vmem:[%s4373_s28 + $0x1a0] sm:$0xff]  ;;  %v841_v44 = vor.u32 %v839_v55, %v837_v63 }
 0x120   : > { %v677_v5 = vpop.f32.mrf.mxu1 }
 0x121   : > { %v1322_v53 = vadd.f32 %v4613_v6, %v1018_v20  ;;  %v678_v19 = vadd.f32 %v677_v5, %v4568_v21  ;;  %v4672_v6 = vpop.f32.mrf.mxu3  ;;  %v844_v20 = vrot.slane %v842_v46, 1 }
 0x123   : > { %v1554_v39 = vpop.f32.mrf.mxu0  ;;  %3582 = vmatmul.msk.bf16.gmra.mxu1 %vm356_vm2, %v4169_v36  ;;  %3600 = vmatmul.msk.bf16.gmra.mxu2 %vm356_vm2, %v838_v56  ;;  %v4667_v61 = vadd.f32 %v1551_v18, %v1322_v53  ;;  %v845_v53 = vsel %vm744_vm3, %v841_v44, %v844_v20 }
 0x125   : > { %5444 = vst [vmem:[#allocation3_spill] sm:$0xff] %v4667_v61  ;;  %3723 = vmatmul.msk.bf16.gmra.mxu3 %vm356_vm2, %v4206_v0 }
 0x126   : > { %3840 = vmatmul.msk.bf16.gmra.mxu0 %vm356_vm2, %v4220_v10  ;;  %v946_v25 = vpop.f32.mrf.mxu2 }
 0x127   : > { %v1019_v50 = vadd.f32 %v946_v25, %v678_v19  ;;  %v4221_v19 = vld [vmem:[%s4373_s28 + $0x224] sm:$0xff] }
 0x128   : > { %v679_v28 = vpop.f32.mrf.mxu1 }
 0x129   : > { %v1323_v4 = vadd.f32 %v4622_v8, %v1019_v50  ;;  %v680_v21 = vadd.f32 %v679_v28, %v4580_v38  ;;  %v4682_v25 = vpop.f32.mrf.mxu3  ;;  %v4691_v38 = vld [vmem:[%s4373_s28 + $0x78] sm:$0xff] }
 0x12b   : > { %v1556_v36 = vpop.f32.mrf.mxu0  ;;  %v4677_v18 = vadd.f32 %v1554_v39, %v1323_v4  ;;  %v846_v4 = vshrl.u32 %v4171_v7, 16 }
 0x12d   : > { %5445 = vst [vmem:[#allocation4_spill] sm:$0xff] %v4677_v18 }
 0x12e   : > { %v948_v5 = vpop.f32.mrf.mxu2 }
 0x12f   : > { %v1020_v56 = vadd.f32 %v948_v5, %v680_v21  ;;  %v848_v5 = vor.u32 %v846_v4, %v844_v20 }
 0x130   : > { %v682_v10 = vpop.f32.mrf.mxu1 }
 0x131   : > { %v1324_v8 = vadd.f32 %v4632_v37, %v1020_v56  ;;  %v683_v39 = vadd.f32 %v682_v10, %v4476_v9  ;;  %v849_v37 = vshll.u32 %v4691_v38, 16  ;;  %v4695_v0 = vpop.f32.mrf.mxu3 }
 0x133   : > { %v1559_v50 = vpop.f32.mrf.mxu0  ;;  %3583 = vmatmul.msk.bf16.gmra.mxu1 %vm356_vm2, %v4170_v54  ;;  %3601 = vmatmul.msk.bf16.gmra.mxu2 %vm356_vm2, %v845_v53  ;;  %v4687_v63 = vadd.f32 %v1556_v36, %v1324_v8  ;;  %v4207_v36 = vld [vmem:[%s4373_s28 + $0x1a8] sm:$0xff]  ;;  %v851_v9 = vrot.slane %v849_v37, 1 }
 0x134   : > { %v4243_v37 = vld [vmem:[%s4373_s28 + $0xa4] sm:$0xff] }
 0x135   : > { %5446 = vst [vmem:[#allocation5_spill] sm:$0xff] %v4687_v63  ;;  %3724 = vmatmul.msk.bf16.gmra.mxu3 %vm356_vm2, %v4207_v36  ;;  %v852_v8 = vsel %vm744_vm3, %v848_v5, %v851_v9  ;;  %v1657_v36 = vshll.u32 %v4402_v24, 16  ;;  %v853_v5 = vshrl.u32 %v4691_v38, 16 }
 0x136   : > { %3841 = vmatmul.msk.bf16.gmra.mxu0 %vm356_vm2, %v4221_v19  ;;  %v951_v28 = vpop.f32.mrf.mxu2 }
 0x137   : > { %v1021_v55 = vadd.f32 %v951_v28, %v683_v39  ;;  %v4222_v39 = vld [vmem:[%s4373_s28 + $0x22c] sm:$0xff]  ;;  %v855_v63 = vor.u32 %v853_v5, %v851_v9 }
 0x138   : > { %v684_v46 = vpop.f32.mrf.mxu1 }
 0x139   : > { %v1325_v54 = vadd.f32 %v4642_v11, %v1021_v55  ;;  %v685_v56 = vadd.f32 %v684_v46, %v4488_v15  ;;  %v4705_v11 = vpop.f32.mrf.mxu3  ;;  %v4714_v15 = vld [vmem:[%s4373_s28 + $0x80] sm:$0xff] }
 0x13b   : > { %v1561_v44 = vpop.f32.mrf.mxu0  ;;  %v4700_v21 = vadd.f32 %v1559_v50, %v1325_v54  ;;  %v4242_v50 = vld [vmem:[%s4373_s28 + $0x9c] sm:$0xff] }
 0x13c   : > { %v2517_v54 = vshll.u32 %v4242_v50, 16 }
 0x13d   : > { %5447 = vst [vmem:[#allocation6_spill] sm:$0xff] %v4700_v21  ;;  %v1659_v21 = vrot.slane %v1657_v36, 1 }
 0x13e   : > { %v953_v10 = vpop.f32.mrf.mxu2 }
 0x13f   : > { %v1022_v53 = vadd.f32 %v953_v10, %v685_v56  ;;  %v856_v56 = vshll.u32 %v4714_v15, 16  ;;  %v2515_v10 = vshrl.u32 %v4242_v50, 16 }
 0x140   : > { %v687_v19 = vpop.f32.mrf.mxu1 }
 0x141   : > { %v1326_v28 = vadd.f32 %v4652_v17, %v1022_v53  ;;  %v688_v46 = vadd.f32 %v687_v19, %v4496_v23  ;;  %v2519_v53 = vrot.slane %v2517_v54, 1  ;;  %v1661_v23 = vshll.u32 %v4423_v32, 16 }
 0x142   : > { %v858_v18 = vrot.slane %v856_v56, 1 }
 0x143   : > { %v1564_v55 = vpop.f32.mrf.mxu0  ;;  %3584 = vmatmul.msk.bf16.gmra.mxu1 %vm356_vm2, %v4171_v7  ;;  %3602 = vmatmul.msk.bf16.gmra.mxu2 %vm356_vm2, %v852_v8  ;;  %v4710_v20 = vadd.f32 %v1561_v44, %v1326_v28  ;;  %v4722_v44 = vpop.f32.mrf.mxu3  ;;  %v2522_v8 = vshll.u32 %v4243_v37, 16  ;;  %v2520_v19 = vor.u32 %v2519_v53, %v2515_v10 }
 0x144   : > { %v859_v53 = vsel %vm744_vm3, %v855_v63, %v858_v18 }
 0x145   : > { %5448 = vst [vmem:[#allocation7_spill] sm:$0xff] %v4710_v20  ;;  %v2524_v20 = vrot.slane %v2522_v8, 1 }
 0x146   : > { %3842 = vmatmul.msk.bf16.gmra.mxu0 %vm356_vm2, %v4222_v39  ;;  %v956_v4 = vpop.f32.mrf.mxu2 }
 0x147   : > { %v1023_v17 = vadd.f32 %v956_v4, %v688_v46  ;;  %v1655_v46 = vshrl.u32 %v4402_v24, 16  ;;  %v2525_v61 = vsel %vm744_vm3, %v2520_v19, %v2524_v20  ;;  %v4223_v24 = vld [vmem:[%s4373_s28 + $0x234] sm:$0xff] }
 0x148   : > { %v689_v7 = vpop.f32.mrf.mxu1  ;;  %4052 = vmatmul.msk.bf16.vlgmr.msra.gmra.mxu3 %vm356_vm2, %v2525_v61 }
 0x149   : > { %v1327_v39 = vadd.f32 %v4662_v34, %v1023_v17  ;;  %v690_v50 = vadd.f32 %v689_v7, %v4510_v31  ;;  %v4732_v34 = vrot.slane %v1661_v23, 1  ;;  %v1660_v36 = vor.u32 %v1659_v21, %v1655_v46  ;;  %v4244_v21 = vld [vmem:[%s4373_s28 + $0xac] sm:$0xff] }
 0x14a   : > { %v2530_v23 = vshll.u32 %v4244_v21, 16 }
 0x14b   : > { %v1566_v28 = vpop.f32.mrf.mxu0  ;;  %v4727_v4 = vadd.f32 %v1564_v55, %v1327_v39  ;;  %v4736_v55 = vpop.f32.mrf.mxu3  ;;  %v4741_v31 = vsel %vm744_vm3, %v1660_v36, %v4732_v34  ;;  %v2526_v39 = vshrl.u32 %v4243_v37, 16 }
 0x14d   : > { %v2528_v46 = vor.u32 %v2526_v39, %v2524_v20  ;;  %v4224_v20 = vld [vmem:[%s4373_s28 + $0x23c] sm:$0xff]  ;;  %v4259_v39 = vld [vmem:[%s4373_s28 + $0x8] sm:$0xf0] }
 0x14e   : > { %v958_v54 = vpop.f32.mrf.mxu2 }
 0x14f   : > { %v1024_v17 = vadd.f32 %v958_v54, %v690_v50  ;;  %v860_v50 = vshrl.u32 %v4714_v15, 16 }
 0x150   : > { %v692_v10 = vpop.f32.mrf.mxu1 }
 0x151   : > { %v1328_v9 = vadd.f32 %v4672_v6, %v1024_v17  ;;  %v693_v63 = vadd.f32 %v692_v10, %v4520_v41 }
 0x153   : > { %v1569_v5 = vpop.f32.mrf.mxu0  ;;  %3585 = vmatmul.msk.bf16.gmra.mxu1 %vm356_vm2, %v4691_v38  ;;  %3603 = vmatmul.msk.bf16.gmra.mxu2 %vm356_vm2, %v859_v53  ;;  %v4746_v61 = vadd.f32 %v1566_v28, %v1328_v9  ;;  %v4751_v8 = vpop.f32.mrf.mxu3  ;;  %v2532_v28 = vrot.slane %v2530_v23, 1  ;;  %v862_v53 = vor.u32 %v860_v50, %v858_v18  ;;  %v4772_v18 = vld [vmem:[%s4373_s28 + $0x10] sm:$0xff] }
 0x154   : > { %v2084_v50 = vshll.u32 %v4772_v18, 16 }
 0x155   : > { %v2533_v41 = vsel %vm744_vm3, %v2528_v46, %v2532_v28 }
 0x156   : > { %3843 = vmatmul.msk.bf16.gmra.mxu0 %vm356_vm2, %v4223_v24  ;;  %v961_v7 = vpop.f32.mrf.mxu2  ;;  %v4225_v24 = vld [vmem:[%s4373_s28 + $0x8] sm:$0xff] }
 0x157   : > { %v1025_v56 = vadd.f32 %v961_v7, %v693_v63  ;;  %v2079_v63 = vshll.u32 %v4225_v24, 16 }
 0x158   : > { %v694_v6 = vpop.f32.mrf.mxu1  ;;  %4053 = vmatmul.msk.bf16.gmra.mxu3 %vm356_vm2, %v2533_v41  ;;  %v2534_v41 = vshrl.u32 %v4244_v21, 16 }
 0x159   : > { %v1329_v38 = vadd.f32 %v4682_v25, %v1025_v56  ;;  %v695_v17 = vadd.f32 %v694_v6, %v4534_v49  ;;  %v4072_v6 = vld [vmem:[%s4373_s28 + $0x8] sm:$0xe] }
 0x15b   : > { %v1571_v19 = vpop.f32.mrf.mxu0  ;;  %v4755_v54 = vadd.f32 %v1569_v5, %v1329_v38  ;;  %v4762_v36 = vpop.f32.mrf.mxu3  ;;  %v2077_v38 = vshrl.u32 %v4225_v24, 16 }
 0x15d   : > { %5449 = vst [vmem:[#allocation8_spill] sm:$0xff] %v4755_v54 }
 0x15e   : > { %v963_v10 = vpop.f32.mrf.mxu2 }
 0x15f   : > { %v1026_v37 = vadd.f32 %v963_v10, %v695_v17 }
 0x160   : > { %v697_v25 = vpop.f32.mrf.mxu1 }
 0x161   : > { %v1330_v9 = vadd.f32 %v4695_v0, %v1026_v37  ;;  %v698_v7 = vadd.f32 %v697_v25, %v4544_v59  ;;  %v4245_v0 = vld [vmem:[%s4373_s28 + $0xb4] sm:$0xff]  ;;  %v2536_v59 = vor.u32 %v2534_v41, %v2532_v28 }
 0x162   : > { %v2538_v17 = vshll.u32 %v4245_v0, 16 }
 0x163   : > { %v1574_v5 = vpop.f32.mrf.mxu0  ;;  %3586 = vmatmul.msk.bf16.gmra.mxu1 %vm356_vm2, %v4714_v15  ;;  %3604 = vmatmul.msk.bf16.gmra.mxu2 %vm356_vm2, %v862_v53  ;;  %v4768_v49 = vadd.f32 %v1571_v19, %v1330_v9  ;;  %v2081_v15 = vrot.slane %v2079_v63, 1  ;;  %v4779_v19 = vpop.f32.mrf.mxu3  ;;  %v4260_v53 = vld [vmem:[%s4373_s28 + $0x10] sm:$0xff] }
 0x164   : > { %v2540_v25 = vrot.slane %v2538_v17, 1  ;;  %v2958_v54 = vrot.slane %v4260_v53, 1  ;;  %v1668_v17 = vshll.u32 %v4442_v43, 16 }
 0x165   : > { %5450 = vst [vmem:[#allocation9_spill] sm:$0xff] %v4768_v49  ;;  %v2082_v49 = vor.u32 %v2081_v15, %v2077_v38 }
 0x166   : > { %3844 = vmatmul.msk.bf16.gmra.mxu0 %vm356_vm2, %v4224_v20  ;;  %v966_v56 = vpop.f32.mrf.mxu2  ;;  %v4073_v20 = vor.u32 %v4259_v39, %v4072_v6  ;;  %v2541_v24 = vsel %vm744_vm3, %v2536_v59, %v2540_v25 }
 0x167   : > { %v1027_v23 = vadd.f32 %v966_v56, %v698_v7  ;;  %v2086_v7 = vrot.slane %v2084_v50, 1  ;;  %v4246_v50 = vld [vmem:[%s4373_s28 + $0xbc] sm:$0xff] }
 0x168   : > { %v699_v46 = vpop.f32.mrf.mxu1  ;;  %v2957_v56 = vrot.slane %v4073_v20, 1  ;;  %4054 = vmatmul.msk.bf16.gmra.mxu3 %vm356_vm2, %v2541_v24  ;;  %v2546_v59 = vshll.u32 %v4246_v50, 16 }
 0x169   : > { %v1331_v10 = vadd.f32 %v4705_v11, %v1027_v23  ;;  %v700_v63 = vadd.f32 %v699_v46, %v4556_v3  ;;  %v2087_v28 = vsel %vm744_vm3, %v2082_v49, %v2086_v7  ;;  %v4227_v46 = vld [vmem:[%s4373_s28 + $0x18] sm:$0xff] }
 0x16a   : > { %v2959_v38 = vsel %vm2956_vm4, %v2957_v56, %v2958_v54  ;;  %v2092_v53 = vshll.u32 %v4227_v46, 16  ;;  %v4261_v56 = vld [vmem:[%s4373_s28 + $0x18] sm:$0xff] }
 0x16b   : > { %v1576_v37 = vpop.f32.mrf.mxu0  ;;  %v4783_v9 = vadd.f32 %v1574_v5, %v1331_v10  ;;  %v4789_v5 = vpop.f32.mrf.mxu3 }
 0x16e   : > { %v968_v21 = vpop.f32.mrf.mxu2 }
 0x16f   : > { %v1028_v11 = vadd.f32 %v968_v21, %v700_v63  ;;  %v2548_v21 = vrot.slane %v2546_v59, 1  ;;  %v1675_v59 = vshll.u32 %v4453_v52, 16 }
 0x170   : > { %v702_v6 = vpop.f32.mrf.mxu1 }
 0x171   : > { %v1332_v39 = vadd.f32 %v4722_v44, %v1028_v11  ;;  %v703_v49 = vadd.f32 %v702_v6, %v4564_v16  ;;  %v1665_v44 = vshrl.u32 %v4423_v32, 16  ;;  %v1670_v6 = vrot.slane %v1668_v17, 1  ;;  %v4228_v17 = vld [vmem:[%s4373_s28 + $0x20] sm:$0xff] }
 0x173   : > { %v1579_v23 = vpop.f32.mrf.mxu0  ;;  %3846 = vmatmul.msk.bf16.vlgmr.msra.gmra.mxu1 %vm356_vm2, %v4741_v31  ;;  %3932 = vmatmul.msk.bf16.vlgmr.msra.gmra.mxu2 %vm356_vm2, %v2087_v28  ;;  %v4796_v3 = vadd.f32 %v1576_v37, %v1332_v39  ;;  %v2088_v31 = vshrl.u32 %v4772_v18, 16  ;;  %v4805_v20 = vpop.f32.mrf.mxu3  ;;  %v2542_v37 = vshrl.u32 %v4245_v0, 16  ;;  %v1667_v11 = vor.u32 %v1665_v44, %v4732_v34 }
 0x174   : > { %v2094_v39 = vrot.slane %v2092_v53, 1  ;;  %v2960_v0 = vrot.slane %v4261_v56, 1  ;;  %v4247_v53 = vld [vmem:[%s4373_s28 + $0xc4] sm:$0xff]  ;;  %v2100_v56 = vshll.u32 %v4228_v17, 16 }
 0x175   : > { %v2544_v16 = vor.u32 %v2542_v37, %v2540_v25  ;;  %v2090_v28 = vor.u32 %v2088_v31, %v2086_v7  ;;  %v1672_v37 = vshrl.u32 %v4442_v43, 16  ;;  %v1677_v43 = vrot.slane %v1675_v59, 1 }
 0x176   : > { %4138 = vmatmul.msk.bf16.vlgmr.msra.gmra.mxu0 %vm356_vm2, %v2959_v38  ;;  %v971_v15 = vpop.f32.mrf.mxu2 }
 0x177   : > { %v1029_v41 = vadd.f32 %v971_v15, %v703_v49  ;;  %v2549_v18 = vsel %vm744_vm3, %v2544_v16, %v2548_v21  ;;  %v1671_v15 = vsel %vm744_vm3, %v1667_v11, %v1670_v6  ;;  %v2095_v34 = vsel %vm744_vm3, %v2090_v28, %v2094_v39 }
 0x178   : > { %v704_v10 = vpop.f32.mrf.mxu1  ;;  %4055 = vmatmul.msk.bf16.gmra.mxu3 %vm356_vm2, %v2549_v18  ;;  %v2554_v11 = vshll.u32 %v4247_v53, 16 }
 0x179   : > { %v1333_v24 = vadd.f32 %v4736_v55, %v1029_v41  ;;  %v705_v38 = vadd.f32 %v704_v10, %v4576_v29  ;;  %v2961_v41 = vsel %vm2956_vm4, %v2958_v54, %v2960_v0 }
 0x17b   : > { %v1581_v63 = vpop.f32.mrf.mxu0  ;;  %v4810_v32 = vadd.f32 %v1579_v23, %v1333_v24  ;;  %v4817_v23 = vpop.f32.mrf.mxu3  ;;  %v2096_v24 = vshrl.u32 %v4227_v46, 16 }
 0x17e   : > { %v973_v55 = vpop.f32.mrf.mxu2 }
 0x17f   : > { %v1030_v49 = vadd.f32 %v973_v55, %v705_v38  ;;  %v4262_v38 = vld [vmem:[%s4373_s28 + $0x20] sm:$0xff] }
 0x180   : > { %v707_v25 = vpop.f32.mrf.mxu1 }
 0x181   : > { %v1334_v7 = vadd.f32 %v4751_v8, %v1030_v49  ;;  %v708_v10 = vadd.f32 %v707_v25, %v4486_v14  ;;  %v2556_v14 = vrot.slane %v2554_v11, 1  ;;  %v1674_v49 = vor.u32 %v1672_v37, %v1670_v6 }
 0x182   : > { %v2104_v11 = vshrl.u32 %v4228_v17, 16 }
 0x183   : > { %v1584_v44 = vpop.f32.mrf.mxu0  ;;  %3847 = vmatmul.msk.bf16.gmra.mxu1 %vm356_vm2, %v1671_v15  ;;  %3933 = vmatmul.msk.bf16.gmra.mxu2 %vm356_vm2, %v2095_v34  ;;  %v4823_v29 = vadd.f32 %v1581_v63, %v1334_v7  ;;  %v4831_v16 = vpop.f32.mrf.mxu3  ;;  %v2550_v63 = vshrl.u32 %v4246_v50, 16  ;;  %v2098_v15 = vor.u32 %v2096_v24, %v2094_v39  ;;  %v2102_v34 = vrot.slane %v2100_v56, 1  ;;  %v4248_v24 = vld [vmem:[%s4373_s28 + $0xcc] sm:$0xff] }
 0x185   : > { %v2552_v55 = vor.u32 %v2550_v63, %v2548_v21  ;;  %v1678_v21 = vsel %vm744_vm3, %v1674_v49, %v1677_v43  ;;  %v2103_v6 = vsel %vm744_vm3, %v2098_v15, %v2102_v34 }
 0x186   : > { %4139 = vmatmul.msk.bf16.gmra.mxu0 %vm356_vm2, %v2961_v41  ;;  %v976_v31 = vpop.f32.mrf.mxu2  ;;  %v2962_v41 = vrot.slane %v4262_v38, 1  ;;  %v2558_v38 = vshrl.u32 %v4247_v53, 16 }
 0x187   : > { %v1031_v8 = vadd.f32 %v976_v31, %v708_v10  ;;  %v2557_v7 = vsel %vm744_vm3, %v2552_v55, %v2556_v14  ;;  %v2562_v55 = vshll.u32 %v4248_v24, 16 }
 0x188   : > { %v709_v54 = vpop.f32.mrf.mxu1  ;;  %4056 = vmatmul.msk.bf16.gmra.mxu3 %vm356_vm2, %v2557_v7  ;;  %v2963_v37 = vsel %vm2956_vm4, %v2960_v0, %v2962_v41  ;;  %v1682_v0 = vshll.u32 %v4464_v62, 16  ;;  %v4863_v7 = vld [vmem:[%s4373_s28 + $0x28] sm:$0xff]  ;;  %v2106_v62 = vor.u32 %v2104_v11, %v2102_v34 }
 0x189   : > { %v1335_v28 = vadd.f32 %v4762_v36, %v1031_v8  ;;  %v710_v46 = vadd.f32 %v709_v54, %v4494_v22  ;;  %v4852_v8 = vld [vmem:[%s4373_s28 + $0x28] sm:$0xff]  ;;  %v2964_v53 = vrot.slane %v4863_v7, 1  ;;  %v2566_v7 = vshrl.u32 %v4248_v24, 16 }
 0x18b   : > { %v1586_v18 = vpop.f32.mrf.mxu0  ;;  %v4835_v25 = vadd.f32 %v1584_v44, %v1335_v28  ;;  %v4842_v44 = vpop.f32.mrf.mxu3  ;;  %v2108_v28 = vshll.u32 %v4852_v8, 16 }
 0x18e   : > { %v978_v50 = vpop.f32.mrf.mxu2 }
 0x18f   : > { %v1032_v36 = vadd.f32 %v978_v50, %v710_v46  ;;  %v2564_v46 = vrot.slane %v2562_v55, 1  ;;  %v2112_v55 = vshrl.u32 %v4852_v8, 16 }
 0x190   : > { %v712_v10 = vpop.f32.mrf.mxu1 }
 0x191   : > { %v1336_v39 = vadd.f32 %v4779_v19, %v1032_v36  ;;  %v713_v59 = vadd.f32 %v712_v10, %v4508_v30  ;;  %v1679_v19 = vshrl.u32 %v4453_v52, 16  ;;  %v2560_v30 = vor.u32 %v2558_v38, %v2556_v14 }
 0x192   : > { %v1684_v36 = vrot.slane %v1682_v0, 1  ;;  %v2110_v10 = vrot.slane %v2108_v28, 1  ;;  %v4249_v0 = vld [vmem:[%s4373_s28 + $0xd4] sm:$0xff] }
 0x193   : > { %v1589_v31 = vpop.f32.mrf.mxu0  ;;  %3848 = vmatmul.msk.bf16.gmra.mxu1 %vm356_vm2, %v1678_v21  ;;  %3934 = vmatmul.msk.bf16.gmra.mxu2 %vm356_vm2, %v2103_v6  ;;  %v4848_v22 = vadd.f32 %v1586_v18, %v1336_v39  ;;  %v4859_v18 = vpop.f32.mrf.mxu3  ;;  %v1681_v50 = vor.u32 %v1679_v19, %v1677_v43  ;;  %v2565_v17 = vsel %vm744_vm3, %v2560_v30, %v2564_v46  ;;  %v4293_v28 = vld [vmem:[%s4373_s28 + $0x150] sm:$0xff]  ;;  %v2570_v30 = vshll.u32 %v4249_v0, 16 }
 0x194   : > { %v2111_v39 = vsel %vm744_vm3, %v2106_v62, %v2110_v10  ;;  %v4895_v62 = vld [vmem:[%s4373_s28 + $0x30] sm:$0xff] }
 0x195   : > { %v1685_v43 = vsel %vm744_vm3, %v1681_v50, %v1684_v36  ;;  %v2966_v24 = vrot.slane %v4895_v62, 1  ;;  %v2574_v62 = vshrl.u32 %v4249_v0, 16 }
 0x196   : > { %4140 = vmatmul.msk.bf16.gmra.mxu0 %vm356_vm2, %v2963_v37  ;;  %v981_v54 = vpop.f32.mrf.mxu2  ;;  %v2965_v37 = vsel %vm2956_vm4, %v2962_v41, %v2964_v53  ;;  %v1689_v41 = vshll.u32 %v4293_v28, 16 }
 0x197   : > { %v1033_v56 = vadd.f32 %v981_v54, %v713_v59  ;;  %v4883_v54 = vld [vmem:[%s4373_s28 + $0x30] sm:$0xff] }
 0x198   : > { %v714_v63 = vpop.f32.mrf.mxu1  ;;  %4057 = vmatmul.msk.bf16.gmra.mxu3 %vm356_vm2, %v2565_v17  ;;  %v2568_v17 = vor.u32 %v2566_v7, %v2564_v46 }
 0x199   : > { %v1337_v49 = vadd.f32 %v4789_v5, %v1033_v56  ;;  %v715_v21 = vadd.f32 %v714_v63, %v4518_v40  ;;  %v4292_v63 = vld [vmem:[%s4373_s28 + $0x148] sm:$0xff] }
 0x19b   : > { %v1591_v15 = vpop.f32.mrf.mxu0  ;;  %v4865_v52 = vadd.f32 %v1589_v31, %v1337_v49  ;;  %v4873_v34 = vpop.f32.mrf.mxu3  ;;  %v2116_v49 = vshll.u32 %v4883_v54, 16 }
 0x19e   : > { %v983_v5 = vpop.f32.mrf.mxu2 }
 0x19f   : > { %v1034_v6 = vadd.f32 %v983_v5, %v715_v21  ;;  %v2572_v21 = vrot.slane %v2570_v30, 1  ;;  %v2120_v30 = vshrl.u32 %v4883_v54, 16 }
 0x1a0   : > { %v717_v14 = vpop.f32.mrf.mxu1 }
 0x1a1   : > { %v1338_v31 = vadd.f32 %v4805_v20, %v1034_v6  ;;  %v718_v19 = vadd.f32 %v717_v14, %v4532_v48  ;;  %v1686_v20 = vshrl.u32 %v4292_v63, 16  ;;  %v1691_v14 = vrot.slane %v1689_v41, 1 }
 0x1a2   : > { %v2573_v8 = vsel %vm744_vm3, %v2568_v17, %v2572_v21 }
 0x1a3   : > { %v1594_v40 = vpop.f32.mrf.mxu0  ;;  %3849 = vmatmul.msk.bf16.gmra.mxu1 %vm356_vm2, %v1685_v43  ;;  %3935 = vmatmul.msk.bf16.gmra.mxu2 %vm356_vm2, %v2111_v39  ;;  %v4879_v59 = vadd.f32 %v1591_v15, %v1338_v31  ;;  %v4891_v15 = vpop.f32.mrf.mxu3  ;;  %v1688_v5 = vor.u32 %v1686_v20, %v1684_v36  ;;  %v2114_v43 = vor.u32 %v2112_v55, %v2110_v10  ;;  %v2118_v39 = vrot.slane %v2116_v49, 1  ;;  %v4915_v20 = vld [vmem:[%s4373_s28 + $0x38] sm:$0xff] }
 0x1a4   : > { %v1693_v55 = vshrl.u32 %v4293_v28, 16  ;;  %v4294_v49 = vld [vmem:[%s4373_s28 + $0x158] sm:$0xff] }
 0x1a5   : > { %v1692_v36 = vsel %vm744_vm3, %v1688_v5, %v1691_v14  ;;  %v1696_v7 = vshll.u32 %v4294_v49, 16 }
 0x1a6   : > { %4141 = vmatmul.msk.bf16.gmra.mxu0 %vm356_vm2, %v2965_v37  ;;  %v986_v56 = vpop.f32.mrf.mxu2  ;;  %v1695_v28 = vor.u32 %v1693_v55, %v1691_v14  ;;  %v4946_v55 = vld [vmem:[%s4373_s28 + $0x40] sm:$0xff] }
 0x1a7   : > { %v1035_v11 = vadd.f32 %v986_v56, %v718_v19 }
 0x1a8   : > { %v719_v38 = vpop.f32.mrf.mxu1  ;;  %4058 = vmatmul.msk.bf16.gmra.mxu3 %vm356_vm2, %v2573_v8  ;;  %v4926_v8 = vld [vmem:[%s4373_s28 + $0x38] sm:$0xff] }
 0x1a9   : > { %v1339_v50 = vadd.f32 %v4817_v23, %v1035_v11  ;;  %v720_v31 = vadd.f32 %v719_v38, %v4542_v58  ;;  %v2967_v58 = vsel %vm2956_vm4, %v2964_v53, %v2966_v24  ;;  %v4250_v38 = vld [vmem:[%s4373_s28 + $0xdc] sm:$0xff]  ;;  %v2968_v0 = vrot.slane %v4926_v8, 1 }
 0x1aa   : > { %v2578_v17 = vshll.u32 %v4250_v38, 16  ;;  %v2582_v8 = vshrl.u32 %v4250_v38, 16 }
 0x1ab   : > { %v1596_v48 = vpop.f32.mrf.mxu0  ;;  %v4897_v6 = vadd.f32 %v1594_v40, %v1339_v50  ;;  %v2119_v40 = vsel %vm744_vm3, %v2114_v43, %v2118_v39  ;;  %v4905_v10 = vpop.f32.mrf.mxu3  ;;  %v2124_v50 = vshll.u32 %v4915_v20, 16 }
 0x1ae   : > { %v988_v23 = vpop.f32.mrf.mxu2 }
 0x1af   : > { %v1036_v37 = vadd.f32 %v988_v23, %v720_v31  ;;  %v2580_v31 = vrot.slane %v2578_v17, 1  ;;  %v2128_v17 = vshrl.u32 %v4915_v20, 16 }
 0x1b0   : > { %v722_v46 = vpop.f32.mrf.mxu1 }
 0x1b1   : > { %v1340_v19 = vadd.f32 %v4831_v16, %v1036_v37  ;;  %v723_v11 = vadd.f32 %v722_v46, %v4554_v2  ;;  %v2576_v2 = vor.u32 %v2574_v62, %v2572_v21  ;;  %v1698_v37 = vrot.slane %v1696_v7, 1 }
 0x1b2   : > { %v2122_v46 = vor.u32 %v2120_v30, %v2118_v39  ;;  %v1700_v30 = vshrl.u32 %v4294_v49, 16 }
 0x1b3   : > { %v1599_v56 = vpop.f32.mrf.mxu0  ;;  %3850 = vmatmul.msk.bf16.gmra.mxu1 %vm356_vm2, %v1692_v36  ;;  %3936 = vmatmul.msk.bf16.gmra.mxu2 %vm356_vm2, %v2119_v40  ;;  %v4911_v63 = vadd.f32 %v1596_v48, %v1340_v19  ;;  %v4922_v48 = vpop.f32.mrf.mxu3  ;;  %v2126_v36 = vrot.slane %v2124_v50, 1  ;;  %v2581_v54 = vsel %vm744_vm3, %v2576_v2, %v2580_v31  ;;  %v1699_v14 = vsel %vm744_vm3, %v1695_v28, %v1698_v37  ;;  %v4295_v50 = vld [vmem:[%s4373_s28 + $0x160] sm:$0xff] }
 0x1b4   : > { %v1703_v62 = vshll.u32 %v4295_v50, 16  ;;  %v1702_v49 = vor.u32 %v1700_v30, %v1698_v37  ;;  %v4977_v30 = vld [vmem:[%s4373_s28 + $0x48] sm:$0xff] }
 0x1b6   : > { %4142 = vmatmul.msk.bf16.gmra.mxu0 %vm356_vm2, %v2967_v58  ;;  %v991_v41 = vpop.f32.mrf.mxu2 }
 0x1b7   : > { %v1037_v16 = vadd.f32 %v991_v41, %v723_v11 }
 0x1b8   : > { %v724_v53 = vpop.f32.mrf.mxu1  ;;  %4059 = vmatmul.msk.bf16.gmra.mxu3 %vm356_vm2, %v2581_v54  ;;  %v4957_v54 = vld [vmem:[%s4373_s28 + $0x40] sm:$0xff] }
 0x1b9   : > { %v1341_v5 = vadd.f32 %v4842_v44, %v1037_v16  ;;  %v725_v40 = vadd.f32 %v724_v53, %v4562_v13  ;;  %v2969_v13 = vsel %vm2956_vm4, %v2966_v24, %v2968_v0  ;;  %v4251_v53 = vld [vmem:[%s4373_s28 + $0xe4] sm:$0xff]  ;;  %v2970_v38 = vrot.slane %v4957_v54, 1 }
 0x1ba   : > { %v2586_v2 = vshll.u32 %v4251_v53, 16  ;;  %v2590_v54 = vshrl.u32 %v4251_v53, 16 }
 0x1bb   : > { %v1601_v43 = vpop.f32.mrf.mxu0  ;;  %v4928_v23 = vadd.f32 %v1599_v56, %v1341_v5  ;;  %v2127_v56 = vsel %vm744_vm3, %v2122_v46, %v2126_v36  ;;  %v4936_v39 = vpop.f32.mrf.mxu3  ;;  %v2132_v5 = vshll.u32 %v4946_v55, 16 }
 0x1be   : > { %v993_v44 = vpop.f32.mrf.mxu2 }
 0x1bf   : > { %v1038_v19 = vadd.f32 %v993_v44, %v725_v40  ;;  %v2588_v40 = vrot.slane %v2586_v2, 1  ;;  %v2136_v2 = vshrl.u32 %v4946_v55, 16 }
 0x1c0   : > { %v727_v21 = vpop.f32.mrf.mxu1 }
 0x1c1   : > { %v1342_v58 = vadd.f32 %v4859_v18, %v1038_v19  ;;  %v728_v16 = vadd.f32 %v727_v21, %v4574_v26  ;;  %v2584_v26 = vor.u32 %v2582_v8, %v2580_v31  ;;  %v1705_v19 = vrot.slane %v1703_v62, 1 }
 0x1c2   : > { %v2130_v21 = vor.u32 %v2128_v17, %v2126_v36  ;;  %v1707_v17 = vshrl.u32 %v4295_v50, 16 }
 0x1c3   : > { %v1604_v11 = vpop.f32.mrf.mxu0  ;;  %3851 = vmatmul.msk.bf16.gmra.mxu1 %vm356_vm2, %v1699_v14  ;;  %3937 = vmatmul.msk.bf16.gmra.mxu2 %vm356_vm2, %v2127_v56  ;;  %v4942_v41 = vadd.f32 %v1601_v43, %v1342_v58  ;;  %v4953_v43 = vpop.f32.mrf.mxu3  ;;  %v2134_v14 = vrot.slane %v2132_v5, 1  ;;  %v2589_v20 = vsel %vm744_vm3, %v2584_v26, %v2588_v40  ;;  %v1706_v37 = vsel %vm744_vm3, %v1702_v49, %v1705_v19  ;;  %v4296_v5 = vld [vmem:[%s4373_s28 + $0x168] sm:$0xff] }
 0x1c4   : > { %v1710_v8 = vshll.u32 %v4296_v5, 16  ;;  %v1709_v50 = vor.u32 %v1707_v17, %v1705_v19  ;;  %v5008_v17 = vld [vmem:[%s4373_s28 + $0x50] sm:$0xff] }
 0x1c6   : > { %4143 = vmatmul.msk.bf16.gmra.mxu0 %vm356_vm2, %v2969_v13  ;;  %v996_v7 = vpop.f32.mrf.mxu2 }
 0x1c7   : > { %v1039_v18 = vadd.f32 %v996_v7, %v728_v16 }
 0x1c8   : > { %v729_v24 = vpop.f32.mrf.mxu1  ;;  %4060 = vmatmul.msk.bf16.gmra.mxu3 %vm356_vm2, %v2589_v20  ;;  %v4988_v20 = vld [vmem:[%s4373_s28 + $0x48] sm:$0xff] }
 0x1c9   : > { %v1343_v28 = vadd.f32 %v4873_v34, %v1039_v18  ;;  %v730_v56 = vadd.f32 %v729_v24, %v4584_v47  ;;  %v2971_v47 = vsel %vm2956_vm4, %v2968_v0, %v2970_v38  ;;  %v4252_v24 = vld [vmem:[%s4373_s28 + $0xec] sm:$0xff]  ;;  %v2972_v53 = vrot.slane %v4988_v20, 1 }
 0x1ca   : > { %v2594_v26 = vshll.u32 %v4252_v24, 16  ;;  %v2598_v20 = vshrl.u32 %v4252_v24, 16 }
 0x1cb   : > { %v1606_v46 = vpop.f32.mrf.mxu0  ;;  %v4959_v44 = vadd.f32 %v1604_v11, %v1343_v28  ;;  %v2135_v11 = vsel %vm744_vm3, %v2130_v21, %v2134_v14  ;;  %v4967_v36 = vpop.f32.mrf.mxu3  ;;  %v2140_v28 = vshll.u32 %v4977_v30, 16 }
 0x1ce   : > { %v998_v34 = vpop.f32.mrf.mxu2 }
 0x1cf   : > { %v1040_v58 = vadd.f32 %v998_v34, %v730_v56  ;;  %v2596_v56 = vrot.slane %v2594_v26, 1  ;;  %v2144_v26 = vshrl.u32 %v4977_v30, 16 }
 0x1d0   : > { %v732_v31 = vpop.f32.mrf.mxu1 }
 0x1d1   : > { %v1344_v13 = vadd.f32 %v4891_v15, %v1040_v58  ;;  %v733_v18 = vadd.f32 %v732_v31, %v4500_v27  ;;  %v2592_v27 = vor.u32 %v2590_v54, %v2588_v40  ;;  %v1712_v58 = vrot.slane %v1710_v8, 1 }
 0x1d2   : > { %v2138_v31 = vor.u32 %v2136_v2, %v2134_v14  ;;  %v1714_v2 = vshrl.u32 %v4296_v5, 16 }
 0x1d3   : > { %v1609_v16 = vpop.f32.mrf.mxu0  ;;  %3852 = vmatmul.msk.bf16.gmra.mxu1 %vm356_vm2, %v1706_v37  ;;  %3938 = vmatmul.msk.bf16.gmra.mxu2 %vm356_vm2, %v2135_v11  ;;  %v4973_v7 = vadd.f32 %v1606_v46, %v1344_v13  ;;  %v4984_v46 = vpop.f32.mrf.mxu3  ;;  %v2142_v37 = vrot.slane %v2140_v28, 1  ;;  %v2597_v55 = vsel %vm744_vm3, %v2592_v27, %v2596_v56  ;;  %v1713_v19 = vsel %vm744_vm3, %v1709_v50, %v1712_v58  ;;  %v4297_v28 = vld [vmem:[%s4373_s28 + $0x170] sm:$0xff] }
 0x1d4   : > { %v1717_v54 = vshll.u32 %v4297_v28, 16  ;;  %v1716_v5 = vor.u32 %v1714_v2, %v1712_v58 }
 0x1d6   : > { %4144 = vmatmul.msk.bf16.gmra.mxu0 %vm356_vm2, %v2971_v47  ;;  %v1001_v62 = vpop.f32.mrf.mxu2 }
 0x1d7   : > { %v1041_v15 = vadd.f32 %v1001_v62, %v733_v18 }
 0x1d8   : > { %v734_v0 = vpop.f32.mrf.mxu1  ;;  %4061 = vmatmul.msk.bf16.gmra.mxu3 %vm356_vm2, %v2597_v55  ;;  %v5019_v55 = vld [vmem:[%s4373_s28 + $0x50] sm:$0xff] }
 0x1d9   : > { %v1345_v49 = vadd.f32 %v4905_v10, %v1041_v15  ;;  %v735_v11 = vadd.f32 %v734_v0, %v4512_v35  ;;  %v2973_v35 = vsel %vm2956_vm4, %v2970_v38, %v2972_v53  ;;  %v4253_v0 = vld [vmem:[%s4373_s28 + $0xf4] sm:$0xff]  ;;  %v2974_v24 = vrot.slane %v5019_v55, 1 }
 0x1da   : > { %v2602_v27 = vshll.u32 %v4253_v0, 16 }
 0x1db   : > { %v1611_v21 = vpop.f32.mrf.mxu0  ;;  %v4990_v34 = vadd.f32 %v1609_v16, %v1345_v49  ;;  %v2143_v16 = vsel %vm744_vm3, %v2138_v31, %v2142_v37  ;;  %v4998_v14 = vpop.f32.mrf.mxu3  ;;  %v2148_v49 = vshll.u32 %v5008_v17, 16  ;;  %v2975_v2 = vsel %vm2956_vm4, %v2972_v53, %v2974_v24 }
 0x1de   : > { %v1003_v10 = vpop.f32.mrf.mxu2 }
 0x1df   : > { %v1042_v13 = vadd.f32 %v1003_v10, %v735_v11  ;;  %v2604_v11 = vrot.slane %v2602_v27, 1  ;;  %v5046_v27 = vld [vmem:[%s4373_s28 + $0x178] sm:$0xff] }
 0x1e0   : > { %v737_v40 = vpop.f32.mrf.mxu1  ;;  %v1724_v53 = vshll.u32 %v5046_v27, 16 }
 0x1e1   : > { %v1346_v47 = vadd.f32 %v4922_v48, %v1042_v13  ;;  %v738_v15 = vadd.f32 %v737_v40, %v4524_v45  ;;  %v2600_v45 = vor.u32 %v2598_v20, %v2596_v56  ;;  %v1719_v13 = vrot.slane %v1717_v54, 1  ;;  %v5039_v54 = vld [vmem:[%s4373_s28 + $0x58] sm:$0xff] }
 0x1e2   : > { %v2146_v40 = vor.u32 %v2144_v26, %v2142_v37  ;;  %v2156_v55 = vshll.u32 %v5039_v54, 16 }
 0x1e3   : > { %v1614_v18 = vpop.f32.mrf.mxu0  ;;  %3853 = vmatmul.msk.bf16.gmra.mxu1 %vm356_vm2, %v1713_v19  ;;  %3939 = vmatmul.msk.bf16.gmra.mxu2 %vm356_vm2, %v2143_v16  ;;  %v5004_v62 = vadd.f32 %v1611_v21, %v1346_v47  ;;  %v5015_v21 = vpop.f32.mrf.mxu3  ;;  %v2150_v19 = vrot.slane %v2148_v49, 1  ;;  %v2605_v30 = vsel %vm744_vm3, %v2600_v45, %v2604_v11  ;;  %v5451_v16 = vld [vmem:[#allocation2_spill] sm:$0xff]  ;;  %v1720_v58 = vsel %vm744_vm3, %v1716_v5, %v1719_v13 }
 0x1e4   : > { %v5043_v49 = vld [vmem:[%s4373_s28 + $0xfc] sm:$0xff]  ;;  %v2606_v5 = vshrl.u32 %v4253_v0, 16 }
 0x1e6   : > { %4145 = vmatmul.msk.bf16.gmra.mxu0 %vm356_vm2, %v2973_v35  ;;  %v1006_v8 = vpop.f32.mrf.mxu2 }
 0x1e7   : > { %v1043_v48 = vadd.f32 %v1006_v8, %v738_v15 }
 0x1e8   : > { %v739_v38 = vpop.f32.mrf.mxu1  ;;  %4062 = vmatmul.msk.bf16.gmra.mxu3 %vm356_vm2, %v2605_v30 }
 0x1e9   : > { %v1347_v50 = vadd.f32 %v4936_v39, %v1043_v48  ;;  %v740_v47 = vadd.f32 %v739_v38, %v5451_v16  ;;  %v5061_v16 = vld [vmem:[%s4373_s28 + $0x58] sm:$0xff] }
 0x1eb   : > { %v1616_v31 = vpop.f32.mrf.mxu0  ;;  %v5021_v10 = vadd.f32 %v1614_v18, %v1347_v50  ;;  %v2151_v18 = vsel %vm744_vm3, %v2146_v40, %v2150_v19  ;;  %v5029_v37 = vpop.f32.mrf.mxu3 }
 0x1ee   : > { %v1008_v39 = vpop.f32.mrf.mxu2 }
 0x1ef   : > { %v1044_v35 = vadd.f32 %v1008_v39, %v740_v47  ;;  %v2608_v47 = vor.u32 %v2606_v5, %v2604_v11  ;;  %v2976_v11 = vrot.slane %v5061_v16, 1  ;;  %v5094_v5 = vld [vmem:[%s4373_s28 + $0x60] sm:$0xff]  ;;  %v5144_v16 = vld [vmem:[%s4373_s28 + $0x10c] sm:$0xff] }
 0x1f0   : > { %v1836_v56 = vpop.f32.mrf.mxu1 }
 0x1f1   : > { %v1348_v15 = vadd.f32 %v4953_v43, %v1044_v35  ;;  %v1921_v38 = vadd.f32 %v1836_v56, %v4599_v1  ;;  %v1721_v43 = vshrl.u32 %v4297_v28, 16  ;;  %v2610_v1 = vshll.u32 %v5043_v49, 16  ;;  %v5058_v28 = vld [vmem:[%s5440_s2] ss:$0 sm:$0xff] }
 0x1f2   : > { %v5066_v35 = vld [vmem:[%s5441_s3] ss:$0 sm:$0xff]  ;;  %v1726_v56 = vrot.slane %v1724_v53, 1 }
 0x1f3   : > { %v3055_v8 = vpop.f32.mrf.mxu0  ;;  %3854 = vmatmul.msk.bf16.gmra.mxu1 %vm356_vm2, %v1720_v58  ;;  %3940 = vmatmul.msk.bf16.gmra.mxu2 %vm356_vm2, %v2151_v18  ;;  %v5035_v48 = vadd.f32 %v1616_v31, %v1348_v15  ;;  %v2152_v31 = vshrl.u32 %v5008_v17, 16  ;;  %v5051_v45 = vpop.f32.mrf.mxu3  ;;  %v2612_v39 = vrot.slane %v2610_v1, 1  ;;  %v1723_v0 = vor.u32 %v1721_v43, %v1719_v13 }
 0x1f4   : > { %v2158_v58 = vrot.slane %v2156_v55, 1 }
 0x1f5   : > { %v2613_v18 = vsel %vm744_vm3, %v2608_v47, %v2612_v39  ;;  %v5099_v47 = vld [vmem:[%s4373_s28 + $0x104] sm:$0xff] }
 0x1f6   : > { %4146 = vmatmul.msk.bf16.gmra.mxu0 %vm356_vm2, %v2975_v2  ;;  %v2274_v26 = vpop.f32.mrf.mxu2 }
 0x1f7   : > { %v2359_v20 = vadd.f32 %v2274_v26, %v1921_v38 }
 0x1f8   : > { %v1838_v50 = vpop.f32.mrf.mxu1  ;;  %4063 = vmatmul.msk.bf16.gmra.mxu3 %vm356_vm2, %v2613_v18 }
 0x1f9   : > { %v2797_v40 = vadd.f32 %v4967_v36, %v2359_v20  ;;  %v2154_v36 = vor.u32 %v2152_v31, %v2150_v19  ;;  %v1922_v2 = vadd.f32 %v1838_v50, %v4608_v57  ;;  %v1727_v19 = vsel %vm744_vm3, %v1723_v0, %v1726_v56  ;;  %v5104_v0 = vld [vmem:[%s4373_s28 + $0x180] sm:$0xff] }
 0x1fa   : > { %v2977_v31 = vsel %vm2956_vm4, %v2974_v24, %v2976_v11 }
 0x1fb   : > { %v3057_v30 = vpop.f32.mrf.mxu0  ;;  %v3140_v17 = vadd.f32 %v3055_v8, %v2797_v40  ;;  %v2159_v57 = vsel %vm744_vm3, %v2154_v36, %v2158_v58  ;;  %v5082_v43 = vpop.f32.mrf.mxu3  ;;  %v1731_v36 = vshll.u32 %v5104_v0, 16 }
 0x1fd   : > { %v3178_v15 = vmul.f32 %v5058_v28, %v3140_v17 }
 0x1fe   : > { %v2276_v8 = vpop.f32.mrf.mxu2 }
 0x1ff   : > { %v3216_v38 = vadd.f32 %v5066_v35, %v3178_v15  ;;  %v2360_v26 = vadd.f32 %v2276_v8, %v1922_v2  ;;  %v2160_v15 = vshrl.u32 %v5039_v54, 16  ;;  %v2164_v2 = vshll.u32 %v5094_v5, 16 }
 0x200   : > { %v1841_v13 = vpop.f32.mrf.mxu1  ;;  %v2614_v8 = vshrl.u32 %v5043_v49, 16 }
 0x201   : > { %v3250_v20 = vmax.f32 %v3216_v38, 0.0  ;;  %v2798_v53 = vadd.f32 %v4984_v46, %v2360_v26  ;;  %v1923_v46 = vadd.f32 %v1841_v13, %v4617_v33  ;;  %v2618_v38 = vshll.u32 %v5099_v47, 16 }
 0x203   : > { %v3060_v50 = vpop.f32.mrf.mxu0  ;;  %3285 = vst.msk [vmem:[%s5078_s16] sm:$0xff] %vm3284_vm5, %v3250_v20  ;;  %v3141_v55 = vadd.f32 %v3057_v30, %v2798_v53  ;;  %3855 = vmatmul.msk.bf16.gmra.mxu1 %vm356_vm2, %v1727_v19  ;;  %3941 = vmatmul.msk.bf16.gmra.mxu2 %vm356_vm2, %v2159_v57  ;;  %v1728_v30 = vshrl.u32 %v5046_v27, 16  ;;  %v5109_v33 = vpop.f32.mrf.mxu3  ;;  %v5115_v27 = vld [vmem:[%s4373_s28 + $0x60] sm:$0xff]  ;;  %v2616_v57 = vor.u32 %v2614_v8, %v2612_v39  ;;  %v2620_v20 = vrot.slane %v2618_v38, 1  ;;  %v5139_v8 = vld [vmem:[%s4373_s28 + $0x68] sm:$0xff] }
 0x205   : > { %v3179_v1 = vmul.f32 %v5058_v28, %v3141_v55  ;;  %v1730_v54 = vor.u32 %v1728_v30, %v1726_v56  ;;  %v2162_v55 = vor.u32 %v2160_v15, %v2158_v58 }
 0x206   : > { %4147 = vmatmul.msk.bf16.gmra.mxu0 %vm356_vm2, %v2977_v31  ;;  %v2279_v40 = vpop.f32.mrf.mxu2  ;;  %v1733_v31 = vrot.slane %v1731_v36, 1 }
 0x207   : > { %v3217_v24 = vadd.f32 %v5066_v35, %v3179_v1  ;;  %v2361_v17 = vadd.f32 %v2279_v40, %v1923_v46  ;;  %v2166_v1 = vrot.slane %v2164_v2, 1  ;;  %v2621_v46 = vsel %vm744_vm3, %v2616_v57, %v2620_v20 }
 0x208   : > { %v1843_v18 = vpop.f32.mrf.mxu1  ;;  %4064 = vmatmul.msk.bf16.gmra.mxu3 %vm356_vm2, %v2621_v46  ;;  %v1734_v58 = vsel %vm744_vm3, %v1730_v54, %v1733_v31  ;;  %v2168_v54 = vshrl.u32 %v5094_v5, 16  ;;  %v2622_v46 = vshrl.u32 %v5099_v47, 16 }
 0x209   : > { %v3251_v26 = vmax.f32 %v3217_v24, 0.0  ;;  %v2799_v13 = vadd.f32 %v4998_v14, %v2361_v17  ;;  %v1924_v40 = vadd.f32 %v1843_v18, %v4627_v42  ;;  %v2978_v14 = vrot.slane %v5115_v27, 1  ;;  %v5149_v27 = vld [vmem:[%s4373_s28 + $0x188] sm:$0xff] }
 0x20a   : > { %v2167_v17 = vsel %vm744_vm3, %v2162_v55, %v2166_v1  ;;  %v1738_v57 = vshll.u32 %v5149_v27, 16  ;;  %v2172_v55 = vshll.u32 %v5139_v8, 16 }
 0x20b   : > { %v3062_v19 = vpop.f32.mrf.mxu0  ;;  %3286 = vst.msk [vmem:[%s5078_s16 + $0x8] sm:$0xff] %vm3284_vm5, %v3251_v26  ;;  %v3142_v53 = vadd.f32 %v3060_v50, %v2799_v13  ;;  %v5127_v30 = vpop.f32.mrf.mxu3  ;;  %v2979_v15 = vsel %vm2956_vm4, %v2976_v11, %v2978_v14 }
 0x20d   : > { %v3180_v49 = vmul.f32 %v5058_v28, %v3142_v53 }
 0x20e   : > { %v2281_v39 = vpop.f32.mrf.mxu2 }
 0x20f   : > { %v3218_v24 = vadd.f32 %v5066_v35, %v3180_v49  ;;  %v2362_v50 = vadd.f32 %v2281_v39, %v1924_v40  ;;  %v2626_v49 = vshll.u32 %v5144_v16, 16 }
 0x210   : > { %v1846_v56 = vpop.f32.mrf.mxu1 }
 0x211   : > { %v3252_v36 = vmax.f32 %v3218_v24, 0.0  ;;  %v2800_v42 = vadd.f32 %v5015_v21, %v2362_v50  ;;  %v1925_v21 = vadd.f32 %v1846_v56, %v4637_v12  ;;  %v2624_v50 = vor.u32 %v2622_v46, %v2620_v20  ;;  %v5187_v46 = vld [vmem:[%s4373_s28 + $0x114] sm:$0xff] }
 0x212   : > { %v2628_v56 = vrot.slane %v2626_v49, 1 }
 0x213   : > { %v3065_v18 = vpop.f32.mrf.mxu0  ;;  %3287 = vst.msk [vmem:[%s5078_s16 + $0x10] sm:$0xff] %vm3284_vm5, %v3252_v36  ;;  %v3143_v2 = vadd.f32 %v3062_v19, %v2800_v42  ;;  %3856 = vmatmul.msk.bf16.gmra.mxu1 %vm356_vm2, %v1734_v58  ;;  %3942 = vmatmul.msk.bf16.gmra.mxu2 %vm356_vm2, %v2167_v17  ;;  %v1735_v19 = vshrl.u32 %v5104_v0, 16  ;;  %v5154_v12 = vpop.f32.mrf.mxu3  ;;  %v5160_v0 = vld [vmem:[%s4373_s28 + $0x68] sm:$0xff]  ;;  %v1740_v17 = vrot.slane %v1738_v57, 1  ;;  %v2170_v36 = vor.u32 %v2168_v54, %v2166_v1 }
 0x214   : > { %v2174_v42 = vrot.slane %v2172_v55, 1 }
 0x215   : > { %v3181_v38 = vmul.f32 %v5058_v28, %v3143_v2  ;;  %v1737_v5 = vor.u32 %v1735_v19, %v1733_v31 }
 0x216   : > { %4148 = vmatmul.msk.bf16.gmra.mxu0 %vm356_vm2, %v2979_v15  ;;  %v2284_v26 = vpop.f32.mrf.mxu2  ;;  %v2629_v15 = vsel %vm744_vm3, %v2624_v50, %v2628_v56  ;;  %v2176_v50 = vshrl.u32 %v5139_v8, 16 }
 0x217   : > { %v3219_v11 = vadd.f32 %v5066_v35, %v3181_v38  ;;  %v2363_v13 = vadd.f32 %v2284_v26, %v1925_v21  ;;  %v1741_v1 = vsel %vm744_vm3, %v1737_v5, %v1740_v17  ;;  %v2175_v21 = vsel %vm744_vm3, %v2170_v36, %v2174_v42 }
 0x218   : > { %v1848_v53 = vpop.f32.mrf.mxu1  ;;  %4065 = vmatmul.msk.bf16.gmra.mxu3 %vm356_vm2, %v2629_v15  ;;  %v2630_v5 = vshrl.u32 %v5144_v16, 16  ;;  %v2634_v36 = vshll.u32 %v5187_v46, 16 }
 0x219   : > { %v3253_v40 = vmax.f32 %v3219_v11, 0.0  ;;  %v2801_v39 = vadd.f32 %v5029_v37, %v2363_v13  ;;  %v1926_v2 = vadd.f32 %v1848_v53, %v4647_v51  ;;  %v2980_v37 = vrot.slane %v5160_v0, 1  ;;  %v5182_v53 = vld [vmem:[%s4373_s28 + $0x70] sm:$0xff] }
 0x21b   : > { %v3067_v24 = vpop.f32.mrf.mxu0  ;;  %3288 = vst.msk [vmem:[%s5078_s16 + $0x18] sm:$0xff] %vm3284_vm5, %v3253_v40  ;;  %v3144_v58 = vadd.f32 %v3065_v18, %v2801_v39  ;;  %v5172_v26 = vpop.f32.mrf.mxu3  ;;  %v2981_v19 = vsel %vm2956_vm4, %v2978_v14, %v2980_v37  ;;  %v1742_v40 = vshrl.u32 %v5149_v27, 16  ;;  %v5192_v39 = vld [vmem:[%s4373_s28 + $0x190] sm:$0xff] }
 0x21c   : > { %v5203_v27 = vld [vmem:[%s4373_s28 + $0x70] sm:$0xff] }
 0x21d   : > { %v3182_v47 = vmul.f32 %v5058_v28, %v3144_v58  ;;  %v2180_v58 = vshll.u32 %v5182_v53, 16  ;;  %v1744_v8 = vor.u32 %v1742_v40, %v1740_v17 }
 0x21e   : > { %v2286_v20 = vpop.f32.mrf.mxu2 }
 0x21f   : > { %v3220_v38 = vadd.f32 %v5066_v35, %v3182_v47  ;;  %v2364_v18 = vadd.f32 %v2286_v20, %v1926_v2  ;;  %v2632_v20 = vor.u32 %v2630_v5, %v2628_v56 }
 0x220   : > { %v1851_v31 = vpop.f32.mrf.mxu1 }
 0x221   : > { %v3254_v11 = vmax.f32 %v3220_v38, 0.0  ;;  %v2802_v51 = vadd.f32 %v5051_v45, %v2364_v18  ;;  %v1927_v55 = vadd.f32 %v1851_v31, %v4657_v60  ;;  %v2636_v38 = vrot.slane %v2634_v36, 1  ;;  %v5230_v36 = vld [vmem:[%s4373_s28 + $0x11c] sm:$0xff] }
 0x223   : > { %v3070_v13 = vpop.f32.mrf.mxu0  ;;  %3289 = vst.msk [vmem:[%s5078_s16 + $0x20] sm:$0xff] %vm3284_vm5, %v3254_v11  ;;  %v3145_v57 = vadd.f32 %v3067_v24, %v2802_v51  ;;  %3857 = vmatmul.msk.bf16.gmra.mxu1 %vm356_vm2, %v1741_v1  ;;  %3943 = vmatmul.msk.bf16.gmra.mxu2 %vm356_vm2, %v2175_v21  ;;  %v1745_v24 = vshll.u32 %v5192_v39, 16  ;;  %v5197_v60 = vpop.f32.mrf.mxu3  ;;  %v2178_v1 = vor.u32 %v2176_v50, %v2174_v42  ;;  %v2182_v21 = vrot.slane %v2180_v58, 1  ;;  %v5452_v51 = vld [vmem:[#allocation3_spill] sm:$0xff]  ;;  %v5453_v58 = vld [vmem:[#allocation4_spill] sm:$0xff] }
 0x224   : > { %v2637_v11 = vsel %vm744_vm3, %v2632_v20, %v2636_v38 }
 0x225   : > { %v3183_v54 = vmul.f32 %v5058_v28, %v3145_v57  ;;  %v1747_v31 = vrot.slane %v1745_v24, 1 }
 0x226   : > { %4149 = vmatmul.msk.bf16.gmra.mxu0 %vm356_vm2, %v2981_v19  ;;  %v2289_v45 = vpop.f32.mrf.mxu2 }
 0x227   : > { %v3221_v14 = vadd.f32 %v5066_v35, %v3183_v54  ;;  %v2365_v49 = vadd.f32 %v2289_v45, %v1927_v55  ;;  %v1748_v42 = vsel %vm744_vm3, %v1744_v8, %v1747_v31  ;;  %v2183_v54 = vsel %vm744_vm3, %v2178_v1, %v2182_v21 }
 0x228   : > { %v1853_v0 = vpop.f32.mrf.mxu1  ;;  %4066 = vmatmul.msk.bf16.gmra.mxu3 %vm356_vm2, %v2637_v11  ;;  %v2638_v11 = vshrl.u32 %v5187_v46, 16 }
 0x229   : > { %v3255_v15 = vmax.f32 %v3221_v14, 0.0  ;;  %v2803_v47 = vadd.f32 %v5082_v43, %v2365_v49  ;;  %v1928_v19 = vadd.f32 %v1853_v0, %v5452_v51  ;;  %v2982_v43 = vrot.slane %v5203_v27, 1  ;;  %v5225_v0 = vld [vmem:[%s4373_s28 + $0x78] sm:$0xff] }
 0x22a   : > { %v2188_v8 = vshll.u32 %v5225_v0, 16 }
 0x22b   : > { %v3072_v2 = vpop.f32.mrf.mxu0  ;;  %3290 = vst.msk [vmem:[%s5078_s16 + $0x28] sm:$0xff] %vm3284_vm5, %v3255_v15  ;;  %v3146_v18 = vadd.f32 %v3070_v13, %v2803_v47  ;;  %v5215_v55 = vpop.f32.mrf.mxu3  ;;  %v2983_v40 = vsel %vm2956_vm4, %v2980_v37, %v2982_v43  ;;  %v1749_v47 = vshrl.u32 %v5192_v39, 16  ;;  %v2640_v39 = vor.u32 %v2638_v11, %v2636_v38 }
 0x22d   : > { %v3184_v16 = vmul.f32 %v5058_v28, %v3146_v18  ;;  %v2184_v18 = vshrl.u32 %v5182_v53, 16  ;;  %v1751_v53 = vor.u32 %v1749_v47, %v1747_v31 }
 0x22e   : > { %v2291_v56 = vpop.f32.mrf.mxu2 }
 0x22f   : > { %v3222_v57 = vadd.f32 %v5066_v35, %v3184_v16  ;;  %v2366_v13 = vadd.f32 %v2291_v56, %v1928_v19  ;;  %v2642_v16 = vshll.u32 %v5230_v36, 16 }
 0x230   : > { %v1856_v17 = vpop.f32.mrf.mxu1 }
 0x231   : > { %v3256_v45 = vmax.f32 %v3222_v57, 0.0  ;;  %v2804_v14 = vadd.f32 %v5109_v33, %v2366_v13  ;;  %v1929_v5 = vadd.f32 %v1856_v17, %v5453_v58  ;;  %v5243_v57 = vld [vmem:[%s4373_s28 + $0x78] sm:$0xff]  ;;  %v2644_v13 = vrot.slane %v2642_v16, 1 }
 0x233   : > { %v3075_v49 = vpop.f32.mrf.mxu0  ;;  %3291 = vst.msk [vmem:[%s5078_s16 + $0x30] sm:$0xff] %vm3284_vm5, %v3256_v45  ;;  %v3147_v24 = vadd.f32 %v3072_v2, %v2804_v14  ;;  %3858 = vmatmul.msk.bf16.gmra.mxu1 %vm356_vm2, %v1748_v42  ;;  %3944 = vmatmul.msk.bf16.gmra.mxu2 %vm356_vm2, %v2183_v54  ;;  %v4302_v2 = vld [vmem:[%s4373_s28 + $0x198] sm:$0xff]  ;;  %v5237_v1 = vpop.f32.mrf.mxu3  ;;  %v2186_v54 = vor.u32 %v2184_v18, %v2182_v21  ;;  %v2190_v45 = vrot.slane %v2188_v8, 1  ;;  %v5455_v18 = vld [vmem:[#allocation6_spill] sm:$0xff] }
 0x234   : > { %v1752_v27 = vshll.u32 %v4302_v2, 16  ;;  %v2645_v14 = vsel %vm744_vm3, %v2640_v39, %v2644_v13  ;;  %v2192_v39 = vshrl.u32 %v5225_v0, 16 }
 0x235   : > { %v3185_v50 = vmul.f32 %v5058_v28, %v3147_v24  ;;  %v2191_v58 = vsel %vm744_vm3, %v2186_v54, %v2190_v45 }
 0x236   : > { %4150 = vmatmul.msk.bf16.gmra.mxu0 %vm356_vm2, %v2983_v40  ;;  %v2294_v33 = vpop.f32.mrf.mxu2  ;;  %v1754_v42 = vrot.slane %v1752_v27, 1  ;;  %v5454_v40 = vld [vmem:[#allocation5_spill] sm:$0xff] }
 0x237   : > { %v3223_v37 = vadd.f32 %v5066_v35, %v3185_v50  ;;  %v2367_v15 = vadd.f32 %v2294_v33, %v1929_v5 }
 0x238   : > { %v1858_v20 = vpop.f32.mrf.mxu1  ;;  %4067 = vmatmul.msk.bf16.gmra.mxu3 %vm356_vm2, %v2645_v14  ;;  %v1755_v21 = vsel %vm744_vm3, %v1751_v53, %v1754_v42 }
 0x239   : > { %v3257_v51 = vmax.f32 %v3223_v37, 0.0  ;;  %v2805_v19 = vadd.f32 %v5127_v30, %v2367_v15  ;;  %v1930_v24 = vadd.f32 %v1858_v20, %v5454_v40  ;;  %v2984_v30 = vrot.slane %v5243_v57, 1  ;;  %v5265_v20 = vld [vmem:[%s4373_s28 + $0x80] sm:$0xff] }
 0x23a   : > { %v2646_v40 = vshrl.u32 %v5230_v36, 16 }
 0x23b   : > { %v3077_v56 = vpop.f32.mrf.mxu0  ;;  %3292 = vst.msk [vmem:[%s5078_s16 + $0x38] sm:$0xff] %vm3284_vm5, %v3257_v51  ;;  %v3148_v17 = vadd.f32 %v3075_v49, %v2805_v19  ;;  %v2985_v15 = vsel %vm2956_vm4, %v2982_v43, %v2984_v30  ;;  %v5257_v47 = vpop.f32.mrf.mxu3  ;;  %v1756_v19 = vshrl.u32 %v4302_v2, 16 }
 0x23d   : > { %v3186_v46 = vmul.f32 %v5058_v28, %v3148_v17  ;;  %v2196_v17 = vshll.u32 %v5265_v20, 16 }
 0x23e   : > { %v2296_v38 = vpop.f32.mrf.mxu2 }
 0x23f   : > { %v3224_v50 = vadd.f32 %v5066_v35, %v3186_v46  ;;  %v2368_v49 = vadd.f32 %v2296_v38, %v1930_v24  ;;  %v5275_v46 = vld [vmem:[%s4373_s28 + $0x80] sm:$0xff]  ;;  %v2648_v38 = vor.u32 %v2646_v40, %v2644_v13 }
 0x240   : > { %v1861_v31 = vpop.f32.mrf.mxu1 }
 0x241   : > { %v3258_v5 = vmax.f32 %v3224_v50, 0.0  ;;  %v2806_v33 = vadd.f32 %v5154_v12, %v2368_v49  ;;  %v1931_v8 = vadd.f32 %v1861_v31, %v5455_v18  ;;  %v1758_v50 = vor.u32 %v1756_v19, %v1754_v42 }
 0x242   : > { %v2194_v49 = vor.u32 %v2192_v39, %v2190_v45  ;;  %v2198_v31 = vrot.slane %v2196_v17, 1  ;;  %v4304_v17 = vld [vmem:[%s4373_s28 + $0x1a8] sm:$0xff] }
 0x243   : > { %v3080_v37 = vpop.f32.mrf.mxu0  ;;  %3293 = vst.msk [vmem:[%s5078_s16 + $0x40] sm:$0xff] %vm3284_vm5, %v3258_v5  ;;  %v3149_v27 = vadd.f32 %v3077_v56, %v2806_v33  ;;  %3859 = vmatmul.msk.bf16.gmra.mxu1 %vm356_vm2, %v1755_v21  ;;  %3945 = vmatmul.msk.bf16.gmra.mxu2 %vm356_vm2, %v2191_v58  ;;  %v4303_v56 = vld [vmem:[%s4373_s28 + $0x1a0] sm:$0xff]  ;;  %v5280_v0 = vpop.f32.mrf.mxu3  ;;  %v5456_v58 = vld [vmem:[#allocation7_spill] sm:$0xff]  ;;  %v2986_v5 = vrot.slane %v5275_v46, 1 }
 0x244   : > { %v1759_v57 = vshll.u32 %v4303_v56, 16  ;;  %v1763_v39 = vshrl.u32 %v4303_v56, 16 }
 0x245   : > { %v3187_v12 = vmul.f32 %v5058_v28, %v3149_v27  ;;  %v2987_v18 = vsel %vm2956_vm4, %v2984_v30, %v2986_v5 }
 0x246   : > { %4151 = vmatmul.msk.bf16.gmra.mxu0 %vm356_vm2, %v2985_v15  ;;  %v2299_v43 = vpop.f32.mrf.mxu2  ;;  %v1761_v2 = vrot.slane %v1759_v57, 1 }
 0x247   : > { %v3225_v11 = vadd.f32 %v5066_v35, %v3187_v12  ;;  %v2369_v16 = vadd.f32 %v2299_v43, %v1931_v8  ;;  %v5297_v43 = vld [vmem:[%s4373_s28 + $0x88] sm:$0xff] }
 0x248   : > { %v1863_v51 = vpop.f32.mrf.mxu1  ;;  %4068 = vmatmul.msk.bf16.gmra.mxu3 %vm356_vm2, %v2648_v38  ;;  %v1762_v45 = vsel %vm744_vm3, %v1758_v50, %v1761_v2  ;;  %v4275_v38 = vld [vmem:[%s4373_s28 + $0x88] sm:$0xff]  ;;  %v1765_v50 = vor.u32 %v1763_v39, %v1761_v2 }
 0x249   : > { %v3259_v53 = vmax.f32 %v3225_v11, 0.0  ;;  %v2807_v54 = vadd.f32 %v5172_v26, %v2369_v16  ;;  %v1932_v26 = vadd.f32 %v1863_v51, %v5456_v58 }
 0x24b   : > { %v3082_v14 = vpop.f32.mrf.mxu0  ;;  %3294 = vst.msk [vmem:[%s5078_s16 + $0x48] sm:$0xff] %vm3284_vm5, %v3259_v53  ;;  %v3150_v24 = vadd.f32 %v3080_v37, %v2807_v54  ;;  %v2199_v37 = vsel %vm744_vm3, %v2194_v49, %v2198_v31  ;;  %v5301_v51 = vpop.f32.mrf.mxu3  ;;  %v1766_v53 = vshll.u32 %v4304_v17, 16  ;;  %v2200_v54 = vshrl.u32 %v5265_v20, 16 }
 0x24d   : > { %v3188_v21 = vmul.f32 %v5058_v28, %v3150_v24  ;;  %v1768_v49 = vrot.slane %v1766_v53, 1 }
 0x24e   : > { %v2301_v36 = vpop.f32.mrf.mxu2 }
 0x24f   : > { %v3226_v33 = vadd.f32 %v5066_v35, %v3188_v21  ;;  %v2370_v13 = vadd.f32 %v2301_v36, %v1932_v26  ;;  %v2202_v21 = vor.u32 %v2200_v54, %v2198_v31  ;;  %v2988_v26 = vrot.slane %v4275_v38, 1  ;;  %v5458_v38 = vld [vmem:[#allocation9_spill] sm:$0xff] }
 0x250   : > { %v1866_v42 = vpop.f32.mrf.mxu1 }
 0x251   : > { %v3260_v15 = vmax.f32 %v3226_v33, 0.0  ;;  %v2808_v27 = vadd.f32 %v5197_v60, %v2370_v13  ;;  %v1933_v60 = vadd.f32 %v1866_v42, %v4727_v4  ;;  %v1769_v42 = vsel %vm744_vm3, %v1765_v50, %v1768_v49 }
 0x253   : > { %v3085_v12 = vpop.f32.mrf.mxu0  ;;  %3295 = vst.msk [vmem:[%s5078_s16 + $0x50] sm:$0xff] %vm3284_vm5, %v3260_v15  ;;  %v3151_v8 = vadd.f32 %v3082_v14, %v2808_v27  ;;  %3860 = vmatmul.msk.bf16.gmra.mxu1 %vm356_vm2, %v1762_v45  ;;  %3946 = vmatmul.msk.bf16.gmra.mxu2 %vm356_vm2, %v2199_v37  ;;  %v2204_v14 = vshll.u32 %v5297_v43, 16  ;;  %v5316_v2 = vpop.f32.mrf.mxu3  ;;  %v2989_v27 = vsel %vm2956_vm4, %v2986_v5, %v2988_v26 }
 0x255   : > { %v3189_v11 = vmul.f32 %v5058_v28, %v3151_v8  ;;  %v2206_v58 = vrot.slane %v2204_v14, 1  ;;  %v5457_v8 = vld [vmem:[#allocation8_spill] sm:$0xff] }
 0x256   : > { %4152 = vmatmul.msk.bf16.gmra.mxu0 %vm356_vm2, %v2987_v18  ;;  %v2304_v16 = vpop.f32.mrf.mxu2 }
 0x257   : > { %v3227_v30 = vadd.f32 %v5066_v35, %v3189_v11  ;;  %v2371_v19 = vadd.f32 %v2304_v16, %v1933_v60  ;;  %v2207_v45 = vsel %vm744_vm3, %v2202_v21, %v2206_v58 }
 0x258   : > { %v1868_v57 = vpop.f32.mrf.mxu1 }
 0x259   : > { %v3261_v46 = vmax.f32 %v3227_v30, 0.0  ;;  %v2809_v40 = vadd.f32 %v5215_v55, %v2371_v19  ;;  %v1934_v20 = vadd.f32 %v1868_v57, %v4746_v61 }
 0x25b   : > { %v3087_v24 = vpop.f32.mrf.mxu0  ;;  %3296 = vst.msk [vmem:[%s5078_s16 + $0x58] sm:$0xff] %vm3284_vm5, %v3261_v46  ;;  %v3152_v4 = vadd.f32 %v3085_v12, %v2809_v40  ;;  %v2865_v12 = vld [vmem:[%s4373_s28 + $0x90] sm:$0x1]  ;;  %v2757_v54 = vpop.f32.mrf.mxu3  ;;  %v1770_v46 = vshrl.u32 %v4304_v17, 16  ;;  %v2208_v40 = vshrl.u32 %v5297_v43, 16 }
 0x25c   : > { %v2937_v60 = vunpack.c.l.b16 %v2865_v12 }
 0x25d   : > { %v3190_v56 = vmul.f32 %v5058_v28, %v3152_v4 }
 0x25e   : > { %v2306_v36 = vpop.f32.mrf.mxu2  ;;  %v2955_v53 = vpack.c.b16 %v2937_v60, %v2937_v60 }
 0x25f   : > { %v3228_v33 = vadd.f32 %v5066_v35, %v3190_v56  ;;  %v2372_v55 = vadd.f32 %v2306_v36, %v1934_v20  ;;  %v2210_v36 = vor.u32 %v2208_v40, %v2206_v58 }
 0x260   : > { %v1871_v13 = vpop.f32.mrf.mxu1  ;;  %v2990_v50 = vrot.slane %v2955_v53, 1 }
 0x261   : > { %v3262_v31 = vmax.f32 %v3228_v33, 0.0  ;;  %v2810_v37 = vadd.f32 %v5237_v1, %v2372_v55  ;;  %v1935_v11 = vadd.f32 %v1871_v13, %v5457_v8 }
 0x262   : > { %v2991_v17 = vsel %vm2956_vm4, %v2988_v26, %v2990_v50 }
 0x263   : > { %v3090_v15 = vpop.f32.mrf.mxu0  ;;  %3297 = vst.msk [vmem:[%s5078_s16 + $0x60] sm:$0xff] %vm3284_vm5, %v3262_v31  ;;  %v3153_v61 = vadd.f32 %v3087_v24, %v2810_v37  ;;  %3861 = vmatmul.msk.bf16.gmra.mxu1 %vm356_vm2, %v1769_v42  ;;  %3947 = vmatmul.msk.bf16.gmra.mxu2 %vm356_vm2, %v2207_v45  ;;  %v2759_v45 = vpop.f32.mrf.mxu3 }
 0x265   : > { %v3191_v18 = vmul.f32 %v5058_v28, %v3153_v61 }
 0x266   : > { %4153 = vmatmul.msk.bf16.gmra.mxu0 %vm356_vm2, %v2989_v27  ;;  %v2309_v1 = vpop.f32.mrf.mxu2 }
 0x267   : > { %v3229_v16 = vadd.f32 %v5066_v35, %v3191_v18  ;;  %v2373_v5 = vadd.f32 %v2309_v1, %v1935_v11 }
 0x268   : > { %v1873_v30 = vpop.f32.mrf.mxu1 }
 0x269   : > { %v3263_v19 = vmax.f32 %v3229_v16, 0.0  ;;  %v2811_v57 = vadd.f32 %v5257_v47, %v2373_v5  ;;  %v1936_v4 = vadd.f32 %v1873_v30, %v5458_v38  ;;  %v1772_v47 = vor.u32 %v1770_v46, %v1768_v49 }
 0x26b   : > { %v3092_v39 = vpop.f32.mrf.mxu0  ;;  %3298 = vst.msk [vmem:[%s5078_s16 + $0x68] sm:$0xff] %vm3284_vm5, %v3263_v19  ;;  %v3154_v14 = vadd.f32 %v3090_v15, %v2811_v57  ;;  %v2762_v60 = vpop.f32.mrf.mxu3 }
 0x26d   : > { %v3192_v24 = vmul.f32 %v5058_v28, %v3154_v14 }
 0x26e   : > { %v2311_v21 = vpop.f32.mrf.mxu2 }
 0x26f   : > { %v3230_v56 = vadd.f32 %v5066_v35, %v3192_v24  ;;  %v2374_v20 = vadd.f32 %v2311_v21, %v1936_v4 }
 0x270   : > { %v1876_v33 = vpop.f32.mrf.mxu1 }
 0x271   : > { %v3264_v55 = vmax.f32 %v3230_v56, 0.0  ;;  %v2812_v13 = vadd.f32 %v5280_v0, %v2374_v20  ;;  %v1937_v58 = vadd.f32 %v1876_v33, %v4783_v9 }
 0x273   : > { %v3095_v42 = vpop.f32.mrf.mxu0  ;;  %3299 = vst.msk [vmem:[%s5078_s16 + $0x70] sm:$0xff] %vm3284_vm5, %v3264_v55  ;;  %v3155_v43 = vadd.f32 %v3092_v39, %v2812_v13  ;;  %3862 = vmatmul.msk.bf16.gmra.mxu1 %vm356_vm2, %v1772_v47  ;;  %3948 = vmatmul.msk.bf16.gmra.mxu2 %vm356_vm2, %v2210_v36  ;;  %v2764_v40 = vpop.f32.mrf.mxu3 }
 0x275   : > { %v3193_v49 = vmul.f32 %v5058_v28, %v3155_v43 }
 0x276   : > { %4154 = vmatmul.msk.bf16.gmra.mxu0 %vm356_vm2, %v2991_v17  ;;  %v2314_v31 = vpop.f32.mrf.mxu2 }
 0x277   : > { %v3231_v0 = vadd.f32 %v5066_v35, %v3193_v49  ;;  %v2375_v37 = vadd.f32 %v2314_v31, %v1937_v58 }
 0x278   : > { %v1878_v26 = vpop.f32.mrf.mxu1 }
 0x279   : > { %v3265_v15 = vmax.f32 %v3231_v0, 0.0  ;;  %v2813_v27 = vadd.f32 %v5301_v51, %v2375_v37  ;;  %v1938_v8 = vadd.f32 %v1878_v26, %v4796_v3 }
 0x27b   : > { %v3097_v12 = vpop.f32.mrf.mxu0  ;;  %3300 = vst.msk [vmem:[%s5078_s16 + $0x78] sm:$0xff] %vm3284_vm5, %v3265_v15  ;;  %v3156_v61 = vadd.f32 %v3095_v42, %v2813_v27  ;;  %v2767_v13 = vpop.f32.mrf.mxu3 }
 0x27d   : > { %v3194_v18 = vmul.f32 %v5058_v28, %v3156_v61 }
 0x27e   : > { %v2316_v11 = vpop.f32.mrf.mxu2 }
 0x27f   : > { %v3232_v9 = vadd.f32 %v5066_v35, %v3194_v18  ;;  %v2376_v1 = vadd.f32 %v2316_v11, %v1938_v8 }
 0x280   : > { %v1881_v16 = vpop.f32.mrf.mxu1 }
 0x281   : > { %v3266_v5 = vmax.f32 %v3232_v9, 0.0  ;;  %v2814_v30 = vadd.f32 %v5316_v2, %v2376_v1  ;;  %v1939_v39 = vadd.f32 %v1881_v16, %v4810_v32 }
 0x283   : > { %v3100_v19 = vpop.f32.mrf.mxu0  ;;  %3301 = vst.msk [vmem:[%s5078_s16 + $0x80] sm:$0xff] %vm3284_vm5, %v3266_v5  ;;  %v3157_v51 = vadd.f32 %v3097_v12, %v2814_v30  ;;  %v2769_v26 = vpop.f32.mrf.mxu3 }
 0x285   : > { %v3195_v57 = vmul.f32 %v5058_v28, %v3157_v51 }
 0x286   : > { %v2319_v53 = vpop.f32.mrf.mxu2 }
 0x287   : > { %v3233_v3 = vadd.f32 %v5066_v35, %v3195_v57  ;;  %v2377_v14 = vadd.f32 %v2319_v53, %v1939_v39 }
 0x288   : > { %v1883_v46 = vpop.f32.mrf.mxu1 }
 0x289   : > { %v3267_v24 = vmax.f32 %v3233_v3, 0.0  ;;  %v2815_v38 = vadd.f32 %v2757_v54, %v2377_v14  ;;  %v1940_v21 = vadd.f32 %v1883_v46, %v4823_v29 }
 0x28b   : > { %v3102_v4 = vpop.f32.mrf.mxu0  ;;  %3302 = vst.msk [vmem:[%s5078_s16 + $0x88] sm:$0xff] %vm3284_vm5, %v3267_v24  ;;  %v3158_v2 = vadd.f32 %v3100_v19, %v2815_v38  ;;  %v2772_v30 = vpop.f32.mrf.mxu3 }
 0x28d   : > { %v3196_v50 = vmul.f32 %v5058_v28, %v3158_v2 }
 0x28e   : > { %v2321_v56 = vpop.f32.mrf.mxu2 }
 0x28f   : > { %v3234_v32 = vadd.f32 %v5066_v35, %v3196_v50  ;;  %v2378_v20 = vadd.f32 %v2321_v56, %v1940_v21 }
 0x290   : > { %v1886_v47 = vpop.f32.mrf.mxu1 }
 0x291   : > { %v3268_v36 = vmax.f32 %v3234_v32, 0.0  ;;  %v2816_v33 = vadd.f32 %v2759_v45, %v2378_v20  ;;  %v1941_v17 = vadd.f32 %v1886_v47, %v4835_v25 }
 0x293   : > { %v3105_v55 = vpop.f32.mrf.mxu0  ;;  %3303 = vst.msk [vmem:[%s5078_s16 + $0x90] sm:$0xff] %vm3284_vm5, %v3268_v36  ;;  %v3159_v54 = vadd.f32 %v3102_v4, %v2816_v33  ;;  %v2774_v4 = vpop.f32.mrf.mxu3 }
 0x295   : > { %v3197_v42 = vmul.f32 %v5058_v28, %v3159_v54 }
 0x296   : > { %v2324_v43 = vpop.f32.mrf.mxu2 }
 0x297   : > { %v3235_v29 = vadd.f32 %v5066_v35, %v3197_v42  ;;  %v2379_v49 = vadd.f32 %v2324_v43, %v1941_v17 }
 0x298   : > { %v1888_v58 = vpop.f32.mrf.mxu1 }
 0x299   : > { %v3269_v31 = vmax.f32 %v3235_v29, 0.0  ;;  %v2817_v0 = vadd.f32 %v2762_v60, %v2379_v49  ;;  %v1942_v27 = vadd.f32 %v1888_v58, %v4848_v22 }
 0x29b   : > { %v3107_v37 = vpop.f32.mrf.mxu0  ;;  %3304 = vst.msk [vmem:[%s5078_s16 + $0x98] sm:$0xff] %vm3284_vm5, %v3269_v31  ;;  %v3160_v45 = vadd.f32 %v3105_v55, %v2817_v0  ;;  %v2777_v42 = vpop.f32.mrf.mxu3 }
 0x29d   : > { %v3198_v15 = vmul.f32 %v5058_v28, %v3160_v45 }
 0x29e   : > { %v2326_v12 = vpop.f32.mrf.mxu2 }
 0x29f   : > { %v3236_v25 = vadd.f32 %v5066_v35, %v3198_v15  ;;  %v2380_v61 = vadd.f32 %v2326_v12, %v1942_v27 }
 0x2a0   : > { %v1891_v18 = vpop.f32.mrf.mxu1 }
 0x2a1   : > { %v3270_v8 = vmax.f32 %v3236_v25, 0.0  ;;  %v2818_v11 = vadd.f32 %v2764_v40, %v2380_v61  ;;  %v1943_v16 = vadd.f32 %v1891_v18, %v4865_v52 }
 0x2a3   : > { %v3110_v9 = vpop.f32.mrf.mxu0  ;;  %3305 = vst.msk [vmem:[%s5078_s16 + $0xa0] sm:$0xff] %vm3284_vm5, %v3270_v8  ;;  %v3161_v60 = vadd.f32 %v3107_v37, %v2818_v11  ;;  %v2779_v15 = vpop.f32.mrf.mxu3 }
 0x2a5   : > { %v3199_v1 = vmul.f32 %v5058_v28, %v3161_v60 }
 0x2a6   : > { %v2329_v5 = vpop.f32.mrf.mxu2 }
 0x2a7   : > { %v3237_v22 = vadd.f32 %v5066_v35, %v3199_v1  ;;  %v2381_v19 = vadd.f32 %v2329_v5, %v1943_v16 }
 0x2a8   : > { %v1893_v51 = vpop.f32.mrf.mxu1 }
 0x2a9   : > { %v3271_v57 = vmax.f32 %v3237_v22, 0.0  ;;  %v2819_v39 = vadd.f32 %v2767_v13, %v2381_v19  ;;  %v1944_v46 = vadd.f32 %v1893_v51, %v4879_v59 }
 0x2ab   : > { %v3112_v53 = vpop.f32.mrf.mxu0  ;;  %3306 = vst.msk [vmem:[%s5078_s16 + $0xa8] sm:$0xff] %vm3284_vm5, %v3271_v57  ;;  %v3162_v3 = vadd.f32 %v3110_v9, %v2819_v39 }
 0x2ad   : > { %v3200_v14 = vmul.f32 %v5058_v28, %v3162_v3 }
 0x2ae   : > { %v2331_v40 = vpop.f32.mrf.mxu2 }
 0x2af   : > { %v3238_v52 = vadd.f32 %v5066_v35, %v3200_v14  ;;  %v2382_v24 = vadd.f32 %v2331_v40, %v1944_v46 }
 0x2b0   : > { %v1896_v38 = vpop.f32.mrf.mxu1 }
 0x2b1   : > { %v3272_v2 = vmax.f32 %v3238_v52, 0.0  ;;  %v2820_v50 = vadd.f32 %v2769_v26, %v2382_v24  ;;  %v1945_v20 = vadd.f32 %v1896_v38, %v4897_v6 }
 0x2b3   : > { %v3115_v21 = vpop.f32.mrf.mxu0  ;;  %3307 = vst.msk [vmem:[%s5078_s16 + $0xb0] sm:$0xff] %vm3284_vm5, %v3272_v2  ;;  %v3163_v56 = vadd.f32 %v3112_v53, %v2820_v50 }
 0x2b5   : > { %v3201_v32 = vmul.f32 %v5058_v28, %v3163_v56 }
 0x2b6   : > { %v2334_v47 = vpop.f32.mrf.mxu2 }
 0x2b7   : > { %v3239_v59 = vadd.f32 %v5066_v35, %v3201_v32  ;;  %v2383_v36 = vadd.f32 %v2334_v47, %v1945_v20 }
 0x2b8   : > { %v1898_v33 = vpop.f32.mrf.mxu1 }
 0x2b9   : > { %v3273_v55 = vmax.f32 %v3239_v59, 0.0  ;;  %v2821_v13 = vadd.f32 %v2772_v30, %v2383_v36  ;;  %v1946_v29 = vadd.f32 %v1898_v33, %v4911_v63  ;;  %v2782_v30 = vpop.f32.mrf.mxu3 }
 0x2bb   : > { %v3117_v54 = vpop.f32.mrf.mxu0  ;;  %3308 = vst.msk [vmem:[%s5078_s16 + $0xb8] sm:$0xff] %vm3284_vm5, %v3273_v55  ;;  %v3164_v17 = vadd.f32 %v3115_v21, %v2821_v13 }
 0x2bd   : > { %v3202_v43 = vmul.f32 %v5058_v28, %v3164_v17 }
 0x2be   : > { %v2336_v49 = vpop.f32.mrf.mxu2 }
 0x2bf   : > { %v3240_v6 = vadd.f32 %v5066_v35, %v3202_v43  ;;  %v2384_v58 = vadd.f32 %v2336_v49, %v1946_v29 }
 0x2c0   : > { %v1901_v31 = vpop.f32.mrf.mxu1 }
 0x2c1   : > { %v3274_v0 = vmax.f32 %v3240_v6, 0.0  ;;  %v2822_v37 = vadd.f32 %v2774_v4, %v2384_v58  ;;  %v1947_v12 = vadd.f32 %v1901_v31, %v4928_v23  ;;  %v2784_v24 = vpop.f32.mrf.mxu3 }
 0x2c3   : > { %v3120_v45 = vpop.f32.mrf.mxu0  ;;  %3309 = vst.msk [vmem:[%s5078_s16 + $0xc0] sm:$0xff] %vm3284_vm5, %v3274_v0  ;;  %v3165_v26 = vadd.f32 %v3117_v54, %v2822_v37  ;;  %v4305_v54 = vld [vmem:[%s5440_s2] ss:$0 sm:$0xff] }
 0x2c5   : > { %v3203_v27 = vmul.f32 %v5058_v28, %v3165_v26 }
 0x2c6   : > { %v2339_v25 = vpop.f32.mrf.mxu2 }
 0x2c7   : > { %v3241_v63 = vadd.f32 %v5066_v35, %v3203_v27  ;;  %v2385_v61 = vadd.f32 %v2339_v25, %v1947_v12 }
 0x2c8   : > { %v1903_v18 = vpop.f32.mrf.mxu1 }
 0x2c9   : > { %v3275_v8 = vmax.f32 %v3241_v63, 0.0  ;;  %v2823_v11 = vadd.f32 %v2777_v42, %v2385_v61  ;;  %v1948_v16 = vadd.f32 %v1903_v18, %v4942_v41  ;;  %v2787_v33 = vpop.f32.mrf.mxu3 }
 0x2cb   : > { %v3122_v9 = vpop.f32.mrf.mxu0  ;;  %3310 = vst.msk [vmem:[%s5078_s16 + $0xc8] sm:$0xff] %vm3284_vm5, %v3275_v8  ;;  %v3166_v60 = vadd.f32 %v3120_v45, %v2823_v11 }
 0x2cd   : > { %v3204_v1 = vmul.f32 %v5058_v28, %v3166_v60 }
 0x2ce   : > { %v2341_v5 = vpop.f32.mrf.mxu2 }
 0x2cf   : > { %v3242_v23 = vadd.f32 %v5066_v35, %v3204_v1  ;;  %v2386_v22 = vadd.f32 %v2341_v5, %v1948_v16 }
 0x2d0   : > { %v1906_v19 = vpop.f32.mrf.mxu1 }
 0x2d1   : > { %v3276_v51 = vmax.f32 %v3242_v23, 0.0  ;;  %v2824_v57 = vadd.f32 %v2779_v15, %v2386_v22  ;;  %v1949_v14 = vadd.f32 %v1906_v19, %v4959_v44  ;;  %v2789_v31 = vpop.f32.mrf.mxu3 }
 0x2d3   : > { %v3125_v39 = vpop.f32.mrf.mxu0  ;;  %3311 = vst.msk [vmem:[%s5078_s16 + $0xd0] sm:$0xff] %vm3284_vm5, %v3276_v51  ;;  %v3167_v53 = vadd.f32 %v3122_v9, %v2824_v57 }
 0x2d5   : > { %v3205_v3 = vmul.f32 %v5058_v28, %v3167_v53 }
 0x2d6   : > { %v2344_v46 = vpop.f32.mrf.mxu2 }
 0x2d7   : > { %v3243_v41 = vadd.f32 %v5066_v35, %v3205_v3  ;;  %v2387_v40 = vadd.f32 %v2344_v46, %v1949_v14 }
 0x2d8   : > { %v1908_v52 = vpop.f32.mrf.mxu1 }
 0x2d9   : > { %v3277_v38 = vmax.f32 %v3243_v41, 0.0  ;;  %v2825_v4 = vadd.f32 %v2782_v30, %v2387_v40  ;;  %v1950_v56 = vadd.f32 %v1908_v52, %v4973_v7  ;;  %v2792_v8 = vpop.f32.mrf.mxu3 }
 0x2db   : > { %v3127_v2 = vpop.f32.mrf.mxu0  ;;  %3312 = vst.msk [vmem:[%s5078_s16 + $0xd8] sm:$0xff] %vm3284_vm5, %v3277_v38  ;;  %v3168_v50 = vadd.f32 %v3125_v39, %v2825_v4 }
 0x2dd   : > { %v3206_v21 = vmul.f32 %v5058_v28, %v3168_v50 }
 0x2de   : > { %v2346_v32 = vpop.f32.mrf.mxu2 }
 0x2df   : > { %v3244_v44 = vadd.f32 %v5066_v35, %v3206_v21  ;;  %v2388_v20 = vadd.f32 %v2346_v32, %v1950_v56 }
 0x2e0   : > { %v1911_v47 = vpop.f32.mrf.mxu1 }
 0x2e1   : > { %v3278_v59 = vmax.f32 %v3244_v44, 0.0  ;;  %v2826_v36 = vadd.f32 %v2784_v24, %v2388_v20  ;;  %v1951_v7 = vadd.f32 %v1911_v47, %v4990_v34  ;;  %v4306_v34 = vld [vmem:[%s5441_s3] ss:$0 sm:$0xff] }
 0x2e3   : > { %3313 = vst.msk [vmem:[%s5078_s16 + $0xe0] sm:$0xff] %vm3284_vm5, %v3278_v59  ;;  %v3169_v55 = vadd.f32 %v3127_v2, %v2826_v36  ;;  %v3130_v13 = vpop.f32.mrf.mxu0 }
 0x2e5   : > { %v3207_v28 = vmul.f32 %v4305_v54, %v3169_v55 }
 0x2e6   : > { %v2349_v42 = vpop.f32.mrf.mxu2 }
 0x2e7   : > { %v3245_v17 = vadd.f32 %v5066_v35, %v3207_v28  ;;  %v2389_v43 = vadd.f32 %v2349_v42, %v1951_v7 }
 0x2e8   : > { %v1913_v29 = vpop.f32.mrf.mxu1 }
 0x2e9   : > { %v3279_v49 = vmax.f32 %v3245_v17, 0.0  ;;  %v2827_v6 = vadd.f32 %v2787_v33, %v2389_v43  ;;  %v1952_v37 = vadd.f32 %v1913_v29, %v5004_v62 }
 0x2eb   : > { %3314 = vst.msk [vmem:[%s5078_s16 + $0xe8] sm:$0xff] %vm3284_vm5, %v3279_v49  ;;  %v3170_v58 = vadd.f32 %v3130_v13, %v2827_v6  ;;  %v3132_v45 = vpop.f32.mrf.mxu0 }
 0x2ed   : > { %v3208_v0 = vmul.f32 %v4305_v54, %v3170_v58 }
 0x2ee   : > { %v2351_v26 = vpop.f32.mrf.mxu2 }
 0x2ef   : > { %v3246_v15 = vadd.f32 %v4306_v34, %v3208_v0  ;;  %v2390_v35 = vadd.f32 %v2351_v26, %v1952_v37 }
 0x2f0   : > { %v1916_v27 = vpop.f32.mrf.mxu1 }
 0x2f1   : > { %v3280_v12 = vmax.f32 %v3246_v15, 0.0  ;;  %v2828_v25 = vadd.f32 %v2789_v31, %v2390_v35  ;;  %v1953_v18 = vadd.f32 %v1916_v27, %v5021_v10  ;;  %v2794_v10 = vpop.f32.mrf.mxu3 }
 0x2f3   : > { %3315 = vst.msk [vmem:[%s5078_s16 + $0xf0] sm:$0xff] %vm3284_vm5, %v3280_v12  ;;  %v3171_v63 = vadd.f32 %v3132_v45, %v2828_v25  ;;  %v3135_v60 = vpop.f32.mrf.mxu0 }
 0x2f5   : > { %v3209_v61 = vmul.f32 %v4305_v54, %v3171_v63 }
 0x2f6   : > { %v2354_v62 = vpop.f32.mrf.mxu2 }
 0x2f7   : > { %v3247_v11 = vadd.f32 %v4306_v34, %v3209_v61  ;;  %v2391_v9 = vadd.f32 %v2354_v62, %v1953_v18 }
 0x2f8   : > { %v1918_v5 = vpop.f32.mrf.mxu1 }
 0x2f9   : > { %v3281_v1 = vmax.f32 %v3247_v11, 0.0  ;;  %v2829_v16 = vadd.f32 %v2792_v8, %v2391_v9  ;;  %v1954_v22 = vadd.f32 %v1918_v5, %v5035_v48 }
 0x2fb   : > { %3316 = vst.msk [vmem:[%s5078_s16 + $0xf8] sm:$0xff] %vm3284_vm5, %v3281_v1  ;;  %v3172_v30 = vadd.f32 %v3135_v60, %v2829_v16  ;;  %v3137_v3 = vpop.f32.mrf.mxu0 }
 0x2fd   : > { %v3210_v23 = vmul.f32 %v4305_v54, %v3172_v30 }
 0x2fe   : > { %v2356_v19 = vpop.f32.mrf.mxu2 }
 0x2ff   : > { %v3248_v51 = vadd.f32 %v4306_v34, %v3210_v23  ;;  %v2392_v57 = vadd.f32 %v2356_v19, %v1954_v22 }
 0x301   : > { %v3282_v39 = vmax.f32 %v3248_v51, 0.0  ;;  %v2830_v53 = vadd.f32 %v2794_v10, %v2392_v57 }
 0x303   : > { %3317 = vst.msk [vmem:[%s5078_s16 + $0x100] sm:$0xff] %vm3284_vm5, %v3282_v39  ;;  %v3173_v14 = vadd.f32 %v3137_v3, %v2830_v53 }
 0x305   : > { %v3211_v46 = vmul.f32 %v4305_v54, %v3173_v14 }
 0x307   : > { %v3249_v41 = vadd.f32 %v4306_v34, %v3211_v46 }
 0x309   : > { %v3283_v40 = vmax.f32 %v3249_v41, 0.0 }
 0x30b   : > { %3319 = vst.msk [vmem:[%s5078_s16 + $0x108] sm:$0x7f] %vm3318_vm6, %v3283_v40 }
 0x30c PF: > { %s14_s15 = sadd.s32 1, %s4313_s15  }
 0x30d   : > { %p11_p4 = scmp.ge.s32.totalorder %s14_s15, 4  }
 0x30f   :  { %13 = sbr.rel (!%p11_p4) target bundleno = 1 (0x1), region = 77 }

// kernel: propose_forward.6
= control target key start
LH: loop header
LB: loop body
LE: loop exit
PB: predicated region body
PF: predicated region fallthrough
CT: control target
= control target key end

     0   :  { %s3922_s15 = smov 0   ;;  %s5060_s0 = inlined_call_operand.vmem [shape: bf16[2,1,324,16], index: 0, kind: input, shape index: {}]   ;;  %s5061_s1 = inlined_call_operand.vmem [shape: bf16[9,16,32], index: 1, kind: input, shape index: {}]   ;;  %s5062_s2 = inlined_call_operand.vmem [shape: f32[1,32], index: 2, kind: input, shape index: {}]   ;;  %s5063_s3 = inlined_call_operand.vmem [shape: f32[1,32], index: 3, kind: input, shape index: {}]   ;;  %s5064_s4 = inlined_call_operand.vmem [shape: f32[2,286,32], index: 4, kind: output, shape index: {}]  }
   0x1 LB: > { %s3263_s16 = sadd.s32 4294967295, %s3895_s15   ;;  %p3267_p0 = scmp.ge.s32.totalorder %s3895_s15, 1  ;;  %s3895_s15 = sphi %s3922_s15, %s14_s15  }
   0x2   : > { %p162_p1 = scmp.lt.s32.totalorder %s3895_s15, 3 }
   0x4   : > { %p163_p2 = pnand %p3267_p0, %p162_p1 }
   0x6   : > { %166 = sbr.rel (%p163_p2) target bundleno = 817 (0x331), region = 36 }
   0xb   : > { %v3775_v0 = vld [vmem:[%s5061_s1 + $0x8] sm:$0xff]  ;;  %p188_p3 = scmp.lt.s32.totalorder %s3263_s16, 1  ;;  %v3776_v1 = vld [vmem:[%s5061_s1 + $0x10] sm:$0xff]  ;;  %v3774_v2 = vld [vmem:[%s5061_s1] sm:$0xff]  ;;  %vm331_vm0 = vsmask.f32 7424 }
   0xc   : > { %v3813_v3 = vld [vmem:[%s5061_s1 + $0x20] sm:$0xff]  ;;  %3852 = vmatpush.bf16.msra.mxu1 %v3775_v0  ;;  %3853 = vmatpush.bf16.msra.mxu2 %v3775_v0  ;;  %vm481_vm1 = vcmask 130048   ;;  %v3795_v38 = vld [vmem:[%s5061_s1 + $0x18] sm:$0xff]  ;;  %vm787_vm2 = vcmask 1046528   ;;  %vm1510_vm3 = vsmask.f32 6400 }
   0xd   : > { %s5088_s16 = smov (!%p188_p3, %s3263_s16), 1  ;;  %543 = vmatpush.bf16.msra.mxu0 %v3775_v0  ;;  %3854 = vmatpush.bf16.msra.mxu3 %v3775_v0  ;;  %vm2484_vm4 = vsmask.f32 5376  ;;  %vm1879_vm5 = vcmask 1045504   ;;  %vm2857_vm6 = vcmask 1044480   ;;  %vm3170_vm7 = vcmask 261120  }
   0xe   : > { %s3855_s25 = smul.u32 164, %s5088_s16  ;;  %vm3206_vm8 = vcmask 259072  }
   0xf   : > { %s3856_s17 = smul.u32 288, %s5088_s16 }
  0x10   : > { %890 = vmatpush.bf16.msrb.mxu2 %v3776_v1  ;;  %688 = vmatpush.bf16.msrb.mxu1 %v3774_v2  ;;  %s3948_s28 = scalar_lea.vmem %s5060_s0, %s3855_s25 }
  0x11   : > { %1744 = vmatpush.bf16.msrb.mxu0 %v3813_v3  ;;  %v3951_v4 = vld [vmem:[%s3948_s28 + $0x28] sm:$0xff]  ;;  %v3954_v5 = vld [vmem:[%s3948_s28 + $0x30] sm:$0xff]  ;;  %v3960_v7 = vld [vmem:[%s3948_s28 + $0x58] sm:$0xff]  ;;  %1249 = vmatpush.bf16.msrb.mxu3 %v3795_v38  ;;  %s4716_s21 = scalar_lea.vmem %s5064_s4, %s3856_s17 }
  0x12   : > { %v3957_v6 = vld [vmem:[%s3948_s28 + $0x50] sm:$0xff]  ;;  %v3963_v8 = vld [vmem:[%s3948_s28] sm:$0xff]   ;;  %v3966_v9 = vld [vmem:[%s3948_s28 + $0x8] sm:$0xff]  ;;  %v372_v10 = vshll.u32 %v3951_v4, 16  ;;  %v376_v11 = vshrl.u32 %v3951_v4, 16  ;;  %v380_v12 = vshll.u32 %v3954_v5, 16 }
  0x13   : > { %v412_v13 = vshll.u32 %v3957_v6, 16  ;;  %v416_v14 = vshrl.u32 %v3957_v6, 16  ;;  %v420_v15 = vshll.u32 %v3960_v7, 16  ;;  %v333_v16 = vshrl.u32 %v3963_v8, 16  ;;  %v3984_v27 = vld [vmem:[%s3948_s28 + $0x78] sm:$0xff]  ;;  %v3773_v28 = vld [vmem:[%s3948_s28 + $0x80] sm:$0xff] }
  0x14   : > { %v335_v17 = vshll.u32 %v3963_v8, 16  ;;  %v3976_v18 = vrot.slane %v372_v10, 1  ;;  %v382_v19 = vrot.slane %v380_v12, 1  ;;  %v340_v21 = vshll.u32 %v3966_v9, 16  ;;  %v3993_v33 = vld [vmem:[%s3948_s28 + $0x38] sm:$0xff]  ;;  %v3997_v34 = vld [vmem:[%s3948_s28 + $0x60] sm:$0xff] }
  0x15   : > { %v3978_v20 = vrot.slane %v412_v13, 1  ;;  %v422_v22 = vrot.slane %v420_v15, 1  ;;  %v452_v35 = vshll.u32 %v3984_v27, 16  ;;  %v456_v36 = vshrl.u32 %v3984_v27, 16  ;;  %v4005_v39 = vld [vmem:[%s3948_s28 + $0x10] sm:$0xff]  ;;  %v4019_v54 = vld [vmem:[%s3948_s28 + $0x48] sm:$0xff] }
  0x16   : > { %v337_v23 = vrot.slane %v335_v17, 1  ;;  %v378_v24 = vor.u32 %v376_v11, %v3976_v18  ;;  %v342_v26 = vrot.slane %v340_v21, 1  ;;  %v460_v37 = vshll.u32 %v3773_v28, 16  ;;  %v3843_v57 = vld [vmem:[%s3948_s28 + $0x88] sm:$0xff]   ;;  %v4029_v0 = vld [vmem:[%s3948_s28 + $0x40] sm:$0xff]  ;;  %v4037_v12 = vld [vmem:[%s3948_s28 + $0x18] sm:$0xff] }
  0x17   : > { %v418_v25 = vor.u32 %v416_v14, %v3978_v20  ;;  %v4007_v40 = vrot.slane %v452_v35, 1  ;;  %v384_v42 = vshrl.u32 %v3954_v5, 16  ;;  %v388_v43 = vshll.u32 %v3993_v33, 16  ;;  %v4033_v1 = vld [vmem:[%s3948_s28 + $0x68] sm:$0xff]  ;;  %v4045_v21 = vld [vmem:[%s3948_s28 + $0x20] sm:$0xff] }
  0x18   : > { %v338_v29 = vor.u32 %v337_v23, %v333_v16  ;;  %v383_v30 = vsel %vm331_vm0, %v378_v24, %v382_v19  ;;  %v462_v41 = vrot.slane %v460_v37, 1  ;;  %v424_v44 = vshrl.u32 %v3960_v7, 16 }
  0x19   : > { %v423_v31 = vsel %vm331_vm0, %v418_v25, %v422_v22  ;;  %3345 = vmatmul.msk.bf16.vlgmr.msra.gmra.mxu1 %vm481_vm1, %v383_v30  ;;  %v428_v45 = vshll.u32 %v3997_v34, 16  ;;  %v458_v46 = vor.u32 %v456_v36, %v4007_v40  ;;  %v344_v47 = vshrl.u32 %v3966_v9, 16 }
  0x1a   : > { %3350 = vmatmul.msk.bf16.vlgmr.msra.gmra.mxu2 %vm481_vm1, %v423_v31  ;;  %v343_v32 = vsel %vm331_vm0, %v338_v29, %v342_v26  ;;  %v348_v48 = vshll.u32 %v4005_v39, 16  ;;  %v386_v50 = vor.u32 %v384_v42, %v382_v19  ;;  %v390_v51 = vrot.slane %v388_v43, 1  ;;  %v4063_v43 = vld [vmem:[%s3948_s28 + $0x70] sm:$0xff] }
  0x1b   : > { %3340 = vmatmul.msk.bf16.vlgmr.msra.gmra.mxu0 %vm481_vm1, %v343_v32  ;;  %v463_v49 = vsel %vm331_vm0, %v458_v46, %v462_v41  ;;  %v426_v52 = vor.u32 %v424_v44, %v422_v22  ;;  %v430_v53 = vrot.slane %v428_v45, 1  ;;  %v346_v55 = vor.u32 %v344_v47, %v342_v26 }
  0x1c   : > { %3355 = vmatmul.msk.bf16.vlgmr.msra.gmra.mxu3 %vm481_vm1, %v463_v49  ;;  %v350_v56 = vrot.slane %v348_v48, 1  ;;  %v391_v58 = vsel %vm331_vm0, %v386_v50, %v390_v51  ;;  %v464_v60 = vshrl.u32 %v3773_v28, 16  ;;  %v468_v61 = vshll.u32 %v3843_v57, 16 }
  0x1d   : > { %v431_v59 = vsel %vm331_vm0, %v426_v52, %v430_v53  ;;  %v404_v62 = vshll.u32 %v4019_v54, 16  ;;  %v408_v11 = vshrl.u32 %v4019_v54, 16  ;;  %v392_v14 = vshrl.u32 %v3993_v33, 16 }
  0x1e   : > { %v351_v63 = vsel %vm331_vm0, %v346_v55, %v350_v56  ;;  %v466_v2 = vor.u32 %v464_v60, %v462_v41  ;;  %v470_v3 = vrot.slane %v468_v61, 1  ;;  %v396_v15 = vshll.u32 %v4029_v0, 16  ;;  %v3408_v55 = vld [vmem:[%s3948_s28 + $0x8] sm:$0xe]  ;;  %v3832_v61 = vld [vmem:[%s5061_s1 + $0x30] sm:$0xff] }
  0x1f   : > { %v406_v10 = vrot.slane %v404_v62, 1  ;;  %v432_v16 = vshrl.u32 %v3997_v34, 16  ;;  %v436_v17 = vshll.u32 %v4033_v1, 16  ;;  %v352_v23 = vshrl.u32 %v4005_v39, 16  ;;  %2349 = vmatpush.bf16.msra.mxu2 %v3832_v61  ;;  %v3798_v61 = vld [vmem:[%s3948_s28 + $0x20] sm:$0xff] }
  0x20   : > { %v471_v19 = vsel %vm331_vm0, %v466_v2, %v470_v3  ;;  %v356_v24 = vshll.u32 %v4037_v12, 16  ;;  %v394_v25 = vor.u32 %v392_v14, %v390_v51  ;;  %v398_v26 = vrot.slane %v396_v15, 1  ;;  %v3833_v2 = vld [vmem:[%s5061_s1 + $0x38] sm:$0xff]  ;;  %v1377_v14 = vld [vmem:[%s3948_s28 + $0x8] sm:$0xe] }
  0x21   : > { %v410_v13 = vor.u32 %v408_v11, %v406_v10  ;;  %v434_v28 = vor.u32 %v432_v16, %v430_v53  ;;  %v438_v29 = vrot.slane %v436_v17, 1  ;;  %v364_v30 = vshll.u32 %v4045_v21, 16  ;;  %2722 = vmatpush.bf16.msra.mxu3 %v3833_v2  ;;  %v4097_v15 = vld [vmem:[%s3948_s28 + $0xc] sm:$0xf] }
  0x22   : > { %v354_v31 = vor.u32 %v352_v23, %v350_v56  ;;  %v358_v32 = vrot.slane %v356_v24, 1  ;;  %v399_v35 = vsel %vm331_vm0, %v394_v25, %v398_v26  ;;  %v368_v37 = vshrl.u32 %v4045_v21, 16  ;;  %v3777_v56 = vld [vmem:[%s3948_s28 + $0x8] sm:$0xf0]  ;;  %v3779_v24 = vld [vmem:[%s3948_s28 + $0x18] sm:$0xff]  ;;  %v3796_v25 = vld [vmem:[%s3948_s28 + $0x10] sm:$0xff] }
  0x23   : > { %v4049_v22 = vsel %vm331_vm0, %v410_v13, %v3978_v20  ;;  %v439_v20 = vsel %vm331_vm0, %v434_v28, %v438_v29  ;;  %v366_v36 = vrot.slane %v364_v30, 1  ;;  %v472_v42 = vshrl.u32 %v3843_v57, 16  ;;  %v3848_v28 = vld [vmem:[%s3948_s28] sm:$0xf0]  ;;  %v3849_v30 = vld [vmem:[%s3948_s28] sm:$0xe] }
  0x24   : > { %v359_v38 = vsel %vm331_vm0, %v354_v31, %v358_v32  ;;  %v400_v46 = vshrl.u32 %v4029_v0, 16  ;;  %v440_v47 = vshrl.u32 %v4033_v1, 16  ;;  %v444_v48 = vshll.u32 %v4063_v43, 16 }
  0x25   : > { %v370_v41 = vor.u32 %v368_v37, %v366_v36  ;;  %v474_v45 = vor.u32 %v472_v42, %v470_v3  ;;  %v360_v49 = vshrl.u32 %v4037_v12, 16  ;;  %v3814_v3 = vld [vmem:[%s5061_s1 + $0x28] sm:$0xff]  ;;  %v448_v11 = vshrl.u32 %v4063_v43, 16 }
  0x26   : > { %v402_v50 = vor.u32 %v400_v46, %v398_v26  ;;  %v442_v51 = vor.u32 %v440_v47, %v438_v29  ;;  %v446_v52 = vrot.slane %v444_v48, 1  ;;  %1984 = vmatpush.bf16.msra.mxu1 %v3814_v3  ;;  %v1454_v17 = vunpack.c.l.b16 %v1377_v14  ;;  %v3780_v48 = vld [vmem:[%s3948_s28 + $0x20] sm:$0xff] }
  0x27   : > { %v375_v44 = vsel %vm331_vm0, %v370_v41, %v3976_v18  ;;  %v362_v53 = vor.u32 %v360_v49, %v358_v32  ;;  %v1150_v29 = vrot.slane %v3779_v24, 1  ;;  %v1541_v2 = vshll.u32 %v3798_v61, 16 }
  0x28   : > { %v407_v57 = vsel %vm331_vm0, %v402_v50, %v406_v10  ;;  %v447_v18 = vsel %vm331_vm0, %v442_v51, %v446_v52  ;;  %v3834_v10 = vld [vmem:[%s5061_s1 + $0x40] sm:$0xff]  ;;  %v450_v16 = vor.u32 %v448_v11, %v446_v52  ;;  %v3797_v50 = vld [vmem:[%s3948_s28 + $0x18] sm:$0xff]  ;;  %v1152_v51 = vrot.slane %v3780_v48, 1 }
  0x29   : > { %3346 = vmatmul.msk.bf16.gmra.mxu1 %vm481_vm1, %v391_v58  ;;  %v3778_v58 = vld [vmem:[%s3948_s28 + $0x10] sm:$0xff]  ;;  %v367_v60 = vsel %vm331_vm0, %v362_v53, %v366_v36  ;;  %2962 = vmatpush.bf16.msra.mxu0 %v3834_v10  ;;  %v1529_v52 = vshrl.u32 %v3797_v50, 16  ;;  %v1532_v53 = vshll.u32 %v3797_v50, 16  ;;  %v1543_v11 = vrot.slane %v1541_v2, 2 }
  0x2a   : > { %3351 = vmatmul.msk.bf16.gmra.mxu2 %vm481_vm1, %v431_v59  ;;  %v3409_v59 = vor.u32 %v3777_v56, %v3408_v55  ;;  %v455_v23 = vsel %vm331_vm0, %v450_v16, %v4007_v40  ;;  %v1523_v40 = vshll.u32 %v3796_v25, 16  ;;  %v1153_v55 = vsel %vm787_vm2, %v1150_v29, %v1152_v51 }
  0x2b   : > { %3341 = vmatmul.msk.bf16.gmra.mxu0 %vm481_vm1, %v351_v63  ;;  %v1148_v63 = vrot.slane %v3778_v58, 1  ;;  %v1531_v56 = vrot.slane %v1529_v52, 1 }
  0x2c   : > { %3356 = vmatmul.msk.bf16.gmra.mxu3 %vm481_vm1, %v471_v19  ;;  %v1147_v62 = vrot.slane %v3409_v59, 1  ;;  %v5065_v19 = vunpack.c.l.b16 %v4097_v15 }
  0x2d   : > { %v1151_v36 = vsel %vm787_vm2, %v1148_v63, %v1150_v29 }
  0x2e   : > { %v1149_v13 = vsel %vm787_vm2, %v1147_v62, %v1148_v63  ;;  %v1491_v26 = vpack.c.b16 %v5065_v19, %v1454_v17  ;;  %v1538_v63 = vshrl.u32 %v3798_v61, 16  ;;  %v3782_v17 = vld [vmem:[%s3948_s28 + $0x30] sm:$0xff] }
  0x2f   : > { %v1156_v24 = vrot.slane %v3782_v17, 1 }
  0x30   : > { %v1512_v31 = vshrl.u32 %v1491_v26, 16  ;;  %v1515_v32 = vshll.u32 %v1491_v26, 16  ;;  %v1540_v10 = vrot.slane %v1538_v63, 1 }
  0x32   : > { %v1514_v37 = vrot.slane %v1512_v31, 1  ;;  %v1544_v14 = vor.u32 %v1543_v11, %v1540_v10  ;;  %v795_v31 = vrot.slane %v4045_v21, 1  ;;  %v799_v10 = vrot.slane %v3954_v5, 1 }
  0x39   : > { %3347 = vmatmul.msk.bf16.gmra.mxu1 %vm481_vm1, %v399_v35  ;;  %v1520_v35 = vshrl.u32 %v3796_v25, 16 }
  0x3a   : > { %3352 = vmatmul.msk.bf16.gmra.mxu2 %vm481_vm1, %v439_v20  ;;  %v3850_v20 = vor.u32 %v3849_v30, %v3848_v28 }
  0x3b   : > { %3342 = vmatmul.msk.bf16.gmra.mxu0 %vm481_vm1, %v359_v38  ;;  %v1517_v38 = vrot.slane %v1515_v32, 2  ;;  %v1522_v41 = vrot.slane %v1520_v35, 1 }
  0x3c   : > { %3357 = vmatmul.msk.bf16.gmra.mxu3 %vm481_vm1, %v474_v45  ;;  %v788_v42 = vrot.slane %v3850_v20, 1 }
  0x3d   : > { %v1518_v45 = vor.u32 %v1517_v38, %v1514_v37  ;;  %v3800_v37 = vld [vmem:[%s3948_s28 + $0x30] sm:$0xff] }
  0x49   : > { %3348 = vmatmul.msk.bf16.gmra.mxu1 %vm481_vm1, %v407_v57  ;;  %v1534_v57 = vrot.slane %v1532_v53, 2 }
  0x4a   : > { %3353 = vmatmul.msk.bf16.gmra.mxu2 %vm481_vm1, %v447_v18  ;;  %v791_v18 = vrot.slane %v4005_v39, 1 }
  0x4b   : > { %3343 = vmatmul.msk.bf16.gmra.mxu0 %vm481_vm1, %v367_v60  ;;  %v1535_v58 = vor.u32 %v1534_v57, %v1531_v56  ;;  %v3781_v60 = vld [vmem:[%s3948_s28 + $0x28] sm:$0xff] }
  0x4c   : > { %3482 = vmatmul.msk.bf16.vlgmr.msrb.gmra.mxu3 %vm481_vm1, %v1149_v13  ;;  %v1154_v62 = vrot.slane %v3781_v60, 1  ;;  %v793_v13 = vrot.slane %v4037_v12, 1 }
  0x4e   : > { %v1155_v3 = vsel %vm787_vm2, %v1152_v51, %v1154_v62  ;;  %v794_v16 = vsel %vm787_vm2, %v791_v18, %v793_v13  ;;  %v1157_v28 = vsel %vm787_vm2, %v1154_v62, %v1156_v24 }
  0x59   : > { %3349 = vmatmul.msk.bf16.gmra.mxu1 %vm481_vm1, %v4049_v22  ;;  %v1525_v22 = vrot.slane %v1523_v40, 2  ;;  %v3783_v40 = vld [vmem:[%s3948_s28 + $0x38] sm:$0xff] }
  0x5a   : > { %3354 = vmatmul.msk.bf16.gmra.mxu2 %vm481_vm1, %v455_v23  ;;  %v3799_v23 = vld [vmem:[%s3948_s28 + $0x28] sm:$0xff]  ;;  %v1158_v38 = vrot.slane %v3783_v40, 1 }
  0x5b   : > { %3344 = vmatmul.msk.bf16.gmra.mxu0 %vm481_vm1, %v375_v44  ;;  %v789_v44 = vrot.slane %v3966_v9, 1  ;;  %v1526_v46 = vor.u32 %v1525_v22, %v1522_v41  ;;  %v1547_v25 = vshrl.u32 %v3799_v23, 16  ;;  %v1550_v26 = vshll.u32 %v3799_v23, 16 }
  0x5c   : > { %3483 = vmatmul.msk.bf16.gmra.mxu3 %vm481_vm1, %v1151_v36  ;;  %v1556_v41 = vshrl.u32 %v3800_v37, 16  ;;  %v1559_v22 = vshll.u32 %v3800_v37, 16  ;;  %v801_v37 = vrot.slane %v3993_v33, 1 }
  0x5d   : > { %v790_v47 = vsel %vm787_vm2, %v788_v42, %v789_v44  ;;  %v1527_v49 = vsel %vm1510_vm3, %v1518_v45, %v1526_v46  ;;  %v792_v59 = vsel %vm787_vm2, %v789_v44, %v791_v18  ;;  %v1549_v29 = vrot.slane %v1547_v25, 1  ;;  %v3801_v18 = vld [vmem:[%s3948_s28 + $0x38] sm:$0xff]  ;;  %v3802_v25 = vld [vmem:[%s3948_s28 + $0x40] sm:$0xff] }
  0x5e   : > { %v1552_v30 = vrot.slane %v1550_v26, 2  ;;  %v1159_v45 = vsel %vm787_vm2, %v1156_v24, %v1158_v38  ;;  %v1561_v48 = vrot.slane %v1559_v22, 2  ;;  %v1568_v60 = vshll.u32 %v3801_v18, 16 }
  0x60   : > { %v1553_v32 = vor.u32 %v1552_v30, %v1549_v29  ;;  %v1577_v29 = vshll.u32 %v3802_v25, 16 }
  0x62   : > { %v1554_v36 = vsel %vm1510_vm3, %v1544_v14, %v1553_v32 }
  0x69   : > { %3362 = vmatmul.msk.bf16.vlgmr.msrb.gmra.mxu1 %vm481_vm1, %v3963_v8  ;;  %v1536_v8 = vsel %vm1510_vm3, %v1526_v46, %v1535_v58 }
  0x6a   : > { %3386 = vmatmul.msk.bf16.vlgmr.msrb.gmra.mxu2 %vm481_vm1, %v790_v47  ;;  %v1558_v47 = vrot.slane %v1556_v41, 1 }
  0x6b   : > { %3574 = vmatmul.msk.bf16.vlgmr.msrb.gmra.mxu0 %vm481_vm1, %v1527_v49 }
  0x6c   : > { %3484 = vmatmul.msk.bf16.gmra.mxu3 %vm481_vm1, %v1153_v55  ;;  %v1562_v49 = vor.u32 %v1561_v48, %v1558_v47  ;;  %v3784_v55 = vld [vmem:[%s3948_s28 + $0x40] sm:$0xff]  ;;  %v802_v47 = vsel %vm787_vm2, %v799_v10, %v801_v37  ;;  %v3786_v48 = vld [vmem:[%s3948_s28 + $0x50] sm:$0xff] }
  0x6e   : > { %v1563_v57 = vsel %vm1510_vm3, %v1553_v32, %v1562_v49 }
  0x79   : > { %3363 = vmatmul.msk.bf16.gmra.mxu1 %vm481_vm1, %v3966_v9  ;;  %v1545_v9 = vsel %vm1510_vm3, %v1535_v58, %v1544_v14  ;;  %v1160_v58 = vrot.slane %v3784_v55, 1  ;;  %v1164_v55 = vrot.slane %v3786_v48, 1 }
  0x7a   : > { %3387 = vmatmul.msk.bf16.gmra.mxu2 %vm481_vm1, %v792_v59  ;;  %v1565_v59 = vshrl.u32 %v3801_v18, 16 }
  0x7b   : > { %3575 = vmatmul.msk.bf16.gmra.mxu0 %vm481_vm1, %v1536_v8  ;;  %v1161_v63 = vsel %vm787_vm2, %v1158_v38, %v1160_v58 }
  0x7c   : > { %3485 = vmatmul.msk.bf16.gmra.mxu3 %vm481_vm1, %v1155_v3  ;;  %v1570_v3 = vrot.slane %v1568_v60, 2 }
  0x89   : > { %3364 = vmatmul.msk.bf16.gmra.mxu1 %vm481_vm1, %v4005_v39  ;;  %v796_v39 = vsel %vm787_vm2, %v793_v13, %v795_v31 }
  0x8a   : > { %3388 = vmatmul.msk.bf16.gmra.mxu2 %vm481_vm1, %v794_v16 }
  0x8b   : > { %3576 = vmatmul.msk.bf16.gmra.mxu0 %vm481_vm1, %v1545_v9  ;;  %v3785_v9 = vld [vmem:[%s3948_s28 + $0x48] sm:$0xff] }
  0x8c   : > { %3486 = vmatmul.msk.bf16.gmra.mxu3 %vm481_vm1, %v1157_v28  ;;  %v1162_v26 = vrot.slane %v3785_v9, 1  ;;  %v1574_v28 = vshrl.u32 %v3802_v25, 16 }
  0x96   : > { %v4149_v35 = vpop.f32.mrf.mxu1 }
  0x98   : > { %v4153_v20 = vpop.f32.mrf.mxu0 }
  0x99   : > { %3365 = vmatmul.msk.bf16.gmra.mxu1 %vm481_vm1, %v4037_v12  ;;  %v797_v12 = vrot.slane %v3951_v4, 1 }
  0x9a   : > { %3389 = vmatmul.msk.bf16.gmra.mxu2 %vm481_vm1, %v796_v39  ;;  %v1163_v39 = vsel %vm787_vm2, %v1160_v58, %v1162_v26 }
  0x9b   : > { %3577 = vmatmul.msk.bf16.gmra.mxu0 %vm481_vm1, %v1554_v36  ;;  %v798_v53 = vsel %vm787_vm2, %v795_v31, %v797_v12  ;;  %v800_v17 = vsel %vm787_vm2, %v797_v12, %v799_v10  ;;  %v1579_v36 = vrot.slane %v1577_v29, 2  ;;  %v803_v10 = vrot.slane %v4029_v0, 1 }
  0x9c   : > { %3487 = vmatmul.msk.bf16.gmra.mxu3 %vm481_vm1, %v1159_v45 }
  0x9d   : > { %v4161_v42 = vpop.f32.mrf.mxu2  ;;  %v804_v25 = vsel %vm787_vm2, %v801_v37, %v803_v10 }
  0x9e   : > { %v4163_v44 = vpop.f32.mrf.mxu1 }
  0x9f   : > { %v4172_v51 = vpop.f32.mrf.mxu3 }
  0xa0   : > { %v4166_v46 = vpop.f32.mrf.mxu0  ;;  %5067 = vst [vmem:[#allocation2_spill] sm:$0xff] %v4172_v51  ;;  %v3806_v51 = vld [vmem:[%s3948_s28 + $0x60] sm:$0xff] }
  0xa5   : > { %v4170_v50 = vpop.f32.mrf.mxu2 }
  0xa6   : > { %v4174_v52 = vpop.f32.mrf.mxu1 }
  0xa7   : > { %v4188_v61 = vpop.f32.mrf.mxu3 }
  0xa8   : > { %v4178_v56 = vpop.f32.mrf.mxu0  ;;  %5068 = vst [vmem:[#allocation3_spill] sm:$0xff] %v4188_v61 }
  0xa9   : > { %3366 = vmatmul.msk.bf16.gmra.mxu1 %vm481_vm1, %v4045_v21  ;;  %v1567_v21 = vrot.slane %v1565_v59, 1 }
  0xaa   : > { %3390 = vmatmul.msk.bf16.gmra.mxu2 %vm481_vm1, %v798_v53  ;;  %v3803_v53 = vld [vmem:[%s3948_s28 + $0x48] sm:$0xff] }
  0xab   : > { %3578 = vmatmul.msk.bf16.gmra.mxu0 %vm481_vm1, %v1563_v57  ;;  %v1571_v11 = vor.u32 %v1570_v3, %v1567_v21  ;;  %v1583_v57 = vshrl.u32 %v3803_v53, 16  ;;  %v1586_v18 = vshll.u32 %v3803_v53, 16 }
  0xac   : > { %3488 = vmatmul.msk.bf16.gmra.mxu3 %vm481_vm1, %v1161_v63  ;;  %v1165_v63 = vsel %vm787_vm2, %v1162_v26, %v1164_v55 }
  0xad   : > { %v4186_v8 = vpop.f32.mrf.mxu2  ;;  %v1572_v24 = vsel %vm1510_vm3, %v1562_v49, %v1571_v11  ;;  %v1588_v3 = vrot.slane %v1586_v18, 2  ;;  %v805_v18 = vrot.slane %v4019_v54, 1 }
  0xae   : > { %v4190_v62 = vpop.f32.mrf.mxu1 }
  0xaf   : > { %v4199_v14 = vpop.f32.mrf.mxu3 }
  0xb0   : > { %v4193_v2 = vpop.f32.mrf.mxu0  ;;  %5069 = vst [vmem:[#allocation4_spill] sm:$0xff] %v4199_v14 }
  0xb5   : > { %v4197_v13 = vpop.f32.mrf.mxu2 }
  0xb6   : > { %v4201_v16 = vpop.f32.mrf.mxu1 }
  0xb7   : > { %v4215_v31 = vpop.f32.mrf.mxu3 }
  0xb8   : > { %v4205_v23 = vpop.f32.mrf.mxu0  ;;  %5070 = vst [vmem:[#allocation5_spill] sm:$0xff] %v4215_v31 }
  0xb9   : > { %3367 = vmatmul.msk.bf16.gmra.mxu1 %vm481_vm1, %v3951_v4  ;;  %v1576_v4 = vrot.slane %v1574_v28, 1  ;;  %v3787_v28 = vld [vmem:[%s3948_s28 + $0x58] sm:$0xff] }
  0xba   : > { %3391 = vmatmul.msk.bf16.gmra.mxu2 %vm481_vm1, %v800_v17 }
  0xbb   : > { %3579 = vmatmul.msk.bf16.gmra.mxu0 %vm481_vm1, %v1572_v24  ;;  %v1580_v38 = vor.u32 %v1579_v36, %v1576_v4  ;;  %v1166_v4 = vrot.slane %v3787_v28, 1  ;;  %v806_v28 = vsel %vm787_vm2, %v803_v10, %v805_v18 }
  0xbc   : > { %3489 = vmatmul.msk.bf16.gmra.mxu3 %vm481_vm1, %v1163_v39  ;;  %v3804_v39 = vld [vmem:[%s3948_s28 + $0x50] sm:$0xff] }
  0xbd   : > { %v4213_v30 = vpop.f32.mrf.mxu2  ;;  %v1581_v49 = vsel %vm1510_vm3, %v1571_v11, %v1580_v38  ;;  %v1592_v36 = vshrl.u32 %v3804_v39, 16 }
  0xbe   : > { %v4217_v32 = vpop.f32.mrf.mxu1 }
  0xbf   : > { %v4226_v22 = vpop.f32.mrf.mxu3 }
  0xc0   : > { %v4220_v40 = vpop.f32.mrf.mxu0  ;;  %5071 = vst [vmem:[#allocation6_spill] sm:$0xff] %v4226_v22 }
  0xc5   : > { %v4224_v41 = vpop.f32.mrf.mxu2 }
  0xc6   : > { %v4228_v45 = vpop.f32.mrf.mxu1 }
  0xc7   : > { %v4242_v59 = vpop.f32.mrf.mxu3 }
  0xc8   : > { %v4232_v12 = vpop.f32.mrf.mxu0  ;;  %5072 = vst [vmem:[#allocation7_spill] sm:$0xff] %v4242_v59 }
  0xc9   : > { %3368 = vmatmul.msk.bf16.gmra.mxu1 %vm481_vm1, %v3954_v5  ;;  %v1585_v5 = vrot.slane %v1583_v57, 1  ;;  %v1594_v57 = vrot.slane %v1592_v36, 1 }
  0xca   : > { %3392 = vmatmul.msk.bf16.gmra.mxu2 %vm481_vm1, %v802_v47  ;;  %v1595_v47 = vshll.u32 %v3804_v39, 16 }
  0xcb   : > { %3580 = vmatmul.msk.bf16.gmra.mxu0 %vm481_vm1, %v1581_v49  ;;  %v1589_v11 = vor.u32 %v1588_v3, %v1585_v5 }
  0xcc   : > { %3490 = vmatmul.msk.bf16.gmra.mxu3 %vm481_vm1, %v1165_v63 }
  0xcd   : > { %v4240_v58 = vpop.f32.mrf.mxu2  ;;  %v1590_v26 = vsel %vm1510_vm3, %v1580_v38, %v1589_v11  ;;  %v1167_v38 = vsel %vm787_vm2, %v1164_v55, %v1166_v4  ;;  %v3805_v55 = vld [vmem:[%s3948_s28 + $0x58] sm:$0xff] }
  0xce   : > { %v4244_v60 = vpop.f32.mrf.mxu1 }
  0xcf   : > { %v1251_v9 = vpop.f32.mrf.mxu3 }
  0xd0   : > { %v4247_v21 = vpop.f32.mrf.mxu0 }
  0xd5   : > { %v4251_v17 = vpop.f32.mrf.mxu2 }
  0xd6   : > { %v4253_v24 = vpop.f32.mrf.mxu1 }
  0xd7   : > { %v1253_v37 = vpop.f32.mrf.mxu3 }
  0xd8   : > { %v4257_v29 = vpop.f32.mrf.mxu0 }
  0xd9   : > { %3369 = vmatmul.msk.bf16.gmra.mxu1 %vm481_vm1, %v3993_v33  ;;  %v1597_v33 = vrot.slane %v1595_v47, 2 }
  0xda   : > { %3393 = vmatmul.msk.bf16.gmra.mxu2 %vm481_vm1, %v804_v25 }
  0xdb   : > { %3581 = vmatmul.msk.bf16.gmra.mxu0 %vm481_vm1, %v1590_v26  ;;  %v1598_v63 = vor.u32 %v1597_v33, %v1594_v57  ;;  %v3788_v26 = vld [vmem:[%s3948_s28 + $0x60] sm:$0xff]  ;;  %v1604_v57 = vshll.u32 %v3805_v55, 16 }
  0xdc   : > { %3491 = vmatmul.msk.bf16.gmra.mxu3 %vm481_vm1, %v1167_v38  ;;  %v1168_v36 = vrot.slane %v3788_v26, 1  ;;  %v1601_v38 = vshrl.u32 %v3805_v55, 16 }
  0xdd   : > { %v4265_v48 = vpop.f32.mrf.mxu2  ;;  %v1599_v19 = vsel %vm1510_vm3, %v1589_v11, %v1598_v63 }
  0xde   : > { %v4267_v49 = vpop.f32.mrf.mxu1  ;;  %v1169_v11 = vsel %vm787_vm2, %v1166_v4, %v1168_v36  ;;  %v1603_v61 = vrot.slane %v1601_v38, 1 }
  0xdf   : > { %v1256_v3 = vpop.f32.mrf.mxu3 }
  0xe0   : > { %v4270_v53 = vpop.f32.mrf.mxu0 }
  0xe5   : > { %v4274_v5 = vpop.f32.mrf.mxu2 }
  0xe6   : > { %v690_v25 = vpop.f32.mrf.mxu1 }
  0xe7   : > { %v691_v47 = vadd.f32 %v690_v25, %v4153_v20  ;;  %v1258_v59 = vpop.f32.mrf.mxu3  ;;  %v807_v20 = vrot.slane %v3957_v6, 1 }
  0xe8   : > { %v1746_v39 = vpop.f32.mrf.mxu0 }
  0xe9   : > { %3370 = vmatmul.msk.bf16.gmra.mxu1 %vm481_vm1, %v4029_v0  ;;  %v1606_v0 = vrot.slane %v1604_v57, 2  ;;  %v808_v4 = vsel %vm787_vm2, %v805_v18, %v807_v20  ;;  %v1613_v18 = vshll.u32 %v3806_v51, 16 }
  0xea   : > { %3394 = vmatmul.msk.bf16.gmra.mxu2 %vm481_vm1, %v806_v28 }
  0xeb   : > { %3582 = vmatmul.msk.bf16.gmra.mxu0 %vm481_vm1, %v1599_v19  ;;  %v1607_v28 = vor.u32 %v1606_v0, %v1603_v61 }
  0xec   : > { %3492 = vmatmul.msk.bf16.gmra.mxu3 %vm481_vm1, %v1169_v11 }
  0xed   : > { %v892_v33 = vpop.f32.mrf.mxu2  ;;  %v1608_v57 = vsel %vm1510_vm3, %v1598_v63, %v1607_v28 }
  0xee   : > { %v982_v10 = vadd.f32 %v892_v33, %v691_v47  ;;  %v692_v22 = vpop.f32.mrf.mxu1 }
  0xef   : > { %v693_v25 = vadd.f32 %v692_v22, %v4166_v46  ;;  %v1261_v55 = vpop.f32.mrf.mxu3  ;;  %v1610_v22 = vshrl.u32 %v3806_v51, 16 }
  0xf0   : > { %v1341_v31 = vadd.f32 %v1251_v9, %v982_v10  ;;  %v1748_v14 = vpop.f32.mrf.mxu0  ;;  %v3789_v9 = vld [vmem:[%s3948_s28 + $0x68] sm:$0xff] }
  0xf1   : > { %v1170_v46 = vrot.slane %v3789_v9, 1 }
  0xf2   : > { %v4287_v19 = vadd.f32 %v1746_v39, %v1341_v31 }
  0xf3   : > { %v1171_v63 = vsel %vm787_vm2, %v1168_v36, %v1170_v46 }
  0xf5   : > { %v894_v26 = vpop.f32.mrf.mxu2 }
  0xf6   : > { %v983_v47 = vadd.f32 %v894_v26, %v693_v25  ;;  %v695_v33 = vpop.f32.mrf.mxu1  ;;  %v1612_v26 = vrot.slane %v1610_v22, 1 }
  0xf7   : > { %v696_v61 = vadd.f32 %v695_v33, %v4178_v56  ;;  %v809_v56 = vrot.slane %v3960_v7, 1 }
  0xf8   : > { %v1342_v10 = vadd.f32 %v1253_v37, %v983_v47  ;;  %v1751_v38 = vpop.f32.mrf.mxu0  ;;  %v1263_v37 = vpop.f32.mrf.mxu3 }
  0xf9   : > { %3371 = vmatmul.msk.bf16.gmra.mxu1 %vm481_vm1, %v4019_v54  ;;  %v810_v36 = vsel %vm787_vm2, %v807_v20, %v809_v56 }
  0xfa   : > { %3395 = vmatmul.msk.bf16.gmra.mxu2 %vm481_vm1, %v808_v4  ;;  %v4298_v31 = vadd.f32 %v1748_v14, %v1342_v10  ;;  %v1615_v14 = vrot.slane %v1613_v18, 2 }
  0xfb   : > { %3583 = vmatmul.msk.bf16.gmra.mxu0 %vm481_vm1, %v1608_v57 }
  0xfc   : > { %3493 = vmatmul.msk.bf16.gmra.mxu3 %vm481_vm1, %v1171_v63  ;;  %v1616_v33 = vor.u32 %v1615_v14, %v1612_v26 }
  0xfd   : > { %v897_v39 = vpop.f32.mrf.mxu2 }
  0xfe   : > { %v984_v11 = vadd.f32 %v897_v39, %v696_v61  ;;  %v697_v0 = vpop.f32.mrf.mxu1  ;;  %v1617_v18 = vsel %vm1510_vm3, %v1607_v28, %v1616_v33  ;;  %v3807_v39 = vld [vmem:[%s3948_s28 + $0x68] sm:$0xff] }
  0xff   : > { %v698_v51 = vadd.f32 %v697_v0, %v4193_v2  ;;  %v1619_v0 = vshrl.u32 %v3807_v39, 16  ;;  %v1622_v20 = vshll.u32 %v3807_v39, 16 }
 0x100   : > { %v1343_v25 = vadd.f32 %v1256_v3, %v984_v11  ;;  %v1753_v54 = vpop.f32.mrf.mxu0  ;;  %v1266_v9 = vpop.f32.mrf.mxu3  ;;  %v3790_v3 = vld [vmem:[%s3948_s28 + $0x70] sm:$0xff] }
 0x101   : > { %v1172_v2 = vrot.slane %v3790_v3, 1 }
 0x102   : > { %v4304_v47 = vadd.f32 %v1751_v38, %v1343_v25 }
 0x103   : > { %v1173_v28 = vsel %vm787_vm2, %v1170_v46, %v1172_v2 }
 0x105   : > { %v899_v4 = vpop.f32.mrf.mxu2 }
 0x106   : > { %v985_v10 = vadd.f32 %v899_v4, %v698_v51  ;;  %v700_v57 = vpop.f32.mrf.mxu1  ;;  %v1621_v51 = vrot.slane %v1619_v0, 1 }
 0x107   : > { %v701_v11 = vadd.f32 %v700_v57, %v4205_v23  ;;  %v811_v23 = vrot.slane %v3997_v34, 1 }
 0x108   : > { %v1344_v61 = vadd.f32 %v1258_v59, %v985_v10  ;;  %v1756_v22 = vpop.f32.mrf.mxu0  ;;  %v1268_v59 = vpop.f32.mrf.mxu3 }
 0x109   : > { %3372 = vmatmul.msk.bf16.gmra.mxu1 %vm481_vm1, %v3957_v6  ;;  %v812_v46 = vsel %vm787_vm2, %v809_v56, %v811_v23 }
 0x10a   : > { %3396 = vmatmul.msk.bf16.gmra.mxu2 %vm481_vm1, %v810_v36  ;;  %v4315_v38 = vadd.f32 %v1753_v54, %v1344_v61  ;;  %v1624_v54 = vrot.slane %v1622_v20, 2  ;;  %v3808_v20 = vld [vmem:[%s3948_s28 + $0x70] sm:$0xff] }
 0x10b   : > { %3584 = vmatmul.msk.bf16.gmra.mxu0 %vm481_vm1, %v1617_v18  ;;  %v1631_v56 = vshll.u32 %v3808_v20, 16 }
 0x10c   : > { %3494 = vmatmul.msk.bf16.gmra.mxu3 %vm481_vm1, %v1173_v28  ;;  %v1625_v57 = vor.u32 %v1624_v54, %v1621_v51 }
 0x10d   : > { %v902_v63 = vpop.f32.mrf.mxu2 }
 0x10e   : > { %v986_v25 = vadd.f32 %v902_v63, %v701_v11  ;;  %v702_v26 = vpop.f32.mrf.mxu1  ;;  %v1626_v0 = vsel %vm1510_vm3, %v1616_v33, %v1625_v57 }
 0x10f   : > { %v703_v10 = vadd.f32 %v702_v26, %v4220_v40 }
 0x110   : > { %v1345_v14 = vadd.f32 %v1261_v55, %v986_v25  ;;  %v1758_v6 = vpop.f32.mrf.mxu0  ;;  %v1271_v3 = vpop.f32.mrf.mxu3  ;;  %v3791_v55 = vld [vmem:[%s3948_s28 + $0x78] sm:$0xff]  ;;  %v1628_v25 = vshrl.u32 %v3808_v20, 16 }
 0x111   : > { %v1174_v40 = vrot.slane %v3791_v55, 1 }
 0x112   : > { %v4321_v4 = vadd.f32 %v1756_v22, %v1345_v14  ;;  %v1630_v54 = vrot.slane %v1628_v25, 1  ;;  %v3809_v25 = vld [vmem:[%s3948_s28 + $0x78] sm:$0xff] }
 0x113   : > { %v1175_v33 = vsel %vm787_vm2, %v1172_v2, %v1174_v40 }
 0x115   : > { %v904_v36 = vpop.f32.mrf.mxu2 }
 0x116   : > { %v987_v61 = vadd.f32 %v904_v36, %v703_v10  ;;  %v705_v18 = vpop.f32.mrf.mxu1 }
 0x117   : > { %v706_v63 = vadd.f32 %v705_v18, %v4232_v12  ;;  %v813_v12 = vrot.slane %v4033_v1, 1 }
 0x118   : > { %v1346_v39 = vadd.f32 %v1263_v37, %v987_v61  ;;  %v1761_v11 = vpop.f32.mrf.mxu0  ;;  %v1273_v37 = vpop.f32.mrf.mxu3 }
 0x119   : > { %3373 = vmatmul.msk.bf16.gmra.mxu1 %vm481_vm1, %v3960_v7  ;;  %v814_v2 = vsel %vm787_vm2, %v811_v23, %v813_v12  ;;  %v1640_v23 = vshll.u32 %v3809_v25, 16 }
 0x11a   : > { %3397 = vmatmul.msk.bf16.gmra.mxu2 %vm481_vm1, %v812_v46  ;;  %v4332_v22 = vadd.f32 %v1758_v6, %v1346_v39  ;;  %v1633_v6 = vrot.slane %v1631_v56, 2 }
 0x11b   : > { %3585 = vmatmul.msk.bf16.gmra.mxu0 %vm481_vm1, %v1626_v0 }
 0x11c   : > { %3495 = vmatmul.msk.bf16.gmra.mxu3 %vm481_vm1, %v1175_v33  ;;  %v1634_v61 = vor.u32 %v1633_v6, %v1630_v54 }
 0x11d   : > { %v907_v26 = vpop.f32.mrf.mxu2 }
 0x11e   : > { %v988_v28 = vadd.f32 %v907_v26, %v706_v63  ;;  %v707_v14 = vpop.f32.mrf.mxu1  ;;  %v1635_v63 = vsel %vm1510_vm3, %v1625_v57, %v1634_v61  ;;  %v1637_v26 = vshrl.u32 %v3809_v25, 16 }
 0x11f   : > { %v708_v36 = vadd.f32 %v707_v14, %v4247_v21 }
 0x120   : > { %v1347_v51 = vadd.f32 %v1266_v9, %v988_v28  ;;  %v1763_v7 = vpop.f32.mrf.mxu0  ;;  %v1276_v46 = vpop.f32.mrf.mxu3  ;;  %v3792_v9 = vld [vmem:[%s3948_s28 + $0x80] sm:$0xff]  ;;  %v1639_v54 = vrot.slane %v1637_v26, 1 }
 0x121   : > { %v1176_v21 = vrot.slane %v3792_v9, 1 }
 0x122   : > { %v4338_v10 = vadd.f32 %v1761_v11, %v1347_v51 }
 0x123   : > { %v1177_v57 = vsel %vm787_vm2, %v1174_v40, %v1176_v21 }
 0x125   : > { %v909_v18 = vpop.f32.mrf.mxu2 }
 0x126   : > { %v989_v55 = vadd.f32 %v909_v18, %v708_v36  ;;  %v710_v39 = vpop.f32.mrf.mxu1 }
 0x127   : > { %v711_v56 = vadd.f32 %v710_v39, %v4257_v29  ;;  %v815_v29 = vrot.slane %v4063_v43, 1 }
 0x128   : > { %v1348_v0 = vadd.f32 %v1268_v59, %v989_v55  ;;  %v1766_v20 = vpop.f32.mrf.mxu0  ;;  %v1278_v59 = vpop.f32.mrf.mxu3 }
 0x129   : > { %3374 = vmatmul.msk.bf16.gmra.mxu1 %vm481_vm1, %v3997_v34  ;;  %v816_v40 = vsel %vm787_vm2, %v813_v12, %v815_v29 }
 0x12a   : > { %3398 = vmatmul.msk.bf16.gmra.mxu2 %vm481_vm1, %v814_v2  ;;  %v4349_v11 = vadd.f32 %v1763_v7, %v1348_v0  ;;  %v1642_v7 = vrot.slane %v1640_v23, 2 }
 0x12b   : > { %3586 = vmatmul.msk.bf16.gmra.mxu0 %vm481_vm1, %v1635_v63 }
 0x12c   : > { %3496 = vmatmul.msk.bf16.gmra.mxu3 %vm481_vm1, %v1177_v57  ;;  %v1643_v18 = vor.u32 %v1642_v7, %v1639_v54 }
 0x12d   : > { %v912_v28 = vpop.f32.mrf.mxu2 }
 0x12e   : > { %v990_v14 = vadd.f32 %v912_v28, %v711_v56  ;;  %v712_v33 = vpop.f32.mrf.mxu1  ;;  %v1644_v25 = vsel %vm1510_vm3, %v1634_v61, %v1643_v18  ;;  %v3810_v56 = vld [vmem:[%s3948_s28 + $0x80] sm:$0xff] }
 0x12f   : > { %v713_v36 = vadd.f32 %v712_v33, %v4270_v53  ;;  %v1646_v23 = vshrl.u32 %v3810_v56, 16  ;;  %v1649_v12 = vshll.u32 %v3810_v56, 16  ;;  %v3811_v56 = vld [vmem:[%s3948_s28 + $0x88] sm:$0xff] }
 0x130   : > { %v1349_v51 = vadd.f32 %v1271_v3, %v990_v14  ;;  %v1768_v34 = vpop.f32.mrf.mxu0  ;;  %v1281_v39 = vpop.f32.mrf.mxu3  ;;  %v3793_v3 = vld [vmem:[%s3948_s28 + $0x88] sm:$0xff] }
 0x131   : > { %v1178_v53 = vrot.slane %v3793_v3, 1 }
 0x132   : > { %v4355_v6 = vadd.f32 %v1766_v20, %v1349_v51  ;;  %v1648_v51 = vrot.slane %v1646_v23, 1 }
 0x133   : > { %v1179_v61 = vsel %vm787_vm2, %v1176_v21, %v1178_v53 }
 0x135   : > { %v914_v55 = vpop.f32.mrf.mxu2 }
 0x136   : > { %v991_v2 = vadd.f32 %v914_v55, %v713_v36  ;;  %v715_v9 = vpop.f32.mrf.mxu1 }
 0x137   : > { %v716_v26 = vadd.f32 %v715_v9, %v4149_v35  ;;  %v817_v35 = vrot.slane %v3984_v27, 1 }
 0x138   : > { %v1350_v0 = vadd.f32 %v1273_v37, %v991_v2  ;;  %v1771_v63 = vpop.f32.mrf.mxu0  ;;  %v1283_v37 = vpop.f32.mrf.mxu3 }
 0x139   : > { %3375 = vmatmul.msk.bf16.gmra.mxu1 %vm481_vm1, %v4033_v1  ;;  %v818_v21 = vsel %vm787_vm2, %v815_v29, %v817_v35  ;;  %v1655_v29 = vshrl.u32 %v3811_v56, 16 }
 0x13a   : > { %3399 = vmatmul.msk.bf16.gmra.mxu2 %vm481_vm1, %v816_v40  ;;  %v4366_v20 = vadd.f32 %v1768_v34, %v1350_v0  ;;  %v1651_v34 = vrot.slane %v1649_v12, 2 }
 0x13b   : > { %3587 = vmatmul.msk.bf16.gmra.mxu0 %vm481_vm1, %v1644_v25 }
 0x13c   : > { %3497 = vmatmul.msk.bf16.gmra.mxu3 %vm481_vm1, %v1179_v61  ;;  %v1652_v36 = vor.u32 %v1651_v34, %v1648_v51 }
 0x13d   : > { %v917_v28 = vpop.f32.mrf.mxu2 }
 0x13e   : > { %v992_v14 = vadd.f32 %v917_v28, %v716_v26  ;;  %v717_v33 = vpop.f32.mrf.mxu1  ;;  %v1653_v25 = vsel %vm1510_vm3, %v1643_v18, %v1652_v36  ;;  %v1658_v26 = vshll.u32 %v3811_v56, 16  ;;  %v3868_v56 = vld [vmem:[%s3948_s28 + $0x78] sm:$0xff] }
 0x13f   : > { %v718_v7 = vadd.f32 %v717_v33, %v4163_v44  ;;  %v1657_v33 = vrot.slane %v1655_v29, 1 }
 0x140   : > { %v1351_v57 = vadd.f32 %v1276_v46, %v992_v14  ;;  %v1773_v1 = vpop.f32.mrf.mxu0  ;;  %v1286_v2 = vpop.f32.mrf.mxu3  ;;  %v3794_v46 = vld [vmem:[%s3948_s28 + $0x90] sm:$0xff]  ;;  %v1660_v61 = vrot.slane %v1658_v26, 2 }
 0x141   : > { %v1180_v44 = vrot.slane %v3794_v46, 1 }
 0x142   : > { %v4372_v54 = vadd.f32 %v1771_v63, %v1351_v57  ;;  %v1661_v34 = vor.u32 %v1660_v61, %v1657_v33 }
 0x143   : > { %v1181_v28 = vsel %vm787_vm2, %v1178_v53, %v1180_v44 }
 0x144   : > { %v1662_v46 = vsel %vm1510_vm3, %v1652_v36, %v1661_v34 }
 0x145   : > { %v919_v55 = vpop.f32.mrf.mxu2 }
 0x146   : > { %v993_v9 = vadd.f32 %v919_v55, %v718_v7  ;;  %v720_v40 = vpop.f32.mrf.mxu1 }
 0x147   : > { %v721_v63 = vadd.f32 %v720_v40, %v4174_v52  ;;  %v3867_v52 = vld [vmem:[%s3948_s28 + $0x80] sm:$0xff] }
 0x148   : > { %v1352_v3 = vadd.f32 %v1278_v59, %v993_v9  ;;  %v1776_v0 = vpop.f32.mrf.mxu0  ;;  %v4387_v23 = vpop.f32.mrf.mxu3 }
 0x149   : > { %3376 = vmatmul.msk.bf16.gmra.mxu1 %vm481_vm1, %v4063_v43 }
 0x14a   : > { %3400 = vmatmul.msk.bf16.gmra.mxu2 %vm481_vm1, %v818_v21  ;;  %v4383_v27 = vadd.f32 %v1773_v1, %v1352_v3  ;;  %v819_v1 = vrot.slane %v3867_v52, 1  ;;  %v3812_v3 = vld [vmem:[%s3948_s28 + $0x90] sm:$0xff] }
 0x14b   : > { %3588 = vmatmul.msk.bf16.gmra.mxu0 %vm481_vm1, %v1653_v25  ;;  %v4402_v25 = vld [vmem:[%s3948_s28 + $0x14] sm:$0xf]  ;;  %v1667_v29 = vshll.u32 %v3812_v3, 16 }
 0x14c   : > { %3498 = vmatmul.msk.bf16.gmra.mxu3 %vm481_vm1, %v1181_v28  ;;  %v820_v9 = vsel %vm787_vm2, %v817_v35, %v819_v1  ;;  %v4415_v28 = vld [vmem:[%s3948_s28 + $0x18] sm:$0xff] }
 0x14d   : > { %v922_v59 = vpop.f32.mrf.mxu2 }
 0x14e   : > { %v994_v18 = vadd.f32 %v922_v59, %v721_v63  ;;  %v722_v12 = vpop.f32.mrf.mxu1  ;;  %v1664_v63 = vshrl.u32 %v3812_v3, 16 }
 0x14f   : > { %v723_v51 = vadd.f32 %v722_v12, %v4190_v62 }
 0x150   : > { %v1353_v43 = vadd.f32 %v1281_v39, %v994_v18  ;;  %v1778_v14 = vpop.f32.mrf.mxu0  ;;  %v4395_v55 = vpop.f32.mrf.mxu3  ;;  %v1666_v61 = vrot.slane %v1664_v63, 1 }
 0x152   : > { %v4391_v57 = vadd.f32 %v1776_v0, %v1353_v43  ;;  %v2112_v0 = vld [vmem:[%s3948_s28 + $0x10] sm:$0xc] }
 0x153   : > { %v2189_v35 = vunpack.c.l.b16 %v2112_v0 }
 0x155   : > { %v924_v7 = vpop.f32.mrf.mxu2 }
 0x156   : > { %v995_v39 = vadd.f32 %v924_v7, %v723_v51  ;;  %v725_v53 = vpop.f32.mrf.mxu1  ;;  %v1669_v51 = vrot.slane %v1667_v29, 2  ;;  %v4422_v7 = vld [vmem:[%s3948_s28 + $0x88] sm:$0xff]  }
 0x157   : > { %v726_v36 = vadd.f32 %v725_v53, %v4201_v16  ;;  %v821_v16 = vrot.slane %v4422_v7, 1 }
 0x158   : > { %v1354_v40 = vadd.f32 %v1283_v37, %v995_v39  ;;  %v1781_v21 = vpop.f32.mrf.mxu0  ;;  %v5066_v37 = vunpack.c.l.b16 %v4402_v25  ;;  %v4412_v59 = vpop.f32.mrf.mxu3  ;;  %v1670_v3 = vor.u32 %v1669_v51, %v1666_v61 }
 0x159   : > { %3377 = vmatmul.msk.bf16.gmra.mxu1 %vm481_vm1, %v3868_v56 }
 0x15a   : > { %3401 = vmatmul.msk.bf16.gmra.mxu2 %vm481_vm1, %v820_v9  ;;  %v4407_v62 = vadd.f32 %v1778_v14, %v1354_v40  ;;  %v4419_v43 = vpack.c.b16 %v5066_v37, %v2189_v35  ;;  %v2494_v40 = vshrl.u32 %v4415_v28, 16  ;;  %v1413_v35 = vld [vmem:[%s3948_s28 + $0x98] sm:$0x1]  ;;  %v1671_v37 = vsel %vm1510_vm3, %v1661_v34, %v1670_v3 }
 0x15b   : > { %3589 = vmatmul.msk.bf16.gmra.mxu0 %vm481_vm1, %v1662_v46 }
 0x15c   : > { %3499 = vmatmul.msk.bf16.gmra.mxu3 %vm481_vm1, %v1180_v44  ;;  %v2486_v53 = vshrl.u32 %v4419_v43, 16  ;;  %v2489_v9 = vshll.u32 %v4419_v43, 16  ;;  %v822_v44 = vsel %vm787_vm2, %v819_v1, %v821_v16 }
 0x15d   : > { %v927_v26 = vpop.f32.mrf.mxu2 }
 0x15e   : > { %v996_v18 = vadd.f32 %v927_v26, %v726_v36  ;;  %v727_v12 = vpop.f32.mrf.mxu1  ;;  %v2488_v63 = vrot.slane %v2486_v53, 2  ;;  %v2491_v29 = vrot.slane %v2489_v9, 3  ;;  %v2496_v26 = vrot.slane %v2494_v40, 2 }
 0x15f   : > { %v728_v46 = vadd.f32 %v727_v12, %v4217_v32  ;;  %v1490_v32 = vunpack.c.l.b16 %v1413_v35  ;;  %v3851_v35 = vld [vmem:[%s3948_s28 + $0x88] sm:$0x70] }
 0x160   : > { %v1355_v14 = vadd.f32 %v1286_v2, %v996_v18  ;;  %v1783_v33 = vpop.f32.mrf.mxu0  ;;  %v2497_v2 = vshll.u32 %v4415_v28, 16  ;;  %v4433_v56 = vpop.f32.mrf.mxu3  ;;  %v2492_v1 = vor.u32 %v2491_v29, %v2488_v63 }
 0x162   : > { %v4426_v39 = vadd.f32 %v1781_v21, %v1355_v14  ;;  %v2499_v18 = vrot.slane %v2497_v2, 3 }
 0x164   : > { %v2500_v61 = vor.u32 %v2499_v18, %v2496_v26 }
 0x165   : > { %v929_v0 = vpop.f32.mrf.mxu2 }
 0x166   : > { %v997_v36 = vadd.f32 %v929_v0, %v728_v46  ;;  %v730_v21 = vpop.f32.mrf.mxu1  ;;  %v2501_v40 = vsel %vm2484_vm4, %v2492_v1, %v2500_v61  ;;  %v3846_v0 = vld [vmem:[%s3948_s28 + $0x88] sm:$0xf]  }
 0x167   : > { %v731_v51 = vadd.f32 %v730_v21, %v4228_v45  ;;  %v3847_v18 = vor.u32 %v3851_v35, %v3846_v0 }
 0x168   : > { %v1356_v14 = vadd.f32 %v4387_v23, %v997_v36  ;;  %v1786_v7 = vpop.f32.mrf.mxu0  ;;  %v4445_v23 = vpack.c.b16 %v1490_v32, %v1490_v32  ;;  %v4447_v53 = vpop.f32.mrf.mxu3  ;;  %v1872_v32 = vld [vmem:[%s3948_s28 + $0x8] sm:$0xc] }
 0x169   : > { %3378 = vmatmul.msk.bf16.gmra.mxu1 %vm481_vm1, %v3867_v52 }
 0x16a   : > { %3402 = vmatmul.msk.bf16.gmra.mxu2 %vm481_vm1, %v822_v44  ;;  %v4441_v12 = vadd.f32 %v1783_v33, %v1356_v14  ;;  %v4451_v33 = vld [vmem:[%s3948_s28 + $0x20] sm:$0xff]  ;;  %v1673_v46 = vshll.u32 %v4445_v23, 16 }
 0x16b   : > { %3590 = vmatmul.msk.bf16.gmra.mxu0 %vm481_vm1, %v1671_v37  ;;  %v2503_v36 = vshrl.u32 %v4451_v33, 16  ;;  %v2506_v44 = vshll.u32 %v4451_v33, 16 }
 0x16c   : > { %3714 = vmatmul.msk.bf16.vlgmr.msra.gmra.mxu3 %vm481_vm1, %v2501_v40  ;;  %v1675_v63 = vrot.slane %v1673_v46, 2  ;;  %v2850_v40 = vld [vmem:[%s3948_s28 + $0x10] sm:$0x8] }
 0x16d   : > { %v932_v34 = vpop.f32.mrf.mxu2  ;;  %v2505_v1 = vrot.slane %v2503_v36, 2  ;;  %v2855_v0 = vunpack.c.l.b16 %v2850_v40  ;;  %v5073_v36 = vunpack.c.l.b16 %v4097_v15  ;;  %v2245_v15 = vrot.slane %v4419_v43, 2 }
 0x16e   : > { %v998_v9 = vadd.f32 %v932_v34, %v731_v51  ;;  %v732_v52 = vpop.f32.mrf.mxu1 }
 0x16f   : > { %v733_v21 = vadd.f32 %v732_v52, %v4244_v60  ;;  %v1877_v60 = vunpack.c.l.b16 %v1872_v32 }
 0x170   : > { %v1357_v37 = vadd.f32 %v4395_v55, %v998_v9  ;;  %v1788_v2 = vpop.f32.mrf.mxu0  ;;  %v4463_v55 = vpop.f32.mrf.mxu3  ;;  %v1676_v9 = vsel %vm1510_vm3, %v1670_v3, %v1675_v63  ;;  %v4481_v63 = vld [vmem:[%s3948_s28 + $0x28] sm:$0xff] }
 0x172   : > { %v4456_v45 = vadd.f32 %v1786_v7, %v1357_v37  ;;  %v2508_v7 = vrot.slane %v2506_v44, 3  ;;  %v1878_v44 = vpack.c.b16 %v5073_v36, %v1877_v60 }
 0x174   : > { %v2509_v37 = vor.u32 %v2508_v7, %v2505_v1  ;;  %v2246_v7 = vrot.slane %v4415_v28, 2 }
 0x175   : > { %v934_v29 = vpop.f32.mrf.mxu2 }
 0x176   : > { %v999_v26 = vadd.f32 %v934_v29, %v733_v21  ;;  %v735_v14 = vpop.f32.mrf.mxu1  ;;  %v2247_v43 = vsel %vm1879_vm5, %v2245_v15, %v2246_v7 }
 0x177   : > { %v736_v46 = vadd.f32 %v735_v14, %v4253_v24  ;;  %v1880_v24 = vrot.slane %v1878_v44, 2  ;;  %v3870_v14 = vld [vmem:[%s3948_s28 + $0x10] sm:$0xff] }
 0x178   : > { %v1358_v51 = vadd.f32 %v4412_v59, %v999_v26  ;;  %v1791_v34 = vpop.f32.mrf.mxu0  ;;  %v4475_v35 = vpop.f32.mrf.mxu3  ;;  %v5074_v26 = vunpack.c.l.b16 %v4402_v25  ;;  %v1881_v32 = vrot.slane %v3870_v14, 2  ;;  %v4508_v14 = vld [vmem:[%s3948_s28 + $0x30] sm:$0xff] }
 0x179   : > { %3379 = vmatmul.msk.bf16.gmra.mxu1 %vm481_vm1, %v3847_v18 }
 0x17a   : > { %3403 = vmatmul.msk.bf16.gmra.mxu2 %vm481_vm1, %v821_v16  ;;  %v4471_v52 = vadd.f32 %v1788_v2, %v1358_v51  ;;  %v2510_v16 = vsel %vm2484_vm4, %v2500_v61, %v2509_v37  ;;  %v2856_v18 = vpack.c.b16 %v5074_v26, %v2855_v0  ;;  %v2512_v61 = vshrl.u32 %v4481_v63, 16 }
 0x17b   : > { %3591 = vmatmul.msk.bf16.gmra.mxu0 %vm481_vm1, %v1676_v9  ;;  %v2515_v51 = vshll.u32 %v4481_v63, 16  ;;  %v2859_v9 = vrot.slane %v4415_v28, 3  ;;  %v1882_v0 = vsel %vm1879_vm5, %v1880_v24, %v1881_v32 }
 0x17c   : > { %3715 = vmatmul.msk.bf16.gmra.mxu3 %vm481_vm1, %v2510_v16  ;;  %v2858_v25 = vrot.slane %v2856_v18, 3 }
 0x17d   : > { %v937_v59 = vpop.f32.mrf.mxu2 }
 0x17e   : > { %v1000_v3 = vadd.f32 %v937_v59, %v736_v46  ;;  %v737_v21 = vpop.f32.mrf.mxu1  ;;  %v2514_v59 = vrot.slane %v2512_v61, 2 }
 0x180   : > { %v1359_v2 = vadd.f32 %v4433_v56, %v1000_v3  ;;  %v1793_v29 = vpop.f32.mrf.mxu0  ;;  %v738_v56 = vadd.f32 %v737_v21, %v4267_v49  ;;  %v1306_v60 = vpop.f32.mrf.mxu3  ;;  %v2517_v3 = vrot.slane %v2515_v51, 3  ;;  %v2860_v49 = vsel %vm2857_vm6, %v2858_v25, %v2859_v9  ;;  %v3871_v51 = vld [vmem:[%s3948_s28 + $0x18] sm:$0xff] }
 0x181   : > { %v2248_v25 = vrot.slane %v4451_v33, 2 }
 0x182   : > { %v4488_v1 = vadd.f32 %v1791_v34, %v1359_v2  ;;  %v2518_v21 = vor.u32 %v2517_v3, %v2514_v59 }
 0x183   : > { %v2249_v3 = vsel %vm1879_vm5, %v2246_v7, %v2248_v25 }
 0x185   : > { %v939_v40 = vpop.f32.mrf.mxu2 }
 0x186   : > { %v1001_v46 = vadd.f32 %v939_v40, %v738_v56  ;;  %v740_v34 = vpop.f32.mrf.mxu1  ;;  %v1883_v56 = vrot.slane %v3871_v51, 2  ;;  %v2524_v40 = vshll.u32 %v4508_v14, 16 }
 0x187   : > { %v741_v16 = vadd.f32 %v740_v34, %v4161_v42  ;;  %v2521_v42 = vshrl.u32 %v4508_v14, 16 }
 0x188   : > { %v1360_v36 = vadd.f32 %v4447_v53, %v1001_v46  ;;  %v1796_v44 = vpop.f32.mrf.mxu0  ;;  %v1308_v26 = vpop.f32.mrf.mxu3  ;;  %v2519_v53 = vsel %vm2484_vm4, %v2509_v37, %v2518_v21  ;;  %v2861_v37 = vrot.slane %v4451_v33, 3  ;;  %v1884_v59 = vsel %vm1879_vm5, %v1881_v32, %v1883_v56 }
 0x189   : > { %3598 = vmatmul.msk.bf16.vlgmr.msra.gmra.mxu1 %vm481_vm1, %v1882_v0 }
 0x18a   : > { %3690 = vmatmul.msk.bf16.vlgmr.msra.gmra.mxu2 %vm481_vm1, %v2247_v43  ;;  %v4502_v28 = vadd.f32 %v1793_v29, %v1360_v36  ;;  %v2523_v36 = vrot.slane %v2521_v42, 2 }
 0x18b   : > { %3738 = vmatmul.msk.bf16.vlgmr.msra.gmra.mxu0 %vm481_vm1, %v2860_v49 }
 0x18c   : > { %3716 = vmatmul.msk.bf16.gmra.mxu3 %vm481_vm1, %v2519_v53 }
 0x18d   : > { %v942_v2 = vpop.f32.mrf.mxu2 }
 0x18e   : > { %v1002_v18 = vadd.f32 %v942_v2, %v741_v16  ;;  %v742_v24 = vpop.f32.mrf.mxu1  ;;  %v2862_v2 = vsel %vm2857_vm6, %v2859_v9, %v2861_v37 }
 0x18f   : > { %v743_v46 = vadd.f32 %v742_v24, %v4170_v50 }
 0x190   : > { %v1361_v15 = vadd.f32 %v4463_v55, %v1002_v18  ;;  %v1798_v61 = vpop.f32.mrf.mxu0  ;;  %v1311_v0 = vpop.f32.mrf.mxu3 }
 0x192   : > { %v4512_v29 = vadd.f32 %v1796_v44, %v1361_v15  ;;  %v2526_v44 = vrot.slane %v2524_v40, 3  ;;  %v4532_v15 = vld [vmem:[%s3948_s28 + $0x38] sm:$0xff] }
 0x194   : > { %v2527_v33 = vor.u32 %v2526_v44, %v2523_v36 }
 0x195   : > { %v944_v34 = vpop.f32.mrf.mxu2 }
 0x196   : > { %v1003_v55 = vadd.f32 %v944_v34, %v743_v46  ;;  %v745_v43 = vpop.f32.mrf.mxu1  ;;  %v2250_v46 = vrot.slane %v4481_v63, 2  ;;  %v2533_v34 = vshll.u32 %v4532_v15, 16 }
 0x197   : > { %v746_v32 = vadd.f32 %v745_v43, %v4186_v8  ;;  %v2530_v8 = vshrl.u32 %v4532_v15, 16 }
 0x198   : > { %v1362_v49 = vadd.f32 %v4475_v35, %v1003_v55  ;;  %v1801_v16 = vpop.f32.mrf.mxu0  ;;  %v1313_v18 = vpop.f32.mrf.mxu3  ;;  %v2528_v35 = vsel %vm2484_vm4, %v2518_v21, %v2527_v33  ;;  %v2863_v21 = vrot.slane %v4481_v63, 3  ;;  %v2251_v44 = vsel %vm1879_vm5, %v2248_v25, %v2250_v46 }
 0x199   : > { %3599 = vmatmul.msk.bf16.gmra.mxu1 %vm481_vm1, %v1884_v59 }
 0x19a   : > { %3691 = vmatmul.msk.bf16.gmra.mxu2 %vm481_vm1, %v2249_v3  ;;  %v4526_v50 = vadd.f32 %v1798_v61, %v1362_v49  ;;  %v3872_v61 = vld [vmem:[%s3948_s28 + $0x20] sm:$0xff]  ;;  %v2532_v49 = vrot.slane %v2530_v8, 2 }
 0x19b   : > { %3739 = vmatmul.msk.bf16.gmra.mxu0 %vm481_vm1, %v2862_v2  ;;  %v1885_v40 = vrot.slane %v3872_v61, 2 }
 0x19c   : > { %3717 = vmatmul.msk.bf16.gmra.mxu3 %vm481_vm1, %v2528_v35 }
 0x19d   : > { %v947_v7 = vpop.f32.mrf.mxu2  ;;  %v1886_v36 = vsel %vm1879_vm5, %v1883_v56, %v1885_v40 }
 0x19e   : > { %v1004_v24 = vadd.f32 %v947_v7, %v746_v32  ;;  %v747_v53 = vpop.f32.mrf.mxu1  ;;  %v2864_v7 = vsel %vm2857_vm6, %v2861_v37, %v2863_v21 }
 0x19f   : > { %v748_v55 = vadd.f32 %v747_v53, %v4197_v13 }
 0x1a0   : > { %v1363_v9 = vadd.f32 %v1306_v60, %v1004_v24  ;;  %v1803_v51 = vpop.f32.mrf.mxu0  ;;  %v1316_v59 = vpop.f32.mrf.mxu3 }
 0x1a2   : > { %v4535_v42 = vadd.f32 %v1801_v16, %v1363_v9  ;;  %v2535_v16 = vrot.slane %v2533_v34, 3  ;;  %v4554_v9 = vld [vmem:[%s3948_s28 + $0x40] sm:$0xff] }
 0x1a4   : > { %v2536_v63 = vor.u32 %v2535_v16, %v2532_v49 }
 0x1a5   : > { %v949_v43 = vpop.f32.mrf.mxu2 }
 0x1a6   : > { %v1005_v60 = vadd.f32 %v949_v43, %v748_v55  ;;  %v750_v3 = vpop.f32.mrf.mxu1  ;;  %v2252_v55 = vrot.slane %v4508_v14, 2  ;;  %v2542_v43 = vshll.u32 %v4554_v9, 16 }
 0x1a7   : > { %v751_v56 = vadd.f32 %v750_v3, %v4213_v30  ;;  %v2539_v30 = vshrl.u32 %v4554_v9, 16 }
 0x1a8   : > { %v1364_v2 = vadd.f32 %v1308_v26, %v1005_v60  ;;  %v1806_v32 = vpop.f32.mrf.mxu0  ;;  %v1318_v24 = vpop.f32.mrf.mxu3  ;;  %v2537_v26 = vsel %vm2484_vm4, %v2527_v33, %v2536_v63  ;;  %v2865_v33 = vrot.slane %v4508_v14, 3  ;;  %v2253_v16 = vsel %vm1879_vm5, %v2250_v46, %v2252_v55 }
 0x1a9   : > { %3600 = vmatmul.msk.bf16.gmra.mxu1 %vm481_vm1, %v1886_v36 }
 0x1aa   : > { %3692 = vmatmul.msk.bf16.gmra.mxu2 %vm481_vm1, %v2251_v44  ;;  %v4548_v13 = vadd.f32 %v1803_v51, %v1364_v2  ;;  %v3873_v51 = vld [vmem:[%s3948_s28 + $0x28] sm:$0xff]  ;;  %v2541_v2 = vrot.slane %v2539_v30, 2 }
 0x1ab   : > { %3740 = vmatmul.msk.bf16.gmra.mxu0 %vm481_vm1, %v2864_v7  ;;  %v1887_v34 = vrot.slane %v3873_v51, 2 }
 0x1ac   : > { %3718 = vmatmul.msk.bf16.gmra.mxu3 %vm481_vm1, %v2537_v26 }
 0x1ad   : > { %v952_v25 = vpop.f32.mrf.mxu2  ;;  %v1888_v49 = vsel %vm1879_vm5, %v1885_v40, %v1887_v34 }
 0x1ae   : > { %v1006_v53 = vadd.f32 %v952_v25, %v751_v56  ;;  %v752_v35 = vpop.f32.mrf.mxu1  ;;  %v2866_v25 = vsel %vm2857_vm6, %v2863_v21, %v2865_v33 }
 0x1af   : > { %v753_v60 = vadd.f32 %v752_v35, %v4224_v41 }
 0x1b0   : > { %v1365_v37 = vadd.f32 %v1311_v0, %v1006_v53  ;;  %v1808_v61 = vpop.f32.mrf.mxu0  ;;  %v1321_v36 = vpop.f32.mrf.mxu3 }
 0x1b2   : > { %v4557_v8 = vadd.f32 %v1806_v32, %v1365_v37  ;;  %v2544_v32 = vrot.slane %v2542_v43, 3  ;;  %v4576_v37 = vld [vmem:[%s3948_s28 + $0x48] sm:$0xff] }
 0x1b4   : > { %v2545_v14 = vor.u32 %v2544_v32, %v2541_v2 }
 0x1b5   : > { %v954_v3 = vpop.f32.mrf.mxu2 }
 0x1b6   : > { %v1007_v0 = vadd.f32 %v954_v3, %v753_v60  ;;  %v755_v44 = vpop.f32.mrf.mxu1  ;;  %v2254_v60 = vrot.slane %v4532_v15, 2  ;;  %v2551_v3 = vshll.u32 %v4576_v37, 16 }
 0x1b7   : > { %v756_v40 = vadd.f32 %v755_v44, %v4240_v58  ;;  %v2548_v58 = vshrl.u32 %v4576_v37, 16 }
 0x1b8   : > { %v1366_v7 = vadd.f32 %v1313_v18, %v1007_v0  ;;  %v1811_v56 = vpop.f32.mrf.mxu0  ;;  %v1323_v53 = vpop.f32.mrf.mxu3  ;;  %v2546_v18 = vsel %vm2484_vm4, %v2536_v63, %v2545_v14  ;;  %v2867_v63 = vrot.slane %v4532_v15, 3  ;;  %v2255_v32 = vsel %vm1879_vm5, %v2252_v55, %v2254_v60 }
 0x1b9   : > { %3601 = vmatmul.msk.bf16.gmra.mxu1 %vm481_vm1, %v1888_v49 }
 0x1ba   : > { %3693 = vmatmul.msk.bf16.gmra.mxu2 %vm481_vm1, %v2253_v16  ;;  %v4570_v41 = vadd.f32 %v1808_v61, %v1366_v7  ;;  %v3874_v61 = vld [vmem:[%s3948_s28 + $0x30] sm:$0xff]  ;;  %v2550_v7 = vrot.slane %v2548_v58, 2 }
 0x1bb   : > { %3741 = vmatmul.msk.bf16.gmra.mxu0 %vm481_vm1, %v2866_v25  ;;  %v1889_v43 = vrot.slane %v3874_v61, 2 }
 0x1bc   : > { %3719 = vmatmul.msk.bf16.gmra.mxu3 %vm481_vm1, %v2546_v18 }
 0x1bd   : > { %v957_v46 = vpop.f32.mrf.mxu2  ;;  %v1890_v2 = vsel %vm1879_vm5, %v1887_v34, %v1889_v43 }
 0x1be   : > { %v1008_v35 = vadd.f32 %v957_v46, %v756_v40  ;;  %v757_v26 = vpop.f32.mrf.mxu1  ;;  %v2868_v46 = vsel %vm2857_vm6, %v2865_v33, %v2867_v63 }
 0x1bf   : > { %v758_v0 = vadd.f32 %v757_v26, %v4251_v17 }
 0x1c0   : > { %v1367_v21 = vadd.f32 %v1316_v59, %v1008_v35  ;;  %v1813_v51 = vpop.f32.mrf.mxu0  ;;  %v1326_v49 = vpop.f32.mrf.mxu3 }
 0x1c2   : > { %v4579_v30 = vadd.f32 %v1811_v56, %v1367_v21  ;;  %v2553_v56 = vrot.slane %v2551_v3, 3  ;;  %v4598_v21 = vld [vmem:[%s3948_s28 + $0x50] sm:$0xff] }
 0x1c4   : > { %v2554_v15 = vor.u32 %v2553_v56, %v2550_v7 }
 0x1c5   : > { %v959_v44 = vpop.f32.mrf.mxu2 }
 0x1c6   : > { %v1009_v59 = vadd.f32 %v959_v44, %v758_v0  ;;  %v760_v16 = vpop.f32.mrf.mxu1  ;;  %v2256_v0 = vrot.slane %v4554_v9, 2  ;;  %v2560_v44 = vshll.u32 %v4598_v21, 16 }
 0x1c7   : > { %v761_v34 = vadd.f32 %v760_v16, %v4265_v48  ;;  %v2557_v48 = vshrl.u32 %v4598_v21, 16 }
 0x1c8   : > { %v1368_v25 = vadd.f32 %v1318_v24, %v1009_v59  ;;  %v1816_v40 = vpop.f32.mrf.mxu0  ;;  %v1328_v35 = vpop.f32.mrf.mxu3  ;;  %v2555_v24 = vsel %vm2484_vm4, %v2545_v14, %v2554_v15  ;;  %v2869_v14 = vrot.slane %v4554_v9, 3  ;;  %v2257_v56 = vsel %vm1879_vm5, %v2254_v60, %v2256_v0 }
 0x1c9   : > { %3602 = vmatmul.msk.bf16.gmra.mxu1 %vm481_vm1, %v1890_v2 }
 0x1ca   : > { %3694 = vmatmul.msk.bf16.gmra.mxu2 %vm481_vm1, %v2255_v32  ;;  %v4592_v17 = vadd.f32 %v1813_v51, %v1368_v25  ;;  %v3875_v51 = vld [vmem:[%s3948_s28 + $0x38] sm:$0xff]  ;;  %v2559_v25 = vrot.slane %v2557_v48, 2 }
 0x1cb   : > { %3742 = vmatmul.msk.bf16.gmra.mxu0 %vm481_vm1, %v2868_v46  ;;  %v1891_v3 = vrot.slane %v3875_v51, 2  ;;  %v4620_v51 = vld [vmem:[%s3948_s28 + $0x58] sm:$0xff] }
 0x1cc   : > { %3720 = vmatmul.msk.bf16.gmra.mxu3 %vm481_vm1, %v2555_v24 }
 0x1cd   : > { %v962_v55 = vpop.f32.mrf.mxu2  ;;  %v1892_v7 = vsel %vm1879_vm5, %v1889_v43, %v1891_v3  ;;  %v5075_v43 = vld [vmem:[#allocation2_spill] sm:$0xff] }
 0x1ce   : > { %v1010_v26 = vadd.f32 %v962_v55, %v761_v34  ;;  %v762_v18 = vpop.f32.mrf.mxu1  ;;  %v2870_v55 = vsel %vm2857_vm6, %v2867_v63, %v2869_v14 }
 0x1cf   : > { %v763_v59 = vadd.f32 %v762_v18, %v4274_v5 }
 0x1d0   : > { %v1369_v33 = vadd.f32 %v1321_v36, %v1010_v26  ;;  %v1818_v61 = vpop.f32.mrf.mxu0  ;;  %v1331_v2 = vpop.f32.mrf.mxu3 }
 0x1d2   : > { %v4601_v58 = vadd.f32 %v1816_v40, %v1369_v33  ;;  %v2562_v40 = vrot.slane %v2560_v44, 3 }
 0x1d4   : > { %v2563_v9 = vor.u32 %v2562_v40, %v2559_v25 }
 0x1d5   : > { %v964_v16 = vpop.f32.mrf.mxu2 }
 0x1d6   : > { %v1011_v36 = vadd.f32 %v964_v16, %v763_v59  ;;  %v765_v32 = vpop.f32.mrf.mxu1  ;;  %v2258_v16 = vrot.slane %v4576_v37, 2 }
 0x1d7   : > { %v766_v26 = vadd.f32 %v765_v32, %v5075_v43  ;;  %v2569_v32 = vshll.u32 %v4620_v51, 16 }
 0x1d8   : > { %v1370_v46 = vadd.f32 %v1323_v53, %v1011_v36  ;;  %v1821_v34 = vpop.f32.mrf.mxu0  ;;  %v1333_v18 = vpop.f32.mrf.mxu3  ;;  %v2564_v53 = vsel %vm2484_vm4, %v2554_v15, %v2563_v9  ;;  %v2566_v36 = vshrl.u32 %v4620_v51, 16  ;;  %v2871_v15 = vrot.slane %v4576_v37, 3 }
 0x1d9   : > { %3603 = vmatmul.msk.bf16.gmra.mxu1 %vm481_vm1, %v1892_v7  ;;  %v5076_v7 = vld [vmem:[#allocation3_spill] sm:$0xff] }
 0x1da   : > { %3695 = vmatmul.msk.bf16.gmra.mxu2 %vm481_vm1, %v2257_v56  ;;  %v4614_v5 = vadd.f32 %v1818_v61, %v1370_v46  ;;  %v3876_v61 = vld [vmem:[%s3948_s28 + $0x40] sm:$0xff]  ;;  %v2568_v43 = vrot.slane %v2566_v36, 2 }
 0x1db   : > { %3743 = vmatmul.msk.bf16.gmra.mxu0 %vm481_vm1, %v2870_v55  ;;  %v1893_v59 = vrot.slane %v3876_v61, 2 }
 0x1dc   : > { %3721 = vmatmul.msk.bf16.gmra.mxu3 %vm481_vm1, %v2564_v53  ;;  %v2872_v53 = vsel %vm2857_vm6, %v2869_v14, %v2871_v15 }
 0x1dd   : > { %v967_v60 = vpop.f32.mrf.mxu2  ;;  %v1894_v55 = vsel %vm1879_vm5, %v1891_v3, %v1893_v59  ;;  %v5077_v3 = vld [vmem:[#allocation4_spill] sm:$0xff] }
 0x1de   : > { %v1012_v24 = vadd.f32 %v967_v60, %v766_v26  ;;  %v767_v33 = vpop.f32.mrf.mxu1  ;;  %v2571_v26 = vrot.slane %v2569_v32, 3 }
 0x1df   : > { %v768_v56 = vadd.f32 %v767_v33, %v5076_v7  ;;  %v4642_v7 = vld [vmem:[%s3948_s28 + $0x60] sm:$0xff] }
 0x1e0   : > { %v1371_v63 = vadd.f32 %v1326_v49, %v1012_v24  ;;  %v1823_v48 = vpop.f32.mrf.mxu0  ;;  %v1336_v40 = vpop.f32.mrf.mxu3  ;;  %v2572_v33 = vor.u32 %v2571_v26, %v2568_v43  ;;  %v5078_v43 = vld [vmem:[#allocation5_spill] sm:$0xff] }
 0x1e2   : > { %v4623_v44 = vadd.f32 %v1821_v34, %v1371_v63  ;;  %v2259_v34 = vsel %vm1879_vm5, %v2256_v0, %v2258_v16 }
 0x1e5   : > { %v969_v25 = vpop.f32.mrf.mxu2 }
 0x1e6   : > { %v1013_v49 = vadd.f32 %v969_v25, %v768_v56  ;;  %v770_v46 = vpop.f32.mrf.mxu1 }
 0x1e7   : > { %v771_v63 = vadd.f32 %v770_v46, %v5077_v3  ;;  %v2575_v46 = vshrl.u32 %v4642_v7, 16 }
 0x1e8   : > { %v1372_v60 = vadd.f32 %v1328_v35, %v1013_v49  ;;  %v1826_v24 = vpop.f32.mrf.mxu0  ;;  %v1338_v61 = vpop.f32.mrf.mxu3  ;;  %v2573_v35 = vsel %vm2484_vm4, %v2563_v9, %v2572_v33  ;;  %v2873_v9 = vrot.slane %v4598_v21, 3 }
 0x1e9   : > { %3604 = vmatmul.msk.bf16.gmra.mxu1 %vm481_vm1, %v1894_v55  ;;  %v2260_v55 = vrot.slane %v4598_v21, 2 }
 0x1ea   : > { %3696 = vmatmul.msk.bf16.gmra.mxu2 %vm481_vm1, %v2259_v34  ;;  %v4636_v37 = vadd.f32 %v1823_v48, %v1372_v60  ;;  %v3877_v48 = vld [vmem:[%s3948_s28 + $0x48] sm:$0xff]  ;;  %v2578_v34 = vshll.u32 %v4642_v7, 16 }
 0x1eb   : > { %3744 = vmatmul.msk.bf16.gmra.mxu0 %vm481_vm1, %v2872_v53  ;;  %v1895_v49 = vrot.slane %v3877_v48, 2  ;;  %v2874_v48 = vsel %vm2857_vm6, %v2871_v15, %v2873_v9  ;;  %v4666_v15 = vld [vmem:[%s3948_s28 + $0x68] sm:$0xff] }
 0x1ec   : > { %3722 = vmatmul.msk.bf16.gmra.mxu3 %vm481_vm1, %v2573_v35 }
 0x1ed   : > { %v972_v0 = vpop.f32.mrf.mxu2 }
 0x1ee   : > { %v1014_v36 = vadd.f32 %v972_v0, %v771_v63  ;;  %v772_v32 = vpop.f32.mrf.mxu1  ;;  %v1896_v63 = vsel %vm1879_vm5, %v1893_v59, %v1895_v49  ;;  %v2577_v0 = vrot.slane %v2575_v46, 2  ;;  %v5080_v59 = vld [vmem:[#allocation6_spill] sm:$0xff] }
 0x1ef   : > { %v773_v26 = vadd.f32 %v772_v32, %v5078_v43 }
 0x1f0   : > { %v1373_v14 = vadd.f32 %v1331_v2, %v1014_v36  ;;  %v1828_v56 = vpop.f32.mrf.mxu0  ;;  %v2724_v53 = vpop.f32.mrf.mxu3  ;;  %v2580_v36 = vrot.slane %v2578_v34, 3 }
 0x1f2   : > { %v4645_v25 = vadd.f32 %v1826_v24, %v1373_v14  ;;  %v2261_v24 = vsel %vm1879_vm5, %v2258_v16, %v2260_v55  ;;  %v2581_v32 = vor.u32 %v2580_v36, %v2577_v0  ;;  %v2262_v0 = vrot.slane %v4620_v51, 2 }
 0x1f3   : > { %v2587_v36 = vshll.u32 %v4666_v15, 16 }
 0x1f5   : > { %v974_v60 = vpop.f32.mrf.mxu2 }
 0x1f6   : > { %v1015_v2 = vadd.f32 %v974_v60, %v773_v26  ;;  %v775_v3 = vpop.f32.mrf.mxu1  ;;  %v2582_v26 = vsel %vm2484_vm4, %v2572_v33, %v2581_v32  ;;  %v2875_v33 = vrot.slane %v4620_v51, 3 }
 0x1f7   : > { %v776_v43 = vadd.f32 %v775_v3, %v5080_v59  ;;  %v2584_v3 = vshrl.u32 %v4666_v15, 16 }
 0x1f8   : > { %v1374_v35 = vadd.f32 %v1333_v18, %v1015_v2  ;;  %v1831_v14 = vpop.f32.mrf.mxu0  ;;  %v4662_v46 = vpop.f32.mrf.mxu3 }
 0x1f9   : > { %3605 = vmatmul.msk.bf16.gmra.mxu1 %vm481_vm1, %v1896_v63  ;;  %v3878_v63 = vld [vmem:[%s3948_s28 + $0x50] sm:$0xff] }
 0x1fa   : > { %3697 = vmatmul.msk.bf16.gmra.mxu2 %vm481_vm1, %v2261_v24  ;;  %v4658_v21 = vadd.f32 %v1828_v56, %v1374_v35  ;;  %v1897_v24 = vrot.slane %v3878_v63, 2  ;;  %v5082_v35 = vld [vmem:[#allocation7_spill] sm:$0xff] }
 0x1fb   : > { %3745 = vmatmul.msk.bf16.gmra.mxu0 %vm481_vm1, %v2874_v48 }
 0x1fc   : > { %5079 = vst [vmem:[#allocation2_spill] sm:$0xff] %v4658_v21  ;;  %3723 = vmatmul.msk.bf16.gmra.mxu3 %vm481_vm1, %v2582_v26  ;;  %v2586_v26 = vrot.slane %v2584_v3, 2  ;;  %v2876_v21 = vsel %vm2857_vm6, %v2873_v9, %v2875_v33 }
 0x1fd   : > { %v977_v16 = vpop.f32.mrf.mxu2 }
 0x1fe   : > { %v1016_v34 = vadd.f32 %v977_v16, %v776_v43  ;;  %v777_v18 = vpop.f32.mrf.mxu1 }
 0x1ff   : > { %v778_v48 = vadd.f32 %v777_v18, %v5082_v35  ;;  %v4692_v35 = vld [vmem:[%s3948_s28 + $0x70] sm:$0xff] }
 0x200   : > { %v1375_v60 = vadd.f32 %v1336_v40, %v1016_v34  ;;  %v1833_v2 = vpop.f32.mrf.mxu0  ;;  %v4677_v43 = vpop.f32.mrf.mxu3  ;;  %v2263_v34 = vsel %vm1879_vm5, %v2260_v55, %v2262_v0 }
 0x202   : > { %v4669_v56 = vadd.f32 %v1831_v14, %v1375_v60  ;;  %v1898_v14 = vsel %vm1879_vm5, %v1895_v49, %v1897_v24  ;;  %v2589_v60 = vrot.slane %v2587_v36, 3 }
 0x204   : > { %5081 = vst [vmem:[#allocation3_spill] sm:$0xff] %v4669_v56  ;;  %v2590_v49 = vor.u32 %v2589_v60, %v2586_v26 }
 0x205   : > { %v979_v59 = vpop.f32.mrf.mxu2 }
 0x206   : > { %v1017_v40 = vadd.f32 %v979_v59, %v778_v48  ;;  %v1986_v16 = vpop.f32.mrf.mxu1  ;;  %v2591_v9 = vsel %vm2484_vm4, %v2581_v32, %v2590_v49 }
 0x207   : > { %v2076_v55 = vadd.f32 %v1986_v16, %v4287_v19  ;;  %v4703_v19 = vld [vmem:[%s5063_s3] ss:$0 sm:$0xff]  ;;  %v2264_v16 = vrot.slane %v4642_v7, 2 }
 0x208   : > { %v1376_v63 = vadd.f32 %v1338_v61, %v1017_v40  ;;  %v2964_v56 = vpop.f32.mrf.mxu0  ;;  %v4688_v3 = vpop.f32.mrf.mxu3  ;;  %v3879_v40 = vld [vmem:[%s3948_s28 + $0x58] sm:$0xff] }
 0x209   : > { %3606 = vmatmul.msk.bf16.gmra.mxu1 %vm481_vm1, %v1898_v14  ;;  %v1899_v32 = vrot.slane %v3879_v40, 2  ;;  %v2596_v14 = vshll.u32 %v4692_v35, 16 }
 0x20a   : > { %3698 = vmatmul.msk.bf16.gmra.mxu2 %vm481_vm1, %v2263_v34  ;;  %v4684_v51 = vadd.f32 %v1833_v2, %v1376_v63  ;;  %v4697_v2 = vld [vmem:[%s5062_s2] ss:$0 sm:$0xff] }
 0x20b   : > { %3746 = vmatmul.msk.bf16.gmra.mxu0 %vm481_vm1, %v2876_v21 }
 0x20c   : > { %5083 = vst [vmem:[#allocation4_spill] sm:$0xff] %v4684_v51  ;;  %3724 = vmatmul.msk.bf16.gmra.mxu3 %vm481_vm1, %v2591_v9  ;;  %v1900_v9 = vsel %vm1879_vm5, %v1897_v24, %v1899_v32 }
 0x20d   : > { %v2351_v18 = vpop.f32.mrf.mxu2 }
 0x20e   : > { %v2441_v61 = vadd.f32 %v2351_v18, %v2076_v55  ;;  %v1988_v36 = vpop.f32.mrf.mxu1 }
 0x20f   : > { %v2077_v26 = vadd.f32 %v1988_v36, %v4298_v31  ;;  %v2265_v31 = vsel %vm1879_vm5, %v2262_v0, %v2264_v16 }
 0x210   : > { %v2814_v48 = vadd.f32 %v2724_v53, %v2441_v61  ;;  %v2966_v21 = vpop.f32.mrf.mxu0  ;;  %v2593_v53 = vshrl.u32 %v4692_v35, 16  ;;  %v4718_v63 = vpop.f32.mrf.mxu3 }
 0x212   : > { %v3054_v59 = vadd.f32 %v2964_v56, %v2814_v48  ;;  %v2877_v56 = vrot.slane %v4642_v7, 3  ;;  %v2595_v36 = vrot.slane %v2593_v53, 2  ;;  %v2598_v7 = vrot.slane %v2596_v14, 3 }
 0x214   : > { %v3094_v34 = vmul.f32 %v4697_v2, %v3054_v59  ;;  %v2878_v40 = vsel %vm2857_vm6, %v2875_v33, %v2877_v56  ;;  %v2599_v24 = vor.u32 %v2598_v7, %v2595_v36 }
 0x215   : > { %v2353_v60 = vpop.f32.mrf.mxu2 }
 0x216   : > { %v3134_v55 = vadd.f32 %v4703_v19, %v3094_v34  ;;  %v2442_v18 = vadd.f32 %v2353_v60, %v2077_v26  ;;  %v1991_v61 = vpop.f32.mrf.mxu1  ;;  %v4737_v60 = vld [vmem:[%s3948_s28 + $0x78] sm:$0xff] }
 0x217   : > { %v2078_v53 = vadd.f32 %v1991_v61, %v4304_v47  ;;  %v3880_v47 = vld [vmem:[%s3948_s28 + $0x60] sm:$0xff]  ;;  %v2266_v61 = vrot.slane %v4666_v15, 2  ;;  %v2605_v36 = vshll.u32 %v4737_v60, 16 }
 0x218   : > { %3171 = vst.msk [vmem:[%s4716_s21] sm:$0xff] %vm3170_vm7, %v3134_v55  ;;  %v2815_v48 = vadd.f32 %v4662_v46, %v2442_v18  ;;  %v2969_v59 = vpop.f32.mrf.mxu0  ;;  %v4732_v46 = vpop.f32.mrf.mxu3 }
 0x219   : > { %3607 = vmatmul.msk.bf16.gmra.mxu1 %vm481_vm1, %v1900_v9 }
 0x21a   : > { %v3055_v51 = vadd.f32 %v2966_v21, %v2815_v48  ;;  %3699 = vmatmul.msk.bf16.gmra.mxu2 %vm481_vm1, %v2265_v31  ;;  %v2600_v21 = vsel %vm2484_vm4, %v2590_v49, %v2599_v24  ;;  %v2602_v31 = vshrl.u32 %v4737_v60, 16  ;;  %v2879_v48 = vrot.slane %v4666_v15, 3 }
 0x21b   : > { %3747 = vmatmul.msk.bf16.gmra.mxu0 %vm481_vm1, %v2878_v40 }
 0x21c   : > { %v3095_v0 = vmul.f32 %v4697_v2, %v3055_v51  ;;  %3725 = vmatmul.msk.bf16.gmra.mxu3 %vm481_vm1, %v2600_v21  ;;  %v1901_v51 = vrot.slane %v3880_v47, 2  ;;  %v2607_v21 = vrot.slane %v2605_v36, 3  ;;  %v2880_v15 = vsel %vm2857_vm6, %v2877_v56, %v2879_v48 }
 0x21d   : > { %v2356_v14 = vpop.f32.mrf.mxu2 }
 0x21e   : > { %v3135_v34 = vadd.f32 %v4703_v19, %v3095_v0  ;;  %v2443_v26 = vadd.f32 %v2356_v14, %v2078_v53  ;;  %v1993_v33 = vpop.f32.mrf.mxu1  ;;  %v1902_v14 = vsel %vm1879_vm5, %v1899_v32, %v1901_v51 }
 0x21f   : > { %v2079_v7 = vadd.f32 %v1993_v33, %v4315_v38 }
 0x220   : > { %3172 = vst.msk [vmem:[%s4716_s21 + $0x8] sm:$0xff] %vm3170_vm7, %v3135_v34  ;;  %v2816_v55 = vadd.f32 %v4677_v43, %v2443_v26  ;;  %v2971_v18 = vpop.f32.mrf.mxu0  ;;  %v4750_v40 = vpop.f32.mrf.mxu3  ;;  %v2267_v34 = vsel %vm1879_vm5, %v2264_v16, %v2266_v61  ;;  %v2604_v26 = vrot.slane %v2602_v31, 2 }
 0x222   : > { %v3056_v9 = vadd.f32 %v2969_v59, %v2816_v55  ;;  %v2608_v32 = vor.u32 %v2607_v21, %v2604_v26  ;;  %v2881_v21 = vrot.slane %v4692_v35, 3 }
 0x224   : > { %v3096_v49 = vmul.f32 %v4697_v2, %v3056_v9 }
 0x225   : > { %v2358_v43 = vpop.f32.mrf.mxu2 }
 0x226   : > { %v3136_v59 = vadd.f32 %v4703_v19, %v3096_v49  ;;  %v2444_v0 = vadd.f32 %v2358_v43, %v2079_v7  ;;  %v1996_v53 = vpop.f32.mrf.mxu1  ;;  %v4769_v49 = vld [vmem:[%s3948_s28 + $0x80] sm:$0xff] }
 0x227   : > { %v2080_v9 = vadd.f32 %v1996_v53, %v4321_v4  ;;  %v3881_v4 = vld [vmem:[%s3948_s28 + $0x68] sm:$0xff]  ;;  %v2268_v53 = vrot.slane %v4692_v35, 2  ;;  %v2882_v35 = vsel %vm2857_vm6, %v2879_v48, %v2881_v21 }
 0x228   : > { %3173 = vst.msk [vmem:[%s4716_s21 + $0x10] sm:$0xff] %vm3170_vm7, %v3136_v59  ;;  %v2817_v55 = vadd.f32 %v4688_v3, %v2444_v0  ;;  %v2974_v38 = vpop.f32.mrf.mxu0  ;;  %v4764_v3 = vpop.f32.mrf.mxu3  ;;  %v1903_v0 = vrot.slane %v3881_v4, 2 }
 0x229   : > { %3608 = vmatmul.msk.bf16.gmra.mxu1 %vm481_vm1, %v1902_v14  ;;  %v2611_v14 = vshrl.u32 %v4769_v49, 16 }
 0x22a   : > { %v3057_v33 = vadd.f32 %v2971_v18, %v2817_v55  ;;  %3700 = vmatmul.msk.bf16.gmra.mxu2 %vm481_vm1, %v2267_v34  ;;  %v2609_v18 = vsel %vm2484_vm4, %v2599_v24, %v2608_v32  ;;  %v2614_v34 = vshll.u32 %v4769_v49, 16 }
 0x22b   : > { %3748 = vmatmul.msk.bf16.gmra.mxu0 %vm481_vm1, %v2880_v15 }
 0x22c   : > { %v3097_v16 = vmul.f32 %v4697_v2, %v3057_v33  ;;  %3726 = vmatmul.msk.bf16.gmra.mxu3 %vm481_vm1, %v2609_v18 }
 0x22d   : > { %v2361_v47 = vpop.f32.mrf.mxu2 }
 0x22e   : > { %v3137_v31 = vadd.f32 %v4703_v19, %v3097_v16  ;;  %v2445_v36 = vadd.f32 %v2361_v47, %v2080_v9  ;;  %v1998_v56 = vpop.f32.mrf.mxu1  ;;  %v1904_v16 = vsel %vm1879_vm5, %v1901_v51, %v1903_v0  ;;  %v2269_v9 = vsel %vm1879_vm5, %v2266_v61, %v2268_v53 }
 0x22f   : > { %v2081_v26 = vadd.f32 %v1998_v56, %v4332_v22  ;;  %v2613_v47 = vrot.slane %v2611_v14, 2  ;;  %v4801_v14 = vld [vmem:[%s3948_s28 + $0x88] sm:$0xff] }
 0x230   : > { %3174 = vst.msk [vmem:[%s4716_s21 + $0x18] sm:$0xff] %vm3170_vm7, %v3137_v31  ;;  %v2818_v7 = vadd.f32 %v4718_v63, %v2445_v36  ;;  %v2976_v43 = vpop.f32.mrf.mxu0  ;;  %v4782_v55 = vpop.f32.mrf.mxu3  ;;  %v2616_v31 = vrot.slane %v2614_v34, 3 }
 0x232   : > { %v3058_v59 = vadd.f32 %v2974_v38, %v2818_v7  ;;  %v2617_v51 = vor.u32 %v2616_v31, %v2613_v47 }
 0x234   : > { %v3098_v24 = vmul.f32 %v4697_v2, %v3058_v59 }
 0x235   : > { %v2363_v63 = vpop.f32.mrf.mxu2 }
 0x236   : > { %v3138_v38 = vadd.f32 %v4703_v19, %v3098_v24  ;;  %v2446_v15 = vadd.f32 %v2363_v63, %v2081_v26  ;;  %v2001_v33 = vpop.f32.mrf.mxu1 }
 0x237   : > { %v2082_v18 = vadd.f32 %v2001_v33, %v4338_v10  ;;  %v3882_v10 = vld [vmem:[%s3948_s28 + $0x70] sm:$0xff]  ;;  %v2623_v33 = vshll.u32 %v4801_v14, 16 }
 0x238   : > { %3175 = vst.msk [vmem:[%s4716_s21 + $0x20] sm:$0xff] %vm3170_vm7, %v3138_v38  ;;  %v2819_v36 = vadd.f32 %v4732_v46, %v2446_v15  ;;  %v2979_v22 = vpop.f32.mrf.mxu0  ;;  %v4796_v46 = vpop.f32.mrf.mxu3  ;;  %v1905_v63 = vrot.slane %v3882_v10, 2  ;;  %v2270_v38 = vrot.slane %v4737_v60, 2  ;;  %v2620_v15 = vshrl.u32 %v4801_v14, 16 }
 0x239   : > { %3609 = vmatmul.msk.bf16.gmra.mxu1 %vm481_vm1, %v1904_v16 }
 0x23a   : > { %v3059_v56 = vadd.f32 %v2976_v43, %v2819_v36  ;;  %3701 = vmatmul.msk.bf16.gmra.mxu2 %vm481_vm1, %v2269_v9  ;;  %v2618_v43 = vsel %vm2484_vm4, %v2608_v32, %v2617_v51  ;;  %v2883_v9 = vrot.slane %v4737_v60, 3 }
 0x23b   : > { %3749 = vmatmul.msk.bf16.gmra.mxu0 %vm481_vm1, %v2882_v35  ;;  %v1906_v35 = vsel %vm1879_vm5, %v1903_v0, %v1905_v63 }
 0x23c   : > { %v3099_v61 = vmul.f32 %v4697_v2, %v3059_v56  ;;  %3727 = vmatmul.msk.bf16.gmra.mxu3 %vm481_vm1, %v2618_v43  ;;  %v2271_v56 = vsel %vm1879_vm5, %v2268_v53, %v2270_v38  ;;  %v2884_v60 = vsel %vm2857_vm6, %v2881_v21, %v2883_v9 }
 0x23d   : > { %v2366_v7 = vpop.f32.mrf.mxu2 }
 0x23e   : > { %v3139_v59 = vadd.f32 %v4703_v19, %v3099_v61  ;;  %v2447_v4 = vadd.f32 %v2366_v7, %v2082_v18  ;;  %v2003_v48 = vpop.f32.mrf.mxu1  ;;  %v2622_v61 = vrot.slane %v2620_v15, 2  ;;  %v2625_v18 = vrot.slane %v2623_v33, 3 }
 0x23f   : > { %v2083_v16 = vadd.f32 %v2003_v48, %v4349_v11 }
 0x240   : > { %3176 = vst.msk [vmem:[%s4716_s21 + $0x28] sm:$0xff] %vm3170_vm7, %v3139_v59  ;;  %v2820_v34 = vadd.f32 %v4750_v40, %v2447_v4  ;;  %v2981_v24 = vpop.f32.mrf.mxu0  ;;  %v4814_v47 = vpop.f32.mrf.mxu3  ;;  %v2626_v0 = vor.u32 %v2625_v18, %v2622_v61 }
 0x242   : > { %v3060_v26 = vadd.f32 %v2979_v22, %v2820_v34 }
 0x244   : > { %v3100_v32 = vmul.f32 %v4697_v2, %v3060_v26  ;;  %v4833_v26 = vld [vmem:[%s3948_s28 + $0x90] sm:$0xff] }
 0x245   : > { %v2368_v40 = vpop.f32.mrf.mxu2 }
 0x246   : > { %v3140_v31 = vadd.f32 %v4703_v19, %v3100_v32  ;;  %v2448_v36 = vadd.f32 %v2368_v40, %v2083_v16  ;;  %v2006_v22 = vpop.f32.mrf.mxu1  ;;  %v2272_v16 = vrot.slane %v4769_v49, 2  ;;  %v2629_v40 = vshrl.u32 %v4833_v26, 16 }
 0x247   : > { %v2084_v4 = vadd.f32 %v2006_v22, %v4355_v6  ;;  %v3883_v6 = vld [vmem:[%s3948_s28 + $0x78] sm:$0xff]  ;;  %v2885_v22 = vrot.slane %v4769_v49, 3 }
 0x248   : > { %3177 = vst.msk [vmem:[%s4716_s21 + $0x30] sm:$0xff] %vm3170_vm7, %v3140_v31  ;;  %v2821_v7 = vadd.f32 %v4764_v3, %v2448_v36  ;;  %v2984_v11 = vpop.f32.mrf.mxu0  ;;  %v4828_v3 = vpop.f32.mrf.mxu3  ;;  %v1907_v32 = vrot.slane %v3883_v6, 2  ;;  %v2632_v31 = vshll.u32 %v4833_v26, 16 }
 0x249   : > { %3610 = vmatmul.msk.bf16.gmra.mxu1 %vm481_vm1, %v1906_v35  ;;  %v2886_v49 = vsel %vm2857_vm6, %v2883_v9, %v2885_v22 }
 0x24a   : > { %v3061_v59 = vadd.f32 %v2981_v24, %v2821_v7  ;;  %3702 = vmatmul.msk.bf16.gmra.mxu2 %vm481_vm1, %v2271_v56  ;;  %v2627_v24 = vsel %vm2484_vm4, %v2617_v51, %v2626_v0  ;;  %v1908_v7 = vsel %vm1879_vm5, %v1905_v63, %v1907_v32 }
 0x24b   : > { %3750 = vmatmul.msk.bf16.gmra.mxu0 %vm481_vm1, %v2884_v60  ;;  %v2631_v60 = vrot.slane %v2629_v40, 2 }
 0x24c   : > { %v3101_v53 = vmul.f32 %v4697_v2, %v3061_v59  ;;  %3728 = vmatmul.msk.bf16.gmra.mxu3 %vm481_vm1, %v2627_v24  ;;  %v2634_v59 = vrot.slane %v2632_v31, 3  ;;  %v2274_v31 = vrot.slane %v4801_v14, 2 }
 0x24d   : > { %v2371_v48 = vpop.f32.mrf.mxu2 }
 0x24e   : > { %v3141_v43 = vadd.f32 %v4703_v19, %v3101_v53  ;;  %v2449_v34 = vadd.f32 %v2371_v48, %v2084_v4  ;;  %v2008_v21 = vpop.f32.mrf.mxu1  ;;  %v2635_v63 = vor.u32 %v2634_v59, %v2631_v60  ;;  %v2275_v59 = vsel %vm1879_vm5, %v2272_v16, %v2274_v31 }
 0x24f   : > { %v2085_v36 = vadd.f32 %v2008_v21, %v4366_v20 }
 0x250   : > { %3178 = vst.msk [vmem:[%s4716_s21 + $0x38] sm:$0xff] %vm3170_vm7, %v3141_v43  ;;  %v2822_v10 = vadd.f32 %v4782_v55, %v2449_v34  ;;  %v2986_v15 = vpop.f32.mrf.mxu0  ;;  %v4846_v35 = vpop.f32.mrf.mxu3  ;;  %v2636_v24 = vsel %vm2484_vm4, %v2626_v0, %v2635_v63 }
 0x252   : > { %v3062_v33 = vadd.f32 %v2984_v11, %v2822_v10  ;;  %v2273_v11 = vsel %vm1879_vm5, %v2270_v38, %v2272_v16  ;;  %v4865_v10 = vld [vmem:[%s3948_s28 + $0x98] sm:$0xff] }
 0x254   : > { %v3102_v51 = vmul.f32 %v4697_v2, %v3062_v33 }
 0x255   : > { %v2373_v55 = vpop.f32.mrf.mxu2 }
 0x256   : > { %v3142_v56 = vadd.f32 %v4703_v19, %v3102_v51  ;;  %v2450_v61 = vadd.f32 %v2373_v55, %v2085_v36  ;;  %v2011_v18 = vpop.f32.mrf.mxu1  ;;  %v2638_v51 = vshrl.u32 %v4865_v10, 16  ;;  %v2641_v36 = vshll.u32 %v4865_v10, 16 }
 0x257   : > { %v2086_v48 = vadd.f32 %v2011_v18, %v4372_v54  ;;  %v3884_v54 = vld [vmem:[%s3948_s28 + $0x80] sm:$0xff] }
 0x258   : > { %3179 = vst.msk [vmem:[%s4716_s21 + $0x40] sm:$0xff] %vm3170_vm7, %v3142_v56  ;;  %v2823_v53 = vadd.f32 %v4796_v46, %v2450_v61  ;;  %v2989_v20 = vpop.f32.mrf.mxu0  ;;  %v4860_v46 = vpop.f32.mrf.mxu3  ;;  %v1909_v40 = vrot.slane %v3884_v54, 2 }
 0x259   : > { %3611 = vmatmul.msk.bf16.gmra.mxu1 %vm481_vm1, %v1908_v7 }
 0x25a   : > { %v3063_v4 = vadd.f32 %v2986_v15, %v2823_v53  ;;  %3703 = vmatmul.msk.bf16.gmra.mxu2 %vm481_vm1, %v2273_v11  ;;  %v1910_v60 = vsel %vm1879_vm5, %v1907_v32, %v1909_v40  ;;  %v2640_v53 = vrot.slane %v2638_v51, 2 }
 0x25b   : > { %3751 = vmatmul.msk.bf16.gmra.mxu0 %vm481_vm1, %v2886_v49 }
 0x25c   : > { %v3103_v38 = vmul.f32 %v4697_v2, %v3063_v4  ;;  %3729 = vmatmul.msk.bf16.gmra.mxu3 %vm481_vm1, %v2636_v24  ;;  %v2477_v4 = vld [vmem:[%s3948_s28 + $0xa0] sm:$0x3] }
 0x25d   : > { %v2376_v43 = vpop.f32.mrf.mxu2  ;;  %v2482_v16 = vunpack.c.l.b16 %v2477_v4 }
 0x25e   : > { %v3143_v34 = vadd.f32 %v4703_v19, %v3103_v38  ;;  %v2451_v21 = vadd.f32 %v2376_v43, %v2086_v48  ;;  %v2013_v9 = vpop.f32.mrf.mxu1 }
 0x25f   : > { %v2087_v55 = vadd.f32 %v2013_v9, %v4383_v27 }
 0x260   : > { %3180 = vst.msk [vmem:[%s4716_s21 + $0x48] sm:$0xff] %vm3170_vm7, %v3143_v34  ;;  %v2824_v15 = vadd.f32 %v4814_v47, %v2451_v21  ;;  %v2991_v33 = vpop.f32.mrf.mxu0  ;;  %v2887_v47 = vrot.slane %v4801_v14, 3  ;;  %v4878_v61 = vpop.f32.mrf.mxu3 }
 0x262   : > { %v3064_v6 = vadd.f32 %v2989_v20, %v2824_v15  ;;  %v2643_v20 = vrot.slane %v2641_v36, 3  ;;  %v2888_v14 = vsel %vm2857_vm6, %v2885_v22, %v2887_v47  ;;  %v4897_v15 = vpack.c.b16 %v2482_v16, %v2482_v16 }
 0x263   : > { %v2276_v36 = vrot.slane %v4833_v26, 2 }
 0x264   : > { %v3104_v0 = vmul.f32 %v4697_v2, %v3064_v6  ;;  %v2644_v32 = vor.u32 %v2643_v20, %v2640_v53 }
 0x265   : > { %v2378_v56 = vpop.f32.mrf.mxu2  ;;  %v2277_v20 = vsel %vm1879_vm5, %v2274_v31, %v2276_v36 }
 0x266   : > { %v3144_v18 = vadd.f32 %v4703_v19, %v3104_v0  ;;  %v2452_v7 = vadd.f32 %v2378_v56, %v2087_v55  ;;  %v2016_v11 = vpop.f32.mrf.mxu1  ;;  %v2645_v24 = vsel %vm2484_vm4, %v2635_v63, %v2644_v32  ;;  %v2647_v0 = vshrl.u32 %v4897_v15, 16 }
 0x267   : > { %v2088_v43 = vadd.f32 %v2016_v11, %v4391_v57  ;;  %v3885_v57 = vld [vmem:[%s3948_s28 + $0x88] sm:$0xff]  ;;  %v2650_v55 = vshll.u32 %v4897_v15, 16 }
 0x268   : > { %3181 = vst.msk [vmem:[%s4716_s21 + $0x50] sm:$0xff] %vm3170_vm7, %v3144_v18  ;;  %v2825_v49 = vadd.f32 %v4828_v3, %v2452_v7  ;;  %v2994_v27 = vpop.f32.mrf.mxu0  ;;  %v4893_v34 = vpop.f32.mrf.mxu3  ;;  %v1911_v51 = vrot.slane %v3885_v57, 2  ;;  %v2889_v18 = vrot.slane %v4833_v26, 3 }
 0x269   : > { %3612 = vmatmul.msk.bf16.gmra.mxu1 %vm481_vm1, %v1910_v60 }
 0x26a   : > { %v3065_v38 = vadd.f32 %v2991_v33, %v2825_v49  ;;  %3704 = vmatmul.msk.bf16.gmra.mxu2 %vm481_vm1, %v2275_v59  ;;  %v1912_v53 = vsel %vm1879_vm5, %v1909_v40, %v1911_v51  ;;  %v2649_v49 = vrot.slane %v2647_v0, 2  ;;  %v2890_v26 = vsel %vm2857_vm6, %v2887_v47, %v2889_v18 }
 0x26b   : > { %3752 = vmatmul.msk.bf16.gmra.mxu0 %vm481_vm1, %v2888_v14 }
 0x26c   : > { %v3105_v48 = vmul.f32 %v4697_v2, %v3065_v38  ;;  %3730 = vmatmul.msk.bf16.gmra.mxu3 %vm481_vm1, %v2645_v24  ;;  %v3886_v24 = vld [vmem:[%s3948_s28 + $0x90] sm:$0xff] }
 0x26d   : > { %v2381_v3 = vpop.f32.mrf.mxu2 }
 0x26e   : > { %v3145_v22 = vadd.f32 %v4703_v19, %v3105_v48  ;;  %v2453_v21 = vadd.f32 %v2381_v3, %v2088_v43  ;;  %v2018_v9 = vpop.f32.mrf.mxu1 }
 0x26f   : > { %v2089_v56 = vadd.f32 %v2018_v9, %v4407_v62 }
 0x270   : > { %3182 = vst.msk [vmem:[%s4716_s21 + $0x58] sm:$0xff] %vm3170_vm7, %v3145_v22  ;;  %v2826_v33 = vadd.f32 %v4846_v35, %v2453_v21  ;;  %v2996_v6 = vpop.f32.mrf.mxu0  ;;  %v2764_v7 = vpop.f32.mrf.mxu3 }
 0x272   : > { %v3066_v54 = vadd.f32 %v2994_v27, %v2826_v33  ;;  %v2652_v27 = vrot.slane %v2650_v55, 3  ;;  %v1913_v33 = vrot.slane %v3886_v24, 2 }
 0x274   : > { %v3106_v63 = vmul.f32 %v4697_v2, %v3066_v54  ;;  %v2653_v40 = vor.u32 %v2652_v27, %v2649_v49 }
 0x275   : > { %v2383_v35 = vpop.f32.mrf.mxu2 }
 0x276   : > { %v3146_v11 = vadd.f32 %v4703_v19, %v3106_v63  ;;  %v2454_v60 = vadd.f32 %v2383_v35, %v2089_v56  ;;  %v2021_v59 = vpop.f32.mrf.mxu1  ;;  %v2654_v47 = vsel %vm2484_vm4, %v2644_v32, %v2653_v40  ;;  %v2891_v32 = vrot.slane %v4865_v10, 3 }
 0x277   : > { %v2090_v38 = vadd.f32 %v2021_v59, %v4426_v39  ;;  %v2278_v39 = vrot.slane %v4865_v10, 2  ;;  %v1914_v56 = vsel %vm1879_vm5, %v1911_v51, %v1913_v33  ;;  %v2148_v59 = vld [vmem:[%s3948_s28 + $0xa0] sm:$0x1]  ;;  %v1915_v40 = vrot.slane %v4445_v23, 2 }
 0x278   : > { %3183 = vst.msk [vmem:[%s4716_s21 + $0x60] sm:$0xff] %vm3170_vm7, %v3146_v11  ;;  %v2827_v14 = vadd.f32 %v4860_v46, %v2454_v60  ;;  %v2999_v62 = vpop.f32.mrf.mxu0  ;;  %v2766_v48 = vpop.f32.mrf.mxu3 }
 0x279   : > { %3613 = vmatmul.msk.bf16.gmra.mxu1 %vm481_vm1, %v1912_v53  ;;  %v2279_v35 = vsel %vm1879_vm5, %v2276_v36, %v2278_v39  ;;  %v2225_v53 = vunpack.c.l.b16 %v2148_v59 }
 0x27a   : > { %v3067_v4 = vadd.f32 %v2996_v6, %v2827_v14  ;;  %3705 = vmatmul.msk.bf16.gmra.mxu2 %vm481_vm1, %v2277_v20 }
 0x27b   : > { %3753 = vmatmul.msk.bf16.gmra.mxu0 %vm481_vm1, %v2890_v26 }
 0x27c   : > { %v3107_v31 = vmul.f32 %v4697_v2, %v3067_v4  ;;  %3731 = vmatmul.msk.bf16.gmra.mxu3 %vm481_vm1, %v2654_v47 }
 0x27d   : > { %v2386_v16 = vpop.f32.mrf.mxu2 }
 0x27e   : > { %v3147_v46 = vadd.f32 %v4703_v19, %v3107_v31  ;;  %v2455_v43 = vadd.f32 %v2386_v16, %v2090_v38  ;;  %v2023_v3 = vpop.f32.mrf.mxu1  ;;  %v2893_v16 = vrot.slane %v4897_v15, 3 }
 0x27f   : > { %v2091_v54 = vadd.f32 %v2023_v3, %v4441_v12  ;;  %v2892_v12 = vsel %vm2857_vm6, %v2889_v18, %v2891_v32  ;;  %v2244_v18 = vpack.c.b16 %v2225_v53, %v2225_v53 }
 0x280   : > { %3184 = vst.msk [vmem:[%s4716_s21 + $0x68] sm:$0xff] %vm3170_vm7, %v3147_v46  ;;  %v2828_v22 = vadd.f32 %v4878_v61, %v2455_v43  ;;  %v3001_v21 = vpop.f32.mrf.mxu0  ;;  %v2769_v0 = vpop.f32.mrf.mxu3  ;;  %v2894_v24 = vsel %vm2857_vm6, %v2891_v32, %v2893_v16 }
 0x281   : > { %v2280_v31 = vrot.slane %v2244_v18, 2 }
 0x282   : > { %v3068_v9 = vadd.f32 %v2999_v62, %v2828_v22 }
 0x284   : > { %v3108_v6 = vmul.f32 %v4697_v2, %v3068_v9 }
 0x285   : > { %v2388_v57 = vpop.f32.mrf.mxu2 }
 0x286   : > { %v3148_v61 = vadd.f32 %v4703_v19, %v3108_v6  ;;  %v2456_v55 = vadd.f32 %v2388_v57, %v2091_v54  ;;  %v2026_v63 = vpop.f32.mrf.mxu1 }
 0x287   : > { %v2092_v36 = vadd.f32 %v2026_v63, %v4456_v45 }
 0x288   : > { %3185 = vst.msk [vmem:[%s4716_s21 + $0x70] sm:$0xff] %vm3170_vm7, %v3148_v61  ;;  %v2829_v11 = vadd.f32 %v4893_v34, %v2456_v55  ;;  %v3004_v60 = vpop.f32.mrf.mxu0  ;;  %v2771_v49 = vpop.f32.mrf.mxu3 }
 0x289   : > { %3614 = vmatmul.msk.bf16.gmra.mxu1 %vm481_vm1, %v1914_v56 }
 0x28a   : > { %v3069_v10 = vadd.f32 %v3001_v21, %v2829_v11  ;;  %3706 = vmatmul.msk.bf16.gmra.mxu2 %vm481_vm1, %v2279_v35  ;;  %v1916_v21 = vsel %vm1879_vm5, %v1913_v33, %v1915_v40 }
 0x28b   : > { %3754 = vmatmul.msk.bf16.gmra.mxu0 %vm481_vm1, %v2892_v12 }
 0x28c   : > { %v3109_v51 = vmul.f32 %v4697_v2, %v3069_v10 }
 0x28d   : > { %v2391_v20 = vpop.f32.mrf.mxu2 }
 0x28e   : > { %v3149_v34 = vadd.f32 %v4703_v19, %v3109_v51  ;;  %v2457_v27 = vadd.f32 %v2391_v20, %v2092_v36  ;;  %v2028_v14 = vpop.f32.mrf.mxu1 }
 0x28f   : > { %v2093_v45 = vadd.f32 %v2028_v14, %v4471_v52 }
 0x290   : > { %3186 = vst.msk [vmem:[%s4716_s21 + $0x78] sm:$0xff] %vm3170_vm7, %v3149_v34  ;;  %v2830_v62 = vadd.f32 %v2764_v7, %v2457_v27  ;;  %v3006_v26 = vpop.f32.mrf.mxu0  ;;  %v2774_v43 = vpop.f32.mrf.mxu3  ;;  %v2281_v7 = vsel %vm1879_vm5, %v2278_v39, %v2280_v31 }
 0x292   : > { %v3070_v4 = vadd.f32 %v3004_v60, %v2830_v62 }
 0x294   : > { %v3110_v38 = vmul.f32 %v4697_v2, %v3070_v4 }
 0x295   : > { %v2393_v46 = vpop.f32.mrf.mxu2 }
 0x296   : > { %v3150_v3 = vadd.f32 %v4703_v19, %v3110_v38  ;;  %v2458_v47 = vadd.f32 %v2393_v46, %v2093_v45  ;;  %v2031_v22 = vpop.f32.mrf.mxu1 }
 0x297   : > { %v2094_v33 = vadd.f32 %v2031_v22, %v4488_v1 }
 0x298   : > { %3187 = vst.msk [vmem:[%s4716_s21 + $0x80] sm:$0xff] %vm3170_vm7, %v3150_v3  ;;  %v2831_v23 = vadd.f32 %v2766_v48, %v2458_v47  ;;  %v3009_v9 = vpop.f32.mrf.mxu0  ;;  %v2776_v39 = vpop.f32.mrf.mxu3 }
 0x299   : > { %3615 = vmatmul.msk.bf16.gmra.mxu1 %vm481_vm1, %v1916_v21 }
 0x29a   : > { %v3071_v52 = vadd.f32 %v3006_v26, %v2831_v23  ;;  %3707 = vmatmul.msk.bf16.gmra.mxu2 %vm481_vm1, %v2281_v7 }
 0x29b   : > { %3755 = vmatmul.msk.bf16.gmra.mxu0 %vm481_vm1, %v2894_v24 }
 0x29c   : > { %v3111_v15 = vmul.f32 %v4697_v2, %v3071_v52 }
 0x29d   : > { %v2396_v6 = vpop.f32.mrf.mxu2 }
 0x29e   : > { %v3151_v54 = vadd.f32 %v4703_v19, %v3111_v15  ;;  %v2459_v48 = vadd.f32 %v2396_v6, %v2094_v33  ;;  %v2033_v57 = vpop.f32.mrf.mxu1 }
 0x29f   : > { %v2095_v56 = vadd.f32 %v2033_v57, %v4502_v28 }
 0x2a0   : > { %3188 = vst.msk [vmem:[%s4716_s21 + $0x88] sm:$0xff] %vm3170_vm7, %v3151_v54  ;;  %v2832_v32 = vadd.f32 %v2769_v0, %v2459_v48  ;;  %v3011_v61 = vpop.f32.mrf.mxu0  ;;  %v2779_v11 = vpop.f32.mrf.mxu3 }
 0x2a2   : > { %v3072_v55 = vadd.f32 %v3009_v9, %v2832_v32 }
 0x2a4   : > { %v3112_v63 = vmul.f32 %v4697_v2, %v3072_v55 }
 0x2a5   : > { %v2398_v35 = vpop.f32.mrf.mxu2 }
 0x2a6   : > { %v3152_v1 = vadd.f32 %v4703_v19, %v3112_v63  ;;  %v2460_v60 = vadd.f32 %v2398_v35, %v2095_v56  ;;  %v2036_v12 = vpop.f32.mrf.mxu1 }
 0x2a7   : > { %v2096_v51 = vadd.f32 %v2036_v12, %v4512_v29 }
 0x2a8   : > { %3189 = vst.msk [vmem:[%s4716_s21 + $0x90] sm:$0xff] %vm3170_vm7, %v3152_v1  ;;  %v2833_v59 = vadd.f32 %v2771_v49, %v2460_v60  ;;  %v3014_v10 = vpop.f32.mrf.mxu0  ;;  %v2781_v27 = vpop.f32.mrf.mxu3 }
 0x2aa   : > { %v3073_v53 = vadd.f32 %v3011_v61, %v2833_v59 }
 0x2ac   : > { %v3113_v0 = vmul.f32 %v4697_v2, %v3073_v53 }
 0x2ad   : > { %v2401_v36 = vpop.f32.mrf.mxu2 }
 0x2ae   : > { %v3153_v28 = vadd.f32 %v4703_v19, %v3113_v0  ;;  %v2461_v20 = vadd.f32 %v2401_v36, %v2096_v51  ;;  %v2038_v34 = vpop.f32.mrf.mxu1 }
 0x2af   : > { %v2097_v26 = vadd.f32 %v2038_v34, %v4526_v50 }
 0x2b0   : > { %3190 = vst.msk [vmem:[%s4716_s21 + $0x98] sm:$0xff] %vm3170_vm7, %v3153_v28  ;;  %v2834_v14 = vadd.f32 %v2774_v43, %v2461_v20  ;;  %v3016_v18 = vpop.f32.mrf.mxu0  ;;  %v2784_v16 = vpop.f32.mrf.mxu3 }
 0x2b2   : > { %v3074_v62 = vadd.f32 %v3014_v10, %v2834_v14 }
 0x2b4   : > { %v3114_v49 = vmul.f32 %v4697_v2, %v3074_v62 }
 0x2b5   : > { %v2403_v4 = vpop.f32.mrf.mxu2 }
 0x2b6   : > { %v3154_v29 = vadd.f32 %v4703_v19, %v3114_v49  ;;  %v2462_v40 = vadd.f32 %v2403_v4, %v2097_v26  ;;  %v2041_v31 = vpop.f32.mrf.mxu1 }
 0x2b7   : > { %v2098_v3 = vadd.f32 %v2041_v31, %v4535_v42 }
 0x2b8   : > { %3191 = vst.msk [vmem:[%s4716_s21 + $0xa0] sm:$0xff] %vm3170_vm7, %v3154_v29  ;;  %v2835_v38 = vadd.f32 %v2776_v39, %v2462_v40  ;;  %v3019_v45 = vpop.f32.mrf.mxu0  ;;  %v2786_v24 = vpop.f32.mrf.mxu3 }
 0x2ba   : > { %v3075_v46 = vadd.f32 %v3016_v18, %v2835_v38 }
 0x2bc   : > { %v3115_v43 = vmul.f32 %v4697_v2, %v3075_v46 }
 0x2bd   : > { %v2406_v47 = vpop.f32.mrf.mxu2 }
 0x2be   : > { %v3155_v50 = vadd.f32 %v4703_v19, %v3115_v43  ;;  %v2463_v22 = vadd.f32 %v2406_v47, %v2098_v3  ;;  %v2043_v21 = vpop.f32.mrf.mxu1 }
 0x2bf   : > { %v2099_v15 = vadd.f32 %v2043_v21, %v4548_v13 }
 0x2c0   : > { %3192 = vst.msk [vmem:[%s4716_s21 + $0xa8] sm:$0xff] %vm3170_vm7, %v3155_v50  ;;  %v2836_v7 = vadd.f32 %v2779_v11, %v2463_v22  ;;  %v3021_v23 = vpop.f32.mrf.mxu0  ;;  %v2789_v63 = vpop.f32.mrf.mxu3 }
 0x2c2   : > { %v3076_v9 = vadd.f32 %v3019_v45, %v2836_v7 }
 0x2c4   : > { %v3116_v52 = vmul.f32 %v4697_v2, %v3076_v9 }
 0x2c5   : > { %v2408_v33 = vpop.f32.mrf.mxu2 }
 0x2c6   : > { %v3156_v42 = vadd.f32 %v4703_v19, %v3116_v52  ;;  %v2464_v6 = vadd.f32 %v2408_v33, %v2099_v15  ;;  %v2046_v39 = vpop.f32.mrf.mxu1 }
 0x2c7   : > { %v2100_v61 = vadd.f32 %v2046_v39, %v4557_v8 }
 0x2c8   : > { %3193 = vst.msk [vmem:[%s4716_s21 + $0xb0] sm:$0xff] %vm3170_vm7, %v3156_v42  ;;  %v2837_v54 = vadd.f32 %v2781_v27, %v2464_v6  ;;  %v3024_v48 = vpop.f32.mrf.mxu0  ;;  %v2791_v51 = vpop.f32.mrf.mxu3 }
 0x2ca   : > { %v3077_v57 = vadd.f32 %v3021_v23, %v2837_v54 }
 0x2cc   : > { %v3117_v32 = vmul.f32 %v4697_v2, %v3077_v57 }
 0x2cd   : > { %v2411_v55 = vpop.f32.mrf.mxu2 }
 0x2ce   : > { %v3157_v13 = vadd.f32 %v4703_v19, %v3117_v32  ;;  %v2465_v56 = vadd.f32 %v2411_v55, %v2100_v61  ;;  %v2048_v35 = vpop.f32.mrf.mxu1 }
 0x2cf   : > { %v2101_v59 = vadd.f32 %v2048_v35, %v4570_v41 }
 0x2d0   : > { %3194 = vst.msk [vmem:[%s4716_s21 + $0xb8] sm:$0xff] %vm3170_vm7, %v3157_v13  ;;  %v2838_v11 = vadd.f32 %v2784_v16, %v2465_v56  ;;  %v3026_v1 = vpop.f32.mrf.mxu0  ;;  %v2794_v4 = vpop.f32.mrf.mxu3 }
 0x2d2   : > { %v3078_v60 = vadd.f32 %v3024_v48, %v2838_v11 }
 0x2d4   : > { %v3118_v12 = vmul.f32 %v4697_v2, %v3078_v60 }
 0x2d5   : > { %v2413_v10 = vpop.f32.mrf.mxu2 }
 0x2d6   : > { %v3158_v8 = vadd.f32 %v4703_v19, %v3118_v12  ;;  %v2466_v53 = vadd.f32 %v2413_v10, %v2101_v59  ;;  %v2051_v0 = vpop.f32.mrf.mxu1 }
 0x2d7   : > { %v2102_v27 = vadd.f32 %v2051_v0, %v4579_v30 }
 0x2d8   : > { %3195 = vst.msk [vmem:[%s4716_s21 + $0xc0] sm:$0xff] %vm3170_vm7, %v3158_v8  ;;  %v2839_v36 = vadd.f32 %v2786_v24, %v2466_v53  ;;  %v3029_v28 = vpop.f32.mrf.mxu0  ;;  %v2796_v47 = vpop.f32.mrf.mxu3 }
 0x2da   : > { %v3079_v20 = vadd.f32 %v3026_v1, %v2839_v36 }
 0x2dc   : > { %v3119_v34 = vmul.f32 %v4697_v2, %v3079_v20 }
 0x2dd   : > { %v2416_v14 = vpop.f32.mrf.mxu2 }
 0x2de   : > { %v3159_v41 = vadd.f32 %v4703_v19, %v3119_v34  ;;  %v2467_v18 = vadd.f32 %v2416_v14, %v2102_v27  ;;  %v2053_v62 = vpop.f32.mrf.mxu1 }
 0x2df   : > { %v2103_v31 = vadd.f32 %v2053_v62, %v4592_v17 }
 0x2e0   : > { %3196 = vst.msk [vmem:[%s4716_s21 + $0xc8] sm:$0xff] %vm3170_vm7, %v3159_v41  ;;  %v2840_v49 = vadd.f32 %v2789_v63, %v2467_v18  ;;  %v3031_v26 = vpop.f32.mrf.mxu0  ;;  %v2799_v6 = vpop.f32.mrf.mxu3 }
 0x2e2   : > { %v3080_v29 = vadd.f32 %v3029_v28, %v2840_v49 }
 0x2e4   : > { %v3120_v40 = vmul.f32 %v4697_v2, %v3080_v29 }
 0x2e5   : > { %v2418_v38 = vpop.f32.mrf.mxu2 }
 0x2e6   : > { %v3160_v30 = vadd.f32 %v4703_v19, %v3120_v40  ;;  %v2468_v45 = vadd.f32 %v2418_v38, %v2103_v31  ;;  %v2056_v16 = vpop.f32.mrf.mxu1 }
 0x2e7   : > { %v2104_v22 = vadd.f32 %v2056_v16, %v4601_v58 }
 0x2e8   : > { %3197 = vst.msk [vmem:[%s4716_s21 + $0xd0] sm:$0xff] %vm3170_vm7, %v3160_v30  ;;  %v2841_v46 = vadd.f32 %v2791_v51, %v2468_v45  ;;  %v3034_v43 = vpop.f32.mrf.mxu0  ;;  %v2801_v35 = vpop.f32.mrf.mxu3 }
 0x2ea   : > { %v3081_v3 = vadd.f32 %v3031_v26, %v2841_v46 }
 0x2ec   : > { %v3121_v50 = vmul.f32 %v4697_v2, %v3081_v3 }
 0x2ed   : > { %v2421_v21 = vpop.f32.mrf.mxu2 }
 0x2ee   : > { %v3161_v17 = vadd.f32 %v4703_v19, %v3121_v50  ;;  %v2469_v7 = vadd.f32 %v2421_v21, %v2104_v22  ;;  %v2058_v23 = vpop.f32.mrf.mxu1 }
 0x2ef   : > { %v2105_v33 = vadd.f32 %v2058_v23, %v4614_v5 }
 0x2f0   : > { %3198 = vst.msk [vmem:[%s4716_s21 + $0xd8] sm:$0xff] %vm3170_vm7, %v3161_v17  ;;  %v2842_v9 = vadd.f32 %v2794_v4, %v2469_v7  ;;  %v3036_v24 = vpop.f32.mrf.mxu0  ;;  %v2804_v51 = vpop.f32.mrf.mxu3  ;;  %v5084_v4 = vld [vmem:[#allocation2_spill] sm:$0xff] }
 0x2f2   : > { %v3082_v52 = vadd.f32 %v3034_v43, %v2842_v9  ;;  %v5085_v43 = vld [vmem:[#allocation3_spill] sm:$0xff] }
 0x2f4   : > { %v3122_v15 = vmul.f32 %v4697_v2, %v3082_v52  ;;  %v5086_v52 = vld [vmem:[#allocation4_spill] sm:$0xff] }
 0x2f5   : > { %v2423_v42 = vpop.f32.mrf.mxu2 }
 0x2f6   : > { %v3162_v58 = vadd.f32 %v4703_v19, %v3122_v15  ;;  %v2470_v39 = vadd.f32 %v2423_v42, %v2105_v33  ;;  %v2061_v54 = vpop.f32.mrf.mxu1 }
 0x2f7   : > { %v2106_v55 = vadd.f32 %v2061_v54, %v4623_v44 }
 0x2f8   : > { %3199 = vst.msk [vmem:[%s4716_s21 + $0xe0] sm:$0xff] %vm3170_vm7, %v3162_v58  ;;  %v2843_v48 = vadd.f32 %v2796_v47, %v2470_v39  ;;  %v3039_v57 = vpop.f32.mrf.mxu0  ;;  %v2806_v49 = vpop.f32.mrf.mxu3 }
 0x2fa   : > { %v3083_v32 = vadd.f32 %v3036_v24, %v2843_v48  ;;  %v3887_v24 = vld [vmem:[%s5062_s2] ss:$0 sm:$0xff] }
 0x2fc   : > { %v3123_v61 = vmul.f32 %v4697_v2, %v3083_v32 }
 0x2fd   : > { %v2426_v63 = vpop.f32.mrf.mxu2 }
 0x2fe   : > { %v3163_v5 = vadd.f32 %v4703_v19, %v3123_v61  ;;  %v2471_v13 = vadd.f32 %v2426_v63, %v2106_v55  ;;  %v2063_v56 = vpop.f32.mrf.mxu1 }
 0x2ff   : > { %v2107_v59 = vadd.f32 %v2063_v56, %v4636_v37 }
 0x300   : > { %3200 = vst.msk [vmem:[%s4716_s21 + $0xe8] sm:$0xff] %vm3170_vm7, %v3163_v5  ;;  %v2844_v11 = vadd.f32 %v2799_v6, %v2471_v13  ;;  %v3041_v1 = vpop.f32.mrf.mxu0  ;;  %v2809_v47 = vpop.f32.mrf.mxu3 }
 0x302   : > { %v3084_v60 = vadd.f32 %v3039_v57, %v2844_v11 }
 0x304   : > { %v3124_v12 = vmul.f32 %v4697_v2, %v3084_v60 }
 0x305   : > { %v2428_v10 = vpop.f32.mrf.mxu2 }
 0x306   : > { %v3164_v44 = vadd.f32 %v4703_v19, %v3124_v12  ;;  %v2472_v8 = vadd.f32 %v2428_v10, %v2107_v59  ;;  %v2066_v53 = vpop.f32.mrf.mxu1 }
 0x307   : > { %v2108_v34 = vadd.f32 %v2066_v53, %v4645_v25 }
 0x308   : > { %3201 = vst.msk [vmem:[%s4716_s21 + $0xf0] sm:$0xff] %vm3170_vm7, %v3164_v44  ;;  %v2845_v0 = vadd.f32 %v2801_v35, %v2472_v8  ;;  %v3044_v28 = vpop.f32.mrf.mxu0  ;;  %v2811_v58 = vpop.f32.mrf.mxu3 }
 0x30a   : > { %v3085_v36 = vadd.f32 %v3041_v1, %v2845_v0 }
 0x30c   : > { %v3125_v20 = vmul.f32 %v4697_v2, %v3085_v36 }
 0x30d   : > { %v2431_v27 = vpop.f32.mrf.mxu2 }
 0x30e   : > { %v3165_v37 = vadd.f32 %v4703_v19, %v3125_v20  ;;  %v2473_v14 = vadd.f32 %v2431_v27, %v2108_v34  ;;  %v2068_v41 = vpop.f32.mrf.mxu1 }
 0x30f   : > { %v2109_v29 = vadd.f32 %v2068_v41, %v5084_v4 }
 0x310   : > { %3202 = vst.msk [vmem:[%s4716_s21 + $0xf8] sm:$0xff] %vm3170_vm7, %v3165_v37  ;;  %v2846_v18 = vadd.f32 %v2804_v51, %v2473_v14  ;;  %v3046_v40 = vpop.f32.mrf.mxu0 }
 0x312   : > { %v3086_v62 = vadd.f32 %v3044_v28, %v2846_v18 }
 0x314   : > { %v3126_v26 = vmul.f32 %v4697_v2, %v3086_v62 }
 0x315   : > { %v2433_v31 = vpop.f32.mrf.mxu2 }
 0x316   : > { %v3166_v25 = vadd.f32 %v4703_v19, %v3126_v26  ;;  %v2474_v38 = vadd.f32 %v2433_v31, %v2109_v29  ;;  %v2071_v30 = vpop.f32.mrf.mxu1 }
 0x317   : > { %v2110_v3 = vadd.f32 %v2071_v30, %v5085_v43 }
 0x318   : > { %3203 = vst.msk [vmem:[%s4716_s21 + $0x100] sm:$0xff] %vm3170_vm7, %v3166_v25  ;;  %v2847_v45 = vadd.f32 %v2806_v49, %v2474_v38  ;;  %v3049_v17 = vpop.f32.mrf.mxu0 }
 0x31a   : > { %v3087_v16 = vadd.f32 %v3046_v40, %v2847_v45 }
 0x31c   : > { %v3127_v46 = vmul.f32 %v4697_v2, %v3087_v16 }
 0x31d   : > { %v2436_v50 = vpop.f32.mrf.mxu2 }
 0x31e   : > { %v3167_v22 = vadd.f32 %v4703_v19, %v3127_v46  ;;  %v2475_v21 = vadd.f32 %v2436_v50, %v2110_v3  ;;  %v2073_v23 = vpop.f32.mrf.mxu1  ;;  %v3888_v19 = vld [vmem:[%s5063_s3] ss:$0 sm:$0xff] }
 0x31f   : > { %v2111_v15 = vadd.f32 %v2073_v23, %v5086_v52 }
 0x320   : > { %3204 = vst.msk [vmem:[%s4716_s21 + $0x108] sm:$0xff] %vm3170_vm7, %v3167_v22  ;;  %v2848_v7 = vadd.f32 %v2809_v47, %v2475_v21  ;;  %v3051_v54 = vpop.f32.mrf.mxu0 }
 0x322   : > { %v3088_v9 = vadd.f32 %v3049_v17, %v2848_v7 }
 0x324   : > { %v3128_v2 = vmul.f32 %v3887_v24, %v3088_v9 }
 0x325   : > { %v2438_v33 = vpop.f32.mrf.mxu2 }
 0x326   : > { %v3168_v42 = vadd.f32 %v3888_v19, %v3128_v2  ;;  %v2476_v6 = vadd.f32 %v2438_v33, %v2111_v15 }
 0x328   : > { %3205 = vst.msk [vmem:[%s4716_s21 + $0x110] sm:$0xff] %vm3170_vm7, %v3168_v42  ;;  %v2849_v39 = vadd.f32 %v2811_v58, %v2476_v6 }
 0x32a   : > { %v3089_v48 = vadd.f32 %v3051_v54, %v2849_v39 }
 0x32c   : > { %v3129_v57 = vmul.f32 %v3887_v24, %v3089_v48 }
 0x32e   : > { %v3169_v32 = vadd.f32 %v3888_v19, %v3129_v57 }
 0x330   : > { %3207 = vst.msk [vmem:[%s4716_s21 + $0x118] sm:$0x3f] %vm3206_vm8, %v3169_v32 }
 0x331 PF: > { %s14_s15 = sadd.s32 1, %s3895_s15  }
 0x332   : > { %p11_p4 = scmp.ge.s32.totalorder %s14_s15, 4  }
 0x334   :  { %13 = sbr.rel (!%p11_p4) target bundleno = 1 (0x1), region = 74 }

// kernel: propose_forward.7
= control target key start
LH: loop header
LB: loop body
LE: loop exit
PB: predicated region body
PF: predicated region fallthrough
CT: control target
= control target key end

     0   :  { %s1760_s15 = smov 0   ;;  %s2056_s0 = inlined_call_operand.vmem [shape: bf16[2,4,81,32], index: 0, kind: input, shape index: {}]   ;;  %s2057_s1 = inlined_call_operand.vmem [shape: bf16[9,32,32], index: 1, kind: input, shape index: {}]   ;;  %s2058_s2 = inlined_call_operand.vmem [shape: f32[1,32], index: 2, kind: input, shape index: {}]   ;;  %s2059_s3 = inlined_call_operand.vmem [shape: f32[1,32], index: 3, kind: input, shape index: {}]   ;;  %s2060_s4 = inlined_call_operand.vmem [shape: f32[2,71,32], index: 4, kind: output, shape index: {}]  }
   0x1 LB: > { %s1352_s16 = sadd.s32 4294967295, %s1733_s15   ;;  %p1356_p0 = scmp.ge.s32.totalorder %s1733_s15, 1  ;;  %s1733_s15 = sphi %s1760_s15, %s14_s15  }
   0x2   : > { %p162_p1 = scmp.lt.s32.totalorder %s1733_s15, 3 }
   0x4   : > { %p163_p2 = pnand %p1356_p0, %p162_p1 }
   0x5   : > { %p188_p3 = scmp.lt.s32.totalorder (!%p163_p2), %s1352_s16, 1 }
   0x6   : > { %166 = sbr.rel (%p163_p2) target bundleno = 341 (0x155), region = 36 }
   0xb   : > { %v1673_v0 = vld [vmem:[%s2057_s1 + $0x18] sm:$0xff]  ;;  %v1672_v1 = vld [vmem:[%s2057_s1 + $0x10] sm:$0xff]  ;;  %s2062_s16 = smov (!%p188_p3, %s1352_s16), 1  ;;  %v1675_v2 = vld [vmem:[%s2057_s1 + $0x28] sm:$0xff]  ;;  %vm262_vm0 = vcmask 261120   ;;  %vm1155_vm2 = vcmask 1046528  }
   0xc   : > { %1709 = vmatpush.bf16.msra.mxu1 %v1673_v0  ;;  %1710 = vmatpush.bf16.msra.mxu2 %v1673_v0  ;;  %s1715_s23 = smul.u32 176, %s2062_s16  ;;  %v1667_v3 = vld [vmem:[%s2057_s1 + $0x8] sm:$0xff]  ;;  %v1674_v4 = vld [vmem:[%s2057_s1 + $0x20] sm:$0xff]  ;;  %v1681_v5 = vld [vmem:[%s2057_s1 + $0x38] sm:$0xff]  ;;  %vm399_vm1 = vsmask.f32 7424 }
   0xd   : > { %1711 = vmatpush.bf16.msra.mxu3 %v1673_v0  ;;  %284 = vmatpush.bf16.msra.mxu0 %v1673_v0  ;;  %v1687_v6 = vld [vmem:[%s2057_s1 + $0x48] sm:$0xff]  ;;  %v1666_v11 = vld [vmem:[%s2057_s1] sm:$0xff]  ;;  %v1680_v15 = vld [vmem:[%s2057_s1 + $0x30] sm:$0xff]  ;;  %s1716_s11 = smul.u32 72, %s2062_s16  ;;  %vm1295_vm12 = vcmask 260096  }
   0xe   : > { %s1786_s28 = scalar_lea.vmem %s2056_s0, %s1715_s23  ;;  %v1695_v13 = vld [vmem:[%s2057_s1 + $0x68] sm:$0xff]  ;;  %v1686_v16 = vld [vmem:[%s2057_s1 + $0x40] sm:$0xff]  ;;  %v1689_v17 = vld [vmem:[%s2057_s1 + $0x58] sm:$0xff] }
   0xf   : > { %v1669_v7 = vld [vmem:[%s1786_s28 + $0x34] sm:$0xff]  ;;  %v1670_v8 = vld [vmem:[%s1786_s28 + $0x3c] sm:$0xff]  ;;  %v1800_v9 = vld [vmem:[%s1786_s28 + $0x4c] sm:$0xff]   ;;  %s2011_s14 = scalar_lea.vmem %s2060_s4, %s1716_s11 }
  0x10   : > { %1712 = vmatpush.bf16.msra.mxu1 %v1672_v1  ;;  %1713 = vmatpush.bf16.msra.mxu2 %v1672_v1  ;;  %v244_v10 = vunpack.c.l.b16 %v1800_v9  ;;  %v1668_v12 = vld [vmem:[%s1786_s28 + $0x2c] sm:$0xff]  ;;  %v1701_v18 = vld [vmem:[%s2057_s1 + $0x78] sm:$0xff]  ;;  %v1671_v20 = vld [vmem:[%s1786_s28 + $0x44] sm:$0xff] }
  0x11   : > { %1714 = vmatpush.bf16.msra.mxu3 %v1672_v1  ;;  %285 = vmatpush.bf16.msra.mxu0 %v1672_v1  ;;  %v1708_v19 = vld [vmem:[%s2057_s1 + $0x88] sm:$0xff]  ;;  %v1662_v21 = vld [vmem:[%s1786_s28] sm:$0xff]  ;;  %v1833_v23 = vld [vmem:[%s1786_s28 + $0x58] sm:$0xff] }
  0x12   : > { %v249_v14 = vpack.c.b16 %v244_v10, %v244_v10  ;;  %v1682_v22 = vld [vmem:[%s1786_s28 + $0x84] sm:$0xff]  ;;  %v402_v25 = vshll.u32 %v1662_v21, 16  ;;  %v400_v26 = vshrl.u32 %v1662_v21, 16  ;;  %v1683_v32 = vld [vmem:[%s1786_s28 + $0x8c] sm:$0xff]  ;;  %v1684_v43 = vld [vmem:[%s1786_s28 + $0x94] sm:$0xff] }
  0x13   : > { %1397 = vmatmul.msk.bf16.vlgmr.msra.gmra.mxu1 %vm262_vm0, %v1669_v7  ;;  %1398 = vmatmul.msk.bf16.vlgmr.msra.gmra.mxu2 %vm262_vm0, %v1670_v8  ;;  %v1663_v24 = vld [vmem:[%s1786_s28 + $0x8] sm:$0xff]  ;;  %v1844_v33 = vld [vmem:[%s1786_s28 + $0x60] sm:$0xff]  ;;  %v1664_v35 = vld [vmem:[%s1786_s28 + $0x10] sm:$0xff] }
  0x14   : > { %467 = vmatpush.bf16.msrb.mxu2 %v1675_v2  ;;  %367 = vmatpush.bf16.msrb.mxu1 %v1667_v3  ;;  %v404_v27 = vrot.slane %v402_v25, 1  ;;  %v406_v28 = vshll.u32 %v1663_v24, 16  ;;  %v1694_v34 = vld [vmem:[%s2057_s1 + $0x60] sm:$0xff]  ;;  %v1700_v36 = vld [vmem:[%s2057_s1 + $0x70] sm:$0xff]  ;;  %v410_v38 = vshrl.u32 %v1663_v24, 16  ;;  %v413_v39 = vshll.u32 %v1664_v35, 16 }
  0x15   : > { %574 = vmatpush.bf16.msrb.mxu3 %v1681_v5  ;;  %681 = vmatpush.bf16.msrb.mxu0 %v1687_v6  ;;  %v1688_v37 = vld [vmem:[%s2057_s1 + $0x50] sm:$0xff]  ;;  %v1864_v44 = vld [vmem:[%s1786_s28 + $0x68] sm:$0xff]  ;;  %v1707_v45 = vld [vmem:[%s2057_s1 + $0x80] sm:$0xff]  ;;  %v417_v47 = vshrl.u32 %v1664_v35, 16  ;;  %v724_v5 = vshll.u32 %v1833_v23, 16 }
  0x16   : > { %1396 = vmatmul.msk.bf16.vlgmr.msra.gmra.mxu0 %vm262_vm0, %v1668_v12  ;;  %1400 = vmatmul.msk.bf16.vlgmr.msra.gmra.mxu3 %vm262_vm0, %v249_v14  ;;  %v405_v29 = vor.u32 %v404_v27, %v400_v26  ;;  %v408_v30 = vrot.slane %v406_v28, 1  ;;  %v415_v41 = vrot.slane %v413_v39, 1  ;;  %v1665_v46 = vld [vmem:[%s1786_s28 + $0x18] sm:$0xff]  ;;  %v1876_v51 = vld [vmem:[%s1786_s28 + $0x20] sm:$0xff]   ;;  %v1882_v55 = vld [vmem:[%s1786_s28 + $0x70] sm:$0xff]  ;;  %v728_v12 = vshll.u32 %v1844_v33, 16 }
  0x17   : > { %v420_v48 = vshll.u32 %v1665_v46, 16  ;;  %v328_v53 = vunpack.c.l.b16 %v1876_v51  ;;  %v1685_v54 = vld [vmem:[%s1786_s28 + $0x9c] sm:$0xff]  ;;  %v424_v57 = vshrl.u32 %v1665_v46, 16  ;;  %v1497_v59 = vld [vmem:[%s1786_s28 + $0xa4] sm:$0xf]  ;;  %v1703_v14 = vld [vmem:[%s1786_s28 + $0xc] sm:$0xff] }
  0x18   : > { %468 = vmatpush.bf16.msrb.mxu2 %v1674_v4  ;;  %368 = vmatpush.bf16.msrb.mxu1 %v1666_v11  ;;  %v409_v31 = vsel %vm399_vm1, %v405_v29, %v408_v30  ;;  %v412_v40 = vor.u32 %v410_v38, %v408_v30  ;;  %v419_v49 = vor.u32 %v417_v47, %v415_v41  ;;  %v1455_v60 = vld [vmem:[%s1786_s28 + $0x78] sm:$0xf]  ;;  %v642_v63 = vunpack.c.l.b16 %v1497_v59  ;;  %v1696_v4 = vld [vmem:[%s1786_s28 + $0x30] sm:$0xff]  ;;  %v1629_v8 = vld [vmem:[%s1786_s28 + $0x4] sm:$0xe] }
  0x19   : > { %575 = vmatpush.bf16.msrb.mxu3 %v1680_v15  ;;  %682 = vmatpush.bf16.msrb.mxu0 %v1686_v16  ;;  %v422_v50 = vrot.slane %v420_v48, 1  ;;  %v333_v56 = vpack.c.b16 %v328_v53, %v328_v53  ;;  %v535_v0 = vunpack.c.l.b16 %v1455_v60  ;;  %v1697_v6 = vld [vmem:[%s1786_s28 + $0x38] sm:$0xff]  ;;  %v1010_v7 = vshll.u32 %v1696_v4, 16  ;;  %v1702_v10 = vld [vmem:[%s1786_s28 + $0x4] sm:$0xf0] }
  0x1a   : > { %v416_v42 = vsel %vm399_vm1, %v412_v40, %v415_v41  ;;  %v647_v2 = vpack.c.b16 %v642_v63, %v642_v63  ;;  %v722_v11 = vshrl.u32 %v1833_v23, 16  ;;  %v1630_v15 = vor.u32 %v1702_v10, %v1629_v8  ;;  %v1690_v28 = vld [vmem:[%s1786_s28 + $0x4] sm:$0xff]  ;;  %v1704_v40 = vld [vmem:[%s1786_s28 + $0x14] sm:$0xff] }
  0x1b   : > { %v423_v52 = vsel %vm399_vm1, %v419_v49, %v422_v50  ;;  %v427_v58 = vshll.u32 %v333_v56, 16  ;;  %v426_v61 = vor.u32 %v424_v57, %v422_v50  ;;  %v1892_v3 = vpack.c.b16 %v535_v0, %v535_v0  ;;  %v1699_v57 = vld [vmem:[%s1786_s28 + $0x48] sm:$0xff] }
  0x1c   : > { %934 = vmatpush.bf16.msra.mxu2 %v1695_v13  ;;  %789 = vmatpush.bf16.msra.mxu1 %v1689_v17  ;;  %v726_v13 = vrot.slane %v724_v5, 1  ;;  %v431_v16 = vshrl.u32 %v333_v56, 16  ;;  %v1008_v17 = vshrl.u32 %v1696_v4, 16  ;;  %v1019_v41 = vshrl.u32 %v1697_v6, 16 }
  0x1d   : > { %1079 = vmatpush.bf16.msra.mxu3 %v1701_v18  ;;  %1198 = vmatpush.bf16.msra.mxu0 %v1708_v19  ;;  %v429_v62 = vrot.slane %v427_v58, 1  ;;  %v1012_v18 = vrot.slane %v1010_v7, 1  ;;  %v1015_v19 = vshll.u32 %v1697_v6, 16  ;;  %v1159_v48 = vrot.slane %v1704_v40, 1 }
  0x1e   : > { %v739_v58 = vshrl.u32 %v1864_v44, 16  ;;  %v742_v59 = vshll.u32 %v1882_v55, 16  ;;  %v1031_v0 = vshll.u32 %v1699_v57, 16 }
  0x1f   : > { %v430_v1 = vsel %vm399_vm1, %v426_v61, %v429_v62  ;;  %v433_v25 = vor.u32 %v431_v16, %v429_v62  ;;  %v1013_v26 = vor.u32 %v1012_v18, %v1008_v17  ;;  %v1017_v27 = vrot.slane %v1015_v19, 1  ;;  %v1705_v62 = vld [vmem:[%s1786_s28 + $0x1c] sm:$0xff]  ;;  %v1645_v19 = vld [vmem:[%s1786_s28 + $0x24] sm:$0xf] }
  0x20   : > { %935 = vmatpush.bf16.msra.mxu2 %v1694_v34  ;;  %790 = vmatpush.bf16.msra.mxu1 %v1688_v37  ;;  %v732_v34 = vshrl.u32 %v1844_v33, 16  ;;  %v863_v37 = vshrl.u32 %v1690_v28, 16  ;;  %v1161_v6 = vrot.slane %v1705_v62, 1  ;;  %v1033_v8 = vrot.slane %v1031_v0, 1  ;;  %v1693_v16 = vld [vmem:[%s1786_s28 + $0x1c] sm:$0xff] }
  0x21   : > { %1080 = vmatpush.bf16.msra.mxu3 %v1700_v36  ;;  %1199 = vmatpush.bf16.msra.mxu0 %v1707_v45  ;;  %v1018_v30 = vsel %vm399_vm1, %v1013_v26, %v1017_v27  ;;  %v735_v36 = vshll.u32 %v1864_v44, 16  ;;  %v1021_v49 = vor.u32 %v1019_v41, %v1017_v27  ;;  %v886_v26 = vshll.u32 %v1693_v16, 16 }
  0x22   : > { %v856_v41 = vunpack.c.h.b16 %v1876_v51 }
  0x23   : > { %1399 = vmatmul.msk.bf16.gmra.mxu2 %vm262_vm0, %v1671_v20  ;;  %1425 = vmatmul.msk.bf16.vlgmr.msrb.gmra.mxu1 %vm262_vm0, %v1662_v21  ;;  %v730_v20 = vrot.slane %v728_v12, 1  ;;  %v727_v21 = vor.u32 %v726_v13, %v722_v11  ;;  %v737_v45 = vrot.slane %v735_v36, 1  ;;  %v1162_v13 = vsel %vm1155_vm2, %v1159_v48, %v1161_v6 }
  0x26   : > { %1526 = vmatmul.msk.bf16.vlgmr.msrb.gmra.mxu0 %vm262_vm0, %v1682_v22  ;;  %1484 = vmatmul.msk.bf16.vlgmr.msrb.gmra.mxu3 %vm262_vm0, %v1833_v23  ;;  %v1156_v22 = vrot.slane %v1630_v15, 1  ;;  %v731_v23 = vsel %vm399_vm1, %v727_v21, %v730_v20  ;;  %v1001_v15 = vunpack.c.h.b16 %v1800_v9 }
  0x28   : > { %v1006_v18 = vpack.c.b16 %v1001_v15, %v1001_v15 }
  0x33   : > { %1426 = vmatmul.msk.bf16.gmra.mxu1 %vm262_vm0, %v1663_v24  ;;  %1442 = vmatmul.msk.bf16.vlgmr.msrb.gmra.mxu2 %vm262_vm0, %v409_v31  ;;  %v1157_v24 = vrot.slane %v1703_v14, 1  ;;  %v1691_v31 = vld [vmem:[%s1786_s28 + $0xc] sm:$0xff] }
  0x34   : > { %v870_v39 = vshll.u32 %v1691_v31, 16  ;;  %v874_v60 = vshrl.u32 %v1691_v31, 16 }
  0x35   : > { %v1158_v29 = vsel %vm1155_vm2, %v1156_v22, %v1157_v24  ;;  %v1160_v53 = vsel %vm1155_vm2, %v1157_v24, %v1159_v48  ;;  %v746_v22 = vshrl.u32 %v1882_v55, 16  ;;  %v749_v24 = vshll.u32 %v1892_v3, 16 }
  0x36   : > { %1527 = vmatmul.msk.bf16.gmra.mxu0 %vm262_vm0, %v1683_v32  ;;  %1485 = vmatmul.msk.bf16.gmra.mxu3 %vm262_vm0, %v1844_v33  ;;  %v865_v32 = vshll.u32 %v1690_v28, 16  ;;  %v872_v47 = vrot.slane %v870_v39, 1  ;;  %v1035_v28 = vshrl.u32 %v1699_v57, 16  ;;  %v861_v48 = vpack.c.b16 %v856_v41, %v856_v41 }
  0x37   : > { %v751_v31 = vrot.slane %v749_v24, 1 }
  0x38   : > { %v867_v38 = vrot.slane %v865_v32, 1  ;;  %v876_v4 = vor.u32 %v874_v60, %v872_v47  ;;  %v894_v51 = vshll.u32 %v861_v48, 16  ;;  %v1043_v60 = vshrl.u32 %v1006_v18, 16 }
  0x43   : > { %1427 = vmatmul.msk.bf16.gmra.mxu1 %vm262_vm0, %v1664_v35  ;;  %1443 = vmatmul.msk.bf16.gmra.mxu2 %vm262_vm0, %v416_v42  ;;  %v1698_v35 = vld [vmem:[%s1786_s28 + $0x40] sm:$0xff] }
  0x44   : > { %v1023_v42 = vshll.u32 %v1698_v35, 16  ;;  %v1027_v63 = vshrl.u32 %v1698_v35, 16 }
  0x46   : > { %1528 = vmatmul.msk.bf16.gmra.mxu0 %vm262_vm0, %v1684_v43  ;;  %1486 = vmatmul.msk.bf16.gmra.mxu3 %vm262_vm0, %v1864_v44  ;;  %v734_v43 = vor.u32 %v732_v34, %v730_v20  ;;  %v1025_v50 = vrot.slane %v1023_v42, 1  ;;  %v1706_v20 = vld [vmem:[%s1786_s28 + $0x24] sm:$0x10]  ;;  %v888_v34 = vrot.slane %v886_v26, 1 }
  0x48   : > { %v738_v33 = vsel %vm399_vm1, %v734_v43, %v737_v45  ;;  %v1029_v7 = vor.u32 %v1027_v63, %v1025_v50 }
  0x4a   : > { %v1034_v14 = vsel %vm399_vm1, %v1029_v7, %v1033_v8 }
  0x53   : > { %1428 = vmatmul.msk.bf16.gmra.mxu1 %vm262_vm0, %v1665_v46  ;;  %1444 = vmatmul.msk.bf16.gmra.mxu2 %vm262_vm0, %v423_v52  ;;  %v868_v46 = vor.u32 %v867_v38, %v863_v37  ;;  %v1037_v37 = vor.u32 %v1035_v28, %v1033_v8 }
  0x55   : > { %v873_v52 = vsel %vm399_vm1, %v868_v46, %v872_v47 }
  0x56   : > { %1529 = vmatmul.msk.bf16.gmra.mxu0 %vm262_vm0, %v1685_v54  ;;  %1487 = vmatmul.msk.bf16.gmra.mxu3 %vm262_vm0, %v1882_v55  ;;  %v1026_v54 = vsel %vm399_vm1, %v1021_v49, %v1025_v50 }
  0x63   : > { %1429 = vmatmul.msk.bf16.gmra.mxu1 %vm262_vm0, %v333_v56  ;;  %1445 = vmatmul.msk.bf16.gmra.mxu2 %vm262_vm0, %v430_v1  ;;  %v1692_v56 = vld [vmem:[%s1786_s28 + $0x14] sm:$0xff]  ;;  %v741_v1 = vor.u32 %v739_v58, %v737_v45  ;;  %v896_v58 = vrot.slane %v894_v51, 1 }
  0x64   : > { %v878_v61 = vshll.u32 %v1692_v56, 16 }
  0x66   : > { %1530 = vmatmul.msk.bf16.gmra.mxu0 %vm262_vm0, %v647_v2  ;;  %1488 = vmatmul.msk.bf16.gmra.mxu3 %vm262_vm0, %v1892_v3  ;;  %v744_v2 = vrot.slane %v742_v59, 1  ;;  %v880_v5 = vrot.slane %v878_v61, 1 }
  0x68   : > { %v745_v44 = vsel %vm399_vm1, %v741_v1, %v744_v2  ;;  %v881_v11 = vsel %vm399_vm1, %v876_v4, %v880_v5 }
  0x73   : > { %1446 = vmatmul.msk.bf16.gmra.mxu2 %vm262_vm0, %v433_v25  ;;  %1543 = vmatmul.msk.bf16.vlgmr.msra.gmra.mxu1 %vm262_vm0, %v731_v23  ;;  %v882_v25 = vshrl.u32 %v1692_v56, 16  ;;  %v1646_v23 = vor.u32 %v1706_v20, %v1645_v19  ;;  %v753_v56 = vshrl.u32 %v1892_v3, 16 }
  0x75   : > { %v884_v32 = vor.u32 %v882_v25, %v880_v5  ;;  %v1163_v36 = vrot.slane %v1646_v23, 1  ;;  %v755_v61 = vor.u32 %v753_v56, %v751_v31 }
  0x76   : > { %1655 = vmatmul.msk.bf16.vlgmr.msra.gmra.mxu0 %vm262_vm0, %v1158_v29  ;;  %1618 = vmatmul.msk.bf16.vlgmr.msra.gmra.mxu3 %vm262_vm0, %v1018_v30  ;;  %v1039_v29 = vshll.u32 %v1006_v18, 16  ;;  %v748_v30 = vor.u32 %v746_v22, %v744_v2 }
  0x77   : > { %v889_v40 = vsel %vm399_vm1, %v884_v32, %v888_v34  ;;  %v1164_v46 = vsel %vm1155_vm2, %v1161_v6, %v1163_v36 }
  0x78   : > { %v1041_v38 = vrot.slane %v1039_v29, 1  ;;  %v752_v39 = vsel %vm399_vm1, %v748_v30, %v751_v31 }
  0x7a   : > { %v1042_v47 = vsel %vm399_vm1, %v1037_v37, %v1041_v38  ;;  %v1045_v2 = vor.u32 %v1043_v60, %v1041_v38 }
  0x83   : > { %1544 = vmatmul.msk.bf16.gmra.mxu1 %vm262_vm0, %v738_v33  ;;  %1576 = vmatmul.msk.bf16.vlgmr.msra.gmra.mxu2 %vm262_vm0, %v873_v52  ;;  %v890_v33 = vshrl.u32 %v1693_v16, 16 }
  0x85   : > { %v892_v57 = vor.u32 %v890_v33, %v888_v34 }
  0x86   : > { %1656 = vmatmul.msk.bf16.gmra.mxu0 %vm262_vm0, %v1160_v53  ;;  %1619 = vmatmul.msk.bf16.gmra.mxu3 %vm262_vm0, %v1026_v54 }
  0x87   : > { %v897_v63 = vsel %vm399_vm1, %v892_v57, %v896_v58 }
  0x90   : > { %v1933_v10 = vpop.f32.mrf.mxu1 }
  0x93   : > { %v287_v12 = vpop.f32.mrf.mxu0  ;;  %1545 = vmatmul.msk.bf16.gmra.mxu1 %vm262_vm0, %v745_v44  ;;  %1577 = vmatmul.msk.bf16.gmra.mxu2 %vm262_vm0, %v881_v11 }
  0x96   : > { %1657 = vmatmul.msk.bf16.gmra.mxu0 %vm262_vm0, %v1162_v13  ;;  %v1944_v17 = vpop.f32.mrf.mxu2  ;;  %1620 = vmatmul.msk.bf16.gmra.mxu3 %vm262_vm0, %v1034_v14 }
  0x98   : > { %v294_v21 = vpop.f32.mrf.mxu1 }
  0x99   : > { %v1951_v27 = vpop.f32.mrf.mxu3 }
  0x9b   : > { %v289_v9 = vpop.f32.mrf.mxu0 }
  0x9e   : > { %v1953_v35 = vpop.f32.mrf.mxu2 }
  0xa0   : > { %v370_v55 = vpop.f32.mrf.mxu1 }
  0xa1   : > { %v371_v42 = vadd.f32 %v370_v55, %v287_v12  ;;  %v309_v43 = vpop.f32.mrf.mxu3  ;;  %v898_v12 = vshrl.u32 %v861_v48, 16 }
  0xa3   : > { %v684_v45 = vpop.f32.mrf.mxu0  ;;  %1546 = vmatmul.msk.bf16.gmra.mxu1 %vm262_vm0, %v752_v39  ;;  %1578 = vmatmul.msk.bf16.gmra.mxu2 %vm262_vm0, %v889_v40  ;;  %v900_v15 = vor.u32 %v898_v12, %v896_v58 }
  0xa6   : > { %1658 = vmatmul.msk.bf16.gmra.mxu0 %vm262_vm0, %v1164_v46  ;;  %v302_v49 = vpop.f32.mrf.mxu2  ;;  %1621 = vmatmul.msk.bf16.gmra.mxu3 %vm262_vm0, %v1042_v47 }
  0xa8   : > { %v372_v50 = vpop.f32.mrf.mxu1 }
  0xa9   : > { %v373_v52 = vadd.f32 %v372_v50, %v289_v9  ;;  %v577_v53 = vpop.f32.mrf.mxu3 }
  0xab   : > { %v686_v54 = vpop.f32.mrf.mxu0 }
  0xae   : > { %v304_v59 = vpop.f32.mrf.mxu2 }
  0xb0   : > { %v375_v62 = vpop.f32.mrf.mxu1 }
  0xb1   : > { %v376_v0 = vadd.f32 %v375_v62, %v1933_v10  ;;  %v579_v1 = vpop.f32.mrf.mxu3 }
  0xb3   : > { %v689_v4 = vpop.f32.mrf.mxu0  ;;  %1547 = vmatmul.msk.bf16.gmra.mxu1 %vm262_vm0, %v755_v61  ;;  %1579 = vmatmul.msk.bf16.gmra.mxu2 %vm262_vm0, %v897_v63 }
  0xb6   : > { %1659 = vmatmul.msk.bf16.gmra.mxu0 %vm262_vm0, %v1163_v36  ;;  %v470_v3 = vpop.f32.mrf.mxu2  ;;  %1622 = vmatmul.msk.bf16.gmra.mxu3 %vm262_vm0, %v1045_v2 }
  0xb7   : > { %v494_v5 = vadd.f32 %v470_v3, %v371_v42 }
  0xb8   : > { %v377_v6 = vpop.f32.mrf.mxu1 }
  0xb9   : > { %v601_v7 = vadd.f32 %v577_v53, %v494_v5  ;;  %v378_v8 = vadd.f32 %v377_v6, %v294_v21  ;;  %v582_v44 = vpop.f32.mrf.mxu3 }
  0xbb   : > { %v691_v11 = vpop.f32.mrf.mxu0  ;;  %v1971_v10 = vadd.f32 %v684_v45, %v601_v7 }
  0xbe   : > { %v472_v13 = vpop.f32.mrf.mxu2 }
  0xbf   : > { %v495_v14 = vadd.f32 %v472_v13, %v373_v52 }
  0xc0   : > { %v380_v16 = vpop.f32.mrf.mxu1 }
  0xc1   : > { %v602_v18 = vadd.f32 %v579_v1, %v495_v14  ;;  %v381_v19 = vadd.f32 %v380_v16, %v1944_v17  ;;  %v584_v20 = vpop.f32.mrf.mxu3 }
  0xc3   : > { %v694_v22 = vpop.f32.mrf.mxu0  ;;  %1580 = vmatmul.msk.bf16.gmra.mxu2 %vm262_vm0, %v900_v15  ;;  %v1975_v24 = vadd.f32 %v686_v54, %v602_v18 }
  0xc6   : > { %v475_v25 = vpop.f32.mrf.mxu2 }
  0xc7   : > { %v496_v21 = vadd.f32 %v475_v25, %v376_v0  ;;  %v1997_v25 = vld [vmem:[%s2058_s2] ss:$0 sm:$0xff] }
  0xc8   : > { %v382_v26 = vpop.f32.mrf.mxu1 }
  0xc9   : > { %v603_v9 = vadd.f32 %v582_v44, %v496_v21  ;;  %v383_v23 = vadd.f32 %v382_v26, %v1953_v35  ;;  %v587_v28 = vpop.f32.mrf.mxu3 }
  0xcb   : > { %v696_v29 = vpop.f32.mrf.mxu0  ;;  %v1978_v30 = vadd.f32 %v689_v4, %v603_v9 }
  0xce   : > { %v477_v31 = vpop.f32.mrf.mxu2 }
  0xcf   : > { %v497_v32 = vadd.f32 %v477_v31, %v378_v8 }
  0xd0   : > { %v385_v34 = vpop.f32.mrf.mxu1 }
  0xd1   : > { %v604_v17 = vadd.f32 %v584_v20, %v497_v32  ;;  %v386_v36 = vadd.f32 %v385_v34, %v302_v49  ;;  %v589_v37 = vpop.f32.mrf.mxu3 }
  0xd3   : > { %v699_v38 = vpop.f32.mrf.mxu0  ;;  %v1980_v55 = vadd.f32 %v691_v11, %v604_v17 }
  0xd6   : > { %v480_v39 = vpop.f32.mrf.mxu2 }
  0xd7   : > { %v498_v40 = vadd.f32 %v480_v39, %v381_v19 }
  0xd8   : > { %v387_v41 = vpop.f32.mrf.mxu1 }
  0xd9   : > { %v605_v42 = vadd.f32 %v587_v28, %v498_v40  ;;  %v388_v43 = vadd.f32 %v387_v41, %v304_v59  ;;  %v592_v45 = vpop.f32.mrf.mxu3 }
  0xdb   : > { %v701_v35 = vpop.f32.mrf.mxu0  ;;  %v1982_v46 = vadd.f32 %v694_v22, %v605_v42 }
  0xde   : > { %v482_v47 = vpop.f32.mrf.mxu2 }
  0xdf   : > { %v499_v48 = vadd.f32 %v482_v47, %v383_v23  ;;  %v2002_v23 = vld [vmem:[%s2059_s3] ss:$0 sm:$0xff] }
  0xe0   : > { %v390_v50 = vpop.f32.mrf.mxu1 }
  0xe1   : > { %v606_v33 = vadd.f32 %v589_v37, %v499_v48  ;;  %v391_v51 = vadd.f32 %v390_v50, %v1951_v27  ;;  %v594_v49 = vpop.f32.mrf.mxu3 }
  0xe3   : > { %v704_v52 = vpop.f32.mrf.mxu0  ;;  %v1985_v53 = vadd.f32 %v696_v29, %v606_v33 }
  0xe6   : > { %v485_v54 = vpop.f32.mrf.mxu2 }
  0xe7   : > { %v500_v56 = vadd.f32 %v485_v54, %v386_v36 }
  0xe8   : > { %v392_v57 = vpop.f32.mrf.mxu1 }
  0xe9   : > { %v607_v58 = vadd.f32 %v592_v45, %v500_v56  ;;  %v597_v60 = vpop.f32.mrf.mxu3 }
  0xeb   : > { %v706_v59 = vpop.f32.mrf.mxu0  ;;  %v1987_v61 = vadd.f32 %v699_v38, %v607_v58 }
  0xee   : > { %v487_v62 = vpop.f32.mrf.mxu2 }
  0xef   : > { %v501_v63 = vadd.f32 %v487_v62, %v388_v43 }
  0xf0   : > { %v792_v0 = vpop.f32.mrf.mxu1 }
  0xf1   : > { %v608_v1 = vadd.f32 %v594_v49, %v501_v63  ;;  %v599_v2 = vpop.f32.mrf.mxu3  ;;  %v816_v16 = vadd.f32 %v792_v0, %v1971_v10 }
  0xf3   : > { %v1201_v4 = vpop.f32.mrf.mxu0  ;;  %v1989_v3 = vadd.f32 %v701_v35, %v608_v1 }
  0xf6   : > { %v490_v27 = vpop.f32.mrf.mxu2 }
  0xf7   : > { %v502_v5 = vadd.f32 %v490_v27, %v391_v51 }
  0xf8   : > { %v794_v6 = vpop.f32.mrf.mxu1 }
  0xf9   : > { %v609_v7 = vadd.f32 %v597_v60, %v502_v5  ;;  %v1082_v8 = vpop.f32.mrf.mxu3  ;;  %v817_v28 = vadd.f32 %v794_v6, %v1975_v24 }
  0xfb   : > { %v1203_v44 = vpop.f32.mrf.mxu0  ;;  %v1991_v11 = vadd.f32 %v704_v52, %v609_v7 }
  0xfe   : > { %v492_v12 = vpop.f32.mrf.mxu2 }
 0x100   : > { %v797_v13 = vpop.f32.mrf.mxu1 }
 0x101   : > { %v1084_v14 = vpop.f32.mrf.mxu3  ;;  %v818_v40 = vadd.f32 %v797_v13, %v1978_v30 }
 0x103   : > { %v1206_v15 = vpop.f32.mrf.mxu0 }
 0x106   : > { %v937_v18 = vpop.f32.mrf.mxu2 }
 0x107   : > { %v961_v19 = vadd.f32 %v937_v18, %v816_v16 }
 0x108   : > { %v799_v20 = vpop.f32.mrf.mxu1 }
 0x109   : > { %v1106_v22 = vadd.f32 %v1082_v8, %v961_v19  ;;  %v1087_v21 = vpop.f32.mrf.mxu3  ;;  %v819_v52 = vadd.f32 %v799_v20, %v1980_v55 }
 0x10b   : > { %v1208_v26 = vpop.f32.mrf.mxu0  ;;  %v1225_v9 = vadd.f32 %v1201_v4, %v1106_v22 }
 0x10d   : > { %v1238_v10 = vmul.f32 %v1997_v25, %v1225_v9 }
 0x10e   : > { %v939_v29 = vpop.f32.mrf.mxu2 }
 0x10f   : > { %v1251_v31 = vadd.f32 %v2002_v23, %v1238_v10  ;;  %v962_v32 = vadd.f32 %v939_v29, %v817_v28 }
 0x110   : > { %v802_v34 = vpop.f32.mrf.mxu1 }
 0x111   : > { %vm1260_vm3 = vcmp.ge.f32.partialorder %v1251_v31, 0.0  ;;  %v1269_v17 = vmul.f32 0.2, %v1251_v31  ;;  %v1107_v36 = vadd.f32 %v1084_v14, %v962_v32  ;;  %v1089_v37 = vpop.f32.mrf.mxu3  ;;  %v820_v2 = vadd.f32 %v802_v34, %v1982_v46 }
 0x113   : > { %v1211_v38 = vpop.f32.mrf.mxu0  ;;  %v1278_v24 = vsel %vm1260_vm3, %v1251_v31, %v1269_v17  ;;  %v1226_v39 = vadd.f32 %v1203_v44, %v1107_v36 }
 0x114   : > { %1287 = vst.msk [vmem:[%s2011_s14] sm:$0xff] %vm262_vm0, %v1278_v24 }
 0x115   : > { %v1239_v41 = vmul.f32 %v1997_v25, %v1226_v39 }
 0x116   : > { %v942_v42 = vpop.f32.mrf.mxu2 }
 0x117   : > { %v1252_v43 = vadd.f32 %v2002_v23, %v1239_v41  ;;  %v963_v45 = vadd.f32 %v942_v42, %v818_v40 }
 0x118   : > { %v804_v35 = vpop.f32.mrf.mxu1 }
 0x119   : > { %vm1261_vm4 = vcmp.ge.f32.partialorder %v1252_v43, 0.0  ;;  %v1270_v47 = vmul.f32 0.2, %v1252_v43  ;;  %v1108_v48 = vadd.f32 %v1087_v21, %v963_v45  ;;  %v1092_v50 = vpop.f32.mrf.mxu3 }
 0x11b   : > { %v1213_v33 = vpop.f32.mrf.mxu0  ;;  %v1279_v51 = vsel %vm1261_vm4, %v1252_v43, %v1270_v47  ;;  %v1227_v49 = vadd.f32 %v1206_v15, %v1108_v48  ;;  %v821_v15 = vadd.f32 %v804_v35, %v1985_v53 }
 0x11c   : > { %1288 = vst.msk [vmem:[%s2011_s14 + $0x8] sm:$0xff] %vm262_vm0, %v1279_v51 }
 0x11d   : > { %v1240_v30 = vmul.f32 %v1997_v25, %v1227_v49 }
 0x11e   : > { %v944_v54 = vpop.f32.mrf.mxu2 }
 0x11f   : > { %v1253_v56 = vadd.f32 %v2002_v23, %v1240_v30  ;;  %v964_v57 = vadd.f32 %v944_v54, %v819_v52 }
 0x120   : > { %v807_v58 = vpop.f32.mrf.mxu1 }
 0x121   : > { %vm1262_vm5 = vcmp.ge.f32.partialorder %v1253_v56, 0.0  ;;  %v1271_v60 = vmul.f32 0.2, %v1253_v56  ;;  %v1109_v59 = vadd.f32 %v1089_v37, %v964_v57  ;;  %v1094_v62 = vpop.f32.mrf.mxu3  ;;  %v822_v29 = vadd.f32 %v807_v58, %v1987_v61 }
 0x123   : > { %v1216_v63 = vpop.f32.mrf.mxu0  ;;  %v1280_v0 = vsel %vm1262_vm5, %v1253_v56, %v1271_v60  ;;  %v1228_v1 = vadd.f32 %v1208_v26, %v1109_v59 }
 0x124   : > { %1289 = vst.msk [vmem:[%s2011_s14 + $0x10] sm:$0xff] %vm262_vm0, %v1280_v0 }
 0x125   : > { %v1241_v55 = vmul.f32 %v1997_v25, %v1228_v1 }
 0x126   : > { %v947_v4 = vpop.f32.mrf.mxu2 }
 0x127   : > { %v1254_v27 = vadd.f32 %v2002_v23, %v1241_v55  ;;  %v965_v5 = vadd.f32 %v947_v4, %v820_v2 }
 0x128   : > { %v809_v6 = vpop.f32.mrf.mxu1 }
 0x129   : > { %vm1263_vm6 = vcmp.ge.f32.partialorder %v1254_v27, 0.0  ;;  %v1272_v7 = vmul.f32 0.2, %v1254_v27  ;;  %v1110_v8 = vadd.f32 %v1092_v50, %v965_v5  ;;  %v1097_v44 = vpop.f32.mrf.mxu3  ;;  %v823_v41 = vadd.f32 %v809_v6, %v1989_v3 }
 0x12b   : > { %v1218_v12 = vpop.f32.mrf.mxu0  ;;  %v1281_v13 = vsel %vm1263_vm6, %v1254_v27, %v1272_v7  ;;  %v1229_v14 = vadd.f32 %v1211_v38, %v1110_v8 }
 0x12c   : > { %1290 = vst.msk [vmem:[%s2011_s14 + $0x18] sm:$0xff] %vm262_vm0, %v1281_v13 }
 0x12d   : > { %v1242_v46 = vmul.f32 %v1997_v25, %v1229_v14 }
 0x12e   : > { %v949_v16 = vpop.f32.mrf.mxu2 }
 0x12f   : > { %v1255_v18 = vadd.f32 %v2002_v23, %v1242_v46  ;;  %v966_v19 = vadd.f32 %v949_v16, %v821_v15 }
 0x130   : > { %v812_v20 = vpop.f32.mrf.mxu1 }
 0x131   : > { %vm1264_vm7 = vcmp.ge.f32.partialorder %v1255_v18, 0.0  ;;  %v1273_v22 = vmul.f32 0.2, %v1255_v18  ;;  %v1111_v21 = vadd.f32 %v1094_v62, %v966_v19  ;;  %v1099_v26 = vpop.f32.mrf.mxu3  ;;  %v824_v51 = vadd.f32 %v812_v20, %v1991_v11 }
 0x133   : > { %v1221_v9 = vpop.f32.mrf.mxu0  ;;  %v1282_v28 = vsel %vm1264_vm7, %v1255_v18, %v1273_v22  ;;  %v1230_v10 = vadd.f32 %v1213_v33, %v1111_v21 }
 0x134   : > { %1291 = vst.msk [vmem:[%s2011_s14 + $0x20] sm:$0xff] %vm262_vm0, %v1282_v28 }
 0x135   : > { %v1243_v53 = vmul.f32 %v1997_v25, %v1230_v10 }
 0x136   : > { %v952_v31 = vpop.f32.mrf.mxu2 }
 0x137   : > { %v1256_v32 = vadd.f32 %v2002_v23, %v1243_v53  ;;  %v967_v34 = vadd.f32 %v952_v31, %v822_v29 }
 0x138   : > { %v814_v17 = vpop.f32.mrf.mxu1 }
 0x139   : > { %vm1265_vm8 = vcmp.ge.f32.partialorder %v1256_v32, 0.0  ;;  %v1274_v36 = vmul.f32 0.2, %v1256_v32  ;;  %v1112_v37 = vadd.f32 %v1097_v44, %v967_v34  ;;  %v1102_v38 = vpop.f32.mrf.mxu3 }
 0x13b   : > { %v1223_v24 = vpop.f32.mrf.mxu0  ;;  %v1283_v39 = vsel %vm1265_vm8, %v1256_v32, %v1274_v36  ;;  %v1231_v40 = vadd.f32 %v1216_v63, %v1112_v37 }
 0x13c   : > { %1292 = vst.msk [vmem:[%s2011_s14 + $0x28] sm:$0xff] %vm262_vm0, %v1283_v39 }
 0x13d   : > { %v1244_v61 = vmul.f32 %v1997_v25, %v1231_v40 }
 0x13e   : > { %v954_v42 = vpop.f32.mrf.mxu2 }
 0x13f   : > { %v1257_v43 = vadd.f32 %v2002_v23, %v1244_v61  ;;  %v968_v45 = vadd.f32 %v954_v42, %v823_v41 }
 0x141   : > { %vm1266_vm9 = vcmp.ge.f32.partialorder %v1257_v43, 0.0  ;;  %v1275_v35 = vmul.f32 0.2, %v1257_v43  ;;  %v1113_v47 = vadd.f32 %v1099_v26, %v968_v45  ;;  %v1104_v48 = vpop.f32.mrf.mxu3 }
 0x143   : > { %v1284_v50 = vsel %vm1266_vm9, %v1257_v43, %v1275_v35  ;;  %v1232_v33 = vadd.f32 %v1218_v12, %v1113_v47 }
 0x144   : > { %1293 = vst.msk [vmem:[%s2011_s14 + $0x30] sm:$0xff] %vm262_vm0, %v1284_v50 }
 0x145   : > { %v1245_v49 = vmul.f32 %v1997_v25, %v1232_v33 }
 0x146   : > { %v957_v3 = vpop.f32.mrf.mxu2 }
 0x147   : > { %v1258_v52 = vadd.f32 %v2002_v23, %v1245_v49  ;;  %v969_v30 = vadd.f32 %v957_v3, %v824_v51 }
 0x149   : > { %vm1267_vm10 = vcmp.ge.f32.partialorder %v1258_v52, 0.0  ;;  %v1276_v54 = vmul.f32 0.2, %v1258_v52  ;;  %v1114_v56 = vadd.f32 %v1102_v38, %v969_v30 }
 0x14b   : > { %v1285_v57 = vsel %vm1267_vm10, %v1258_v52, %v1276_v54  ;;  %v1233_v58 = vadd.f32 %v1221_v9, %v1114_v56 }
 0x14c   : > { %1294 = vst.msk [vmem:[%s2011_s14 + $0x38] sm:$0xff] %vm262_vm0, %v1285_v57 }
 0x14d   : > { %v1246_v60 = vmul.f32 %v1997_v25, %v1233_v58 }
 0x14e   : > { %v959_v59 = vpop.f32.mrf.mxu2 }
 0x14f   : > { %v1259_v62 = vadd.f32 %v2002_v23, %v1246_v60 }
 0x151   : > { %vm1268_vm11 = vcmp.ge.f32.partialorder %v1259_v62, 0.0  ;;  %v1277_v11 = vmul.f32 0.2, %v1259_v62 }
 0x153   : > { %v1286_v63 = vsel %vm1268_vm11, %v1259_v62, %v1277_v11 }
 0x154   : > { %1296 = vst.msk [vmem:[%s2011_s14 + $0x40] sm:$0x7f] %vm1295_vm12, %v1286_v63 }
 0x155 PF: > { %s14_s15 = sadd.s32 1, %s1733_s15  }
 0x156   : > { %p11_p4 = scmp.ge.s32.totalorder %s14_s15, 4  }
 0x158   :  { %13 = sbr.rel (!%p11_p4) target bundleno = 1 (0x1), region = 77 }

// kernel: reverse
= control target key start
LH: loop header
LB: loop body
LE: loop exit
PB: predicated region body
PF: predicated region fallthrough
CT: control target
= control target key end

     0   :  { %s125_s0 = inlined_call_operand.vmem [shape: f32[3,3,128,1], index: 0, kind: input, shape index: {}]   ;;  %s126_s1 = inlined_call_operand.vmem [shape: bf16[3,3,128,1], index: 1, kind: output, shape index: {}]  }
   0x1   :  { %v45_v0 = vld [vmem:[%s125_s0 + $0x8] sm:$0x1]  ;;  %v46_v1 = vld [vmem:[%s125_s0 + $0x5] sm:$0x1]  ;;  %v48_v2 = vld [vmem:[%s125_s0 + $0x2] sm:$0x1] }
   0x2   :  { %v4_v3 = vpack.c.bf16 0.0, %v45_v0  ;;  %v9_v4 = vpack.c.bf16 0.0, %v46_v1  ;;  %v14_v5 = vpack.c.bf16 0.0, %v48_v2  ;;  %v50_v6 = vld [vmem:[%s125_s0 + $0x7] sm:$0x1] }
   0x3   :  { %v19_v7 = vpack.c.bf16 0.0, %v50_v6  ;;  %v52_v8 = vld [vmem:[%s125_s0 + $0x4] sm:$0x1]  ;;  %v54_v9 = vld [vmem:[%s125_s0 + $0x1] sm:$0x1] }
   0x4   :  { %5 = vst [vmem:[%s126_s1] sm:$0x1] %v4_v3  ;;  %v24_v10 = vpack.c.bf16 0.0, %v52_v8  ;;  %v56_v11 = vld [vmem:[%s125_s0 + $0x6] sm:$0x1]  ;;  %v29_v12 = vpack.c.bf16 0.0, %v54_v9 }
   0x5   :  { %47 = vst [vmem:[%s126_s1 + $0x3] sm:$0x1] %v9_v4  ;;  %v58_v13 = vld [vmem:[%s125_s0 + $0x3] sm:$0x1]  ;;  %v34_v14 = vpack.c.bf16 0.0, %v56_v11 }
   0x6   :  { %49 = vst [vmem:[%s126_s1 + $0x6] sm:$0x1] %v14_v5  ;;  %v41_v15 = vld [vmem:[%s125_s0] sm:$0x1]  ;;  %v39_v16 = vpack.c.bf16 0.0, %v58_v13 }
   0x7   :  { %51 = vst [vmem:[%s126_s1 + $0x1] sm:$0x1] %v19_v7  ;;  %v43_v17 = vpack.c.bf16 0.0, %v41_v15 }
   0x8   :  { %53 = vst [vmem:[%s126_s1 + $0x4] sm:$0x1] %v24_v10 }
   0x9   :  { %55 = vst [vmem:[%s126_s1 + $0x7] sm:$0x1] %v29_v12 }
   0xa   :  { %57 = vst [vmem:[%s126_s1 + $0x2] sm:$0x1] %v34_v14 }
   0xb   :  { %59 = vst [vmem:[%s126_s1 + $0x5] sm:$0x1] %v39_v16 }
   0xc   :  { %60 = vst [vmem:[%s126_s1 + $0x8] sm:$0x1] %v43_v17 }

// kernel: propose_forward.8
= control target key start
LH: loop header
LB: loop body
LE: loop exit
PB: predicated region body
PF: predicated region fallthrough
CT: control target
= control target key end

     0   :  { %s1058_s15 = smov 0   ;;  %s1203_s0 = inlined_call_operand.vmem [shape: bf16[2,4,25,32], index: 0, kind: input, shape index: {}]   ;;  %s1204_s1 = inlined_call_operand.vmem [shape: bf16[9,32,64], index: 1, kind: input, shape index: {}]   ;;  %s1205_s2 = inlined_call_operand.vmem [shape: f32[1,64], index: 2, kind: input, shape index: {}]   ;;  %s1206_s3 = inlined_call_operand.vmem [shape: f32[1,64], index: 3, kind: input, shape index: {}]   ;;  %s1207_s4 = inlined_call_operand.vmem [shape: f32[2,19,64], index: 4, kind: output, shape index: {}]  }
   0x1 LB: > { %s815_s16 = sadd.s32 4294967295, %s1031_s15   ;;  %p819_p0 = scmp.ge.s32.totalorder %s1031_s15, 1  ;;  %s1031_s15 = sphi %s1058_s15, %s14_s15  }
   0x2   : > { %p162_p1 = scmp.lt.s32.totalorder %s1031_s15, 3 }
   0x4   : > { %p163_p2 = pnand %p819_p0, %p162_p1 }
   0x5   : > { %p188_p3 = scmp.lt.s32.totalorder (!%p163_p2), %s815_s16, 1 }
   0x6   : > { %166 = sbr.rel (%p163_p2) target bundleno = 225 (0xe1), region = 36 }
   0xb   : > { %v978_v0 = vld [vmem:[%s1204_s1 + $0x18] sm:$0xff]  ;;  %v980_v1 = vld [vmem:[%s1204_s1 + $0x28] sm:$0xff]  ;;  %v977_v3 = vld [vmem:[%s1204_s1 + $0x10] sm:$0xff]  ;;  %s1209_s16 = smov (!%p188_p3, %s815_s16), 1  ;;  %vm235_vm0 = vcmask 261120   ;;  %vm689_vm3 = vcmask 1044480  }
   0xc   : > { %v983_v2 = vld [vmem:[%s1204_s1 + $0x38] sm:$0xff]  ;;  %248 = vmatpush.bf16.msra.mxu0 %v978_v0  ;;  %1012 = vmatpush.bf16.msra.mxu1 %v978_v0  ;;  %v976_v4 = vld [vmem:[%s1204_s1 + $0x8] sm:$0xff]  ;;  %v979_v5 = vld [vmem:[%s1204_s1 + $0x20] sm:$0xff]  ;;  %s974_s29 = sshll.u32 %s1209_s16, 6  ;;  %vm309_vm1 = vsmask.f32 7424 }
   0xd   : > { %347 = vmatpush.bf16.msra.mxu2 %v980_v1  ;;  %403 = vmatpush.bf16.msra.mxu3 %v983_v2  ;;  %v982_v6 = vld [vmem:[%s1204_s1 + $0x30] sm:$0xff]  ;;  %v986_v7 = vld [vmem:[%s1204_s1 + $0x48] sm:$0xff]  ;;  %s1099_s12 = scalar_lea.vmem %s1203_s0, %s974_s29  ;;  %v992_v9 = vld [vmem:[%s1204_s1 + $0x78] sm:$0xff]  ;;  %vm544_vm2 = vsmask.f32 5376  ;;  %s1014_s11 = smul.u32 24, %s1209_s16 }
   0xe   : > { %v990_v8 = vld [vmem:[%s1204_s1 + $0x68] sm:$0xff]  ;;  %v1005_v10 = vld [vmem:[%s1099_s12 + $0x10] sm:$0xff]   ;;  %v825_v11 = vld [vmem:[%s1099_s12 + $0x18] sm:$0x3]  ;;  %vm755_vm5 = vcmask 523264   ;;  %vm758_vm8 = vcmask 518144  }
   0xf   : > { %v998_v12 = vld [vmem:[%s1099_s12] sm:$0xff]   ;;  %v220_v13 = vunpack.c.l.b16 %v825_v11  ;;  %v201_v14 = vld [vmem:[%s1099_s12 + $0x8] sm:$0x3]  ;;  %v988_v23 = vld [vmem:[%s1204_s1 + $0x58] sm:$0xff]  ;;  %s1193_s14 = scalar_lea.vmem %s1207_s4, %s1014_s11 }
  0x10   : > { %249 = vmatpush.bf16.msra.mxu0 %v977_v3  ;;  %1013 = vmatpush.bf16.msra.mxu1 %v977_v3  ;;  %v312_v15 = vshll.u32 %v998_v12, 16  ;;  %v1109_v16 = vld [vmem:[%s1099_s12 + $0x20] sm:$0xff]  ;;  %v265_v17 = vunpack.c.l.b16 %v201_v14  ;;  %v310_v18 = vshrl.u32 %v998_v12, 16  ;;  %v996_v24 = vld [vmem:[%s1204_s1 + $0x88] sm:$0xff]  ;;  %v991_v27 = vld [vmem:[%s1204_s1 + $0x70] sm:$0xff] }
  0x11   : > { %348 = vmatpush.bf16.msra.mxu2 %v979_v5  ;;  %404 = vmatpush.bf16.msra.mxu3 %v982_v6  ;;  %v975_v19 = vld [vmem:[%s1204_s1] sm:$0xff]  ;;  %v222_v21 = vpack.c.b16 %v220_v13, %v220_v13  ;;  %v987_v30 = vld [vmem:[%s1204_s1 + $0x50] sm:$0xff]  ;;  %v866_v33 = vld [vmem:[%s1099_s12 + $0x28] sm:$0x3] }
  0x12   : > { %v985_v20 = vld [vmem:[%s1204_s1 + $0x40] sm:$0xff]  ;;  %v314_v22 = vrot.slane %v312_v15, 1  ;;  %v1124_v25 = vpack.c.b16 %v265_v17, %v265_v17  ;;  %v935_v34 = vld [vmem:[%s1099_s12 + $0x18] sm:$0xf]  ;;  %v376_v36 = vunpack.c.l.b16 %v866_v33  ;;  %v984_v38 = vld [vmem:[%s1099_s12 + $0x30] sm:$0xff]  ;;  %v481_v17 = vshll.u32 %v1109_v16, 16 }
  0x13   : > { %838 = vmatmul.msk.bf16.vlgmr.msra.gmra.mxu0 %vm235_vm0, %v1005_v10  ;;  %v989_v26 = vld [vmem:[%s1204_s1 + $0x60] sm:$0xff]  ;;  %839 = vmatmul.msk.bf16.vlgmr.msra.gmra.mxu1 %vm235_vm0, %v222_v21  ;;  %v611_v37 = vunpack.c.l.b16 %v935_v34  ;;  %v1009_v39 = vld [vmem:[%s1099_s12 + $0x10] sm:$0xf0]  ;;  %v1010_v40 = vld [vmem:[%s1099_s12 + $0x10] sm:$0xc]  ;;  %v479_v21 = vshrl.u32 %v1109_v16, 16 }
  0x14   : > { %292 = vmatpush.bf16.msrb.mxu1 %v976_v4  ;;  %459 = vmatpush.bf16.msrb.mxu0 %v986_v7  ;;  %v315_v28 = vor.u32 %v314_v22, %v310_v18  ;;  %v316_v29 = vshll.u32 %v1124_v25, 16  ;;  %v995_v35 = vld [vmem:[%s1204_s1 + $0x80] sm:$0xff]  ;;  %v1149_v41 = vpack.c.b16 %v376_v36, %v376_v36  ;;  %v532_v42 = vld [vmem:[%s1099_s12 + $0x8] sm:$0xf]  ;;  %v1011_v43 = vor.u32 %v1010_v40, %v1009_v39  ;;  %v887_v54 = vld [vmem:[%s1099_s12 + $0x38] sm:$0x3] }
  0x15   : > { %586 = vmatpush.bf16.msrb.mxu2 %v990_v8  ;;  %655 = vmatpush.bf16.msrb.mxu3 %v992_v9  ;;  %v613_v44 = vpack.c.b16 %v611_v37, %v611_v37  ;;  %v320_v45 = vshrl.u32 %v1124_v25, 16  ;;  %v541_v46 = vunpack.c.l.b16 %v532_v42  ;;  %v1006_v47 = vld [vmem:[%s1099_s12] sm:$0xf0]  ;;  %v1007_v48 = vld [vmem:[%s1099_s12] sm:$0xc]  ;;  %v432_v61 = vunpack.c.l.b16 %v887_v54 }
  0x16   : > { %883 = vmatmul.msk.bf16.vlgmr.msra.gmra.mxu3 %vm235_vm0, %v1109_v16  ;;  %v318_v31 = vrot.slane %v316_v29, 1  ;;  %v615_v49 = vshrl.u32 %v1011_v43, 16  ;;  %v618_v50 = vshll.u32 %v1011_v43, 16  ;;  %v1008_v55 = vor.u32 %v1007_v48, %v1006_v47  ;;  %v993_v13 = vld [vmem:[%s1099_s12] sm:$0xf0] }
  0x17   : > { %v623_v51 = vshrl.u32 %v613_v44, 16  ;;  %v626_v52 = vshll.u32 %v613_v44, 16  ;;  %v543_v56 = vpack.c.b16 %v541_v46, %v541_v46  ;;  %v434_v4 = vpack.c.b16 %v432_v61, %v432_v61  ;;  %v960_v14 = vld [vmem:[%s1099_s12 + $0x8] sm:$0xf]  ;;  %v994_v15 = vld [vmem:[%s1099_s12 + $0x8] sm:$0x10] }
  0x18   : > { %293 = vmatpush.bf16.msrb.mxu1 %v975_v19  ;;  %460 = vmatpush.bf16.msrb.mxu0 %v985_v20  ;;  %v319_v32 = vsel %vm309_vm1, %v315_v28, %v318_v31  ;;  %v322_v53 = vor.u32 %v320_v45, %v318_v31  ;;  %v617_v57 = vrot.slane %v615_v49, 2  ;;  %v620_v58 = vrot.slane %v618_v50, 3 }
  0x19   : > { %587 = vmatpush.bf16.msrb.mxu2 %v989_v26  ;;  %656 = vmatpush.bf16.msrb.mxu3 %v991_v27  ;;  %v625_v59 = vrot.slane %v623_v51, 2  ;;  %v628_v60 = vrot.slane %v626_v52, 3  ;;  %v546_v62 = vshrl.u32 %v1008_v55, 16  ;;  %v549_v63 = vshll.u32 %v1008_v55, 16 }
  0x1a   : > { %862 = vmatmul.msk.bf16.vlgmr.msra.gmra.mxu2 %vm235_vm0, %v319_v32  ;;  %v554_v0 = vshrl.u32 %v543_v56, 16  ;;  %v557_v1 = vshll.u32 %v543_v56, 16  ;;  %v621_v2 = vor.u32 %v620_v58, %v617_v57  ;;  %v961_v20 = vor.u32 %v994_v15, %v960_v14 }
  0x1b   : > { %v629_v3 = vor.u32 %v628_v60, %v625_v59  ;;  %v548_v5 = vrot.slane %v546_v62, 2  ;;  %v551_v6 = vrot.slane %v549_v63, 3  ;;  %v483_v22 = vrot.slane %v481_v17, 1 }
  0x1c   : > { %516 = vmatpush.bf16.msra.mxu1 %v988_v23  ;;  %717 = vmatpush.bf16.msra.mxu0 %v996_v24  ;;  %v556_v7 = vrot.slane %v554_v0, 2  ;;  %v559_v8 = vrot.slane %v557_v1, 3  ;;  %v485_v23 = vshll.u32 %v1149_v41, 16  ;;  %v489_v16 = vshrl.u32 %v1149_v41, 16 }
  0x1d   : > { %v630_v9 = vsel %vm544_vm2, %v621_v2, %v629_v3  ;;  %v552_v10 = vor.u32 %v551_v6, %v548_v5  ;;  %v484_v27 = vor.u32 %v483_v22, %v479_v21 }
  0x1e   : > { %v560_v11 = vor.u32 %v559_v8, %v556_v7  ;;  %v487_v26 = vrot.slane %v485_v23, 1 }
  0x20   : > { %517 = vmatpush.bf16.msra.mxu1 %v987_v30  ;;  %718 = vmatpush.bf16.msra.mxu0 %v995_v35  ;;  %v561_v18 = vsel %vm544_vm2, %v552_v10, %v560_v11  ;;  %v488_v29 = vsel %vm309_vm1, %v484_v27, %v487_v26  ;;  %v491_v30 = vor.u32 %v489_v16, %v487_v26 }
  0x23   : > { %904 = vmatmul.msk.bf16.vlgmr.msrb.gmra.mxu0 %vm235_vm0, %v984_v38  ;;  %848 = vmatmul.msk.bf16.vlgmr.msrb.gmra.mxu1 %vm235_vm0, %v998_v12  ;;  %v956_v12 = vld [vmem:[%s1099_s12] sm:$0x8] }
  0x24   : > { %v957_v19 = vor.u32 %v993_v13, %v956_v12 }
  0x26   : > { %884 = vmatmul.msk.bf16.gmra.mxu3 %vm235_vm0, %v1149_v41  ;;  %v690_v24 = vrot.slane %v957_v19, 3 }
  0x2a   : > { %863 = vmatmul.msk.bf16.gmra.mxu2 %vm235_vm0, %v322_v53 }
  0x33   : > { %905 = vmatmul.msk.bf16.gmra.mxu0 %vm235_vm0, %v434_v4  ;;  %849 = vmatmul.msk.bf16.gmra.mxu1 %vm235_vm0, %v1124_v25  ;;  %v691_v25 = vrot.slane %v961_v20, 3  ;;  %v1023_v4 = vld [vmem:[%s1205_s2] ss:$0 sm:$0xff] }
  0x35   : > { %v692_v28 = vsel %vm689_vm3, %v690_v24, %v691_v25 }
  0x36   : > { %948 = vmatmul.msk.bf16.vlgmr.msrb.gmra.mxu3 %vm235_vm0, %v630_v9  ;;  %v1024_v9 = vld [vmem:[%s1206_s3] ss:$0 sm:$0xff] }
  0x3a   : > { %932 = vmatmul.msk.bf16.vlgmr.msrb.gmra.mxu2 %vm235_vm0, %v561_v18 }
  0x43   : > { %970 = vmatmul.msk.bf16.vlgmr.msra.gmra.mxu0 %vm235_vm0, %v692_v28  ;;  %918 = vmatmul.msk.bf16.vlgmr.msra.gmra.mxu1 %vm235_vm0, %v488_v29 }
  0x46   : > { %949 = vmatmul.msk.bf16.gmra.mxu3 %vm235_vm0, %v629_v3 }
  0x4a   : > { %933 = vmatmul.msk.bf16.gmra.mxu2 %vm235_vm0, %v560_v11 }
  0x53   : > { %971 = vmatmul.msk.bf16.gmra.mxu0 %vm235_vm0, %v691_v25  ;;  %919 = vmatmul.msk.bf16.gmra.mxu1 %vm235_vm0, %v491_v30 }
  0x90   : > { %v251_v31 = vpop.f32.mrf.mxu0  ;;  %v256_v32 = vpop.f32.mrf.mxu1 }
  0x98   : > { %v253_v33 = vpop.f32.mrf.mxu0  ;;  %v258_v35 = vpop.f32.mrf.mxu1 }
  0x99   : > { %v406_v34 = vpop.f32.mrf.mxu3 }
  0x9d   : > { %v350_v36 = vpop.f32.mrf.mxu2 }
  0xa0   : > { %v462_v37 = vpop.f32.mrf.mxu0  ;;  %v295_v39 = vpop.f32.mrf.mxu1 }
  0xa1   : > { %v408_v38 = vpop.f32.mrf.mxu3  ;;  %v296_v48 = vadd.f32 %v295_v39, %v251_v31 }
  0xa3   : > { %v359_v52 = vadd.f32 %v350_v36, %v296_v48 }
  0xa5   : > { %v352_v40 = vpop.f32.mrf.mxu2  ;;  %v415_v55 = vadd.f32 %v406_v34, %v359_v52 }
  0xa7   : > { %v471_v60 = vadd.f32 %v462_v37, %v415_v55 }
  0xa8   : > { %v464_v42 = vpop.f32.mrf.mxu0  ;;  %v297_v44 = vpop.f32.mrf.mxu1 }
  0xa9   : > { %v411_v43 = vpop.f32.mrf.mxu3  ;;  %v298_v54 = vadd.f32 %v297_v44, %v253_v33 }
  0xab   : > { %v360_v59 = vadd.f32 %v352_v40, %v298_v54 }
  0xad   : > { %v355_v45 = vpop.f32.mrf.mxu2  ;;  %v416_v1 = vadd.f32 %v408_v38, %v360_v59 }
  0xaf   : > { %v472_v10 = vadd.f32 %v464_v42, %v416_v1 }
  0xb0   : > { %v467_v41 = vpop.f32.mrf.mxu0  ;;  %v300_v47 = vpop.f32.mrf.mxu1 }
  0xb1   : > { %v413_v46 = vpop.f32.mrf.mxu3  ;;  %v301_v63 = vadd.f32 %v300_v47, %v256_v32 }
  0xb3   : > { %v361_v7 = vadd.f32 %v355_v45, %v301_v63 }
  0xb5   : > { %v357_v49 = vpop.f32.mrf.mxu2  ;;  %v417_v17 = vadd.f32 %v411_v43, %v361_v7 }
  0xb7   : > { %v473_v25 = vadd.f32 %v467_v41, %v417_v17 }
  0xb8   : > { %v469_v50 = vpop.f32.mrf.mxu0  ;;  %v302_v53 = vpop.f32.mrf.mxu1 }
  0xb9   : > { %v658_v51 = vpop.f32.mrf.mxu3 }
  0xbd   : > { %v589_v56 = vpop.f32.mrf.mxu2 }
  0xc0   : > { %v720_v57 = vpop.f32.mrf.mxu0  ;;  %v519_v61 = vpop.f32.mrf.mxu1 }
  0xc1   : > { %v660_v58 = vpop.f32.mrf.mxu3  ;;  %v528_v62 = vadd.f32 %v519_v61, %v471_v60 }
  0xc3   : > { %v598_v0 = vadd.f32 %v589_v56, %v528_v62 }
  0xc5   : > { %v591_v2 = vpop.f32.mrf.mxu2  ;;  %v667_v3 = vadd.f32 %v658_v51, %v598_v0 }
  0xc7   : > { %v729_v8 = vadd.f32 %v720_v57, %v667_v3 }
  0xc8   : > { %v722_v5 = vpop.f32.mrf.mxu0  ;;  %v521_v11 = vpop.f32.mrf.mxu1 }
  0xc9   : > { %v663_v6 = vpop.f32.mrf.mxu3  ;;  %v736_v12 = vmul.f32 %v1023_v4, %v729_v8  ;;  %v529_v13 = vadd.f32 %v521_v11, %v472_v10 }
  0xcb   : > { %v743_v14 = vadd.f32 %v1024_v9, %v736_v12  ;;  %v599_v15 = vadd.f32 %v591_v2, %v529_v13 }
  0xcd   : > { %v594_v18 = vpop.f32.mrf.mxu2  ;;  %vm746_vm4 = vcmp.ge.f32.partialorder %v743_v14, 0.0  ;;  %v749_v19 = vmul.f32 0.2, %v743_v14  ;;  %v668_v20 = vadd.f32 %v660_v58, %v599_v15 }
  0xcf   : > { %v752_v23 = vsel %vm746_vm4, %v743_v14, %v749_v19  ;;  %v730_v24 = vadd.f32 %v722_v5, %v668_v20 }
  0xd0   : > { %v725_v21 = vpop.f32.mrf.mxu0  ;;  %756 = vst.msk [vmem:[%s1193_s14] sm:$0xff] %vm755_vm5, %v752_v23  ;;  %v524_v26 = vpop.f32.mrf.mxu1 }
  0xd1   : > { %v665_v22 = vpop.f32.mrf.mxu3  ;;  %v737_v27 = vmul.f32 %v1023_v4, %v730_v24  ;;  %v530_v28 = vadd.f32 %v524_v26, %v473_v25 }
  0xd3   : > { %v744_v29 = vadd.f32 %v1024_v9, %v737_v27  ;;  %v600_v16 = vadd.f32 %v594_v18, %v530_v28 }
  0xd5   : > { %v596_v30 = vpop.f32.mrf.mxu2  ;;  %vm747_vm6 = vcmp.ge.f32.partialorder %v744_v29, 0.0  ;;  %v750_v31 = vmul.f32 0.2, %v744_v29  ;;  %v669_v32 = vadd.f32 %v663_v6, %v600_v16 }
  0xd7   : > { %v753_v34 = vsel %vm747_vm6, %v744_v29, %v750_v31  ;;  %v731_v35 = vadd.f32 %v725_v21, %v669_v32 }
  0xd8   : > { %v727_v33 = vpop.f32.mrf.mxu0  ;;  %757 = vst.msk [vmem:[%s1193_s14 + $0x8] sm:$0xff] %vm755_vm5, %v753_v34  ;;  %v526_v36 = vpop.f32.mrf.mxu1 }
  0xd9   : > { %v738_v37 = vmul.f32 %v1023_v4, %v731_v35 }
  0xdb   : > { %v745_v38 = vadd.f32 %v1024_v9, %v738_v37 }
  0xdd   : > { %vm748_vm7 = vcmp.ge.f32.partialorder %v745_v38, 0.0  ;;  %v751_v39 = vmul.f32 0.2, %v745_v38 }
  0xdf   : > { %v754_v40 = vsel %vm748_vm7, %v745_v38, %v751_v39 }
  0xe0   : > { %759 = vst.msk [vmem:[%s1193_s14 + $0x10] sm:$0x7] %vm758_vm8, %v754_v40 }
  0xe1 PF: > { %s14_s15 = sadd.s32 1, %s1031_s15  }
  0xe2   : > { %p11_p4 = scmp.ge.s32.totalorder %s14_s15, 4  }
  0xe4   :  { %13 = sbr.rel (!%p11_p4) target bundleno = 1 (0x1), region = 77 }

// kernel: propose_forward.9
= control target key start
LH: loop header
LB: loop body
LE: loop exit
PB: predicated region body
PF: predicated region fallthrough
CT: control target
= control target key end

     0   :  { %s1040_s15 = smov 0   ;;  %s1193_s0 = inlined_call_operand.vmem [shape: bf16[2,4,4,64], index: 0, kind: input, shape index: {}]   ;;  %s1194_s1 = inlined_call_operand.vmem [shape: bf16[9,64,128], index: 1, kind: input, shape index: {}]   ;;  %s1195_s2 = inlined_call_operand.vmem [shape: f32[1,128], index: 2, kind: input, shape index: {}]   ;;  %s1196_s3 = inlined_call_operand.vmem [shape: f32[1,128], index: 3, kind: input, shape index: {}]   ;;  %s1197_s4 = inlined_call_operand.vmem [shape: f32[2,1,128], index: 4, kind: output, shape index: {}]  }
   0x1 LB: > { %s732_s16 = sadd.s32 4294967295, %s1013_s15   ;;  %p736_p0 = scmp.ge.s32.totalorder %s1013_s15, 1  ;;  %s1013_s15 = sphi %s1040_s15, %s14_s15  }
   0x2   : > { %p162_p1 = scmp.lt.s32.totalorder %s1013_s15, 3 }
   0x4   : > { %p163_p2 = pnand %p736_p0, %p162_p1 }
   0x5   : > { %p186_p3 = scmp.lt.s32.totalorder (!%p163_p2), %s732_s16, 1 }
   0x6   : > { %166 = sbr.rel (%p163_p2) target bundleno = 195 (0xc3), region = 36 }
   0xb   : > { %v970_v0 = vld [vmem:[%s1194_s1 + $0x38] sm:$0xff]  ;;  %v969_v4 = vld [vmem:[%s1194_s1 + $0x30] sm:$0xff]  ;;  %s1199_s16 = smov (!%p186_p3, %s732_s16), 1  ;;  %v968_v8 = vld [vmem:[%s1194_s1 + $0x28] sm:$0xff]  ;;  %vm239_vm0 = vcmask 523264  }
   0xc   : > { %v974_v1 = vld [vmem:[%s1194_s1 + $0x58] sm:$0xff]  ;;  %247 = vmatpush.bf16.msra.mxu0 %v970_v0  ;;  %v973_v5 = vld [vmem:[%s1194_s1 + $0x50] sm:$0xff]  ;;  %s962_s7 = sshll.u32 %s1199_s16, 3  ;;  %v972_v9 = vld [vmem:[%s1194_s1 + $0x48] sm:$0xff]  ;;  %s193_s28 = scalar_lea.vmem %s1197_s4, %s1199_s16 }
   0xd   : > { %v966_v2 = vld [vmem:[%s1194_s1 + $0x18] sm:$0xff]  ;;  %340 = vmatpush.bf16.msra.mxu2 %v974_v1  ;;  %v965_v6 = vld [vmem:[%s1194_s1 + $0x10] sm:$0xff]  ;;  %s1078_s10 = scalar_lea.vmem %s1193_s0, %s962_s7  ;;  %v964_v11 = vld [vmem:[%s1194_s1 + $0x8] sm:$0xff] }
   0xe   : > { %v978_v3 = vld [vmem:[%s1194_s1 + $0x78] sm:$0xff]  ;;  %287 = vmatpush.bf16.msra.mxu1 %v966_v2  ;;  %v977_v7 = vld [vmem:[%s1194_s1 + $0x70] sm:$0xff]  ;;  %v195_v10 = vld [vmem:[%s1078_s10] sm:$0x1] }
   0xf   : > { %392 = vmatpush.bf16.msra.mxu3 %v978_v3  ;;  %v976_v12 = vld [vmem:[%s1194_s1 + $0x68] sm:$0xff]  ;;  %305 = vst [vmem:[#allocation1] ss:$4 sm:$0xff] %v195_v10  ;;  %v967_v13 = vld [vmem:[%s1194_s1 + $0x20] sm:$0xff]  ;;  %v982_v18 = vld [vmem:[%s1194_s1 + $0x98] sm:$0xff] }
  0x10   : > { %248 = vmatpush.bf16.msra.mxu0 %v969_v4  ;;  %v971_v14 = vld [vmem:[%s1194_s1 + $0x40] sm:$0xff]  ;;  %v990_v19 = vld [vmem:[%s1194_s1 + $0xd8] sm:$0xff]  ;;  %v981_v25 = vld [vmem:[%s1194_s1 + $0x90] sm:$0xff] }
  0x11   : > { %341 = vmatpush.bf16.msra.mxu2 %v973_v5  ;;  %v963_v15 = vld [vmem:[%s1194_s1] sm:$0xff]  ;;  %v986_v23 = vld [vmem:[%s1194_s1 + $0xb8] sm:$0xff]  ;;  %v989_v26 = vld [vmem:[%s1194_s1 + $0xd0] sm:$0xff] }
  0x12   : > { %288 = vmatpush.bf16.msra.mxu1 %v965_v6  ;;  %v975_v16 = vld [vmem:[%s1194_s1 + $0x60] sm:$0xff]  ;;  %v994_v24 = vld [vmem:[%s1194_s1 + $0xf8] sm:$0xff]  ;;  %v985_v27 = vld [vmem:[%s1194_s1 + $0xb0] sm:$0xff] }
  0x13   : > { %393 = vmatpush.bf16.msra.mxu3 %v977_v7  ;;  %v807_v17 = vld [vmem:[%s1078_s10 + $0x4] sm:$0x1]  ;;  %v739_v20 = vld [vmem:[%s1078_s10 + $0x2] sm:$0x1]  ;;  %v993_v28 = vld [vmem:[%s1194_s1 + $0xf0] sm:$0xff] }
  0x14   : > { %249 = vmatpush.bf16.msra.mxu0 %v968_v8  ;;  %v508_v29 = vld [vmem:[%s1078_s10] sm:$0x2]  ;;  %v980_v30 = vld [vmem:[%s1194_s1 + $0x88] sm:$0xff]  ;;  %v998_v37 = vld [vmem:[%s1194_s1 + $0x118] sm:$0xff] }
  0x15   : > { %342 = vmatpush.bf16.msra.mxu2 %v972_v9  ;;  %v988_v31 = vld [vmem:[%s1194_s1 + $0xc8] sm:$0xff]  ;;  %v979_v35 = vld [vmem:[%s1194_s1 + $0x80] sm:$0xff]  ;;  %v997_v44 = vld [vmem:[%s1194_s1 + $0x110] sm:$0xff] }
  0x16   : > { %289 = vmatpush.bf16.msra.mxu1 %v964_v11  ;;  %v306_v21 = vld.sshfl [vmem:[#allocation1] sm:$0xff pattern:$0x73625140]  ;;  %v984_v33 = vld [vmem:[%s1194_s1 + $0xa8] sm:$0xff] }
  0x17   : > { %394 = vmatpush.bf16.msra.mxu3 %v976_v12  ;;  %v307_v22 = vshrl.u32 %v306_v21, 16  ;;  %463 = vst [vmem:[#allocation1] ss:$4 sm:$0xff] %v807_v17  ;;  %v992_v34 = vld [vmem:[%s1194_s1 + $0xe8] sm:$0xff]  ;;  %v987_v36 = vld [vmem:[%s1194_s1 + $0xc0] sm:$0xff] }
  0x18   : > { %250 = vmatpush.bf16.msra.mxu0 %v967_v13  ;;  %v983_v38 = vld [vmem:[%s1194_s1 + $0xa0] sm:$0xff]  ;;  %v996_v46 = vld [vmem:[%s1194_s1 + $0x108] sm:$0xff] }
  0x19   : > { %343 = vmatpush.bf16.msra.mxu2 %v971_v14  ;;  %v991_v39 = vld [vmem:[%s1194_s1 + $0xe0] sm:$0xff] }
  0x1a   : > { %290 = vmatpush.bf16.msra.mxu1 %v963_v15  ;;  %v909_v40 = vld [vmem:[%s1078_s10 + $0x2] sm:$0x2]  ;;  %v833_v41 = vld [vmem:[%s1078_s10 + $0x6] sm:$0x1]  ;;  %v620_v47 = vld [vmem:[%s1078_s10] sm:$0x2] }
  0x1b   : > { %395 = vmatpush.bf16.msra.mxu3 %v975_v16  ;;  %764 = vmatmul.msk.bf16.vlgmr.msra.gmra.mxu0 %vm239_vm0, %v739_v20  ;;  %v995_v49 = vld [vmem:[%s1194_s1 + $0x100] sm:$0xff] }
  0x1c   : > { %444 = vmatpush.bf16.msrb.mxu0 %v982_v18  ;;  %806 = vmatmul.msk.bf16.vlgmr.msra.gmra.mxu2 %vm239_vm0, %v307_v22  ;;  %v677_v13 = vld [vmem:[%s1195_s2] sm:$0x1] }
  0x1d   : > { %554 = vmatpush.bf16.msrb.mxu2 %v990_v19  ;;  %781 = vmatmul.msk.bf16.vlgmr.msra.gmra.mxu1 %vm239_vm0, %v195_v10  ;;  %v679_v15 = vld [vmem:[%s1196_s3] sm:$0x1] }
  0x1e   : > { %832 = vmatmul.msk.bf16.vlgmr.msra.gmra.mxu3 %vm239_vm0, %v807_v17  ;;  %498 = vmatpush.bf16.msrb.mxu1 %v986_v23  ;;  %v464_v32 = vld.sshfl [vmem:[#allocation1] sm:$0xff pattern:$0x73625140] }
  0x1f   : > { %610 = vmatpush.bf16.msrb.mxu3 %v994_v24  ;;  %519 = vst [vmem:[#allocation1] ss:$4 sm:$0xff] %v508_v29  ;;  %v465_v43 = vshrl.u32 %v464_v32, 16 }
  0x20   : > { %445 = vmatpush.bf16.msrb.mxu0 %v981_v25 }
  0x21   : > { %555 = vmatpush.bf16.msrb.mxu2 %v989_v26 }
  0x22   : > { %499 = vmatpush.bf16.msrb.mxu1 %v985_v27 }
  0x23   : > { %611 = vmatpush.bf16.msrb.mxu3 %v993_v28 }
  0x24   : > { %446 = vmatpush.bf16.msrb.mxu0 %v980_v30 }
  0x25   : > { %556 = vmatpush.bf16.msrb.mxu2 %v988_v31 }
  0x26   : > { %500 = vmatpush.bf16.msrb.mxu1 %v984_v33  ;;  %v520_v42 = vld.sshfl [vmem:[#allocation1] sm:$0xff pattern:$0x73625140] }
  0x27   : > { %612 = vmatpush.bf16.msrb.mxu3 %v992_v34  ;;  %v522_v45 = vrot.slane %v520_v42, 1  ;;  %575 = vst [vmem:[#allocation1] ss:$4 sm:$0xff] %v909_v40 }
  0x28   : > { %447 = vmatpush.bf16.msrb.mxu0 %v979_v35 }
  0x29   : > { %557 = vmatpush.bf16.msrb.mxu2 %v987_v36 }
  0x2a   : > { %501 = vmatpush.bf16.msrb.mxu1 %v983_v38 }
  0x2b   : > { %613 = vmatpush.bf16.msrb.mxu3 %v991_v39  ;;  %858 = vmatmul.msk.bf16.vlgmr.msrb.gmra.mxu0 %vm239_vm0, %v833_v41 }
  0x2c   : > { %667 = vmatpush.bf16.msra.mxu0 %v998_v37  ;;  %908 = vmatmul.msk.bf16.vlgmr.msrb.gmra.mxu2 %vm239_vm0, %v522_v45 }
  0x2d   : > { %883 = vmatmul.msk.bf16.vlgmr.msrb.gmra.mxu1 %vm239_vm0, %v465_v43 }
  0x2e   : > { %v576_v48 = vld.sshfl [vmem:[#allocation1] sm:$0xff pattern:$0x73625140] }
  0x2f   : > { %v578_v50 = vrot.slane %v576_v48, 1  ;;  %631 = vst [vmem:[#allocation1] ss:$4 sm:$0xff] %v620_v47 }
  0x30   : > { %668 = vmatpush.bf16.msra.mxu0 %v997_v44 }
  0x31   : > { %934 = vmatmul.msk.bf16.vlgmr.msrb.gmra.mxu3 %vm239_vm0, %v578_v50 }
  0x34   : > { %669 = vmatpush.bf16.msra.mxu0 %v996_v46 }
  0x36   : > { %v632_v51 = vld.sshfl [vmem:[#allocation1] sm:$0xff pattern:$0x73625140] }
  0x37   : > { %v633_v52 = vshrl.u32 %v632_v51, 16 }
  0x38   : > { %670 = vmatpush.bf16.msra.mxu0 %v995_v49 }
  0x39   : > { %v635_v53 = vrot.slane %v633_v52, 1 }
  0x3b   : > { %959 = vmatmul.msk.bf16.vlgmr.msra.gmra.mxu0 %vm239_vm0, %v635_v53 }
  0x98   : > { %v252_v54 = vpop.f32.mrf.mxu0 }
  0x9a   : > { %v292_v55 = vpop.f32.mrf.mxu1 }
  0x9b   : > { %v293_v63 = vadd.f32 %v292_v55, %v252_v54 }
  0x9f   : > { %v345_v56 = vpop.f32.mrf.mxu2 }
  0xa0   : > { %v254_v58 = vpop.f32.mrf.mxu0  ;;  %v349_v1 = vadd.f32 %v345_v56, %v293_v63 }
  0xa1   : > { %v397_v57 = vpop.f32.mrf.mxu3 }
  0xa2   : > { %v294_v59 = vpop.f32.mrf.mxu1  ;;  %v401_v3 = vadd.f32 %v397_v57, %v349_v1 }
  0xa7   : > { %v347_v60 = vpop.f32.mrf.mxu2 }
  0xa8   : > { %v449_v62 = vpop.f32.mrf.mxu0 }
  0xa9   : > { %v399_v61 = vpop.f32.mrf.mxu3  ;;  %v453_v5 = vadd.f32 %v449_v62, %v401_v3 }
  0xaa   : > { %v503_v0 = vpop.f32.mrf.mxu1 }
  0xab   : > { %v507_v7 = vadd.f32 %v503_v0, %v453_v5 }
  0xaf   : > { %v559_v2 = vpop.f32.mrf.mxu2 }
  0xb0   : > { %v451_v4 = vpop.f32.mrf.mxu0  ;;  %v563_v10 = vadd.f32 %v559_v2, %v507_v7 }
  0xb2   : > { %v505_v6 = vpop.f32.mrf.mxu1 }
  0xb4   : > { %v615_v8 = vpop.f32.mrf.mxu3 }
  0xb5   : > { %v619_v11 = vadd.f32 %v615_v8, %v563_v10 }
  0xb7   : > { %v561_v9 = vpop.f32.mrf.mxu2 }
  0xb8   : > { %v672_v12 = vpop.f32.mrf.mxu0 }
  0xb9   : > { %v676_v14 = vadd.f32 %v672_v12, %v619_v11 }
  0xbb   : > { %v678_v16 = vmul.f32 %v677_v13, %v676_v14 }
  0xbc   : > { %v617_v17 = vpop.f32.mrf.mxu3 }
  0xbd   : > { %v680_v18 = vadd.f32 %v679_v15, %v678_v16 }
  0xbf   : > { %vm681_vm1 = vcmp.ge.f32.partialorder %v680_v18, 0.0  ;;  %v682_v19 = vmul.f32 0.2, %v680_v18 }
  0xc0   : > { %v674_v20 = vpop.f32.mrf.mxu0 }
  0xc1   : > { %v683_v21 = vsel %vm681_vm1, %v680_v18, %v682_v19 }
  0xc2   : > { %684 = vst [vmem:[%s193_s28] sm:$0x1] %v683_v21 }
  0xc3 PF: > { %s14_s15 = sadd.s32 1, %s1013_s15  }
  0xc4   : > { %p11_p4 = scmp.ge.s32.totalorder %s14_s15, 4  }
  0xc6   :  { %13 = sbr.rel (!%p11_p4) target bundleno = 1 (0x1), region = 77 }

</bundles_post_ra>
